<compile_context>
chip_gen: v5e
topology: v5e:2x2
jax: 0.10.0
libtpu: 0.0.40
codegen_flags: <defaults>
</compile_context>

<pallas_src>
import functools

import jax
import jax.numpy as jnp
import numpy as np
from jax.experimental import pallas as pl
from jax.experimental.pallas import tpu as pltpu

EPS = 1e-5  # torch.nn.InstanceNorm2d default eps


# ---------------------------------------------------------------------------
# Fused Pallas kernel: one full ResidualBlock for a single image.
#   x_ref   : (C, H, W)  VMEM   input image (batch dim squeezed)
#   w_ref   : (2*C*C*9,) SMEM   conv1 + conv2 weights, flattened row-major
#   aff_ref : (4, C)     SMEM   rows = [gamma1, beta1, gamma2, beta2]
#   o_ref   : (C, H, W)  VMEM   output image
#   pad_ref : (C, H+2, W+2) VMEM scratch, reused for both reflection pads
# ---------------------------------------------------------------------------
def _residual_block_kernel(x_ref, w_ref, aff_ref, o_ref, pad_ref, *, C, H, W):

    def reflect_pad_into_scratch(get_chan):
        # ReflectionPad2d(1): padded[0] = row 1, padded[H+1] = row H-2, etc.
        for c in range(C):
            a = get_chan(c)                                        # (H, W)
            pad_ref[c, 1:H + 1, 1:W + 1] = a
            pad_ref[c, 0:1, 1:W + 1] = a[1:2, :]                   # top
            pad_ref[c, H + 1:H + 2, 1:W + 1] = a[H - 2:H - 1, :]   # bottom
        for c in range(C):
            # Columns last so corners reflect the already-reflected rows.
            pad_ref[c, :, 0:1] = pad_ref[c, :, 2:3]                # left
            pad_ref[c, :, W + 1:W + 2] = pad_ref[c, :, W - 1:W]    # right

    def conv3x3_in(layer, relu):
        # 3x3 conv (bias dropped — it cancels under InstanceNorm) as VPU
        # multiply-accumulate taps, then InstanceNorm2d(affine=True) [+ReLU].
        # NOTE: for large C (>~32) this should become a single MXU im2col
        # matmul (C, 9C)@(9C, HW) built in VMEM, with HW-axis tiling.
        base = layer * C * C * 9
        out_chans = []
        for o in range(C):
            acc = jnp.zeros((H, W), jnp.float32)
            for i in range(C):
                for dy in range(3):
                    for dx in range(3):
                        wv = w_ref[base + ((o * C + i) * 3 + dy) * 3 + dx]
                        acc = acc + wv * pad_ref[i, dy:dy + H, dx:dx + W]
            # InstanceNorm2d: per-(instance, channel) biased stats over HxW.
            m = jnp.mean(acc, keepdims=True)
            cent = acc - m
            var = jnp.mean(cent * cent, keepdims=True)
            y = cent * jax.lax.rsqrt(var + EPS)
            y = y * aff_ref[2 * layer, o] + aff_ref[2 * layer + 1, o]
            if relu:
                y = jnp.maximum(y, 0.0)
            out_chans.append(y)
        return out_chans

    # ConvBlock 1: reflect-pad conv3x3 + IN + ReLU (y1 stays on-chip).
    reflect_pad_into_scratch(lambda c: x_ref[c])
    y1 = conv3x3_in(0, relu=True)

    # ConvBlock 2: reflect-pad conv3x3 + IN (no ReLU), fused residual add.
    reflect_pad_into_scratch(lambda c: y1[c])
    y2 = conv3x3_in(1, relu=False)
    for c in range(C):
        o_ref[c] = y2[c] + x_ref[c]


# ---------------------------------------------------------------------------
# Wrapper: pack parameters and launch the single fused pallas_call.
# ---------------------------------------------------------------------------
def residual_block(x, params):
    """Forward of ResidualBlock(channels=C) on NCHW float32 input."""
    # Conv biases b1/b2 are accepted for state-dict parity but intentionally
    # unused: a bias added before InstanceNorm cancels in the mean subtraction.
    (w1, _b1, g1, bt1, w2, _b2, g2, bt2) = params
    N, C, H, W = x.shape

    w_flat = jnp.concatenate(
        [w1.reshape(-1), w2.reshape(-1)]).astype(jnp.float32)       # (2*C*C*9,)
    affine = jnp.stack([g1, bt1, g2, bt2], axis=0).astype(jnp.float32)  # (4, C)

    kernel = functools.partial(_residual_block_kernel, C=C, H=H, W=W)
    return pl.pallas_call(
        kernel,
        out_shape=jax.ShapeDtypeStruct((N, C, H, W), jnp.float32),
        grid=(N,),
        in_specs=[
            # Per-image block; leading batch dim squeezed out of the kernel Ref.
            pl.BlockSpec((None, C, H, W), lambda n: (n, 0, 0, 0)),
            # Small parameter tables live in SMEM and are read as scalars.
            pl.BlockSpec(memory_space=pltpu.MemorySpace.SMEM),
            pl.BlockSpec(memory_space=pltpu.MemorySpace.SMEM),
        ],
        out_specs=pl.BlockSpec((None, C, H, W), lambda n: (n, 0, 0, 0)),
        scratch_shapes=[pltpu.VMEM((C, H + 2, W + 2), jnp.float32)],
        compiler_params=pltpu.CompilerParams(
            dimension_semantics=("parallel",)),
    )(x.astype(jnp.float32), w_flat, affine)


# ---------------------------------------------------------------------------
# Pure-JAX reference (mirrors the PyTorch module, INCLUDING the conv bias,
# which verifies that dropping the bias inside the kernel is exact).
# ---------------------------------------------------------------------------
def _reflect_pad(x):
    return jnp.pad(x, ((0, 0), (0, 0), (1, 1), (1, 1)), mode="reflect")


def _conv_block_ref(x, w, b, g, bt, relu):
    xp = _reflect_pad(x)
    y = jax.lax.conv_general_dilated(
        xp, w, window_strides=(1, 1), padding="VALID",
        dimension_numbers=("NCHW", "OIHW", "NCHW"),
        precision=jax.lax.Precision.HIGHEST)
    y = y + b[None, :, None, None]
    m = jnp.mean(y, axis=(2, 3), keepdims=True)
    v = jnp.mean((y - m) ** 2, axis=(2, 3), keepdims=True)
    y = (y - m) * jax.lax.rsqrt(v + EPS)
    y = y * g[None, :, None, None] + bt[None, :, None, None]
    if relu:
        y = jnp.maximum(y, 0.0)
    return y


def residual_block_ref(x, params):
    (w1, b1, g1, bt1, w2, b2, g2, bt2) = params
    y = _conv_block_ref(x, w1, b1, g1, bt1, relu=True)
    y = _conv_block_ref(y, w2, b2, g2, bt2, relu=False)
    return y + x


if __name__ == "__main__":
    N, C, H, W = 2, 4, 16, 16
    keys = jax.random.split(jax.random.PRNGKey(0), 9)

    x = jax.random.normal(keys[0], (N, C, H, W), jnp.float32)
    w1 = 0.1 * jax.random.normal(keys[1], (C, C, 3, 3), jnp.float32)
    b1 = 0.1 * jax.random.normal(keys[2], (C,), jnp.float32)
    g1 = 1.0 + 0.1 * jax.random.normal(keys[3], (C,), jnp.float32)
    bt1 = 0.1 * jax.random.normal(keys[4], (C,), jnp.float32)
    w2 = 0.1 * jax.random.normal(keys[5], (C, C, 3, 3), jnp.float32)
    b2 = 0.1 * jax.random.normal(keys[6], (C,), jnp.float32)
    g2 = 1.0 + 0.1 * jax.random.normal(keys[7], (C,), jnp.float32)
    bt2 = 0.1 * jax.random.normal(keys[8], (C,), jnp.float32)
    params = (w1, b1, g1, bt1, w2, b2, g2, bt2)

    out = jax.jit(residual_block)(x, params)
    out = jax.block_until_ready(out)

    ref = residual_block_ref(x, params)
    assert out.shape == x.shape and out.dtype == x.dtype
    if not np.allclose(np.asarray(out), np.asarray(ref), atol=1e-3, rtol=1e-3):
        diff = float(np.max(np.abs(np.asarray(out) - np.asarray(ref))))
        raise AssertionError(f"mismatch vs reference, max abs diff = {diff:e}")

    print("KERNEL_OK")
</pallas_src>

<mosaic_0001>
module attributes {stable_mosaic.version = 11 : i64} {
  func.func @_residual_block_kernel(%arg0: i32, %arg1: memref<1x4x16x16xf32, #tpu.memory_space<vmem>>, %arg2: memref<288xf32, #tpu.memory_space<smem>>, %arg3: memref<4x4xf32, #tpu.memory_space<smem>>, %arg4: memref<1x4x16x16xf32, #tpu.memory_space<vmem>>, %arg5: memref<4x18x18xf32, #tpu.memory_space<vmem>>) attributes {dimension_semantics = [#tpu.dimension_semantics<parallel>], iteration_bounds = array<i64: 2>, scalar_prefetch = 0 : i64, scratch_operands = 1 : i64, tpu.core_type = #tpu.core_type<tc>, window_params = [{transform_indices = @transform_0, window_bounds = array<i64: 1, 4, 16, 16>}, {transform_indices = @transform_1, window_bounds = array<i64: 288>}, {transform_indices = @transform_2, window_bounds = array<i64: 4, 4>}, {transform_indices = @transform_3, window_bounds = array<i64: 1, 4, 16, 16>}]} {
    %c0 = arith.constant 0 : index
    %c0_0 = arith.constant 0 : index
    %c0_1 = arith.constant 0 : index
    %c0_2 = arith.constant 0 : index
    %0 = vector.load %arg1[%c0, %c0_0, %c0_1, %c0_2] : memref<1x4x16x16xf32, #tpu.memory_space<vmem>>, vector<1x1x16x16xf32>
    %1 = vector.shape_cast %0 : vector<1x1x16x16xf32> to vector<16x16xf32>
    %c0_3 = arith.constant 0 : index
    %c1 = arith.constant 1 : index
    %c1_4 = arith.constant 1 : index
    %2 = vector.load %arg5[%c0_3, %c1, %c1_4] : memref<4x18x18xf32, #tpu.memory_space<vmem>>, vector<1x16x16xf32>
    %3 = vector.shape_cast %2 : vector<1x16x16xf32> to vector<16x16xf32>
    %4 = vector.shape_cast %1 : vector<16x16xf32> to vector<1x16x16xf32>
    tpu.vector_store %arg5[%c0_3, %c1, %c1_4], %4 {strides = array<i32>} : memref<4x18x18xf32, #tpu.memory_space<vmem>>, vector<1x16x16xf32>,
    %5 = vector.extract_strided_slice %1 {offsets = [1, 0], sizes = [1, 16], strides = [1, 1]} : vector<16x16xf32> to vector<1x16xf32>
    %c0_5 = arith.constant 0 : index
    %c0_6 = arith.constant 0 : index
    %c1_7 = arith.constant 1 : index
    %6 = vector.load %arg5[%c0_5, %c0_6, %c1_7] : memref<4x18x18xf32, #tpu.memory_space<vmem>>, vector<1x1x16xf32>
    %7 = vector.shape_cast %6 : vector<1x1x16xf32> to vector<1x16xf32>
    %8 = vector.shape_cast %5 : vector<1x16xf32> to vector<1x1x16xf32>
    tpu.vector_store %arg5[%c0_5, %c0_6, %c1_7], %8 {strides = array<i32>} : memref<4x18x18xf32, #tpu.memory_space<vmem>>, vector<1x1x16xf32>,
    %9 = vector.extract_strided_slice %1 {offsets = [14, 0], sizes = [1, 16], strides = [1, 1]} : vector<16x16xf32> to vector<1x16xf32>
    %c0_8 = arith.constant 0 : index
    %c17 = arith.constant 17 : index
    %c1_9 = arith.constant 1 : index
    %10 = vector.load %arg5[%c0_8, %c17, %c1_9] : memref<4x18x18xf32, #tpu.memory_space<vmem>>, vector<1x1x16xf32>
    %11 = vector.shape_cast %10 : vector<1x1x16xf32> to vector<1x16xf32>
    %12 = vector.shape_cast %9 : vector<1x16xf32> to vector<1x1x16xf32>
    tpu.vector_store %arg5[%c0_8, %c17, %c1_9], %12 {strides = array<i32>} : memref<4x18x18xf32, #tpu.memory_space<vmem>>, vector<1x1x16xf32>,
    %c0_10 = arith.constant 0 : index
    %c1_11 = arith.constant 1 : index
    %c0_12 = arith.constant 0 : index
    %c0_13 = arith.constant 0 : index
    %13 = vector.load %arg1[%c0_10, %c1_11, %c0_12, %c0_13] : memref<1x4x16x16xf32, #tpu.memory_space<vmem>>, vector<1x1x16x16xf32>
    %14 = vector.shape_cast %13 : vector<1x1x16x16xf32> to vector<16x16xf32>
    %c1_14 = arith.constant 1 : index
    %c1_15 = arith.constant 1 : index
    %c1_16 = arith.constant 1 : index
    %15 = vector.load %arg5[%c1_14, %c1_15, %c1_16] : memref<4x18x18xf32, #tpu.memory_space<vmem>>, vector<1x16x16xf32>
    %16 = vector.shape_cast %15 : vector<1x16x16xf32> to vector<16x16xf32>
    %17 = vector.shape_cast %14 : vector<16x16xf32> to vector<1x16x16xf32>
    tpu.vector_store %arg5[%c1_14, %c1_15, %c1_16], %17 {strides = array<i32>} : memref<4x18x18xf32, #tpu.memory_space<vmem>>, vector<1x16x16xf32>,
    %18 = vector.extract_strided_slice %14 {offsets = [1, 0], sizes = [1, 16], strides = [1, 1]} : vector<16x16xf32> to vector<1x16xf32>
    %c1_17 = arith.constant 1 : index
    %c0_18 = arith.constant 0 : index
    %c1_19 = arith.constant 1 : index
    %19 = vector.load %arg5[%c1_17, %c0_18, %c1_19] : memref<4x18x18xf32, #tpu.memory_space<vmem>>, vector<1x1x16xf32>
    %20 = vector.shape_cast %19 : vector<1x1x16xf32> to vector<1x16xf32>
    %21 = vector.shape_cast %18 : vector<1x16xf32> to vector<1x1x16xf32>
    tpu.vector_store %arg5[%c1_17, %c0_18, %c1_19], %21 {strides = array<i32>} : memref<4x18x18xf32, #tpu.memory_space<vmem>>, vector<1x1x16xf32>,
    %22 = vector.extract_strided_slice %14 {offsets = [14, 0], sizes = [1, 16], strides = [1, 1]} : vector<16x16xf32> to vector<1x16xf32>
    %c1_20 = arith.constant 1 : index
    %c17_21 = arith.constant 17 : index
    %c1_22 = arith.constant 1 : index
    %23 = vector.load %arg5[%c1_20, %c17_21, %c1_22] : memref<4x18x18xf32, #tpu.memory_space<vmem>>, vector<1x1x16xf32>
    %24 = vector.shape_cast %23 : vector<1x1x16xf32> to vector<1x16xf32>
    %25 = vector.shape_cast %22 : vector<1x16xf32> to vector<1x1x16xf32>
    tpu.vector_store %arg5[%c1_20, %c17_21, %c1_22], %25 {strides = array<i32>} : memref<4x18x18xf32, #tpu.memory_space<vmem>>, vector<1x1x16xf32>,
    %c0_23 = arith.constant 0 : index
    %c2 = arith.constant 2 : index
    %c0_24 = arith.constant 0 : index
    %c0_25 = arith.constant 0 : index
    %26 = vector.load %arg1[%c0_23, %c2, %c0_24, %c0_25] : memref<1x4x16x16xf32, #tpu.memory_space<vmem>>, vector<1x1x16x16xf32>
    %27 = vector.shape_cast %26 : vector<1x1x16x16xf32> to vector<16x16xf32>
    %c2_26 = arith.constant 2 : index
    %c1_27 = arith.constant 1 : index
    %c1_28 = arith.constant 1 : index
    %28 = vector.load %arg5[%c2_26, %c1_27, %c1_28] : memref<4x18x18xf32, #tpu.memory_space<vmem>>, vector<1x16x16xf32>
    %29 = vector.shape_cast %28 : vector<1x16x16xf32> to vector<16x16xf32>
    %30 = vector.shape_cast %27 : vector<16x16xf32> to vector<1x16x16xf32>
    tpu.vector_store %arg5[%c2_26, %c1_27, %c1_28], %30 {strides = array<i32>} : memref<4x18x18xf32, #tpu.memory_space<vmem>>, vector<1x16x16xf32>,
    %31 = vector.extract_strided_slice %27 {offsets = [1, 0], sizes = [1, 16], strides = [1, 1]} : vector<16x16xf32> to vector<1x16xf32>
    %c2_29 = arith.constant 2 : index
    %c0_30 = arith.constant 0 : index
    %c1_31 = arith.constant 1 : index
    %32 = vector.load %arg5[%c2_29, %c0_30, %c1_31] : memref<4x18x18xf32, #tpu.memory_space<vmem>>, vector<1x1x16xf32>
    %33 = vector.shape_cast %32 : vector<1x1x16xf32> to vector<1x16xf32>
    %34 = vector.shape_cast %31 : vector<1x16xf32> to vector<1x1x16xf32>
    tpu.vector_store %arg5[%c2_29, %c0_30, %c1_31], %34 {strides = array<i32>} : memref<4x18x18xf32, #tpu.memory_space<vmem>>, vector<1x1x16xf32>,
    %35 = vector.extract_strided_slice %27 {offsets = [14, 0], sizes = [1, 16], strides = [1, 1]} : vector<16x16xf32> to vector<1x16xf32>
    %c2_32 = arith.constant 2 : index
    %c17_33 = arith.constant 17 : index
    %c1_34 = arith.constant 1 : index
    %36 = vector.load %arg5[%c2_32, %c17_33, %c1_34] : memref<4x18x18xf32, #tpu.memory_space<vmem>>, vector<1x1x16xf32>
    %37 = vector.shape_cast %36 : vector<1x1x16xf32> to vector<1x16xf32>
    %38 = vector.shape_cast %35 : vector<1x16xf32> to vector<1x1x16xf32>
    tpu.vector_store %arg5[%c2_32, %c17_33, %c1_34], %38 {strides = array<i32>} : memref<4x18x18xf32, #tpu.memory_space<vmem>>, vector<1x1x16xf32>,
    %c0_35 = arith.constant 0 : index
    %c3 = arith.constant 3 : index
    %c0_36 = arith.constant 0 : index
    %c0_37 = arith.constant 0 : index
    %39 = vector.load %arg1[%c0_35, %c3, %c0_36, %c0_37] : memref<1x4x16x16xf32, #tpu.memory_space<vmem>>, vector<1x1x16x16xf32>
    %40 = vector.shape_cast %39 : vector<1x1x16x16xf32> to vector<16x16xf32>
    %c3_38 = arith.constant 3 : index
    %c1_39 = arith.constant 1 : index
    %c1_40 = arith.constant 1 : index
    %41 = vector.load %arg5[%c3_38, %c1_39, %c1_40] : memref<4x18x18xf32, #tpu.memory_space<vmem>>, vector<1x16x16xf32>
    %42 = vector.shape_cast %41 : vector<1x16x16xf32> to vector<16x16xf32>
    %43 = vector.shape_cast %40 : vector<16x16xf32> to vector<1x16x16xf32>
    tpu.vector_store %arg5[%c3_38, %c1_39, %c1_40], %43 {strides = array<i32>} : memref<4x18x18xf32, #tpu.memory_space<vmem>>, vector<1x16x16xf32>,
    %44 = vector.extract_strided_slice %40 {offsets = [1, 0], sizes = [1, 16], strides = [1, 1]} : vector<16x16xf32> to vector<1x16xf32>
    %c3_41 = arith.constant 3 : index
    %c0_42 = arith.constant 0 : index
    %c1_43 = arith.constant 1 : index
    %45 = vector.load %arg5[%c3_41, %c0_42, %c1_43] : memref<4x18x18xf32, #tpu.memory_space<vmem>>, vector<1x1x16xf32>
    %46 = vector.shape_cast %45 : vector<1x1x16xf32> to vector<1x16xf32>
    %47 = vector.shape_cast %44 : vector<1x16xf32> to vector<1x1x16xf32>
    tpu.vector_store %arg5[%c3_41, %c0_42, %c1_43], %47 {strides = array<i32>} : memref<4x18x18xf32, #tpu.memory_space<vmem>>, vector<1x1x16xf32>,
    %48 = vector.extract_strided_slice %40 {offsets = [14, 0], sizes = [1, 16], strides = [1, 1]} : vector<16x16xf32> to vector<1x16xf32>
    %c3_44 = arith.constant 3 : index
    %c17_45 = arith.constant 17 : index
    %c1_46 = arith.constant 1 : index
    %49 = vector.load %arg5[%c3_44, %c17_45, %c1_46] : memref<4x18x18xf32, #tpu.memory_space<vmem>>, vector<1x1x16xf32>
    %50 = vector.shape_cast %49 : vector<1x1x16xf32> to vector<1x16xf32>
    %51 = vector.shape_cast %48 : vector<1x16xf32> to vector<1x1x16xf32>
    tpu.vector_store %arg5[%c3_44, %c17_45, %c1_46], %51 {strides = array<i32>} : memref<4x18x18xf32, #tpu.memory_space<vmem>>, vector<1x1x16xf32>,
    %c0_47 = arith.constant 0 : index
    %c0_48 = arith.constant 0 : index
    %c2_49 = arith.constant 2 : index
    %52 = vector.load %arg5[%c0_47, %c0_48, %c2_49] : memref<4x18x18xf32, #tpu.memory_space<vmem>>, vector<1x18x1xf32>
    %53 = vector.shape_cast %52 : vector<1x18x1xf32> to vector<18x1xf32>
    %c0_50 = arith.constant 0 : index
    %c0_51 = arith.constant 0 : index
    %c0_52 = arith.constant 0 : index
    %54 = vector.load %arg5[%c0_50, %c0_51, %c0_52] : memref<4x18x18xf32, #tpu.memory_space<vmem>>, vector<1x18x1xf32>
    %55 = vector.shape_cast %54 : vector<1x18x1xf32> to vector<18x1xf32>
    %56 = vector.shape_cast %53 : vector<18x1xf32> to vector<1x18x1xf32>
    tpu.vector_store %arg5[%c0_50, %c0_51, %c0_52], %56 {strides = array<i32>} : memref<4x18x18xf32, #tpu.memory_space<vmem>>, vector<1x18x1xf32>,
    %c0_53 = arith.constant 0 : index
    %c0_54 = arith.constant 0 : index
    %c15 = arith.constant 15 : index
    %57 = vector.load %arg5[%c0_53, %c0_54, %c15] : memref<4x18x18xf32, #tpu.memory_space<vmem>>, vector<1x18x1xf32>
    %58 = vector.shape_cast %57 : vector<1x18x1xf32> to vector<18x1xf32>
    %c0_55 = arith.constant 0 : index
    %c0_56 = arith.constant 0 : index
    %c17_57 = arith.constant 17 : index
    %59 = vector.load %arg5[%c0_55, %c0_56, %c17_57] : memref<4x18x18xf32, #tpu.memory_space<vmem>>, vector<1x18x1xf32>
    %60 = vector.shape_cast %59 : vector<1x18x1xf32> to vector<18x1xf32>
    %61 = vector.shape_cast %58 : vector<18x1xf32> to vector<1x18x1xf32>
    tpu.vector_store %arg5[%c0_55, %c0_56, %c17_57], %61 {strides = array<i32>} : memref<4x18x18xf32, #tpu.memory_space<vmem>>, vector<1x18x1xf32>,
    %c1_58 = arith.constant 1 : index
    %c0_59 = arith.constant 0 : index
    %c2_60 = arith.constant 2 : index
    %62 = vector.load %arg5[%c1_58, %c0_59, %c2_60] : memref<4x18x18xf32, #tpu.memory_space<vmem>>, vector<1x18x1xf32>
    %63 = vector.shape_cast %62 : vector<1x18x1xf32> to vector<18x1xf32>
    %c1_61 = arith.constant 1 : index
    %c0_62 = arith.constant 0 : index
    %c0_63 = arith.constant 0 : index
    %64 = vector.load %arg5[%c1_61, %c0_62, %c0_63] : memref<4x18x18xf32, #tpu.memory_space<vmem>>, vector<1x18x1xf32>
    %65 = vector.shape_cast %64 : vector<1x18x1xf32> to vector<18x1xf32>
    %66 = vector.shape_cast %63 : vector<18x1xf32> to vector<1x18x1xf32>
    tpu.vector_store %arg5[%c1_61, %c0_62, %c0_63], %66 {strides = array<i32>} : memref<4x18x18xf32, #tpu.memory_space<vmem>>, vector<1x18x1xf32>,
    %c1_64 = arith.constant 1 : index
    %c0_65 = arith.constant 0 : index
    %c15_66 = arith.constant 15 : index
    %67 = vector.load %arg5[%c1_64, %c0_65, %c15_66] : memref<4x18x18xf32, #tpu.memory_space<vmem>>, vector<1x18x1xf32>
    %68 = vector.shape_cast %67 : vector<1x18x1xf32> to vector<18x1xf32>
    %c1_67 = arith.constant 1 : index
    %c0_68 = arith.constant 0 : index
    %c17_69 = arith.constant 17 : index
    %69 = vector.load %arg5[%c1_67, %c0_68, %c17_69] : memref<4x18x18xf32, #tpu.memory_space<vmem>>, vector<1x18x1xf32>
    %70 = vector.shape_cast %69 : vector<1x18x1xf32> to vector<18x1xf32>
    %71 = vector.shape_cast %68 : vector<18x1xf32> to vector<1x18x1xf32>
    tpu.vector_store %arg5[%c1_67, %c0_68, %c17_69], %71 {strides = array<i32>} : memref<4x18x18xf32, #tpu.memory_space<vmem>>, vector<1x18x1xf32>,
    %c2_70 = arith.constant 2 : index
    %c0_71 = arith.constant 0 : index
    %c2_72 = arith.constant 2 : index
    %72 = vector.load %arg5[%c2_70, %c0_71, %c2_72] : memref<4x18x18xf32, #tpu.memory_space<vmem>>, vector<1x18x1xf32>
    %73 = vector.shape_cast %72 : vector<1x18x1xf32> to vector<18x1xf32>
    %c2_73 = arith.constant 2 : index
    %c0_74 = arith.constant 0 : index
    %c0_75 = arith.constant 0 : index
    %74 = vector.load %arg5[%c2_73, %c0_74, %c0_75] : memref<4x18x18xf32, #tpu.memory_space<vmem>>, vector<1x18x1xf32>
    %75 = vector.shape_cast %74 : vector<1x18x1xf32> to vector<18x1xf32>
    %76 = vector.shape_cast %73 : vector<18x1xf32> to vector<1x18x1xf32>
    tpu.vector_store %arg5[%c2_73, %c0_74, %c0_75], %76 {strides = array<i32>} : memref<4x18x18xf32, #tpu.memory_space<vmem>>, vector<1x18x1xf32>,
    %c2_76 = arith.constant 2 : index
    %c0_77 = arith.constant 0 : index
    %c15_78 = arith.constant 15 : index
    %77 = vector.load %arg5[%c2_76, %c0_77, %c15_78] : memref<4x18x18xf32, #tpu.memory_space<vmem>>, vector<1x18x1xf32>
    %78 = vector.shape_cast %77 : vector<1x18x1xf32> to vector<18x1xf32>
    %c2_79 = arith.constant 2 : index
    %c0_80 = arith.constant 0 : index
    %c17_81 = arith.constant 17 : index
    %79 = vector.load %arg5[%c2_79, %c0_80, %c17_81] : memref<4x18x18xf32, #tpu.memory_space<vmem>>, vector<1x18x1xf32>
    %80 = vector.shape_cast %79 : vector<1x18x1xf32> to vector<18x1xf32>
    %81 = vector.shape_cast %78 : vector<18x1xf32> to vector<1x18x1xf32>
    tpu.vector_store %arg5[%c2_79, %c0_80, %c17_81], %81 {strides = array<i32>} : memref<4x18x18xf32, #tpu.memory_space<vmem>>, vector<1x18x1xf32>,
    %c3_82 = arith.constant 3 : index
    %c0_83 = arith.constant 0 : index
    %c2_84 = arith.constant 2 : index
    %82 = vector.load %arg5[%c3_82, %c0_83, %c2_84] : memref<4x18x18xf32, #tpu.memory_space<vmem>>, vector<1x18x1xf32>
    %83 = vector.shape_cast %82 : vector<1x18x1xf32> to vector<18x1xf32>
    %c3_85 = arith.constant 3 : index
    %c0_86 = arith.constant 0 : index
    %c0_87 = arith.constant 0 : index
    %84 = vector.load %arg5[%c3_85, %c0_86, %c0_87] : memref<4x18x18xf32, #tpu.memory_space<vmem>>, vector<1x18x1xf32>
    %85 = vector.shape_cast %84 : vector<1x18x1xf32> to vector<18x1xf32>
    %86 = vector.shape_cast %83 : vector<18x1xf32> to vector<1x18x1xf32>
    tpu.vector_store %arg5[%c3_85, %c0_86, %c0_87], %86 {strides = array<i32>} : memref<4x18x18xf32, #tpu.memory_space<vmem>>, vector<1x18x1xf32>,
    %c3_88 = arith.constant 3 : index
    %c0_89 = arith.constant 0 : index
    %c15_90 = arith.constant 15 : index
    %87 = vector.load %arg5[%c3_88, %c0_89, %c15_90] : memref<4x18x18xf32, #tpu.memory_space<vmem>>, vector<1x18x1xf32>
    %88 = vector.shape_cast %87 : vector<1x18x1xf32> to vector<18x1xf32>
    %c3_91 = arith.constant 3 : index
    %c0_92 = arith.constant 0 : index
    %c17_93 = arith.constant 17 : index
    %89 = vector.load %arg5[%c3_91, %c0_92, %c17_93] : memref<4x18x18xf32, #tpu.memory_space<vmem>>, vector<1x18x1xf32>
    %90 = vector.shape_cast %89 : vector<1x18x1xf32> to vector<18x1xf32>
    %91 = vector.shape_cast %88 : vector<18x1xf32> to vector<1x18x1xf32>
    tpu.vector_store %arg5[%c3_91, %c0_92, %c17_93], %91 {strides = array<i32>} : memref<4x18x18xf32, #tpu.memory_space<vmem>>, vector<1x18x1xf32>,
    %cst = arith.constant 0.000000e+00 : f32
    %92 = vector.broadcast %cst : f32 to vector<16x16xf32>
    %c0_94 = arith.constant 0 : index
    %93 = memref.load %arg2[%c0_94] : memref<288xf32, #tpu.memory_space<smem>>
    %c0_95 = arith.constant 0 : index
    %c0_96 = arith.constant 0 : index
    %c0_97 = arith.constant 0 : index
    %94 = vector.load %arg5[%c0_95, %c0_96, %c0_97] : memref<4x18x18xf32, #tpu.memory_space<vmem>>, vector<1x16x16xf32>
    %95 = vector.shape_cast %94 : vector<1x16x16xf32> to vector<16x16xf32>
    %96 = vector.broadcast %93 : f32 to vector<16x16xf32>
    %97 = arith.mulf %96, %95 : vector<16x16xf32>
    %98 = arith.addf %92, %97 : vector<16x16xf32>
    %c1_98 = arith.constant 1 : index
    %99 = memref.load %arg2[%c1_98] : memref<288xf32, #tpu.memory_space<smem>>
    %c0_99 = arith.constant 0 : index
    %c0_100 = arith.constant 0 : index
    %c1_101 = arith.constant 1 : index
    %100 = vector.load %arg5[%c0_99, %c0_100, %c1_101] : memref<4x18x18xf32, #tpu.memory_space<vmem>>, vector<1x16x16xf32>
    %101 = vector.shape_cast %100 : vector<1x16x16xf32> to vector<16x16xf32>
    %102 = vector.broadcast %99 : f32 to vector<16x16xf32>
    %103 = arith.mulf %102, %101 : vector<16x16xf32>
    %104 = arith.addf %98, %103 : vector<16x16xf32>
    %c2_102 = arith.constant 2 : index
    %105 = memref.load %arg2[%c2_102] : memref<288xf32, #tpu.memory_space<smem>>
    %c0_103 = arith.constant 0 : index
    %c0_104 = arith.constant 0 : index
    %c2_105 = arith.constant 2 : index
    %106 = vector.load %arg5[%c0_103, %c0_104, %c2_105] : memref<4x18x18xf32, #tpu.memory_space<vmem>>, vector<1x16x16xf32>
    %107 = vector.shape_cast %106 : vector<1x16x16xf32> to vector<16x16xf32>
    %108 = vector.broadcast %105 : f32 to vector<16x16xf32>
    %109 = arith.mulf %108, %107 : vector<16x16xf32>
    %110 = arith.addf %104, %109 : vector<16x16xf32>
    %c3_106 = arith.constant 3 : index
    %111 = memref.load %arg2[%c3_106] : memref<288xf32, #tpu.memory_space<smem>>
    %c0_107 = arith.constant 0 : index
    %c1_108 = arith.constant 1 : index
    %c0_109 = arith.constant 0 : index
    %112 = vector.load %arg5[%c0_107, %c1_108, %c0_109] : memref<4x18x18xf32, #tpu.memory_space<vmem>>, vector<1x16x16xf32>
    %113 = vector.shape_cast %112 : vector<1x16x16xf32> to vector<16x16xf32>
    %114 = vector.broadcast %111 : f32 to vector<16x16xf32>
    %115 = arith.mulf %114, %113 : vector<16x16xf32>
    %116 = arith.addf %110, %115 : vector<16x16xf32>
    %c4 = arith.constant 4 : index
    %117 = memref.load %arg2[%c4] : memref<288xf32, #tpu.memory_space<smem>>
    %c0_110 = arith.constant 0 : index
    %c1_111 = arith.constant 1 : index
    %c1_112 = arith.constant 1 : index
    %118 = vector.load %arg5[%c0_110, %c1_111, %c1_112] : memref<4x18x18xf32, #tpu.memory_space<vmem>>, vector<1x16x16xf32>
    %119 = vector.shape_cast %118 : vector<1x16x16xf32> to vector<16x16xf32>
    %120 = vector.broadcast %117 : f32 to vector<16x16xf32>
    %121 = arith.mulf %120, %119 : vector<16x16xf32>
    %122 = arith.addf %116, %121 : vector<16x16xf32>
    %c5 = arith.constant 5 : index
    %123 = memref.load %arg2[%c5] : memref<288xf32, #tpu.memory_space<smem>>
    %c0_113 = arith.constant 0 : index
    %c1_114 = arith.constant 1 : index
    %c2_115 = arith.constant 2 : index
    %124 = vector.load %arg5[%c0_113, %c1_114, %c2_115] : memref<4x18x18xf32, #tpu.memory_space<vmem>>, vector<1x16x16xf32>
    %125 = vector.shape_cast %124 : vector<1x16x16xf32> to vector<16x16xf32>
    %126 = vector.broadcast %123 : f32 to vector<16x16xf32>
    %127 = arith.mulf %126, %125 : vector<16x16xf32>
    %128 = arith.addf %122, %127 : vector<16x16xf32>
    %c6 = arith.constant 6 : index
    %129 = memref.load %arg2[%c6] : memref<288xf32, #tpu.memory_space<smem>>
    %c0_116 = arith.constant 0 : index
    %c2_117 = arith.constant 2 : index
    %c0_118 = arith.constant 0 : index
    %130 = vector.load %arg5[%c0_116, %c2_117, %c0_118] : memref<4x18x18xf32, #tpu.memory_space<vmem>>, vector<1x16x16xf32>
    %131 = vector.shape_cast %130 : vector<1x16x16xf32> to vector<16x16xf32>
    %132 = vector.broadcast %129 : f32 to vector<16x16xf32>
    %133 = arith.mulf %132, %131 : vector<16x16xf32>
    %134 = arith.addf %128, %133 : vector<16x16xf32>
    %c7 = arith.constant 7 : index
    %135 = memref.load %arg2[%c7] : memref<288xf32, #tpu.memory_space<smem>>
    %c0_119 = arith.constant 0 : index
    %c2_120 = arith.constant 2 : index
    %c1_121 = arith.constant 1 : index
    %136 = vector.load %arg5[%c0_119, %c2_120, %c1_121] : memref<4x18x18xf32, #tpu.memory_space<vmem>>, vector<1x16x16xf32>
    %137 = vector.shape_cast %136 : vector<1x16x16xf32> to vector<16x16xf32>
    %138 = vector.broadcast %135 : f32 to vector<16x16xf32>
    %139 = arith.mulf %138, %137 : vector<16x16xf32>
    %140 = arith.addf %134, %139 : vector<16x16xf32>
    %c8 = arith.constant 8 : index
    %141 = memref.load %arg2[%c8] : memref<288xf32, #tpu.memory_space<smem>>
    %c0_122 = arith.constant 0 : index
    %c2_123 = arith.constant 2 : index
    %c2_124 = arith.constant 2 : index
    %142 = vector.load %arg5[%c0_122, %c2_123, %c2_124] : memref<4x18x18xf32, #tpu.memory_space<vmem>>, vector<1x16x16xf32>
    %143 = vector.shape_cast %142 : vector<1x16x16xf32> to vector<16x16xf32>
    %144 = vector.broadcast %141 : f32 to vector<16x16xf32>
    %145 = arith.mulf %144, %143 : vector<16x16xf32>
    %146 = arith.addf %140, %145 : vector<16x16xf32>
    %c9 = arith.constant 9 : index
    %147 = memref.load %arg2[%c9] : memref<288xf32, #tpu.memory_space<smem>>
    %c1_125 = arith.constant 1 : index
    %c0_126 = arith.constant 0 : index
    %c0_127 = arith.constant 0 : index
    %148 = vector.load %arg5[%c1_125, %c0_126, %c0_127] : memref<4x18x18xf32, #tpu.memory_space<vmem>>, vector<1x16x16xf32>
    %149 = vector.shape_cast %148 : vector<1x16x16xf32> to vector<16x16xf32>
    %150 = vector.broadcast %147 : f32 to vector<16x16xf32>
    %151 = arith.mulf %150, %149 : vector<16x16xf32>
    %152 = arith.addf %146, %151 : vector<16x16xf32>
    %c10 = arith.constant 10 : index
    %153 = memref.load %arg2[%c10] : memref<288xf32, #tpu.memory_space<smem>>
    %c1_128 = arith.constant 1 : index
    %c0_129 = arith.constant 0 : index
    %c1_130 = arith.constant 1 : index
    %154 = vector.load %arg5[%c1_128, %c0_129, %c1_130] : memref<4x18x18xf32, #tpu.memory_space<vmem>>, vector<1x16x16xf32>
    %155 = vector.shape_cast %154 : vector<1x16x16xf32> to vector<16x16xf32>
    %156 = vector.broadcast %153 : f32 to vector<16x16xf32>
    %157 = arith.mulf %156, %155 : vector<16x16xf32>
    %158 = arith.addf %152, %157 : vector<16x16xf32>
    %c11 = arith.constant 11 : index
    %159 = memref.load %arg2[%c11] : memref<288xf32, #tpu.memory_space<smem>>
    %c1_131 = arith.constant 1 : index
    %c0_132 = arith.constant 0 : index
    %c2_133 = arith.constant 2 : index
    %160 = vector.load %arg5[%c1_131, %c0_132, %c2_133] : memref<4x18x18xf32, #tpu.memory_space<vmem>>, vector<1x16x16xf32>
    %161 = vector.shape_cast %160 : vector<1x16x16xf32> to vector<16x16xf32>
    %162 = vector.broadcast %159 : f32 to vector<16x16xf32>
    %163 = arith.mulf %162, %161 : vector<16x16xf32>
    %164 = arith.addf %158, %163 : vector<16x16xf32>
    %c12 = arith.constant 12 : index
    %165 = memref.load %arg2[%c12] : memref<288xf32, #tpu.memory_space<smem>>
    %c1_134 = arith.constant 1 : index
    %c1_135 = arith.constant 1 : index
    %c0_136 = arith.constant 0 : index
    %166 = vector.load %arg5[%c1_134, %c1_135, %c0_136] : memref<4x18x18xf32, #tpu.memory_space<vmem>>, vector<1x16x16xf32>
    %167 = vector.shape_cast %166 : vector<1x16x16xf32> to vector<16x16xf32>
    %168 = vector.broadcast %165 : f32 to vector<16x16xf32>
    %169 = arith.mulf %168, %167 : vector<16x16xf32>
    %170 = arith.addf %164, %169 : vector<16x16xf32>
    %c13 = arith.constant 13 : index
    %171 = memref.load %arg2[%c13] : memref<288xf32, #tpu.memory_space<smem>>
    %c1_137 = arith.constant 1 : index
    %c1_138 = arith.constant 1 : index
    %c1_139 = arith.constant 1 : index
    %172 = vector.load %arg5[%c1_137, %c1_138, %c1_139] : memref<4x18x18xf32, #tpu.memory_space<vmem>>, vector<1x16x16xf32>
    %173 = vector.shape_cast %172 : vector<1x16x16xf32> to vector<16x16xf32>
    %174 = vector.broadcast %171 : f32 to vector<16x16xf32>
    %175 = arith.mulf %174, %173 : vector<16x16xf32>
    %176 = arith.addf %170, %175 : vector<16x16xf32>
    %c14 = arith.constant 14 : index
    %177 = memref.load %arg2[%c14] : memref<288xf32, #tpu.memory_space<smem>>
    %c1_140 = arith.constant 1 : index
    %c1_141 = arith.constant 1 : index
    %c2_142 = arith.constant 2 : index
    %178 = vector.load %arg5[%c1_140, %c1_141, %c2_142] : memref<4x18x18xf32, #tpu.memory_space<vmem>>, vector<1x16x16xf32>
    %179 = vector.shape_cast %178 : vector<1x16x16xf32> to vector<16x16xf32>
    %180 = vector.broadcast %177 : f32 to vector<16x16xf32>
    %181 = arith.mulf %180, %179 : vector<16x16xf32>
    %182 = arith.addf %176, %181 : vector<16x16xf32>
    %c15_143 = arith.constant 15 : index
    %183 = memref.load %arg2[%c15_143] : memref<288xf32, #tpu.memory_space<smem>>
    %c1_144 = arith.constant 1 : index
    %c2_145 = arith.constant 2 : index
    %c0_146 = arith.constant 0 : index
    %184 = vector.load %arg5[%c1_144, %c2_145, %c0_146] : memref<4x18x18xf32, #tpu.memory_space<vmem>>, vector<1x16x16xf32>
    %185 = vector.shape_cast %184 : vector<1x16x16xf32> to vector<16x16xf32>
    %186 = vector.broadcast %183 : f32 to vector<16x16xf32>
    %187 = arith.mulf %186, %185 : vector<16x16xf32>
    %188 = arith.addf %182, %187 : vector<16x16xf32>
    %c16 = arith.constant 16 : index
    %189 = memref.load %arg2[%c16] : memref<288xf32, #tpu.memory_space<smem>>
    %c1_147 = arith.constant 1 : index
    %c2_148 = arith.constant 2 : index
    %c1_149 = arith.constant 1 : index
    %190 = vector.load %arg5[%c1_147, %c2_148, %c1_149] : memref<4x18x18xf32, #tpu.memory_space<vmem>>, vector<1x16x16xf32>
    %191 = vector.shape_cast %190 : vector<1x16x16xf32> to vector<16x16xf32>
    %192 = vector.broadcast %189 : f32 to vector<16x16xf32>
    %193 = arith.mulf %192, %191 : vector<16x16xf32>
    %194 = arith.addf %188, %193 : vector<16x16xf32>
    %c17_150 = arith.constant 17 : index
    %195 = memref.load %arg2[%c17_150] : memref<288xf32, #tpu.memory_space<smem>>
    %c1_151 = arith.constant 1 : index
    %c2_152 = arith.constant 2 : index
    %c2_153 = arith.constant 2 : index
    %196 = vector.load %arg5[%c1_151, %c2_152, %c2_153] : memref<4x18x18xf32, #tpu.memory_space<vmem>>, vector<1x16x16xf32>
    %197 = vector.shape_cast %196 : vector<1x16x16xf32> to vector<16x16xf32>
    %198 = vector.broadcast %195 : f32 to vector<16x16xf32>
    %199 = arith.mulf %198, %197 : vector<16x16xf32>
    %200 = arith.addf %194, %199 : vector<16x16xf32>
    %c18 = arith.constant 18 : index
    %201 = memref.load %arg2[%c18] : memref<288xf32, #tpu.memory_space<smem>>
    %c2_154 = arith.constant 2 : index
    %c0_155 = arith.constant 0 : index
    %c0_156 = arith.constant 0 : index
    %202 = vector.load %arg5[%c2_154, %c0_155, %c0_156] : memref<4x18x18xf32, #tpu.memory_space<vmem>>, vector<1x16x16xf32>
    %203 = vector.shape_cast %202 : vector<1x16x16xf32> to vector<16x16xf32>
    %204 = vector.broadcast %201 : f32 to vector<16x16xf32>
    %205 = arith.mulf %204, %203 : vector<16x16xf32>
    %206 = arith.addf %200, %205 : vector<16x16xf32>
    %c19 = arith.constant 19 : index
    %207 = memref.load %arg2[%c19] : memref<288xf32, #tpu.memory_space<smem>>
    %c2_157 = arith.constant 2 : index
    %c0_158 = arith.constant 0 : index
    %c1_159 = arith.constant 1 : index
    %208 = vector.load %arg5[%c2_157, %c0_158, %c1_159] : memref<4x18x18xf32, #tpu.memory_space<vmem>>, vector<1x16x16xf32>
    %209 = vector.shape_cast %208 : vector<1x16x16xf32> to vector<16x16xf32>
    %210 = vector.broadcast %207 : f32 to vector<16x16xf32>
    %211 = arith.mulf %210, %209 : vector<16x16xf32>
    %212 = arith.addf %206, %211 : vector<16x16xf32>
    %c20 = arith.constant 20 : index
    %213 = memref.load %arg2[%c20] : memref<288xf32, #tpu.memory_space<smem>>
    %c2_160 = arith.constant 2 : index
    %c0_161 = arith.constant 0 : index
    %c2_162 = arith.constant 2 : index
    %214 = vector.load %arg5[%c2_160, %c0_161, %c2_162] : memref<4x18x18xf32, #tpu.memory_space<vmem>>, vector<1x16x16xf32>
    %215 = vector.shape_cast %214 : vector<1x16x16xf32> to vector<16x16xf32>
    %216 = vector.broadcast %213 : f32 to vector<16x16xf32>
    %217 = arith.mulf %216, %215 : vector<16x16xf32>
    %218 = arith.addf %212, %217 : vector<16x16xf32>
    %c21 = arith.constant 21 : index
    %219 = memref.load %arg2[%c21] : memref<288xf32, #tpu.memory_space<smem>>
    %c2_163 = arith.constant 2 : index
    %c1_164 = arith.constant 1 : index
    %c0_165 = arith.constant 0 : index
    %220 = vector.load %arg5[%c2_163, %c1_164, %c0_165] : memref<4x18x18xf32, #tpu.memory_space<vmem>>, vector<1x16x16xf32>
    %221 = vector.shape_cast %220 : vector<1x16x16xf32> to vector<16x16xf32>
    %222 = vector.broadcast %219 : f32 to vector<16x16xf32>
    %223 = arith.mulf %222, %221 : vector<16x16xf32>
    %224 = arith.addf %218, %223 : vector<16x16xf32>
    %c22 = arith.constant 22 : index
    %225 = memref.load %arg2[%c22] : memref<288xf32, #tpu.memory_space<smem>>
    %c2_166 = arith.constant 2 : index
    %c1_167 = arith.constant 1 : index
    %c1_168 = arith.constant 1 : index
    %226 = vector.load %arg5[%c2_166, %c1_167, %c1_168] : memref<4x18x18xf32, #tpu.memory_space<vmem>>, vector<1x16x16xf32>
    %227 = vector.shape_cast %226 : vector<1x16x16xf32> to vector<16x16xf32>
    %228 = vector.broadcast %225 : f32 to vector<16x16xf32>
    %229 = arith.mulf %228, %227 : vector<16x16xf32>
    %230 = arith.addf %224, %229 : vector<16x16xf32>
    %c23 = arith.constant 23 : index
    %231 = memref.load %arg2[%c23] : memref<288xf32, #tpu.memory_space<smem>>
    %c2_169 = arith.constant 2 : index
    %c1_170 = arith.constant 1 : index
    %c2_171 = arith.constant 2 : index
    %232 = vector.load %arg5[%c2_169, %c1_170, %c2_171] : memref<4x18x18xf32, #tpu.memory_space<vmem>>, vector<1x16x16xf32>
    %233 = vector.shape_cast %232 : vector<1x16x16xf32> to vector<16x16xf32>
    %234 = vector.broadcast %231 : f32 to vector<16x16xf32>
    %235 = arith.mulf %234, %233 : vector<16x16xf32>
    %236 = arith.addf %230, %235 : vector<16x16xf32>
    %c24 = arith.constant 24 : index
    %237 = memref.load %arg2[%c24] : memref<288xf32, #tpu.memory_space<smem>>
    %c2_172 = arith.constant 2 : index
    %c2_173 = arith.constant 2 : index
    %c0_174 = arith.constant 0 : index
    %238 = vector.load %arg5[%c2_172, %c2_173, %c0_174] : memref<4x18x18xf32, #tpu.memory_space<vmem>>, vector<1x16x16xf32>
    %239 = vector.shape_cast %238 : vector<1x16x16xf32> to vector<16x16xf32>
    %240 = vector.broadcast %237 : f32 to vector<16x16xf32>
    %241 = arith.mulf %240, %239 : vector<16x16xf32>
    %242 = arith.addf %236, %241 : vector<16x16xf32>
    %c25 = arith.constant 25 : index
    %243 = memref.load %arg2[%c25] : memref<288xf32, #tpu.memory_space<smem>>
    %c2_175 = arith.constant 2 : index
    %c2_176 = arith.constant 2 : index
    %c1_177 = arith.constant 1 : index
    %244 = vector.load %arg5[%c2_175, %c2_176, %c1_177] : memref<4x18x18xf32, #tpu.memory_space<vmem>>, vector<1x16x16xf32>
    %245 = vector.shape_cast %244 : vector<1x16x16xf32> to vector<16x16xf32>
    %246 = vector.broadcast %243 : f32 to vector<16x16xf32>
    %247 = arith.mulf %246, %245 : vector<16x16xf32>
    %248 = arith.addf %242, %247 : vector<16x16xf32>
    %c26 = arith.constant 26 : index
    %249 = memref.load %arg2[%c26] : memref<288xf32, #tpu.memory_space<smem>>
    %c2_178 = arith.constant 2 : index
    %c2_179 = arith.constant 2 : index
    %c2_180 = arith.constant 2 : index
    %250 = vector.load %arg5[%c2_178, %c2_179, %c2_180] : memref<4x18x18xf32, #tpu.memory_space<vmem>>, vector<1x16x16xf32>
    %251 = vector.shape_cast %250 : vector<1x16x16xf32> to vector<16x16xf32>
    %252 = vector.broadcast %249 : f32 to vector<16x16xf32>
    %253 = arith.mulf %252, %251 : vector<16x16xf32>
    %254 = arith.addf %248, %253 : vector<16x16xf32>
    %c27 = arith.constant 27 : index
    %255 = memref.load %arg2[%c27] : memref<288xf32, #tpu.memory_space<smem>>
    %c3_181 = arith.constant 3 : index
    %c0_182 = arith.constant 0 : index
    %c0_183 = arith.constant 0 : index
    %256 = vector.load %arg5[%c3_181, %c0_182, %c0_183] : memref<4x18x18xf32, #tpu.memory_space<vmem>>, vector<1x16x16xf32>
    %257 = vector.shape_cast %256 : vector<1x16x16xf32> to vector<16x16xf32>
    %258 = vector.broadcast %255 : f32 to vector<16x16xf32>
    %259 = arith.mulf %258, %257 : vector<16x16xf32>
    %260 = arith.addf %254, %259 : vector<16x16xf32>
    %c28 = arith.constant 28 : index
    %261 = memref.load %arg2[%c28] : memref<288xf32, #tpu.memory_space<smem>>
    %c3_184 = arith.constant 3 : index
    %c0_185 = arith.constant 0 : index
    %c1_186 = arith.constant 1 : index
    %262 = vector.load %arg5[%c3_184, %c0_185, %c1_186] : memref<4x18x18xf32, #tpu.memory_space<vmem>>, vector<1x16x16xf32>
    %263 = vector.shape_cast %262 : vector<1x16x16xf32> to vector<16x16xf32>
    %264 = vector.broadcast %261 : f32 to vector<16x16xf32>
    %265 = arith.mulf %264, %263 : vector<16x16xf32>
    %266 = arith.addf %260, %265 : vector<16x16xf32>
    %c29 = arith.constant 29 : index
    %267 = memref.load %arg2[%c29] : memref<288xf32, #tpu.memory_space<smem>>
    %c3_187 = arith.constant 3 : index
    %c0_188 = arith.constant 0 : index
    %c2_189 = arith.constant 2 : index
    %268 = vector.load %arg5[%c3_187, %c0_188, %c2_189] : memref<4x18x18xf32, #tpu.memory_space<vmem>>, vector<1x16x16xf32>
    %269 = vector.shape_cast %268 : vector<1x16x16xf32> to vector<16x16xf32>
    %270 = vector.broadcast %267 : f32 to vector<16x16xf32>
    %271 = arith.mulf %270, %269 : vector<16x16xf32>
    %272 = arith.addf %266, %271 : vector<16x16xf32>
    %c30 = arith.constant 30 : index
    %273 = memref.load %arg2[%c30] : memref<288xf32, #tpu.memory_space<smem>>
    %c3_190 = arith.constant 3 : index
    %c1_191 = arith.constant 1 : index
    %c0_192 = arith.constant 0 : index
    %274 = vector.load %arg5[%c3_190, %c1_191, %c0_192] : memref<4x18x18xf32, #tpu.memory_space<vmem>>, vector<1x16x16xf32>
    %275 = vector.shape_cast %274 : vector<1x16x16xf32> to vector<16x16xf32>
    %276 = vector.broadcast %273 : f32 to vector<16x16xf32>
    %277 = arith.mulf %276, %275 : vector<16x16xf32>
    %278 = arith.addf %272, %277 : vector<16x16xf32>
    %c31 = arith.constant 31 : index
    %279 = memref.load %arg2[%c31] : memref<288xf32, #tpu.memory_space<smem>>
    %c3_193 = arith.constant 3 : index
    %c1_194 = arith.constant 1 : index
    %c1_195 = arith.constant 1 : index
    %280 = vector.load %arg5[%c3_193, %c1_194, %c1_195] : memref<4x18x18xf32, #tpu.memory_space<vmem>>, vector<1x16x16xf32>
    %281 = vector.shape_cast %280 : vector<1x16x16xf32> to vector<16x16xf32>
    %282 = vector.broadcast %279 : f32 to vector<16x16xf32>
    %283 = arith.mulf %282, %281 : vector<16x16xf32>
    %284 = arith.addf %278, %283 : vector<16x16xf32>
    %c32 = arith.constant 32 : index
    %285 = memref.load %arg2[%c32] : memref<288xf32, #tpu.memory_space<smem>>
    %c3_196 = arith.constant 3 : index
    %c1_197 = arith.constant 1 : index
    %c2_198 = arith.constant 2 : index
    %286 = vector.load %arg5[%c3_196, %c1_197, %c2_198] : memref<4x18x18xf32, #tpu.memory_space<vmem>>, vector<1x16x16xf32>
    %287 = vector.shape_cast %286 : vector<1x16x16xf32> to vector<16x16xf32>
    %288 = vector.broadcast %285 : f32 to vector<16x16xf32>
    %289 = arith.mulf %288, %287 : vector<16x16xf32>
    %290 = arith.addf %284, %289 : vector<16x16xf32>
    %c33 = arith.constant 33 : index
    %291 = memref.load %arg2[%c33] : memref<288xf32, #tpu.memory_space<smem>>
    %c3_199 = arith.constant 3 : index
    %c2_200 = arith.constant 2 : index
    %c0_201 = arith.constant 0 : index
    %292 = vector.load %arg5[%c3_199, %c2_200, %c0_201] : memref<4x18x18xf32, #tpu.memory_space<vmem>>, vector<1x16x16xf32>
    %293 = vector.shape_cast %292 : vector<1x16x16xf32> to vector<16x16xf32>
    %294 = vector.broadcast %291 : f32 to vector<16x16xf32>
    %295 = arith.mulf %294, %293 : vector<16x16xf32>
    %296 = arith.addf %290, %295 : vector<16x16xf32>
    %c34 = arith.constant 34 : index
    %297 = memref.load %arg2[%c34] : memref<288xf32, #tpu.memory_space<smem>>
    %c3_202 = arith.constant 3 : index
    %c2_203 = arith.constant 2 : index
    %c1_204 = arith.constant 1 : index
    %298 = vector.load %arg5[%c3_202, %c2_203, %c1_204] : memref<4x18x18xf32, #tpu.memory_space<vmem>>, vector<1x16x16xf32>
    %299 = vector.shape_cast %298 : vector<1x16x16xf32> to vector<16x16xf32>
    %300 = vector.broadcast %297 : f32 to vector<16x16xf32>
    %301 = arith.mulf %300, %299 : vector<16x16xf32>
    %302 = arith.addf %296, %301 : vector<16x16xf32>
    %c35 = arith.constant 35 : index
    %303 = memref.load %arg2[%c35] : memref<288xf32, #tpu.memory_space<smem>>
    %c3_205 = arith.constant 3 : index
    %c2_206 = arith.constant 2 : index
    %c2_207 = arith.constant 2 : index
    %304 = vector.load %arg5[%c3_205, %c2_206, %c2_207] : memref<4x18x18xf32, #tpu.memory_space<vmem>>, vector<1x16x16xf32>
    %305 = vector.shape_cast %304 : vector<1x16x16xf32> to vector<16x16xf32>
    %306 = vector.broadcast %303 : f32 to vector<16x16xf32>
    %307 = arith.mulf %306, %305 : vector<16x16xf32>
    %308 = arith.addf %302, %307 : vector<16x16xf32>
    %309 = vector.shape_cast %308 : vector<16x16xf32> to vector<1x16x16xf32>
    %cst_208 = arith.constant dense<0.000000e+00> : vector<1xf32>
    %310 = vector.multi_reduction <add>, %309, %cst_208 [1, 2] : vector<1x16x16xf32> to vector<1xf32>
    %311 = vector.shape_cast %310 : vector<1xf32> to vector<1x1x1xf32>
    %312 = vector.extract %311[0, 0, 0] : f32 from vector<1x1x1xf32>
    %313 = vector.broadcast %312 : f32 to vector<1x1xf32>
    %cst_209 = arith.constant 2.560000e+02 : f32
    %314 = vector.broadcast %cst_209 : f32 to vector<1x1xf32>
    %315 = arith.divf %313, %314 : vector<1x1xf32>
    %316 = vector.broadcast %315 : vector<1x1xf32> to vector<16x16xf32>
    %317 = arith.subf %308, %316 : vector<16x16xf32>
    %318 = arith.mulf %317, %317 : vector<16x16xf32>
    %319 = vector.shape_cast %318 : vector<16x16xf32> to vector<1x16x16xf32>
    %cst_210 = arith.constant dense<0.000000e+00> : vector<1xf32>
    %320 = vector.multi_reduction <add>, %319, %cst_210 [1, 2] : vector<1x16x16xf32> to vector<1xf32>
    %321 = vector.shape_cast %320 : vector<1xf32> to vector<1x1x1xf32>
    %322 = vector.extract %321[0, 0, 0] : f32 from vector<1x1x1xf32>
    %323 = vector.broadcast %322 : f32 to vector<1x1xf32>
    %cst_211 = arith.constant 2.560000e+02 : f32
    %324 = vector.broadcast %cst_211 : f32 to vector<1x1xf32>
    %325 = arith.divf %323, %324 : vector<1x1xf32>
    %cst_212 = arith.constant 9.99999974E-6 : f32
    %326 = vector.broadcast %cst_212 : f32 to vector<1x1xf32>
    %327 = arith.addf %325, %326 : vector<1x1xf32>
    %328 = math.rsqrt %327 : vector<1x1xf32>
    %329 = vector.broadcast %328 : vector<1x1xf32> to vector<16x16xf32>
    %330 = arith.mulf %317, %329 : vector<16x16xf32>
    %c0_213 = arith.constant 0 : index
    %c0_214 = arith.constant 0 : index
    %331 = memref.load %arg3[%c0_213, %c0_214] : memref<4x4xf32, #tpu.memory_space<smem>>
    %332 = vector.broadcast %331 : f32 to vector<16x16xf32>
    %333 = arith.mulf %330, %332 : vector<16x16xf32>
    %c1_215 = arith.constant 1 : index
    %c0_216 = arith.constant 0 : index
    %334 = memref.load %arg3[%c1_215, %c0_216] : memref<4x4xf32, #tpu.memory_space<smem>>
    %335 = vector.broadcast %334 : f32 to vector<16x16xf32>
    %336 = arith.addf %333, %335 : vector<16x16xf32>
    %cst_217 = arith.constant 0.000000e+00 : f32
    %337 = vector.broadcast %cst_217 : f32 to vector<16x16xf32>
    %338 = arith.maximumf %336, %337 : vector<16x16xf32>
    %cst_218 = arith.constant 0.000000e+00 : f32
    %339 = vector.broadcast %cst_218 : f32 to vector<16x16xf32>
    %c36 = arith.constant 36 : index
    %340 = memref.load %arg2[%c36] : memref<288xf32, #tpu.memory_space<smem>>
    %c0_219 = arith.constant 0 : index
    %c0_220 = arith.constant 0 : index
    %c0_221 = arith.constant 0 : index
    %341 = vector.load %arg5[%c0_219, %c0_220, %c0_221] : memref<4x18x18xf32, #tpu.memory_space<vmem>>, vector<1x16x16xf32>
    %342 = vector.shape_cast %341 : vector<1x16x16xf32> to vector<16x16xf32>
    %343 = vector.broadcast %340 : f32 to vector<16x16xf32>
    %344 = arith.mulf %343, %342 : vector<16x16xf32>
    %345 = arith.addf %339, %344 : vector<16x16xf32>
    %c37 = arith.constant 37 : index
    %346 = memref.load %arg2[%c37] : memref<288xf32, #tpu.memory_space<smem>>
    %c0_222 = arith.constant 0 : index
    %c0_223 = arith.constant 0 : index
    %c1_224 = arith.constant 1 : index
    %347 = vector.load %arg5[%c0_222, %c0_223, %c1_224] : memref<4x18x18xf32, #tpu.memory_space<vmem>>, vector<1x16x16xf32>
    %348 = vector.shape_cast %347 : vector<1x16x16xf32> to vector<16x16xf32>
    %349 = vector.broadcast %346 : f32 to vector<16x16xf32>
    %350 = arith.mulf %349, %348 : vector<16x16xf32>
    %351 = arith.addf %345, %350 : vector<16x16xf32>
    %c38 = arith.constant 38 : index
    %352 = memref.load %arg2[%c38] : memref<288xf32, #tpu.memory_space<smem>>
    %c0_225 = arith.constant 0 : index
    %c0_226 = arith.constant 0 : index
    %c2_227 = arith.constant 2 : index
    %353 = vector.load %arg5[%c0_225, %c0_226, %c2_227] : memref<4x18x18xf32, #tpu.memory_space<vmem>>, vector<1x16x16xf32>
    %354 = vector.shape_cast %353 : vector<1x16x16xf32> to vector<16x16xf32>
    %355 = vector.broadcast %352 : f32 to vector<16x16xf32>
    %356 = arith.mulf %355, %354 : vector<16x16xf32>
    %357 = arith.addf %351, %356 : vector<16x16xf32>
    %c39 = arith.constant 39 : index
    %358 = memref.load %arg2[%c39] : memref<288xf32, #tpu.memory_space<smem>>
    %c0_228 = arith.constant 0 : index
    %c1_229 = arith.constant 1 : index
    %c0_230 = arith.constant 0 : index
    %359 = vector.load %arg5[%c0_228, %c1_229, %c0_230] : memref<4x18x18xf32, #tpu.memory_space<vmem>>, vector<1x16x16xf32>
    %360 = vector.shape_cast %359 : vector<1x16x16xf32> to vector<16x16xf32>
    %361 = vector.broadcast %358 : f32 to vector<16x16xf32>
    %362 = arith.mulf %361, %360 : vector<16x16xf32>
    %363 = arith.addf %357, %362 : vector<16x16xf32>
    %c40 = arith.constant 40 : index
    %364 = memref.load %arg2[%c40] : memref<288xf32, #tpu.memory_space<smem>>
    %c0_231 = arith.constant 0 : index
    %c1_232 = arith.constant 1 : index
    %c1_233 = arith.constant 1 : index
    %365 = vector.load %arg5[%c0_231, %c1_232, %c1_233] : memref<4x18x18xf32, #tpu.memory_space<vmem>>, vector<1x16x16xf32>
    %366 = vector.shape_cast %365 : vector<1x16x16xf32> to vector<16x16xf32>
    %367 = vector.broadcast %364 : f32 to vector<16x16xf32>
    %368 = arith.mulf %367, %366 : vector<16x16xf32>
    %369 = arith.addf %363, %368 : vector<16x16xf32>
    %c41 = arith.constant 41 : index
    %370 = memref.load %arg2[%c41] : memref<288xf32, #tpu.memory_space<smem>>
    %c0_234 = arith.constant 0 : index
    %c1_235 = arith.constant 1 : index
    %c2_236 = arith.constant 2 : index
    %371 = vector.load %arg5[%c0_234, %c1_235, %c2_236] : memref<4x18x18xf32, #tpu.memory_space<vmem>>, vector<1x16x16xf32>
    %372 = vector.shape_cast %371 : vector<1x16x16xf32> to vector<16x16xf32>
    %373 = vector.broadcast %370 : f32 to vector<16x16xf32>
    %374 = arith.mulf %373, %372 : vector<16x16xf32>
    %375 = arith.addf %369, %374 : vector<16x16xf32>
    %c42 = arith.constant 42 : index
    %376 = memref.load %arg2[%c42] : memref<288xf32, #tpu.memory_space<smem>>
    %c0_237 = arith.constant 0 : index
    %c2_238 = arith.constant 2 : index
    %c0_239 = arith.constant 0 : index
    %377 = vector.load %arg5[%c0_237, %c2_238, %c0_239] : memref<4x18x18xf32, #tpu.memory_space<vmem>>, vector<1x16x16xf32>
    %378 = vector.shape_cast %377 : vector<1x16x16xf32> to vector<16x16xf32>
    %379 = vector.broadcast %376 : f32 to vector<16x16xf32>
    %380 = arith.mulf %379, %378 : vector<16x16xf32>
    %381 = arith.addf %375, %380 : vector<16x16xf32>
    %c43 = arith.constant 43 : index
    %382 = memref.load %arg2[%c43] : memref<288xf32, #tpu.memory_space<smem>>
    %c0_240 = arith.constant 0 : index
    %c2_241 = arith.constant 2 : index
    %c1_242 = arith.constant 1 : index
    %383 = vector.load %arg5[%c0_240, %c2_241, %c1_242] : memref<4x18x18xf32, #tpu.memory_space<vmem>>, vector<1x16x16xf32>
    %384 = vector.shape_cast %383 : vector<1x16x16xf32> to vector<16x16xf32>
    %385 = vector.broadcast %382 : f32 to vector<16x16xf32>
    %386 = arith.mulf %385, %384 : vector<16x16xf32>
    %387 = arith.addf %381, %386 : vector<16x16xf32>
    %c44 = arith.constant 44 : index
    %388 = memref.load %arg2[%c44] : memref<288xf32, #tpu.memory_space<smem>>
    %c0_243 = arith.constant 0 : index
    %c2_244 = arith.constant 2 : index
    %c2_245 = arith.constant 2 : index
    %389 = vector.load %arg5[%c0_243, %c2_244, %c2_245] : memref<4x18x18xf32, #tpu.memory_space<vmem>>, vector<1x16x16xf32>
    %390 = vector.shape_cast %389 : vector<1x16x16xf32> to vector<16x16xf32>
    %391 = vector.broadcast %388 : f32 to vector<16x16xf32>
    %392 = arith.mulf %391, %390 : vector<16x16xf32>
    %393 = arith.addf %387, %392 : vector<16x16xf32>
    %c45 = arith.constant 45 : index
    %394 = memref.load %arg2[%c45] : memref<288xf32, #tpu.memory_space<smem>>
    %c1_246 = arith.constant 1 : index
    %c0_247 = arith.constant 0 : index
    %c0_248 = arith.constant 0 : index
    %395 = vector.load %arg5[%c1_246, %c0_247, %c0_248] : memref<4x18x18xf32, #tpu.memory_space<vmem>>, vector<1x16x16xf32>
    %396 = vector.shape_cast %395 : vector<1x16x16xf32> to vector<16x16xf32>
    %397 = vector.broadcast %394 : f32 to vector<16x16xf32>
    %398 = arith.mulf %397, %396 : vector<16x16xf32>
    %399 = arith.addf %393, %398 : vector<16x16xf32>
    %c46 = arith.constant 46 : index
    %400 = memref.load %arg2[%c46] : memref<288xf32, #tpu.memory_space<smem>>
    %c1_249 = arith.constant 1 : index
    %c0_250 = arith.constant 0 : index
    %c1_251 = arith.constant 1 : index
    %401 = vector.load %arg5[%c1_249, %c0_250, %c1_251] : memref<4x18x18xf32, #tpu.memory_space<vmem>>, vector<1x16x16xf32>
    %402 = vector.shape_cast %401 : vector<1x16x16xf32> to vector<16x16xf32>
    %403 = vector.broadcast %400 : f32 to vector<16x16xf32>
    %404 = arith.mulf %403, %402 : vector<16x16xf32>
    %405 = arith.addf %399, %404 : vector<16x16xf32>
    %c47 = arith.constant 47 : index
    %406 = memref.load %arg2[%c47] : memref<288xf32, #tpu.memory_space<smem>>
    %c1_252 = arith.constant 1 : index
    %c0_253 = arith.constant 0 : index
    %c2_254 = arith.constant 2 : index
    %407 = vector.load %arg5[%c1_252, %c0_253, %c2_254] : memref<4x18x18xf32, #tpu.memory_space<vmem>>, vector<1x16x16xf32>
    %408 = vector.shape_cast %407 : vector<1x16x16xf32> to vector<16x16xf32>
    %409 = vector.broadcast %406 : f32 to vector<16x16xf32>
    %410 = arith.mulf %409, %408 : vector<16x16xf32>
    %411 = arith.addf %405, %410 : vector<16x16xf32>
    %c48 = arith.constant 48 : index
    %412 = memref.load %arg2[%c48] : memref<288xf32, #tpu.memory_space<smem>>
    %c1_255 = arith.constant 1 : index
    %c1_256 = arith.constant 1 : index
    %c0_257 = arith.constant 0 : index
    %413 = vector.load %arg5[%c1_255, %c1_256, %c0_257] : memref<4x18x18xf32, #tpu.memory_space<vmem>>, vector<1x16x16xf32>
    %414 = vector.shape_cast %413 : vector<1x16x16xf32> to vector<16x16xf32>
    %415 = vector.broadcast %412 : f32 to vector<16x16xf32>
    %416 = arith.mulf %415, %414 : vector<16x16xf32>
    %417 = arith.addf %411, %416 : vector<16x16xf32>
    %c49 = arith.constant 49 : index
    %418 = memref.load %arg2[%c49] : memref<288xf32, #tpu.memory_space<smem>>
    %c1_258 = arith.constant 1 : index
    %c1_259 = arith.constant 1 : index
    %c1_260 = arith.constant 1 : index
    %419 = vector.load %arg5[%c1_258, %c1_259, %c1_260] : memref<4x18x18xf32, #tpu.memory_space<vmem>>, vector<1x16x16xf32>
    %420 = vector.shape_cast %419 : vector<1x16x16xf32> to vector<16x16xf32>
    %421 = vector.broadcast %418 : f32 to vector<16x16xf32>
    %422 = arith.mulf %421, %420 : vector<16x16xf32>
    %423 = arith.addf %417, %422 : vector<16x16xf32>
    %c50 = arith.constant 50 : index
    %424 = memref.load %arg2[%c50] : memref<288xf32, #tpu.memory_space<smem>>
    %c1_261 = arith.constant 1 : index
    %c1_262 = arith.constant 1 : index
    %c2_263 = arith.constant 2 : index
    %425 = vector.load %arg5[%c1_261, %c1_262, %c2_263] : memref<4x18x18xf32, #tpu.memory_space<vmem>>, vector<1x16x16xf32>
    %426 = vector.shape_cast %425 : vector<1x16x16xf32> to vector<16x16xf32>
    %427 = vector.broadcast %424 : f32 to vector<16x16xf32>
    %428 = arith.mulf %427, %426 : vector<16x16xf32>
    %429 = arith.addf %423, %428 : vector<16x16xf32>
    %c51 = arith.constant 51 : index
    %430 = memref.load %arg2[%c51] : memref<288xf32, #tpu.memory_space<smem>>
    %c1_264 = arith.constant 1 : index
    %c2_265 = arith.constant 2 : index
    %c0_266 = arith.constant 0 : index
    %431 = vector.load %arg5[%c1_264, %c2_265, %c0_266] : memref<4x18x18xf32, #tpu.memory_space<vmem>>, vector<1x16x16xf32>
    %432 = vector.shape_cast %431 : vector<1x16x16xf32> to vector<16x16xf32>
    %433 = vector.broadcast %430 : f32 to vector<16x16xf32>
    %434 = arith.mulf %433, %432 : vector<16x16xf32>
    %435 = arith.addf %429, %434 : vector<16x16xf32>
    %c52 = arith.constant 52 : index
    %436 = memref.load %arg2[%c52] : memref<288xf32, #tpu.memory_space<smem>>
    %c1_267 = arith.constant 1 : index
    %c2_268 = arith.constant 2 : index
    %c1_269 = arith.constant 1 : index
    %437 = vector.load %arg5[%c1_267, %c2_268, %c1_269] : memref<4x18x18xf32, #tpu.memory_space<vmem>>, vector<1x16x16xf32>
    %438 = vector.shape_cast %437 : vector<1x16x16xf32> to vector<16x16xf32>
    %439 = vector.broadcast %436 : f32 to vector<16x16xf32>
    %440 = arith.mulf %439, %438 : vector<16x16xf32>
    %441 = arith.addf %435, %440 : vector<16x16xf32>
    %c53 = arith.constant 53 : index
    %442 = memref.load %arg2[%c53] : memref<288xf32, #tpu.memory_space<smem>>
    %c1_270 = arith.constant 1 : index
    %c2_271 = arith.constant 2 : index
    %c2_272 = arith.constant 2 : index
    %443 = vector.load %arg5[%c1_270, %c2_271, %c2_272] : memref<4x18x18xf32, #tpu.memory_space<vmem>>, vector<1x16x16xf32>
    %444 = vector.shape_cast %443 : vector<1x16x16xf32> to vector<16x16xf32>
    %445 = vector.broadcast %442 : f32 to vector<16x16xf32>
    %446 = arith.mulf %445, %444 : vector<16x16xf32>
    %447 = arith.addf %441, %446 : vector<16x16xf32>
    %c54 = arith.constant 54 : index
    %448 = memref.load %arg2[%c54] : memref<288xf32, #tpu.memory_space<smem>>
    %c2_273 = arith.constant 2 : index
    %c0_274 = arith.constant 0 : index
    %c0_275 = arith.constant 0 : index
    %449 = vector.load %arg5[%c2_273, %c0_274, %c0_275] : memref<4x18x18xf32, #tpu.memory_space<vmem>>, vector<1x16x16xf32>
    %450 = vector.shape_cast %449 : vector<1x16x16xf32> to vector<16x16xf32>
    %451 = vector.broadcast %448 : f32 to vector<16x16xf32>
    %452 = arith.mulf %451, %450 : vector<16x16xf32>
    %453 = arith.addf %447, %452 : vector<16x16xf32>
    %c55 = arith.constant 55 : index
    %454 = memref.load %arg2[%c55] : memref<288xf32, #tpu.memory_space<smem>>
    %c2_276 = arith.constant 2 : index
    %c0_277 = arith.constant 0 : index
    %c1_278 = arith.constant 1 : index
    %455 = vector.load %arg5[%c2_276, %c0_277, %c1_278] : memref<4x18x18xf32, #tpu.memory_space<vmem>>, vector<1x16x16xf32>
    %456 = vector.shape_cast %455 : vector<1x16x16xf32> to vector<16x16xf32>
    %457 = vector.broadcast %454 : f32 to vector<16x16xf32>
    %458 = arith.mulf %457, %456 : vector<16x16xf32>
    %459 = arith.addf %453, %458 : vector<16x16xf32>
    %c56 = arith.constant 56 : index
    %460 = memref.load %arg2[%c56] : memref<288xf32, #tpu.memory_space<smem>>
    %c2_279 = arith.constant 2 : index
    %c0_280 = arith.constant 0 : index
    %c2_281 = arith.constant 2 : index
    %461 = vector.load %arg5[%c2_279, %c0_280, %c2_281] : memref<4x18x18xf32, #tpu.memory_space<vmem>>, vector<1x16x16xf32>
    %462 = vector.shape_cast %461 : vector<1x16x16xf32> to vector<16x16xf32>
    %463 = vector.broadcast %460 : f32 to vector<16x16xf32>
    %464 = arith.mulf %463, %462 : vector<16x16xf32>
    %465 = arith.addf %459, %464 : vector<16x16xf32>
    %c57 = arith.constant 57 : index
    %466 = memref.load %arg2[%c57] : memref<288xf32, #tpu.memory_space<smem>>
    %c2_282 = arith.constant 2 : index
    %c1_283 = arith.constant 1 : index
    %c0_284 = arith.constant 0 : index
    %467 = vector.load %arg5[%c2_282, %c1_283, %c0_284] : memref<4x18x18xf32, #tpu.memory_space<vmem>>, vector<1x16x16xf32>
    %468 = vector.shape_cast %467 : vector<1x16x16xf32> to vector<16x16xf32>
    %469 = vector.broadcast %466 : f32 to vector<16x16xf32>
    %470 = arith.mulf %469, %468 : vector<16x16xf32>
    %471 = arith.addf %465, %470 : vector<16x16xf32>
    %c58 = arith.constant 58 : index
    %472 = memref.load %arg2[%c58] : memref<288xf32, #tpu.memory_space<smem>>
    %c2_285 = arith.constant 2 : index
    %c1_286 = arith.constant 1 : index
    %c1_287 = arith.constant 1 : index
    %473 = vector.load %arg5[%c2_285, %c1_286, %c1_287] : memref<4x18x18xf32, #tpu.memory_space<vmem>>, vector<1x16x16xf32>
    %474 = vector.shape_cast %473 : vector<1x16x16xf32> to vector<16x16xf32>
    %475 = vector.broadcast %472 : f32 to vector<16x16xf32>
    %476 = arith.mulf %475, %474 : vector<16x16xf32>
    %477 = arith.addf %471, %476 : vector<16x16xf32>
    %c59 = arith.constant 59 : index
    %478 = memref.load %arg2[%c59] : memref<288xf32, #tpu.memory_space<smem>>
    %c2_288 = arith.constant 2 : index
    %c1_289 = arith.constant 1 : index
    %c2_290 = arith.constant 2 : index
    %479 = vector.load %arg5[%c2_288, %c1_289, %c2_290] : memref<4x18x18xf32, #tpu.memory_space<vmem>>, vector<1x16x16xf32>
    %480 = vector.shape_cast %479 : vector<1x16x16xf32> to vector<16x16xf32>
    %481 = vector.broadcast %478 : f32 to vector<16x16xf32>
    %482 = arith.mulf %481, %480 : vector<16x16xf32>
    %483 = arith.addf %477, %482 : vector<16x16xf32>
    %c60 = arith.constant 60 : index
    %484 = memref.load %arg2[%c60] : memref<288xf32, #tpu.memory_space<smem>>
    %c2_291 = arith.constant 2 : index
    %c2_292 = arith.constant 2 : index
    %c0_293 = arith.constant 0 : index
    %485 = vector.load %arg5[%c2_291, %c2_292, %c0_293] : memref<4x18x18xf32, #tpu.memory_space<vmem>>, vector<1x16x16xf32>
    %486 = vector.shape_cast %485 : vector<1x16x16xf32> to vector<16x16xf32>
    %487 = vector.broadcast %484 : f32 to vector<16x16xf32>
    %488 = arith.mulf %487, %486 : vector<16x16xf32>
    %489 = arith.addf %483, %488 : vector<16x16xf32>
    %c61 = arith.constant 61 : index
    %490 = memref.load %arg2[%c61] : memref<288xf32, #tpu.memory_space<smem>>
    %c2_294 = arith.constant 2 : index
    %c2_295 = arith.constant 2 : index
    %c1_296 = arith.constant 1 : index
    %491 = vector.load %arg5[%c2_294, %c2_295, %c1_296] : memref<4x18x18xf32, #tpu.memory_space<vmem>>, vector<1x16x16xf32>
    %492 = vector.shape_cast %491 : vector<1x16x16xf32> to vector<16x16xf32>
    %493 = vector.broadcast %490 : f32 to vector<16x16xf32>
    %494 = arith.mulf %493, %492 : vector<16x16xf32>
    %495 = arith.addf %489, %494 : vector<16x16xf32>
    %c62 = arith.constant 62 : index
    %496 = memref.load %arg2[%c62] : memref<288xf32, #tpu.memory_space<smem>>
    %c2_297 = arith.constant 2 : index
    %c2_298 = arith.constant 2 : index
    %c2_299 = arith.constant 2 : index
    %497 = vector.load %arg5[%c2_297, %c2_298, %c2_299] : memref<4x18x18xf32, #tpu.memory_space<vmem>>, vector<1x16x16xf32>
    %498 = vector.shape_cast %497 : vector<1x16x16xf32> to vector<16x16xf32>
    %499 = vector.broadcast %496 : f32 to vector<16x16xf32>
    %500 = arith.mulf %499, %498 : vector<16x16xf32>
    %501 = arith.addf %495, %500 : vector<16x16xf32>
    %c63 = arith.constant 63 : index
    %502 = memref.load %arg2[%c63] : memref<288xf32, #tpu.memory_space<smem>>
    %c3_300 = arith.constant 3 : index
    %c0_301 = arith.constant 0 : index
    %c0_302 = arith.constant 0 : index
    %503 = vector.load %arg5[%c3_300, %c0_301, %c0_302] : memref<4x18x18xf32, #tpu.memory_space<vmem>>, vector<1x16x16xf32>
    %504 = vector.shape_cast %503 : vector<1x16x16xf32> to vector<16x16xf32>
    %505 = vector.broadcast %502 : f32 to vector<16x16xf32>
    %506 = arith.mulf %505, %504 : vector<16x16xf32>
    %507 = arith.addf %501, %506 : vector<16x16xf32>
    %c64 = arith.constant 64 : index
    %508 = memref.load %arg2[%c64] : memref<288xf32, #tpu.memory_space<smem>>
    %c3_303 = arith.constant 3 : index
    %c0_304 = arith.constant 0 : index
    %c1_305 = arith.constant 1 : index
    %509 = vector.load %arg5[%c3_303, %c0_304, %c1_305] : memref<4x18x18xf32, #tpu.memory_space<vmem>>, vector<1x16x16xf32>
    %510 = vector.shape_cast %509 : vector<1x16x16xf32> to vector<16x16xf32>
    %511 = vector.broadcast %508 : f32 to vector<16x16xf32>
    %512 = arith.mulf %511, %510 : vector<16x16xf32>
    %513 = arith.addf %507, %512 : vector<16x16xf32>
    %c65 = arith.constant 65 : index
    %514 = memref.load %arg2[%c65] : memref<288xf32, #tpu.memory_space<smem>>
    %c3_306 = arith.constant 3 : index
    %c0_307 = arith.constant 0 : index
    %c2_308 = arith.constant 2 : index
    %515 = vector.load %arg5[%c3_306, %c0_307, %c2_308] : memref<4x18x18xf32, #tpu.memory_space<vmem>>, vector<1x16x16xf32>
    %516 = vector.shape_cast %515 : vector<1x16x16xf32> to vector<16x16xf32>
    %517 = vector.broadcast %514 : f32 to vector<16x16xf32>
    %518 = arith.mulf %517, %516 : vector<16x16xf32>
    %519 = arith.addf %513, %518 : vector<16x16xf32>
    %c66 = arith.constant 66 : index
    %520 = memref.load %arg2[%c66] : memref<288xf32, #tpu.memory_space<smem>>
    %c3_309 = arith.constant 3 : index
    %c1_310 = arith.constant 1 : index
    %c0_311 = arith.constant 0 : index
    %521 = vector.load %arg5[%c3_309, %c1_310, %c0_311] : memref<4x18x18xf32, #tpu.memory_space<vmem>>, vector<1x16x16xf32>
    %522 = vector.shape_cast %521 : vector<1x16x16xf32> to vector<16x16xf32>
    %523 = vector.broadcast %520 : f32 to vector<16x16xf32>
    %524 = arith.mulf %523, %522 : vector<16x16xf32>
    %525 = arith.addf %519, %524 : vector<16x16xf32>
    %c67 = arith.constant 67 : index
    %526 = memref.load %arg2[%c67] : memref<288xf32, #tpu.memory_space<smem>>
    %c3_312 = arith.constant 3 : index
    %c1_313 = arith.constant 1 : index
    %c1_314 = arith.constant 1 : index
    %527 = vector.load %arg5[%c3_312, %c1_313, %c1_314] : memref<4x18x18xf32, #tpu.memory_space<vmem>>, vector<1x16x16xf32>
    %528 = vector.shape_cast %527 : vector<1x16x16xf32> to vector<16x16xf32>
    %529 = vector.broadcast %526 : f32 to vector<16x16xf32>
    %530 = arith.mulf %529, %528 : vector<16x16xf32>
    %531 = arith.addf %525, %530 : vector<16x16xf32>
    %c68 = arith.constant 68 : index
    %532 = memref.load %arg2[%c68] : memref<288xf32, #tpu.memory_space<smem>>
    %c3_315 = arith.constant 3 : index
    %c1_316 = arith.constant 1 : index
    %c2_317 = arith.constant 2 : index
    %533 = vector.load %arg5[%c3_315, %c1_316, %c2_317] : memref<4x18x18xf32, #tpu.memory_space<vmem>>, vector<1x16x16xf32>
    %534 = vector.shape_cast %533 : vector<1x16x16xf32> to vector<16x16xf32>
    %535 = vector.broadcast %532 : f32 to vector<16x16xf32>
    %536 = arith.mulf %535, %534 : vector<16x16xf32>
    %537 = arith.addf %531, %536 : vector<16x16xf32>
    %c69 = arith.constant 69 : index
    %538 = memref.load %arg2[%c69] : memref<288xf32, #tpu.memory_space<smem>>
    %c3_318 = arith.constant 3 : index
    %c2_319 = arith.constant 2 : index
    %c0_320 = arith.constant 0 : index
    %539 = vector.load %arg5[%c3_318, %c2_319, %c0_320] : memref<4x18x18xf32, #tpu.memory_space<vmem>>, vector<1x16x16xf32>
    %540 = vector.shape_cast %539 : vector<1x16x16xf32> to vector<16x16xf32>
    %541 = vector.broadcast %538 : f32 to vector<16x16xf32>
    %542 = arith.mulf %541, %540 : vector<16x16xf32>
    %543 = arith.addf %537, %542 : vector<16x16xf32>
    %c70 = arith.constant 70 : index
    %544 = memref.load %arg2[%c70] : memref<288xf32, #tpu.memory_space<smem>>
    %c3_321 = arith.constant 3 : index
    %c2_322 = arith.constant 2 : index
    %c1_323 = arith.constant 1 : index
    %545 = vector.load %arg5[%c3_321, %c2_322, %c1_323] : memref<4x18x18xf32, #tpu.memory_space<vmem>>, vector<1x16x16xf32>
    %546 = vector.shape_cast %545 : vector<1x16x16xf32> to vector<16x16xf32>
    %547 = vector.broadcast %544 : f32 to vector<16x16xf32>
    %548 = arith.mulf %547, %546 : vector<16x16xf32>
    %549 = arith.addf %543, %548 : vector<16x16xf32>
    %c71 = arith.constant 71 : index
    %550 = memref.load %arg2[%c71] : memref<288xf32, #tpu.memory_space<smem>>
    %c3_324 = arith.constant 3 : index
    %c2_325 = arith.constant 2 : index
    %c2_326 = arith.constant 2 : index
    %551 = vector.load %arg5[%c3_324, %c2_325, %c2_326] : memref<4x18x18xf32, #tpu.memory_space<vmem>>, vector<1x16x16xf32>
    %552 = vector.shape_cast %551 : vector<1x16x16xf32> to vector<16x16xf32>
    %553 = vector.broadcast %550 : f32 to vector<16x16xf32>
    %554 = arith.mulf %553, %552 : vector<16x16xf32>
    %555 = arith.addf %549, %554 : vector<16x16xf32>
    %556 = vector.shape_cast %555 : vector<16x16xf32> to vector<1x16x16xf32>
    %cst_327 = arith.constant dense<0.000000e+00> : vector<1xf32>
    %557 = vector.multi_reduction <add>, %556, %cst_327 [1, 2] : vector<1x16x16xf32> to vector<1xf32>
    %558 = vector.shape_cast %557 : vector<1xf32> to vector<1x1x1xf32>
    %559 = vector.extract %558[0, 0, 0] : f32 from vector<1x1x1xf32>
    %560 = vector.broadcast %559 : f32 to vector<1x1xf32>
    %cst_328 = arith.constant 2.560000e+02 : f32
    %561 = vector.broadcast %cst_328 : f32 to vector<1x1xf32>
    %562 = arith.divf %560, %561 : vector<1x1xf32>
    %563 = vector.broadcast %562 : vector<1x1xf32> to vector<16x16xf32>
    %564 = arith.subf %555, %563 : vector<16x16xf32>
    %565 = arith.mulf %564, %564 : vector<16x16xf32>
    %566 = vector.shape_cast %565 : vector<16x16xf32> to vector<1x16x16xf32>
    %cst_329 = arith.constant dense<0.000000e+00> : vector<1xf32>
    %567 = vector.multi_reduction <add>, %566, %cst_329 [1, 2] : vector<1x16x16xf32> to vector<1xf32>
    %568 = vector.shape_cast %567 : vector<1xf32> to vector<1x1x1xf32>
    %569 = vector.extract %568[0, 0, 0] : f32 from vector<1x1x1xf32>
    %570 = vector.broadcast %569 : f32 to vector<1x1xf32>
    %cst_330 = arith.constant 2.560000e+02 : f32
    %571 = vector.broadcast %cst_330 : f32 to vector<1x1xf32>
    %572 = arith.divf %570, %571 : vector<1x1xf32>
    %cst_331 = arith.constant 9.99999974E-6 : f32
    %573 = vector.broadcast %cst_331 : f32 to vector<1x1xf32>
    %574 = arith.addf %572, %573 : vector<1x1xf32>
    %575 = math.rsqrt %574 : vector<1x1xf32>
    %576 = vector.broadcast %575 : vector<1x1xf32> to vector<16x16xf32>
    %577 = arith.mulf %564, %576 : vector<16x16xf32>
    %c0_332 = arith.constant 0 : index
    %c1_333 = arith.constant 1 : index
    %578 = memref.load %arg3[%c0_332, %c1_333] : memref<4x4xf32, #tpu.memory_space<smem>>
    %579 = vector.broadcast %578 : f32 to vector<16x16xf32>
    %580 = arith.mulf %577, %579 : vector<16x16xf32>
    %c1_334 = arith.constant 1 : index
    %c1_335 = arith.constant 1 : index
    %581 = memref.load %arg3[%c1_334, %c1_335] : memref<4x4xf32, #tpu.memory_space<smem>>
    %582 = vector.broadcast %581 : f32 to vector<16x16xf32>
    %583 = arith.addf %580, %582 : vector<16x16xf32>
    %cst_336 = arith.constant 0.000000e+00 : f32
    %584 = vector.broadcast %cst_336 : f32 to vector<16x16xf32>
    %585 = arith.maximumf %583, %584 : vector<16x16xf32>
    %cst_337 = arith.constant 0.000000e+00 : f32
    %586 = vector.broadcast %cst_337 : f32 to vector<16x16xf32>
    %c72 = arith.constant 72 : index
    %587 = memref.load %arg2[%c72] : memref<288xf32, #tpu.memory_space<smem>>
    %c0_338 = arith.constant 0 : index
    %c0_339 = arith.constant 0 : index
    %c0_340 = arith.constant 0 : index
    %588 = vector.load %arg5[%c0_338, %c0_339, %c0_340] : memref<4x18x18xf32, #tpu.memory_space<vmem>>, vector<1x16x16xf32>
    %589 = vector.shape_cast %588 : vector<1x16x16xf32> to vector<16x16xf32>
    %590 = vector.broadcast %587 : f32 to vector<16x16xf32>
    %591 = arith.mulf %590, %589 : vector<16x16xf32>
    %592 = arith.addf %586, %591 : vector<16x16xf32>
    %c73 = arith.constant 73 : index
    %593 = memref.load %arg2[%c73] : memref<288xf32, #tpu.memory_space<smem>>
    %c0_341 = arith.constant 0 : index
    %c0_342 = arith.constant 0 : index
    %c1_343 = arith.constant 1 : index
    %594 = vector.load %arg5[%c0_341, %c0_342, %c1_343] : memref<4x18x18xf32, #tpu.memory_space<vmem>>, vector<1x16x16xf32>
    %595 = vector.shape_cast %594 : vector<1x16x16xf32> to vector<16x16xf32>
    %596 = vector.broadcast %593 : f32 to vector<16x16xf32>
    %597 = arith.mulf %596, %595 : vector<16x16xf32>
    %598 = arith.addf %592, %597 : vector<16x16xf32>
    %c74 = arith.constant 74 : index
    %599 = memref.load %arg2[%c74] : memref<288xf32, #tpu.memory_space<smem>>
    %c0_344 = arith.constant 0 : index
    %c0_345 = arith.constant 0 : index
    %c2_346 = arith.constant 2 : index
    %600 = vector.load %arg5[%c0_344, %c0_345, %c2_346] : memref<4x18x18xf32, #tpu.memory_space<vmem>>, vector<1x16x16xf32>
    %601 = vector.shape_cast %600 : vector<1x16x16xf32> to vector<16x16xf32>
    %602 = vector.broadcast %599 : f32 to vector<16x16xf32>
    %603 = arith.mulf %602, %601 : vector<16x16xf32>
    %604 = arith.addf %598, %603 : vector<16x16xf32>
    %c75 = arith.constant 75 : index
    %605 = memref.load %arg2[%c75] : memref<288xf32, #tpu.memory_space<smem>>
    %c0_347 = arith.constant 0 : index
    %c1_348 = arith.constant 1 : index
    %c0_349 = arith.constant 0 : index
    %606 = vector.load %arg5[%c0_347, %c1_348, %c0_349] : memref<4x18x18xf32, #tpu.memory_space<vmem>>, vector<1x16x16xf32>
    %607 = vector.shape_cast %606 : vector<1x16x16xf32> to vector<16x16xf32>
    %608 = vector.broadcast %605 : f32 to vector<16x16xf32>
    %609 = arith.mulf %608, %607 : vector<16x16xf32>
    %610 = arith.addf %604, %609 : vector<16x16xf32>
    %c76 = arith.constant 76 : index
    %611 = memref.load %arg2[%c76] : memref<288xf32, #tpu.memory_space<smem>>
    %c0_350 = arith.constant 0 : index
    %c1_351 = arith.constant 1 : index
    %c1_352 = arith.constant 1 : index
    %612 = vector.load %arg5[%c0_350, %c1_351, %c1_352] : memref<4x18x18xf32, #tpu.memory_space<vmem>>, vector<1x16x16xf32>
    %613 = vector.shape_cast %612 : vector<1x16x16xf32> to vector<16x16xf32>
    %614 = vector.broadcast %611 : f32 to vector<16x16xf32>
    %615 = arith.mulf %614, %613 : vector<16x16xf32>
    %616 = arith.addf %610, %615 : vector<16x16xf32>
    %c77 = arith.constant 77 : index
    %617 = memref.load %arg2[%c77] : memref<288xf32, #tpu.memory_space<smem>>
    %c0_353 = arith.constant 0 : index
    %c1_354 = arith.constant 1 : index
    %c2_355 = arith.constant 2 : index
    %618 = vector.load %arg5[%c0_353, %c1_354, %c2_355] : memref<4x18x18xf32, #tpu.memory_space<vmem>>, vector<1x16x16xf32>
    %619 = vector.shape_cast %618 : vector<1x16x16xf32> to vector<16x16xf32>
    %620 = vector.broadcast %617 : f32 to vector<16x16xf32>
    %621 = arith.mulf %620, %619 : vector<16x16xf32>
    %622 = arith.addf %616, %621 : vector<16x16xf32>
    %c78 = arith.constant 78 : index
    %623 = memref.load %arg2[%c78] : memref<288xf32, #tpu.memory_space<smem>>
    %c0_356 = arith.constant 0 : index
    %c2_357 = arith.constant 2 : index
    %c0_358 = arith.constant 0 : index
    %624 = vector.load %arg5[%c0_356, %c2_357, %c0_358] : memref<4x18x18xf32, #tpu.memory_space<vmem>>, vector<1x16x16xf32>
    %625 = vector.shape_cast %624 : vector<1x16x16xf32> to vector<16x16xf32>
    %626 = vector.broadcast %623 : f32 to vector<16x16xf32>
    %627 = arith.mulf %626, %625 : vector<16x16xf32>
    %628 = arith.addf %622, %627 : vector<16x16xf32>
    %c79 = arith.constant 79 : index
    %629 = memref.load %arg2[%c79] : memref<288xf32, #tpu.memory_space<smem>>
    %c0_359 = arith.constant 0 : index
    %c2_360 = arith.constant 2 : index
    %c1_361 = arith.constant 1 : index
    %630 = vector.load %arg5[%c0_359, %c2_360, %c1_361] : memref<4x18x18xf32, #tpu.memory_space<vmem>>, vector<1x16x16xf32>
    %631 = vector.shape_cast %630 : vector<1x16x16xf32> to vector<16x16xf32>
    %632 = vector.broadcast %629 : f32 to vector<16x16xf32>
    %633 = arith.mulf %632, %631 : vector<16x16xf32>
    %634 = arith.addf %628, %633 : vector<16x16xf32>
    %c80 = arith.constant 80 : index
    %635 = memref.load %arg2[%c80] : memref<288xf32, #tpu.memory_space<smem>>
    %c0_362 = arith.constant 0 : index
    %c2_363 = arith.constant 2 : index
    %c2_364 = arith.constant 2 : index
    %636 = vector.load %arg5[%c0_362, %c2_363, %c2_364] : memref<4x18x18xf32, #tpu.memory_space<vmem>>, vector<1x16x16xf32>
    %637 = vector.shape_cast %636 : vector<1x16x16xf32> to vector<16x16xf32>
    %638 = vector.broadcast %635 : f32 to vector<16x16xf32>
    %639 = arith.mulf %638, %637 : vector<16x16xf32>
    %640 = arith.addf %634, %639 : vector<16x16xf32>
    %c81 = arith.constant 81 : index
    %641 = memref.load %arg2[%c81] : memref<288xf32, #tpu.memory_space<smem>>
    %c1_365 = arith.constant 1 : index
    %c0_366 = arith.constant 0 : index
    %c0_367 = arith.constant 0 : index
    %642 = vector.load %arg5[%c1_365, %c0_366, %c0_367] : memref<4x18x18xf32, #tpu.memory_space<vmem>>, vector<1x16x16xf32>
    %643 = vector.shape_cast %642 : vector<1x16x16xf32> to vector<16x16xf32>
    %644 = vector.broadcast %641 : f32 to vector<16x16xf32>
    %645 = arith.mulf %644, %643 : vector<16x16xf32>
    %646 = arith.addf %640, %645 : vector<16x16xf32>
    %c82 = arith.constant 82 : index
    %647 = memref.load %arg2[%c82] : memref<288xf32, #tpu.memory_space<smem>>
    %c1_368 = arith.constant 1 : index
    %c0_369 = arith.constant 0 : index
    %c1_370 = arith.constant 1 : index
    %648 = vector.load %arg5[%c1_368, %c0_369, %c1_370] : memref<4x18x18xf32, #tpu.memory_space<vmem>>, vector<1x16x16xf32>
    %649 = vector.shape_cast %648 : vector<1x16x16xf32> to vector<16x16xf32>
    %650 = vector.broadcast %647 : f32 to vector<16x16xf32>
    %651 = arith.mulf %650, %649 : vector<16x16xf32>
    %652 = arith.addf %646, %651 : vector<16x16xf32>
    %c83 = arith.constant 83 : index
    %653 = memref.load %arg2[%c83] : memref<288xf32, #tpu.memory_space<smem>>
    %c1_371 = arith.constant 1 : index
    %c0_372 = arith.constant 0 : index
    %c2_373 = arith.constant 2 : index
    %654 = vector.load %arg5[%c1_371, %c0_372, %c2_373] : memref<4x18x18xf32, #tpu.memory_space<vmem>>, vector<1x16x16xf32>
    %655 = vector.shape_cast %654 : vector<1x16x16xf32> to vector<16x16xf32>
    %656 = vector.broadcast %653 : f32 to vector<16x16xf32>
    %657 = arith.mulf %656, %655 : vector<16x16xf32>
    %658 = arith.addf %652, %657 : vector<16x16xf32>
    %c84 = arith.constant 84 : index
    %659 = memref.load %arg2[%c84] : memref<288xf32, #tpu.memory_space<smem>>
    %c1_374 = arith.constant 1 : index
    %c1_375 = arith.constant 1 : index
    %c0_376 = arith.constant 0 : index
    %660 = vector.load %arg5[%c1_374, %c1_375, %c0_376] : memref<4x18x18xf32, #tpu.memory_space<vmem>>, vector<1x16x16xf32>
    %661 = vector.shape_cast %660 : vector<1x16x16xf32> to vector<16x16xf32>
    %662 = vector.broadcast %659 : f32 to vector<16x16xf32>
    %663 = arith.mulf %662, %661 : vector<16x16xf32>
    %664 = arith.addf %658, %663 : vector<16x16xf32>
    %c85 = arith.constant 85 : index
    %665 = memref.load %arg2[%c85] : memref<288xf32, #tpu.memory_space<smem>>
    %c1_377 = arith.constant 1 : index
    %c1_378 = arith.constant 1 : index
    %c1_379 = arith.constant 1 : index
    %666 = vector.load %arg5[%c1_377, %c1_378, %c1_379] : memref<4x18x18xf32, #tpu.memory_space<vmem>>, vector<1x16x16xf32>
    %667 = vector.shape_cast %666 : vector<1x16x16xf32> to vector<16x16xf32>
    %668 = vector.broadcast %665 : f32 to vector<16x16xf32>
    %669 = arith.mulf %668, %667 : vector<16x16xf32>
    %670 = arith.addf %664, %669 : vector<16x16xf32>
    %c86 = arith.constant 86 : index
    %671 = memref.load %arg2[%c86] : memref<288xf32, #tpu.memory_space<smem>>
    %c1_380 = arith.constant 1 : index
    %c1_381 = arith.constant 1 : index
    %c2_382 = arith.constant 2 : index
    %672 = vector.load %arg5[%c1_380, %c1_381, %c2_382] : memref<4x18x18xf32, #tpu.memory_space<vmem>>, vector<1x16x16xf32>
    %673 = vector.shape_cast %672 : vector<1x16x16xf32> to vector<16x16xf32>
    %674 = vector.broadcast %671 : f32 to vector<16x16xf32>
    %675 = arith.mulf %674, %673 : vector<16x16xf32>
    %676 = arith.addf %670, %675 : vector<16x16xf32>
    %c87 = arith.constant 87 : index
    %677 = memref.load %arg2[%c87] : memref<288xf32, #tpu.memory_space<smem>>
    %c1_383 = arith.constant 1 : index
    %c2_384 = arith.constant 2 : index
    %c0_385 = arith.constant 0 : index
    %678 = vector.load %arg5[%c1_383, %c2_384, %c0_385] : memref<4x18x18xf32, #tpu.memory_space<vmem>>, vector<1x16x16xf32>
    %679 = vector.shape_cast %678 : vector<1x16x16xf32> to vector<16x16xf32>
    %680 = vector.broadcast %677 : f32 to vector<16x16xf32>
    %681 = arith.mulf %680, %679 : vector<16x16xf32>
    %682 = arith.addf %676, %681 : vector<16x16xf32>
    %c88 = arith.constant 88 : index
    %683 = memref.load %arg2[%c88] : memref<288xf32, #tpu.memory_space<smem>>
    %c1_386 = arith.constant 1 : index
    %c2_387 = arith.constant 2 : index
    %c1_388 = arith.constant 1 : index
    %684 = vector.load %arg5[%c1_386, %c2_387, %c1_388] : memref<4x18x18xf32, #tpu.memory_space<vmem>>, vector<1x16x16xf32>
    %685 = vector.shape_cast %684 : vector<1x16x16xf32> to vector<16x16xf32>
    %686 = vector.broadcast %683 : f32 to vector<16x16xf32>
    %687 = arith.mulf %686, %685 : vector<16x16xf32>
    %688 = arith.addf %682, %687 : vector<16x16xf32>
    %c89 = arith.constant 89 : index
    %689 = memref.load %arg2[%c89] : memref<288xf32, #tpu.memory_space<smem>>
    %c1_389 = arith.constant 1 : index
    %c2_390 = arith.constant 2 : index
    %c2_391 = arith.constant 2 : index
    %690 = vector.load %arg5[%c1_389, %c2_390, %c2_391] : memref<4x18x18xf32, #tpu.memory_space<vmem>>, vector<1x16x16xf32>
    %691 = vector.shape_cast %690 : vector<1x16x16xf32> to vector<16x16xf32>
    %692 = vector.broadcast %689 : f32 to vector<16x16xf32>
    %693 = arith.mulf %692, %691 : vector<16x16xf32>
    %694 = arith.addf %688, %693 : vector<16x16xf32>
    %c90 = arith.constant 90 : index
    %695 = memref.load %arg2[%c90] : memref<288xf32, #tpu.memory_space<smem>>
    %c2_392 = arith.constant 2 : index
    %c0_393 = arith.constant 0 : index
    %c0_394 = arith.constant 0 : index
    %696 = vector.load %arg5[%c2_392, %c0_393, %c0_394] : memref<4x18x18xf32, #tpu.memory_space<vmem>>, vector<1x16x16xf32>
    %697 = vector.shape_cast %696 : vector<1x16x16xf32> to vector<16x16xf32>
    %698 = vector.broadcast %695 : f32 to vector<16x16xf32>
    %699 = arith.mulf %698, %697 : vector<16x16xf32>
    %700 = arith.addf %694, %699 : vector<16x16xf32>
    %c91 = arith.constant 91 : index
    %701 = memref.load %arg2[%c91] : memref<288xf32, #tpu.memory_space<smem>>
    %c2_395 = arith.constant 2 : index
    %c0_396 = arith.constant 0 : index
    %c1_397 = arith.constant 1 : index
    %702 = vector.load %arg5[%c2_395, %c0_396, %c1_397] : memref<4x18x18xf32, #tpu.memory_space<vmem>>, vector<1x16x16xf32>
    %703 = vector.shape_cast %702 : vector<1x16x16xf32> to vector<16x16xf32>
    %704 = vector.broadcast %701 : f32 to vector<16x16xf32>
    %705 = arith.mulf %704, %703 : vector<16x16xf32>
    %706 = arith.addf %700, %705 : vector<16x16xf32>
    %c92 = arith.constant 92 : index
    %707 = memref.load %arg2[%c92] : memref<288xf32, #tpu.memory_space<smem>>
    %c2_398 = arith.constant 2 : index
    %c0_399 = arith.constant 0 : index
    %c2_400 = arith.constant 2 : index
    %708 = vector.load %arg5[%c2_398, %c0_399, %c2_400] : memref<4x18x18xf32, #tpu.memory_space<vmem>>, vector<1x16x16xf32>
    %709 = vector.shape_cast %708 : vector<1x16x16xf32> to vector<16x16xf32>
    %710 = vector.broadcast %707 : f32 to vector<16x16xf32>
    %711 = arith.mulf %710, %709 : vector<16x16xf32>
    %712 = arith.addf %706, %711 : vector<16x16xf32>
    %c93 = arith.constant 93 : index
    %713 = memref.load %arg2[%c93] : memref<288xf32, #tpu.memory_space<smem>>
    %c2_401 = arith.constant 2 : index
    %c1_402 = arith.constant 1 : index
    %c0_403 = arith.constant 0 : index
    %714 = vector.load %arg5[%c2_401, %c1_402, %c0_403] : memref<4x18x18xf32, #tpu.memory_space<vmem>>, vector<1x16x16xf32>
    %715 = vector.shape_cast %714 : vector<1x16x16xf32> to vector<16x16xf32>
    %716 = vector.broadcast %713 : f32 to vector<16x16xf32>
    %717 = arith.mulf %716, %715 : vector<16x16xf32>
    %718 = arith.addf %712, %717 : vector<16x16xf32>
    %c94 = arith.constant 94 : index
    %719 = memref.load %arg2[%c94] : memref<288xf32, #tpu.memory_space<smem>>
    %c2_404 = arith.constant 2 : index
    %c1_405 = arith.constant 1 : index
    %c1_406 = arith.constant 1 : index
    %720 = vector.load %arg5[%c2_404, %c1_405, %c1_406] : memref<4x18x18xf32, #tpu.memory_space<vmem>>, vector<1x16x16xf32>
    %721 = vector.shape_cast %720 : vector<1x16x16xf32> to vector<16x16xf32>
    %722 = vector.broadcast %719 : f32 to vector<16x16xf32>
    %723 = arith.mulf %722, %721 : vector<16x16xf32>
    %724 = arith.addf %718, %723 : vector<16x16xf32>
    %c95 = arith.constant 95 : index
    %725 = memref.load %arg2[%c95] : memref<288xf32, #tpu.memory_space<smem>>
    %c2_407 = arith.constant 2 : index
    %c1_408 = arith.constant 1 : index
    %c2_409 = arith.constant 2 : index
    %726 = vector.load %arg5[%c2_407, %c1_408, %c2_409] : memref<4x18x18xf32, #tpu.memory_space<vmem>>, vector<1x16x16xf32>
    %727 = vector.shape_cast %726 : vector<1x16x16xf32> to vector<16x16xf32>
    %728 = vector.broadcast %725 : f32 to vector<16x16xf32>
    %729 = arith.mulf %728, %727 : vector<16x16xf32>
    %730 = arith.addf %724, %729 : vector<16x16xf32>
    %c96 = arith.constant 96 : index
    %731 = memref.load %arg2[%c96] : memref<288xf32, #tpu.memory_space<smem>>
    %c2_410 = arith.constant 2 : index
    %c2_411 = arith.constant 2 : index
    %c0_412 = arith.constant 0 : index
    %732 = vector.load %arg5[%c2_410, %c2_411, %c0_412] : memref<4x18x18xf32, #tpu.memory_space<vmem>>, vector<1x16x16xf32>
    %733 = vector.shape_cast %732 : vector<1x16x16xf32> to vector<16x16xf32>
    %734 = vector.broadcast %731 : f32 to vector<16x16xf32>
    %735 = arith.mulf %734, %733 : vector<16x16xf32>
    %736 = arith.addf %730, %735 : vector<16x16xf32>
    %c97 = arith.constant 97 : index
    %737 = memref.load %arg2[%c97] : memref<288xf32, #tpu.memory_space<smem>>
    %c2_413 = arith.constant 2 : index
    %c2_414 = arith.constant 2 : index
    %c1_415 = arith.constant 1 : index
    %738 = vector.load %arg5[%c2_413, %c2_414, %c1_415] : memref<4x18x18xf32, #tpu.memory_space<vmem>>, vector<1x16x16xf32>
    %739 = vector.shape_cast %738 : vector<1x16x16xf32> to vector<16x16xf32>
    %740 = vector.broadcast %737 : f32 to vector<16x16xf32>
    %741 = arith.mulf %740, %739 : vector<16x16xf32>
    %742 = arith.addf %736, %741 : vector<16x16xf32>
    %c98 = arith.constant 98 : index
    %743 = memref.load %arg2[%c98] : memref<288xf32, #tpu.memory_space<smem>>
    %c2_416 = arith.constant 2 : index
    %c2_417 = arith.constant 2 : index
    %c2_418 = arith.constant 2 : index
    %744 = vector.load %arg5[%c2_416, %c2_417, %c2_418] : memref<4x18x18xf32, #tpu.memory_space<vmem>>, vector<1x16x16xf32>
    %745 = vector.shape_cast %744 : vector<1x16x16xf32> to vector<16x16xf32>
    %746 = vector.broadcast %743 : f32 to vector<16x16xf32>
    %747 = arith.mulf %746, %745 : vector<16x16xf32>
    %748 = arith.addf %742, %747 : vector<16x16xf32>
    %c99 = arith.constant 99 : index
    %749 = memref.load %arg2[%c99] : memref<288xf32, #tpu.memory_space<smem>>
    %c3_419 = arith.constant 3 : index
    %c0_420 = arith.constant 0 : index
    %c0_421 = arith.constant 0 : index
    %750 = vector.load %arg5[%c3_419, %c0_420, %c0_421] : memref<4x18x18xf32, #tpu.memory_space<vmem>>, vector<1x16x16xf32>
    %751 = vector.shape_cast %750 : vector<1x16x16xf32> to vector<16x16xf32>
    %752 = vector.broadcast %749 : f32 to vector<16x16xf32>
    %753 = arith.mulf %752, %751 : vector<16x16xf32>
    %754 = arith.addf %748, %753 : vector<16x16xf32>
    %c100 = arith.constant 100 : index
    %755 = memref.load %arg2[%c100] : memref<288xf32, #tpu.memory_space<smem>>
    %c3_422 = arith.constant 3 : index
    %c0_423 = arith.constant 0 : index
    %c1_424 = arith.constant 1 : index
    %756 = vector.load %arg5[%c3_422, %c0_423, %c1_424] : memref<4x18x18xf32, #tpu.memory_space<vmem>>, vector<1x16x16xf32>
    %757 = vector.shape_cast %756 : vector<1x16x16xf32> to vector<16x16xf32>
    %758 = vector.broadcast %755 : f32 to vector<16x16xf32>
    %759 = arith.mulf %758, %757 : vector<16x16xf32>
    %760 = arith.addf %754, %759 : vector<16x16xf32>
    %c101 = arith.constant 101 : index
    %761 = memref.load %arg2[%c101] : memref<288xf32, #tpu.memory_space<smem>>
    %c3_425 = arith.constant 3 : index
    %c0_426 = arith.constant 0 : index
    %c2_427 = arith.constant 2 : index
    %762 = vector.load %arg5[%c3_425, %c0_426, %c2_427] : memref<4x18x18xf32, #tpu.memory_space<vmem>>, vector<1x16x16xf32>
    %763 = vector.shape_cast %762 : vector<1x16x16xf32> to vector<16x16xf32>
    %764 = vector.broadcast %761 : f32 to vector<16x16xf32>
    %765 = arith.mulf %764, %763 : vector<16x16xf32>
    %766 = arith.addf %760, %765 : vector<16x16xf32>
    %c102 = arith.constant 102 : index
    %767 = memref.load %arg2[%c102] : memref<288xf32, #tpu.memory_space<smem>>
    %c3_428 = arith.constant 3 : index
    %c1_429 = arith.constant 1 : index
    %c0_430 = arith.constant 0 : index
    %768 = vector.load %arg5[%c3_428, %c1_429, %c0_430] : memref<4x18x18xf32, #tpu.memory_space<vmem>>, vector<1x16x16xf32>
    %769 = vector.shape_cast %768 : vector<1x16x16xf32> to vector<16x16xf32>
    %770 = vector.broadcast %767 : f32 to vector<16x16xf32>
    %771 = arith.mulf %770, %769 : vector<16x16xf32>
    %772 = arith.addf %766, %771 : vector<16x16xf32>
    %c103 = arith.constant 103 : index
    %773 = memref.load %arg2[%c103] : memref<288xf32, #tpu.memory_space<smem>>
    %c3_431 = arith.constant 3 : index
    %c1_432 = arith.constant 1 : index
    %c1_433 = arith.constant 1 : index
    %774 = vector.load %arg5[%c3_431, %c1_432, %c1_433] : memref<4x18x18xf32, #tpu.memory_space<vmem>>, vector<1x16x16xf32>
    %775 = vector.shape_cast %774 : vector<1x16x16xf32> to vector<16x16xf32>
    %776 = vector.broadcast %773 : f32 to vector<16x16xf32>
    %777 = arith.mulf %776, %775 : vector<16x16xf32>
    %778 = arith.addf %772, %777 : vector<16x16xf32>
    %c104 = arith.constant 104 : index
    %779 = memref.load %arg2[%c104] : memref<288xf32, #tpu.memory_space<smem>>
    %c3_434 = arith.constant 3 : index
    %c1_435 = arith.constant 1 : index
    %c2_436 = arith.constant 2 : index
    %780 = vector.load %arg5[%c3_434, %c1_435, %c2_436] : memref<4x18x18xf32, #tpu.memory_space<vmem>>, vector<1x16x16xf32>
    %781 = vector.shape_cast %780 : vector<1x16x16xf32> to vector<16x16xf32>
    %782 = vector.broadcast %779 : f32 to vector<16x16xf32>
    %783 = arith.mulf %782, %781 : vector<16x16xf32>
    %784 = arith.addf %778, %783 : vector<16x16xf32>
    %c105 = arith.constant 105 : index
    %785 = memref.load %arg2[%c105] : memref<288xf32, #tpu.memory_space<smem>>
    %c3_437 = arith.constant 3 : index
    %c2_438 = arith.constant 2 : index
    %c0_439 = arith.constant 0 : index
    %786 = vector.load %arg5[%c3_437, %c2_438, %c0_439] : memref<4x18x18xf32, #tpu.memory_space<vmem>>, vector<1x16x16xf32>
    %787 = vector.shape_cast %786 : vector<1x16x16xf32> to vector<16x16xf32>
    %788 = vector.broadcast %785 : f32 to vector<16x16xf32>
    %789 = arith.mulf %788, %787 : vector<16x16xf32>
    %790 = arith.addf %784, %789 : vector<16x16xf32>
    %c106 = arith.constant 106 : index
    %791 = memref.load %arg2[%c106] : memref<288xf32, #tpu.memory_space<smem>>
    %c3_440 = arith.constant 3 : index
    %c2_441 = arith.constant 2 : index
    %c1_442 = arith.constant 1 : index
    %792 = vector.load %arg5[%c3_440, %c2_441, %c1_442] : memref<4x18x18xf32, #tpu.memory_space<vmem>>, vector<1x16x16xf32>
    %793 = vector.shape_cast %792 : vector<1x16x16xf32> to vector<16x16xf32>
    %794 = vector.broadcast %791 : f32 to vector<16x16xf32>
    %795 = arith.mulf %794, %793 : vector<16x16xf32>
    %796 = arith.addf %790, %795 : vector<16x16xf32>
    %c107 = arith.constant 107 : index
    %797 = memref.load %arg2[%c107] : memref<288xf32, #tpu.memory_space<smem>>
    %c3_443 = arith.constant 3 : index
    %c2_444 = arith.constant 2 : index
    %c2_445 = arith.constant 2 : index
    %798 = vector.load %arg5[%c3_443, %c2_444, %c2_445] : memref<4x18x18xf32, #tpu.memory_space<vmem>>, vector<1x16x16xf32>
    %799 = vector.shape_cast %798 : vector<1x16x16xf32> to vector<16x16xf32>
    %800 = vector.broadcast %797 : f32 to vector<16x16xf32>
    %801 = arith.mulf %800, %799 : vector<16x16xf32>
    %802 = arith.addf %796, %801 : vector<16x16xf32>
    %803 = vector.shape_cast %802 : vector<16x16xf32> to vector<1x16x16xf32>
    %cst_446 = arith.constant dense<0.000000e+00> : vector<1xf32>
    %804 = vector.multi_reduction <add>, %803, %cst_446 [1, 2] : vector<1x16x16xf32> to vector<1xf32>
    %805 = vector.shape_cast %804 : vector<1xf32> to vector<1x1x1xf32>
    %806 = vector.extract %805[0, 0, 0] : f32 from vector<1x1x1xf32>
    %807 = vector.broadcast %806 : f32 to vector<1x1xf32>
    %cst_447 = arith.constant 2.560000e+02 : f32
    %808 = vector.broadcast %cst_447 : f32 to vector<1x1xf32>
    %809 = arith.divf %807, %808 : vector<1x1xf32>
    %810 = vector.broadcast %809 : vector<1x1xf32> to vector<16x16xf32>
    %811 = arith.subf %802, %810 : vector<16x16xf32>
    %812 = arith.mulf %811, %811 : vector<16x16xf32>
    %813 = vector.shape_cast %812 : vector<16x16xf32> to vector<1x16x16xf32>
    %cst_448 = arith.constant dense<0.000000e+00> : vector<1xf32>
    %814 = vector.multi_reduction <add>, %813, %cst_448 [1, 2] : vector<1x16x16xf32> to vector<1xf32>
    %815 = vector.shape_cast %814 : vector<1xf32> to vector<1x1x1xf32>
    %816 = vector.extract %815[0, 0, 0] : f32 from vector<1x1x1xf32>
    %817 = vector.broadcast %816 : f32 to vector<1x1xf32>
    %cst_449 = arith.constant 2.560000e+02 : f32
    %818 = vector.broadcast %cst_449 : f32 to vector<1x1xf32>
    %819 = arith.divf %817, %818 : vector<1x1xf32>
    %cst_450 = arith.constant 9.99999974E-6 : f32
    %820 = vector.broadcast %cst_450 : f32 to vector<1x1xf32>
    %821 = arith.addf %819, %820 : vector<1x1xf32>
    %822 = math.rsqrt %821 : vector<1x1xf32>
    %823 = vector.broadcast %822 : vector<1x1xf32> to vector<16x16xf32>
    %824 = arith.mulf %811, %823 : vector<16x16xf32>
    %c0_451 = arith.constant 0 : index
    %c2_452 = arith.constant 2 : index
    %825 = memref.load %arg3[%c0_451, %c2_452] : memref<4x4xf32, #tpu.memory_space<smem>>
    %826 = vector.broadcast %825 : f32 to vector<16x16xf32>
    %827 = arith.mulf %824, %826 : vector<16x16xf32>
    %c1_453 = arith.constant 1 : index
    %c2_454 = arith.constant 2 : index
    %828 = memref.load %arg3[%c1_453, %c2_454] : memref<4x4xf32, #tpu.memory_space<smem>>
    %829 = vector.broadcast %828 : f32 to vector<16x16xf32>
    %830 = arith.addf %827, %829 : vector<16x16xf32>
    %cst_455 = arith.constant 0.000000e+00 : f32
    %831 = vector.broadcast %cst_455 : f32 to vector<16x16xf32>
    %832 = arith.maximumf %830, %831 : vector<16x16xf32>
    %cst_456 = arith.constant 0.000000e+00 : f32
    %833 = vector.broadcast %cst_456 : f32 to vector<16x16xf32>
    %c108 = arith.constant 108 : index
    %834 = memref.load %arg2[%c108] : memref<288xf32, #tpu.memory_space<smem>>
    %c0_457 = arith.constant 0 : index
    %c0_458 = arith.constant 0 : index
    %c0_459 = arith.constant 0 : index
    %835 = vector.load %arg5[%c0_457, %c0_458, %c0_459] : memref<4x18x18xf32, #tpu.memory_space<vmem>>, vector<1x16x16xf32>
    %836 = vector.shape_cast %835 : vector<1x16x16xf32> to vector<16x16xf32>
    %837 = vector.broadcast %834 : f32 to vector<16x16xf32>
    %838 = arith.mulf %837, %836 : vector<16x16xf32>
    %839 = arith.addf %833, %838 : vector<16x16xf32>
    %c109 = arith.constant 109 : index
    %840 = memref.load %arg2[%c109] : memref<288xf32, #tpu.memory_space<smem>>
    %c0_460 = arith.constant 0 : index
    %c0_461 = arith.constant 0 : index
    %c1_462 = arith.constant 1 : index
    %841 = vector.load %arg5[%c0_460, %c0_461, %c1_462] : memref<4x18x18xf32, #tpu.memory_space<vmem>>, vector<1x16x16xf32>
    %842 = vector.shape_cast %841 : vector<1x16x16xf32> to vector<16x16xf32>
    %843 = vector.broadcast %840 : f32 to vector<16x16xf32>
    %844 = arith.mulf %843, %842 : vector<16x16xf32>
    %845 = arith.addf %839, %844 : vector<16x16xf32>
    %c110 = arith.constant 110 : index
    %846 = memref.load %arg2[%c110] : memref<288xf32, #tpu.memory_space<smem>>
    %c0_463 = arith.constant 0 : index
    %c0_464 = arith.constant 0 : index
    %c2_465 = arith.constant 2 : index
    %847 = vector.load %arg5[%c0_463, %c0_464, %c2_465] : memref<4x18x18xf32, #tpu.memory_space<vmem>>, vector<1x16x16xf32>
    %848 = vector.shape_cast %847 : vector<1x16x16xf32> to vector<16x16xf32>
    %849 = vector.broadcast %846 : f32 to vector<16x16xf32>
    %850 = arith.mulf %849, %848 : vector<16x16xf32>
    %851 = arith.addf %845, %850 : vector<16x16xf32>
    %c111 = arith.constant 111 : index
    %852 = memref.load %arg2[%c111] : memref<288xf32, #tpu.memory_space<smem>>
    %c0_466 = arith.constant 0 : index
    %c1_467 = arith.constant 1 : index
    %c0_468 = arith.constant 0 : index
    %853 = vector.load %arg5[%c0_466, %c1_467, %c0_468] : memref<4x18x18xf32, #tpu.memory_space<vmem>>, vector<1x16x16xf32>
    %854 = vector.shape_cast %853 : vector<1x16x16xf32> to vector<16x16xf32>
    %855 = vector.broadcast %852 : f32 to vector<16x16xf32>
    %856 = arith.mulf %855, %854 : vector<16x16xf32>
    %857 = arith.addf %851, %856 : vector<16x16xf32>
    %c112 = arith.constant 112 : index
    %858 = memref.load %arg2[%c112] : memref<288xf32, #tpu.memory_space<smem>>
    %c0_469 = arith.constant 0 : index
    %c1_470 = arith.constant 1 : index
    %c1_471 = arith.constant 1 : index
    %859 = vector.load %arg5[%c0_469, %c1_470, %c1_471] : memref<4x18x18xf32, #tpu.memory_space<vmem>>, vector<1x16x16xf32>
    %860 = vector.shape_cast %859 : vector<1x16x16xf32> to vector<16x16xf32>
    %861 = vector.broadcast %858 : f32 to vector<16x16xf32>
    %862 = arith.mulf %861, %860 : vector<16x16xf32>
    %863 = arith.addf %857, %862 : vector<16x16xf32>
    %c113 = arith.constant 113 : index
    %864 = memref.load %arg2[%c113] : memref<288xf32, #tpu.memory_space<smem>>
    %c0_472 = arith.constant 0 : index
    %c1_473 = arith.constant 1 : index
    %c2_474 = arith.constant 2 : index
    %865 = vector.load %arg5[%c0_472, %c1_473, %c2_474] : memref<4x18x18xf32, #tpu.memory_space<vmem>>, vector<1x16x16xf32>
    %866 = vector.shape_cast %865 : vector<1x16x16xf32> to vector<16x16xf32>
    %867 = vector.broadcast %864 : f32 to vector<16x16xf32>
    %868 = arith.mulf %867, %866 : vector<16x16xf32>
    %869 = arith.addf %863, %868 : vector<16x16xf32>
    %c114 = arith.constant 114 : index
    %870 = memref.load %arg2[%c114] : memref<288xf32, #tpu.memory_space<smem>>
    %c0_475 = arith.constant 0 : index
    %c2_476 = arith.constant 2 : index
    %c0_477 = arith.constant 0 : index
    %871 = vector.load %arg5[%c0_475, %c2_476, %c0_477] : memref<4x18x18xf32, #tpu.memory_space<vmem>>, vector<1x16x16xf32>
    %872 = vector.shape_cast %871 : vector<1x16x16xf32> to vector<16x16xf32>
    %873 = vector.broadcast %870 : f32 to vector<16x16xf32>
    %874 = arith.mulf %873, %872 : vector<16x16xf32>
    %875 = arith.addf %869, %874 : vector<16x16xf32>
    %c115 = arith.constant 115 : index
    %876 = memref.load %arg2[%c115] : memref<288xf32, #tpu.memory_space<smem>>
    %c0_478 = arith.constant 0 : index
    %c2_479 = arith.constant 2 : index
    %c1_480 = arith.constant 1 : index
    %877 = vector.load %arg5[%c0_478, %c2_479, %c1_480] : memref<4x18x18xf32, #tpu.memory_space<vmem>>, vector<1x16x16xf32>
    %878 = vector.shape_cast %877 : vector<1x16x16xf32> to vector<16x16xf32>
    %879 = vector.broadcast %876 : f32 to vector<16x16xf32>
    %880 = arith.mulf %879, %878 : vector<16x16xf32>
    %881 = arith.addf %875, %880 : vector<16x16xf32>
    %c116 = arith.constant 116 : index
    %882 = memref.load %arg2[%c116] : memref<288xf32, #tpu.memory_space<smem>>
    %c0_481 = arith.constant 0 : index
    %c2_482 = arith.constant 2 : index
    %c2_483 = arith.constant 2 : index
    %883 = vector.load %arg5[%c0_481, %c2_482, %c2_483] : memref<4x18x18xf32, #tpu.memory_space<vmem>>, vector<1x16x16xf32>
    %884 = vector.shape_cast %883 : vector<1x16x16xf32> to vector<16x16xf32>
    %885 = vector.broadcast %882 : f32 to vector<16x16xf32>
    %886 = arith.mulf %885, %884 : vector<16x16xf32>
    %887 = arith.addf %881, %886 : vector<16x16xf32>
    %c117 = arith.constant 117 : index
    %888 = memref.load %arg2[%c117] : memref<288xf32, #tpu.memory_space<smem>>
    %c1_484 = arith.constant 1 : index
    %c0_485 = arith.constant 0 : index
    %c0_486 = arith.constant 0 : index
    %889 = vector.load %arg5[%c1_484, %c0_485, %c0_486] : memref<4x18x18xf32, #tpu.memory_space<vmem>>, vector<1x16x16xf32>
    %890 = vector.shape_cast %889 : vector<1x16x16xf32> to vector<16x16xf32>
    %891 = vector.broadcast %888 : f32 to vector<16x16xf32>
    %892 = arith.mulf %891, %890 : vector<16x16xf32>
    %893 = arith.addf %887, %892 : vector<16x16xf32>
    %c118 = arith.constant 118 : index
    %894 = memref.load %arg2[%c118] : memref<288xf32, #tpu.memory_space<smem>>
    %c1_487 = arith.constant 1 : index
    %c0_488 = arith.constant 0 : index
    %c1_489 = arith.constant 1 : index
    %895 = vector.load %arg5[%c1_487, %c0_488, %c1_489] : memref<4x18x18xf32, #tpu.memory_space<vmem>>, vector<1x16x16xf32>
    %896 = vector.shape_cast %895 : vector<1x16x16xf32> to vector<16x16xf32>
    %897 = vector.broadcast %894 : f32 to vector<16x16xf32>
    %898 = arith.mulf %897, %896 : vector<16x16xf32>
    %899 = arith.addf %893, %898 : vector<16x16xf32>
    %c119 = arith.constant 119 : index
    %900 = memref.load %arg2[%c119] : memref<288xf32, #tpu.memory_space<smem>>
    %c1_490 = arith.constant 1 : index
    %c0_491 = arith.constant 0 : index
    %c2_492 = arith.constant 2 : index
    %901 = vector.load %arg5[%c1_490, %c0_491, %c2_492] : memref<4x18x18xf32, #tpu.memory_space<vmem>>, vector<1x16x16xf32>
    %902 = vector.shape_cast %901 : vector<1x16x16xf32> to vector<16x16xf32>
    %903 = vector.broadcast %900 : f32 to vector<16x16xf32>
    %904 = arith.mulf %903, %902 : vector<16x16xf32>
    %905 = arith.addf %899, %904 : vector<16x16xf32>
    %c120 = arith.constant 120 : index
    %906 = memref.load %arg2[%c120] : memref<288xf32, #tpu.memory_space<smem>>
    %c1_493 = arith.constant 1 : index
    %c1_494 = arith.constant 1 : index
    %c0_495 = arith.constant 0 : index
    %907 = vector.load %arg5[%c1_493, %c1_494, %c0_495] : memref<4x18x18xf32, #tpu.memory_space<vmem>>, vector<1x16x16xf32>
    %908 = vector.shape_cast %907 : vector<1x16x16xf32> to vector<16x16xf32>
    %909 = vector.broadcast %906 : f32 to vector<16x16xf32>
    %910 = arith.mulf %909, %908 : vector<16x16xf32>
    %911 = arith.addf %905, %910 : vector<16x16xf32>
    %c121 = arith.constant 121 : index
    %912 = memref.load %arg2[%c121] : memref<288xf32, #tpu.memory_space<smem>>
    %c1_496 = arith.constant 1 : index
    %c1_497 = arith.constant 1 : index
    %c1_498 = arith.constant 1 : index
    %913 = vector.load %arg5[%c1_496, %c1_497, %c1_498] : memref<4x18x18xf32, #tpu.memory_space<vmem>>, vector<1x16x16xf32>
    %914 = vector.shape_cast %913 : vector<1x16x16xf32> to vector<16x16xf32>
    %915 = vector.broadcast %912 : f32 to vector<16x16xf32>
    %916 = arith.mulf %915, %914 : vector<16x16xf32>
    %917 = arith.addf %911, %916 : vector<16x16xf32>
    %c122 = arith.constant 122 : index
    %918 = memref.load %arg2[%c122] : memref<288xf32, #tpu.memory_space<smem>>
    %c1_499 = arith.constant 1 : index
    %c1_500 = arith.constant 1 : index
    %c2_501 = arith.constant 2 : index
    %919 = vector.load %arg5[%c1_499, %c1_500, %c2_501] : memref<4x18x18xf32, #tpu.memory_space<vmem>>, vector<1x16x16xf32>
    %920 = vector.shape_cast %919 : vector<1x16x16xf32> to vector<16x16xf32>
    %921 = vector.broadcast %918 : f32 to vector<16x16xf32>
    %922 = arith.mulf %921, %920 : vector<16x16xf32>
    %923 = arith.addf %917, %922 : vector<16x16xf32>
    %c123 = arith.constant 123 : index
    %924 = memref.load %arg2[%c123] : memref<288xf32, #tpu.memory_space<smem>>
    %c1_502 = arith.constant 1 : index
    %c2_503 = arith.constant 2 : index
    %c0_504 = arith.constant 0 : index
    %925 = vector.load %arg5[%c1_502, %c2_503, %c0_504] : memref<4x18x18xf32, #tpu.memory_space<vmem>>, vector<1x16x16xf32>
    %926 = vector.shape_cast %925 : vector<1x16x16xf32> to vector<16x16xf32>
    %927 = vector.broadcast %924 : f32 to vector<16x16xf32>
    %928 = arith.mulf %927, %926 : vector<16x16xf32>
    %929 = arith.addf %923, %928 : vector<16x16xf32>
    %c124 = arith.constant 124 : index
    %930 = memref.load %arg2[%c124] : memref<288xf32, #tpu.memory_space<smem>>
    %c1_505 = arith.constant 1 : index
    %c2_506 = arith.constant 2 : index
    %c1_507 = arith.constant 1 : index
    %931 = vector.load %arg5[%c1_505, %c2_506, %c1_507] : memref<4x18x18xf32, #tpu.memory_space<vmem>>, vector<1x16x16xf32>
    %932 = vector.shape_cast %931 : vector<1x16x16xf32> to vector<16x16xf32>
    %933 = vector.broadcast %930 : f32 to vector<16x16xf32>
    %934 = arith.mulf %933, %932 : vector<16x16xf32>
    %935 = arith.addf %929, %934 : vector<16x16xf32>
    %c125 = arith.constant 125 : index
    %936 = memref.load %arg2[%c125] : memref<288xf32, #tpu.memory_space<smem>>
    %c1_508 = arith.constant 1 : index
    %c2_509 = arith.constant 2 : index
    %c2_510 = arith.constant 2 : index
    %937 = vector.load %arg5[%c1_508, %c2_509, %c2_510] : memref<4x18x18xf32, #tpu.memory_space<vmem>>, vector<1x16x16xf32>
    %938 = vector.shape_cast %937 : vector<1x16x16xf32> to vector<16x16xf32>
    %939 = vector.broadcast %936 : f32 to vector<16x16xf32>
    %940 = arith.mulf %939, %938 : vector<16x16xf32>
    %941 = arith.addf %935, %940 : vector<16x16xf32>
    %c126 = arith.constant 126 : index
    %942 = memref.load %arg2[%c126] : memref<288xf32, #tpu.memory_space<smem>>
    %c2_511 = arith.constant 2 : index
    %c0_512 = arith.constant 0 : index
    %c0_513 = arith.constant 0 : index
    %943 = vector.load %arg5[%c2_511, %c0_512, %c0_513] : memref<4x18x18xf32, #tpu.memory_space<vmem>>, vector<1x16x16xf32>
    %944 = vector.shape_cast %943 : vector<1x16x16xf32> to vector<16x16xf32>
    %945 = vector.broadcast %942 : f32 to vector<16x16xf32>
    %946 = arith.mulf %945, %944 : vector<16x16xf32>
    %947 = arith.addf %941, %946 : vector<16x16xf32>
    %c127 = arith.constant 127 : index
    %948 = memref.load %arg2[%c127] : memref<288xf32, #tpu.memory_space<smem>>
    %c2_514 = arith.constant 2 : index
    %c0_515 = arith.constant 0 : index
    %c1_516 = arith.constant 1 : index
    %949 = vector.load %arg5[%c2_514, %c0_515, %c1_516] : memref<4x18x18xf32, #tpu.memory_space<vmem>>, vector<1x16x16xf32>
    %950 = vector.shape_cast %949 : vector<1x16x16xf32> to vector<16x16xf32>
    %951 = vector.broadcast %948 : f32 to vector<16x16xf32>
    %952 = arith.mulf %951, %950 : vector<16x16xf32>
    %953 = arith.addf %947, %952 : vector<16x16xf32>
    %c128 = arith.constant 128 : index
    %954 = memref.load %arg2[%c128] : memref<288xf32, #tpu.memory_space<smem>>
    %c2_517 = arith.constant 2 : index
    %c0_518 = arith.constant 0 : index
    %c2_519 = arith.constant 2 : index
    %955 = vector.load %arg5[%c2_517, %c0_518, %c2_519] : memref<4x18x18xf32, #tpu.memory_space<vmem>>, vector<1x16x16xf32>
    %956 = vector.shape_cast %955 : vector<1x16x16xf32> to vector<16x16xf32>
    %957 = vector.broadcast %954 : f32 to vector<16x16xf32>
    %958 = arith.mulf %957, %956 : vector<16x16xf32>
    %959 = arith.addf %953, %958 : vector<16x16xf32>
    %c129 = arith.constant 129 : index
    %960 = memref.load %arg2[%c129] : memref<288xf32, #tpu.memory_space<smem>>
    %c2_520 = arith.constant 2 : index
    %c1_521 = arith.constant 1 : index
    %c0_522 = arith.constant 0 : index
    %961 = vector.load %arg5[%c2_520, %c1_521, %c0_522] : memref<4x18x18xf32, #tpu.memory_space<vmem>>, vector<1x16x16xf32>
    %962 = vector.shape_cast %961 : vector<1x16x16xf32> to vector<16x16xf32>
    %963 = vector.broadcast %960 : f32 to vector<16x16xf32>
    %964 = arith.mulf %963, %962 : vector<16x16xf32>
    %965 = arith.addf %959, %964 : vector<16x16xf32>
    %c130 = arith.constant 130 : index
    %966 = memref.load %arg2[%c130] : memref<288xf32, #tpu.memory_space<smem>>
    %c2_523 = arith.constant 2 : index
    %c1_524 = arith.constant 1 : index
    %c1_525 = arith.constant 1 : index
    %967 = vector.load %arg5[%c2_523, %c1_524, %c1_525] : memref<4x18x18xf32, #tpu.memory_space<vmem>>, vector<1x16x16xf32>
    %968 = vector.shape_cast %967 : vector<1x16x16xf32> to vector<16x16xf32>
    %969 = vector.broadcast %966 : f32 to vector<16x16xf32>
    %970 = arith.mulf %969, %968 : vector<16x16xf32>
    %971 = arith.addf %965, %970 : vector<16x16xf32>
    %c131 = arith.constant 131 : index
    %972 = memref.load %arg2[%c131] : memref<288xf32, #tpu.memory_space<smem>>
    %c2_526 = arith.constant 2 : index
    %c1_527 = arith.constant 1 : index
    %c2_528 = arith.constant 2 : index
    %973 = vector.load %arg5[%c2_526, %c1_527, %c2_528] : memref<4x18x18xf32, #tpu.memory_space<vmem>>, vector<1x16x16xf32>
    %974 = vector.shape_cast %973 : vector<1x16x16xf32> to vector<16x16xf32>
    %975 = vector.broadcast %972 : f32 to vector<16x16xf32>
    %976 = arith.mulf %975, %974 : vector<16x16xf32>
    %977 = arith.addf %971, %976 : vector<16x16xf32>
    %c132 = arith.constant 132 : index
    %978 = memref.load %arg2[%c132] : memref<288xf32, #tpu.memory_space<smem>>
    %c2_529 = arith.constant 2 : index
    %c2_530 = arith.constant 2 : index
    %c0_531 = arith.constant 0 : index
    %979 = vector.load %arg5[%c2_529, %c2_530, %c0_531] : memref<4x18x18xf32, #tpu.memory_space<vmem>>, vector<1x16x16xf32>
    %980 = vector.shape_cast %979 : vector<1x16x16xf32> to vector<16x16xf32>
    %981 = vector.broadcast %978 : f32 to vector<16x16xf32>
    %982 = arith.mulf %981, %980 : vector<16x16xf32>
    %983 = arith.addf %977, %982 : vector<16x16xf32>
    %c133 = arith.constant 133 : index
    %984 = memref.load %arg2[%c133] : memref<288xf32, #tpu.memory_space<smem>>
    %c2_532 = arith.constant 2 : index
    %c2_533 = arith.constant 2 : index
    %c1_534 = arith.constant 1 : index
    %985 = vector.load %arg5[%c2_532, %c2_533, %c1_534] : memref<4x18x18xf32, #tpu.memory_space<vmem>>, vector<1x16x16xf32>
    %986 = vector.shape_cast %985 : vector<1x16x16xf32> to vector<16x16xf32>
    %987 = vector.broadcast %984 : f32 to vector<16x16xf32>
    %988 = arith.mulf %987, %986 : vector<16x16xf32>
    %989 = arith.addf %983, %988 : vector<16x16xf32>
    %c134 = arith.constant 134 : index
    %990 = memref.load %arg2[%c134] : memref<288xf32, #tpu.memory_space<smem>>
    %c2_535 = arith.constant 2 : index
    %c2_536 = arith.constant 2 : index
    %c2_537 = arith.constant 2 : index
    %991 = vector.load %arg5[%c2_535, %c2_536, %c2_537] : memref<4x18x18xf32, #tpu.memory_space<vmem>>, vector<1x16x16xf32>
    %992 = vector.shape_cast %991 : vector<1x16x16xf32> to vector<16x16xf32>
    %993 = vector.broadcast %990 : f32 to vector<16x16xf32>
    %994 = arith.mulf %993, %992 : vector<16x16xf32>
    %995 = arith.addf %989, %994 : vector<16x16xf32>
    %c135 = arith.constant 135 : index
    %996 = memref.load %arg2[%c135] : memref<288xf32, #tpu.memory_space<smem>>
    %c3_538 = arith.constant 3 : index
    %c0_539 = arith.constant 0 : index
    %c0_540 = arith.constant 0 : index
    %997 = vector.load %arg5[%c3_538, %c0_539, %c0_540] : memref<4x18x18xf32, #tpu.memory_space<vmem>>, vector<1x16x16xf32>
    %998 = vector.shape_cast %997 : vector<1x16x16xf32> to vector<16x16xf32>
    %999 = vector.broadcast %996 : f32 to vector<16x16xf32>
    %1000 = arith.mulf %999, %998 : vector<16x16xf32>
    %1001 = arith.addf %995, %1000 : vector<16x16xf32>
    %c136 = arith.constant 136 : index
    %1002 = memref.load %arg2[%c136] : memref<288xf32, #tpu.memory_space<smem>>
    %c3_541 = arith.constant 3 : index
    %c0_542 = arith.constant 0 : index
    %c1_543 = arith.constant 1 : index
    %1003 = vector.load %arg5[%c3_541, %c0_542, %c1_543] : memref<4x18x18xf32, #tpu.memory_space<vmem>>, vector<1x16x16xf32>
    %1004 = vector.shape_cast %1003 : vector<1x16x16xf32> to vector<16x16xf32>
    %1005 = vector.broadcast %1002 : f32 to vector<16x16xf32>
    %1006 = arith.mulf %1005, %1004 : vector<16x16xf32>
    %1007 = arith.addf %1001, %1006 : vector<16x16xf32>
    %c137 = arith.constant 137 : index
    %1008 = memref.load %arg2[%c137] : memref<288xf32, #tpu.memory_space<smem>>
    %c3_544 = arith.constant 3 : index
    %c0_545 = arith.constant 0 : index
    %c2_546 = arith.constant 2 : index
    %1009 = vector.load %arg5[%c3_544, %c0_545, %c2_546] : memref<4x18x18xf32, #tpu.memory_space<vmem>>, vector<1x16x16xf32>
    %1010 = vector.shape_cast %1009 : vector<1x16x16xf32> to vector<16x16xf32>
    %1011 = vector.broadcast %1008 : f32 to vector<16x16xf32>
    %1012 = arith.mulf %1011, %1010 : vector<16x16xf32>
    %1013 = arith.addf %1007, %1012 : vector<16x16xf32>
    %c138 = arith.constant 138 : index
    %1014 = memref.load %arg2[%c138] : memref<288xf32, #tpu.memory_space<smem>>
    %c3_547 = arith.constant 3 : index
    %c1_548 = arith.constant 1 : index
    %c0_549 = arith.constant 0 : index
    %1015 = vector.load %arg5[%c3_547, %c1_548, %c0_549] : memref<4x18x18xf32, #tpu.memory_space<vmem>>, vector<1x16x16xf32>
    %1016 = vector.shape_cast %1015 : vector<1x16x16xf32> to vector<16x16xf32>
    %1017 = vector.broadcast %1014 : f32 to vector<16x16xf32>
    %1018 = arith.mulf %1017, %1016 : vector<16x16xf32>
    %1019 = arith.addf %1013, %1018 : vector<16x16xf32>
    %c139 = arith.constant 139 : index
    %1020 = memref.load %arg2[%c139] : memref<288xf32, #tpu.memory_space<smem>>
    %c3_550 = arith.constant 3 : index
    %c1_551 = arith.constant 1 : index
    %c1_552 = arith.constant 1 : index
    %1021 = vector.load %arg5[%c3_550, %c1_551, %c1_552] : memref<4x18x18xf32, #tpu.memory_space<vmem>>, vector<1x16x16xf32>
    %1022 = vector.shape_cast %1021 : vector<1x16x16xf32> to vector<16x16xf32>
    %1023 = vector.broadcast %1020 : f32 to vector<16x16xf32>
    %1024 = arith.mulf %1023, %1022 : vector<16x16xf32>
    %1025 = arith.addf %1019, %1024 : vector<16x16xf32>
    %c140 = arith.constant 140 : index
    %1026 = memref.load %arg2[%c140] : memref<288xf32, #tpu.memory_space<smem>>
    %c3_553 = arith.constant 3 : index
    %c1_554 = arith.constant 1 : index
    %c2_555 = arith.constant 2 : index
    %1027 = vector.load %arg5[%c3_553, %c1_554, %c2_555] : memref<4x18x18xf32, #tpu.memory_space<vmem>>, vector<1x16x16xf32>
    %1028 = vector.shape_cast %1027 : vector<1x16x16xf32> to vector<16x16xf32>
    %1029 = vector.broadcast %1026 : f32 to vector<16x16xf32>
    %1030 = arith.mulf %1029, %1028 : vector<16x16xf32>
    %1031 = arith.addf %1025, %1030 : vector<16x16xf32>
    %c141 = arith.constant 141 : index
    %1032 = memref.load %arg2[%c141] : memref<288xf32, #tpu.memory_space<smem>>
    %c3_556 = arith.constant 3 : index
    %c2_557 = arith.constant 2 : index
    %c0_558 = arith.constant 0 : index
    %1033 = vector.load %arg5[%c3_556, %c2_557, %c0_558] : memref<4x18x18xf32, #tpu.memory_space<vmem>>, vector<1x16x16xf32>
    %1034 = vector.shape_cast %1033 : vector<1x16x16xf32> to vector<16x16xf32>
    %1035 = vector.broadcast %1032 : f32 to vector<16x16xf32>
    %1036 = arith.mulf %1035, %1034 : vector<16x16xf32>
    %1037 = arith.addf %1031, %1036 : vector<16x16xf32>
    %c142 = arith.constant 142 : index
    %1038 = memref.load %arg2[%c142] : memref<288xf32, #tpu.memory_space<smem>>
    %c3_559 = arith.constant 3 : index
    %c2_560 = arith.constant 2 : index
    %c1_561 = arith.constant 1 : index
    %1039 = vector.load %arg5[%c3_559, %c2_560, %c1_561] : memref<4x18x18xf32, #tpu.memory_space<vmem>>, vector<1x16x16xf32>
    %1040 = vector.shape_cast %1039 : vector<1x16x16xf32> to vector<16x16xf32>
    %1041 = vector.broadcast %1038 : f32 to vector<16x16xf32>
    %1042 = arith.mulf %1041, %1040 : vector<16x16xf32>
    %1043 = arith.addf %1037, %1042 : vector<16x16xf32>
    %c143 = arith.constant 143 : index
    %1044 = memref.load %arg2[%c143] : memref<288xf32, #tpu.memory_space<smem>>
    %c3_562 = arith.constant 3 : index
    %c2_563 = arith.constant 2 : index
    %c2_564 = arith.constant 2 : index
    %1045 = vector.load %arg5[%c3_562, %c2_563, %c2_564] : memref<4x18x18xf32, #tpu.memory_space<vmem>>, vector<1x16x16xf32>
    %1046 = vector.shape_cast %1045 : vector<1x16x16xf32> to vector<16x16xf32>
    %1047 = vector.broadcast %1044 : f32 to vector<16x16xf32>
    %1048 = arith.mulf %1047, %1046 : vector<16x16xf32>
    %1049 = arith.addf %1043, %1048 : vector<16x16xf32>
    %1050 = vector.shape_cast %1049 : vector<16x16xf32> to vector<1x16x16xf32>
    %cst_565 = arith.constant dense<0.000000e+00> : vector<1xf32>
    %1051 = vector.multi_reduction <add>, %1050, %cst_565 [1, 2] : vector<1x16x16xf32> to vector<1xf32>
    %1052 = vector.shape_cast %1051 : vector<1xf32> to vector<1x1x1xf32>
    %1053 = vector.extract %1052[0, 0, 0] : f32 from vector<1x1x1xf32>
    %1054 = vector.broadcast %1053 : f32 to vector<1x1xf32>
    %cst_566 = arith.constant 2.560000e+02 : f32
    %1055 = vector.broadcast %cst_566 : f32 to vector<1x1xf32>
    %1056 = arith.divf %1054, %1055 : vector<1x1xf32>
    %1057 = vector.broadcast %1056 : vector<1x1xf32> to vector<16x16xf32>
    %1058 = arith.subf %1049, %1057 : vector<16x16xf32>
    %1059 = arith.mulf %1058, %1058 : vector<16x16xf32>
    %1060 = vector.shape_cast %1059 : vector<16x16xf32> to vector<1x16x16xf32>
    %cst_567 = arith.constant dense<0.000000e+00> : vector<1xf32>
    %1061 = vector.multi_reduction <add>, %1060, %cst_567 [1, 2] : vector<1x16x16xf32> to vector<1xf32>
    %1062 = vector.shape_cast %1061 : vector<1xf32> to vector<1x1x1xf32>
    %1063 = vector.extract %1062[0, 0, 0] : f32 from vector<1x1x1xf32>
    %1064 = vector.broadcast %1063 : f32 to vector<1x1xf32>
    %cst_568 = arith.constant 2.560000e+02 : f32
    %1065 = vector.broadcast %cst_568 : f32 to vector<1x1xf32>
    %1066 = arith.divf %1064, %1065 : vector<1x1xf32>
    %cst_569 = arith.constant 9.99999974E-6 : f32
    %1067 = vector.broadcast %cst_569 : f32 to vector<1x1xf32>
    %1068 = arith.addf %1066, %1067 : vector<1x1xf32>
    %1069 = math.rsqrt %1068 : vector<1x1xf32>
    %1070 = vector.broadcast %1069 : vector<1x1xf32> to vector<16x16xf32>
    %1071 = arith.mulf %1058, %1070 : vector<16x16xf32>
    %c0_570 = arith.constant 0 : index
    %c3_571 = arith.constant 3 : index
    %1072 = memref.load %arg3[%c0_570, %c3_571] : memref<4x4xf32, #tpu.memory_space<smem>>
    %1073 = vector.broadcast %1072 : f32 to vector<16x16xf32>
    %1074 = arith.mulf %1071, %1073 : vector<16x16xf32>
    %c1_572 = arith.constant 1 : index
    %c3_573 = arith.constant 3 : index
    %1075 = memref.load %arg3[%c1_572, %c3_573] : memref<4x4xf32, #tpu.memory_space<smem>>
    %1076 = vector.broadcast %1075 : f32 to vector<16x16xf32>
    %1077 = arith.addf %1074, %1076 : vector<16x16xf32>
    %cst_574 = arith.constant 0.000000e+00 : f32
    %1078 = vector.broadcast %cst_574 : f32 to vector<16x16xf32>
    %1079 = arith.maximumf %1077, %1078 : vector<16x16xf32>
    %c0_575 = arith.constant 0 : index
    %c1_576 = arith.constant 1 : index
    %c1_577 = arith.constant 1 : index
    %1080 = vector.load %arg5[%c0_575, %c1_576, %c1_577] : memref<4x18x18xf32, #tpu.memory_space<vmem>>, vector<1x16x16xf32>
    %1081 = vector.shape_cast %1080 : vector<1x16x16xf32> to vector<16x16xf32>
    %1082 = vector.shape_cast %338 : vector<16x16xf32> to vector<1x16x16xf32>
    tpu.vector_store %arg5[%c0_575, %c1_576, %c1_577], %1082 {strides = array<i32>} : memref<4x18x18xf32, #tpu.memory_space<vmem>>, vector<1x16x16xf32>,
    %1083 = vector.extract_strided_slice %338 {offsets = [1, 0], sizes = [1, 16], strides = [1, 1]} : vector<16x16xf32> to vector<1x16xf32>
    %c0_578 = arith.constant 0 : index
    %c0_579 = arith.constant 0 : index
    %c1_580 = arith.constant 1 : index
    %1084 = vector.load %arg5[%c0_578, %c0_579, %c1_580] : memref<4x18x18xf32, #tpu.memory_space<vmem>>, vector<1x1x16xf32>
    %1085 = vector.shape_cast %1084 : vector<1x1x16xf32> to vector<1x16xf32>
    %1086 = vector.shape_cast %1083 : vector<1x16xf32> to vector<1x1x16xf32>
    tpu.vector_store %arg5[%c0_578, %c0_579, %c1_580], %1086 {strides = array<i32>} : memref<4x18x18xf32, #tpu.memory_space<vmem>>, vector<1x1x16xf32>,
    %1087 = vector.extract_strided_slice %338 {offsets = [14, 0], sizes = [1, 16], strides = [1, 1]} : vector<16x16xf32> to vector<1x16xf32>
    %c0_581 = arith.constant 0 : index
    %c17_582 = arith.constant 17 : index
    %c1_583 = arith.constant 1 : index
    %1088 = vector.load %arg5[%c0_581, %c17_582, %c1_583] : memref<4x18x18xf32, #tpu.memory_space<vmem>>, vector<1x1x16xf32>
    %1089 = vector.shape_cast %1088 : vector<1x1x16xf32> to vector<1x16xf32>
    %1090 = vector.shape_cast %1087 : vector<1x16xf32> to vector<1x1x16xf32>
    tpu.vector_store %arg5[%c0_581, %c17_582, %c1_583], %1090 {strides = array<i32>} : memref<4x18x18xf32, #tpu.memory_space<vmem>>, vector<1x1x16xf32>,
    %c1_584 = arith.constant 1 : index
    %c1_585 = arith.constant 1 : index
    %c1_586 = arith.constant 1 : index
    %1091 = vector.load %arg5[%c1_584, %c1_585, %c1_586] : memref<4x18x18xf32, #tpu.memory_space<vmem>>, vector<1x16x16xf32>
    %1092 = vector.shape_cast %1091 : vector<1x16x16xf32> to vector<16x16xf32>
    %1093 = vector.shape_cast %585 : vector<16x16xf32> to vector<1x16x16xf32>
    tpu.vector_store %arg5[%c1_584, %c1_585, %c1_586], %1093 {strides = array<i32>} : memref<4x18x18xf32, #tpu.memory_space<vmem>>, vector<1x16x16xf32>,
    %1094 = vector.extract_strided_slice %585 {offsets = [1, 0], sizes = [1, 16], strides = [1, 1]} : vector<16x16xf32> to vector<1x16xf32>
    %c1_587 = arith.constant 1 : index
    %c0_588 = arith.constant 0 : index
    %c1_589 = arith.constant 1 : index
    %1095 = vector.load %arg5[%c1_587, %c0_588, %c1_589] : memref<4x18x18xf32, #tpu.memory_space<vmem>>, vector<1x1x16xf32>
    %1096 = vector.shape_cast %1095 : vector<1x1x16xf32> to vector<1x16xf32>
    %1097 = vector.shape_cast %1094 : vector<1x16xf32> to vector<1x1x16xf32>
    tpu.vector_store %arg5[%c1_587, %c0_588, %c1_589], %1097 {strides = array<i32>} : memref<4x18x18xf32, #tpu.memory_space<vmem>>, vector<1x1x16xf32>,
    %1098 = vector.extract_strided_slice %585 {offsets = [14, 0], sizes = [1, 16], strides = [1, 1]} : vector<16x16xf32> to vector<1x16xf32>
    %c1_590 = arith.constant 1 : index
    %c17_591 = arith.constant 17 : index
    %c1_592 = arith.constant 1 : index
    %1099 = vector.load %arg5[%c1_590, %c17_591, %c1_592] : memref<4x18x18xf32, #tpu.memory_space<vmem>>, vector<1x1x16xf32>
    %1100 = vector.shape_cast %1099 : vector<1x1x16xf32> to vector<1x16xf32>
    %1101 = vector.shape_cast %1098 : vector<1x16xf32> to vector<1x1x16xf32>
    tpu.vector_store %arg5[%c1_590, %c17_591, %c1_592], %1101 {strides = array<i32>} : memref<4x18x18xf32, #tpu.memory_space<vmem>>, vector<1x1x16xf32>,
    %c2_593 = arith.constant 2 : index
    %c1_594 = arith.constant 1 : index
    %c1_595 = arith.constant 1 : index
    %1102 = vector.load %arg5[%c2_593, %c1_594, %c1_595] : memref<4x18x18xf32, #tpu.memory_space<vmem>>, vector<1x16x16xf32>
    %1103 = vector.shape_cast %1102 : vector<1x16x16xf32> to vector<16x16xf32>
    %1104 = vector.shape_cast %832 : vector<16x16xf32> to vector<1x16x16xf32>
    tpu.vector_store %arg5[%c2_593, %c1_594, %c1_595], %1104 {strides = array<i32>} : memref<4x18x18xf32, #tpu.memory_space<vmem>>, vector<1x16x16xf32>,
    %1105 = vector.extract_strided_slice %832 {offsets = [1, 0], sizes = [1, 16], strides = [1, 1]} : vector<16x16xf32> to vector<1x16xf32>
    %c2_596 = arith.constant 2 : index
    %c0_597 = arith.constant 0 : index
    %c1_598 = arith.constant 1 : index
    %1106 = vector.load %arg5[%c2_596, %c0_597, %c1_598] : memref<4x18x18xf32, #tpu.memory_space<vmem>>, vector<1x1x16xf32>
    %1107 = vector.shape_cast %1106 : vector<1x1x16xf32> to vector<1x16xf32>
    %1108 = vector.shape_cast %1105 : vector<1x16xf32> to vector<1x1x16xf32>
    tpu.vector_store %arg5[%c2_596, %c0_597, %c1_598], %1108 {strides = array<i32>} : memref<4x18x18xf32, #tpu.memory_space<vmem>>, vector<1x1x16xf32>,
    %1109 = vector.extract_strided_slice %832 {offsets = [14, 0], sizes = [1, 16], strides = [1, 1]} : vector<16x16xf32> to vector<1x16xf32>
    %c2_599 = arith.constant 2 : index
    %c17_600 = arith.constant 17 : index
    %c1_601 = arith.constant 1 : index
    %1110 = vector.load %arg5[%c2_599, %c17_600, %c1_601] : memref<4x18x18xf32, #tpu.memory_space<vmem>>, vector<1x1x16xf32>
    %1111 = vector.shape_cast %1110 : vector<1x1x16xf32> to vector<1x16xf32>
    %1112 = vector.shape_cast %1109 : vector<1x16xf32> to vector<1x1x16xf32>
    tpu.vector_store %arg5[%c2_599, %c17_600, %c1_601], %1112 {strides = array<i32>} : memref<4x18x18xf32, #tpu.memory_space<vmem>>, vector<1x1x16xf32>,
    %c3_602 = arith.constant 3 : index
    %c1_603 = arith.constant 1 : index
    %c1_604 = arith.constant 1 : index
    %1113 = vector.load %arg5[%c3_602, %c1_603, %c1_604] : memref<4x18x18xf32, #tpu.memory_space<vmem>>, vector<1x16x16xf32>
    %1114 = vector.shape_cast %1113 : vector<1x16x16xf32> to vector<16x16xf32>
    %1115 = vector.shape_cast %1079 : vector<16x16xf32> to vector<1x16x16xf32>
    tpu.vector_store %arg5[%c3_602, %c1_603, %c1_604], %1115 {strides = array<i32>} : memref<4x18x18xf32, #tpu.memory_space<vmem>>, vector<1x16x16xf32>,
    %1116 = vector.extract_strided_slice %1079 {offsets = [1, 0], sizes = [1, 16], strides = [1, 1]} : vector<16x16xf32> to vector<1x16xf32>
    %c3_605 = arith.constant 3 : index
    %c0_606 = arith.constant 0 : index
    %c1_607 = arith.constant 1 : index
    %1117 = vector.load %arg5[%c3_605, %c0_606, %c1_607] : memref<4x18x18xf32, #tpu.memory_space<vmem>>, vector<1x1x16xf32>
    %1118 = vector.shape_cast %1117 : vector<1x1x16xf32> to vector<1x16xf32>
    %1119 = vector.shape_cast %1116 : vector<1x16xf32> to vector<1x1x16xf32>
    tpu.vector_store %arg5[%c3_605, %c0_606, %c1_607], %1119 {strides = array<i32>} : memref<4x18x18xf32, #tpu.memory_space<vmem>>, vector<1x1x16xf32>,
    %1120 = vector.extract_strided_slice %1079 {offsets = [14, 0], sizes = [1, 16], strides = [1, 1]} : vector<16x16xf32> to vector<1x16xf32>
    %c3_608 = arith.constant 3 : index
    %c17_609 = arith.constant 17 : index
    %c1_610 = arith.constant 1 : index
    %1121 = vector.load %arg5[%c3_608, %c17_609, %c1_610] : memref<4x18x18xf32, #tpu.memory_space<vmem>>, vector<1x1x16xf32>
    %1122 = vector.shape_cast %1121 : vector<1x1x16xf32> to vector<1x16xf32>
    %1123 = vector.shape_cast %1120 : vector<1x16xf32> to vector<1x1x16xf32>
    tpu.vector_store %arg5[%c3_608, %c17_609, %c1_610], %1123 {strides = array<i32>} : memref<4x18x18xf32, #tpu.memory_space<vmem>>, vector<1x1x16xf32>,
    %c0_611 = arith.constant 0 : index
    %c0_612 = arith.constant 0 : index
    %c2_613 = arith.constant 2 : index
    %1124 = vector.load %arg5[%c0_611, %c0_612, %c2_613] : memref<4x18x18xf32, #tpu.memory_space<vmem>>, vector<1x18x1xf32>
    %1125 = vector.shape_cast %1124 : vector<1x18x1xf32> to vector<18x1xf32>
    %c0_614 = arith.constant 0 : index
    %c0_615 = arith.constant 0 : index
    %c0_616 = arith.constant 0 : index
    %1126 = vector.load %arg5[%c0_614, %c0_615, %c0_616] : memref<4x18x18xf32, #tpu.memory_space<vmem>>, vector<1x18x1xf32>
    %1127 = vector.shape_cast %1126 : vector<1x18x1xf32> to vector<18x1xf32>
    %1128 = vector.shape_cast %1125 : vector<18x1xf32> to vector<1x18x1xf32>
    tpu.vector_store %arg5[%c0_614, %c0_615, %c0_616], %1128 {strides = array<i32>} : memref<4x18x18xf32, #tpu.memory_space<vmem>>, vector<1x18x1xf32>,
    %c0_617 = arith.constant 0 : index
    %c0_618 = arith.constant 0 : index
    %c15_619 = arith.constant 15 : index
    %1129 = vector.load %arg5[%c0_617, %c0_618, %c15_619] : memref<4x18x18xf32, #tpu.memory_space<vmem>>, vector<1x18x1xf32>
    %1130 = vector.shape_cast %1129 : vector<1x18x1xf32> to vector<18x1xf32>
    %c0_620 = arith.constant 0 : index
    %c0_621 = arith.constant 0 : index
    %c17_622 = arith.constant 17 : index
    %1131 = vector.load %arg5[%c0_620, %c0_621, %c17_622] : memref<4x18x18xf32, #tpu.memory_space<vmem>>, vector<1x18x1xf32>
    %1132 = vector.shape_cast %1131 : vector<1x18x1xf32> to vector<18x1xf32>
    %1133 = vector.shape_cast %1130 : vector<18x1xf32> to vector<1x18x1xf32>
    tpu.vector_store %arg5[%c0_620, %c0_621, %c17_622], %1133 {strides = array<i32>} : memref<4x18x18xf32, #tpu.memory_space<vmem>>, vector<1x18x1xf32>,
    %c1_623 = arith.constant 1 : index
    %c0_624 = arith.constant 0 : index
    %c2_625 = arith.constant 2 : index
    %1134 = vector.load %arg5[%c1_623, %c0_624, %c2_625] : memref<4x18x18xf32, #tpu.memory_space<vmem>>, vector<1x18x1xf32>
    %1135 = vector.shape_cast %1134 : vector<1x18x1xf32> to vector<18x1xf32>
    %c1_626 = arith.constant 1 : index
    %c0_627 = arith.constant 0 : index
    %c0_628 = arith.constant 0 : index
    %1136 = vector.load %arg5[%c1_626, %c0_627, %c0_628] : memref<4x18x18xf32, #tpu.memory_space<vmem>>, vector<1x18x1xf32>
    %1137 = vector.shape_cast %1136 : vector<1x18x1xf32> to vector<18x1xf32>
    %1138 = vector.shape_cast %1135 : vector<18x1xf32> to vector<1x18x1xf32>
    tpu.vector_store %arg5[%c1_626, %c0_627, %c0_628], %1138 {strides = array<i32>} : memref<4x18x18xf32, #tpu.memory_space<vmem>>, vector<1x18x1xf32>,
    %c1_629 = arith.constant 1 : index
    %c0_630 = arith.constant 0 : index
    %c15_631 = arith.constant 15 : index
    %1139 = vector.load %arg5[%c1_629, %c0_630, %c15_631] : memref<4x18x18xf32, #tpu.memory_space<vmem>>, vector<1x18x1xf32>
    %1140 = vector.shape_cast %1139 : vector<1x18x1xf32> to vector<18x1xf32>
    %c1_632 = arith.constant 1 : index
    %c0_633 = arith.constant 0 : index
    %c17_634 = arith.constant 17 : index
    %1141 = vector.load %arg5[%c1_632, %c0_633, %c17_634] : memref<4x18x18xf32, #tpu.memory_space<vmem>>, vector<1x18x1xf32>
    %1142 = vector.shape_cast %1141 : vector<1x18x1xf32> to vector<18x1xf32>
    %1143 = vector.shape_cast %1140 : vector<18x1xf32> to vector<1x18x1xf32>
    tpu.vector_store %arg5[%c1_632, %c0_633, %c17_634], %1143 {strides = array<i32>} : memref<4x18x18xf32, #tpu.memory_space<vmem>>, vector<1x18x1xf32>,
    %c2_635 = arith.constant 2 : index
    %c0_636 = arith.constant 0 : index
    %c2_637 = arith.constant 2 : index
    %1144 = vector.load %arg5[%c2_635, %c0_636, %c2_637] : memref<4x18x18xf32, #tpu.memory_space<vmem>>, vector<1x18x1xf32>
    %1145 = vector.shape_cast %1144 : vector<1x18x1xf32> to vector<18x1xf32>
    %c2_638 = arith.constant 2 : index
    %c0_639 = arith.constant 0 : index
    %c0_640 = arith.constant 0 : index
    %1146 = vector.load %arg5[%c2_638, %c0_639, %c0_640] : memref<4x18x18xf32, #tpu.memory_space<vmem>>, vector<1x18x1xf32>
    %1147 = vector.shape_cast %1146 : vector<1x18x1xf32> to vector<18x1xf32>
    %1148 = vector.shape_cast %1145 : vector<18x1xf32> to vector<1x18x1xf32>
    tpu.vector_store %arg5[%c2_638, %c0_639, %c0_640], %1148 {strides = array<i32>} : memref<4x18x18xf32, #tpu.memory_space<vmem>>, vector<1x18x1xf32>,
    %c2_641 = arith.constant 2 : index
    %c0_642 = arith.constant 0 : index
    %c15_643 = arith.constant 15 : index
    %1149 = vector.load %arg5[%c2_641, %c0_642, %c15_643] : memref<4x18x18xf32, #tpu.memory_space<vmem>>, vector<1x18x1xf32>
    %1150 = vector.shape_cast %1149 : vector<1x18x1xf32> to vector<18x1xf32>
    %c2_644 = arith.constant 2 : index
    %c0_645 = arith.constant 0 : index
    %c17_646 = arith.constant 17 : index
    %1151 = vector.load %arg5[%c2_644, %c0_645, %c17_646] : memref<4x18x18xf32, #tpu.memory_space<vmem>>, vector<1x18x1xf32>
    %1152 = vector.shape_cast %1151 : vector<1x18x1xf32> to vector<18x1xf32>
    %1153 = vector.shape_cast %1150 : vector<18x1xf32> to vector<1x18x1xf32>
    tpu.vector_store %arg5[%c2_644, %c0_645, %c17_646], %1153 {strides = array<i32>} : memref<4x18x18xf32, #tpu.memory_space<vmem>>, vector<1x18x1xf32>,
    %c3_647 = arith.constant 3 : index
    %c0_648 = arith.constant 0 : index
    %c2_649 = arith.constant 2 : index
    %1154 = vector.load %arg5[%c3_647, %c0_648, %c2_649] : memref<4x18x18xf32, #tpu.memory_space<vmem>>, vector<1x18x1xf32>
    %1155 = vector.shape_cast %1154 : vector<1x18x1xf32> to vector<18x1xf32>
    %c3_650 = arith.constant 3 : index
    %c0_651 = arith.constant 0 : index
    %c0_652 = arith.constant 0 : index
    %1156 = vector.load %arg5[%c3_650, %c0_651, %c0_652] : memref<4x18x18xf32, #tpu.memory_space<vmem>>, vector<1x18x1xf32>
    %1157 = vector.shape_cast %1156 : vector<1x18x1xf32> to vector<18x1xf32>
    %1158 = vector.shape_cast %1155 : vector<18x1xf32> to vector<1x18x1xf32>
    tpu.vector_store %arg5[%c3_650, %c0_651, %c0_652], %1158 {strides = array<i32>} : memref<4x18x18xf32, #tpu.memory_space<vmem>>, vector<1x18x1xf32>,
    %c3_653 = arith.constant 3 : index
    %c0_654 = arith.constant 0 : index
    %c15_655 = arith.constant 15 : index
    %1159 = vector.load %arg5[%c3_653, %c0_654, %c15_655] : memref<4x18x18xf32, #tpu.memory_space<vmem>>, vector<1x18x1xf32>
    %1160 = vector.shape_cast %1159 : vector<1x18x1xf32> to vector<18x1xf32>
    %c3_656 = arith.constant 3 : index
    %c0_657 = arith.constant 0 : index
    %c17_658 = arith.constant 17 : index
    %1161 = vector.load %arg5[%c3_656, %c0_657, %c17_658] : memref<4x18x18xf32, #tpu.memory_space<vmem>>, vector<1x18x1xf32>
    %1162 = vector.shape_cast %1161 : vector<1x18x1xf32> to vector<18x1xf32>
    %1163 = vector.shape_cast %1160 : vector<18x1xf32> to vector<1x18x1xf32>
    tpu.vector_store %arg5[%c3_656, %c0_657, %c17_658], %1163 {strides = array<i32>} : memref<4x18x18xf32, #tpu.memory_space<vmem>>, vector<1x18x1xf32>,
    %cst_659 = arith.constant 0.000000e+00 : f32
    %1164 = vector.broadcast %cst_659 : f32 to vector<16x16xf32>
    %c144 = arith.constant 144 : index
    %1165 = memref.load %arg2[%c144] : memref<288xf32, #tpu.memory_space<smem>>
    %c0_660 = arith.constant 0 : index
    %c0_661 = arith.constant 0 : index
    %c0_662 = arith.constant 0 : index
    %1166 = vector.load %arg5[%c0_660, %c0_661, %c0_662] : memref<4x18x18xf32, #tpu.memory_space<vmem>>, vector<1x16x16xf32>
    %1167 = vector.shape_cast %1166 : vector<1x16x16xf32> to vector<16x16xf32>
    %1168 = vector.broadcast %1165 : f32 to vector<16x16xf32>
    %1169 = arith.mulf %1168, %1167 : vector<16x16xf32>
    %1170 = arith.addf %1164, %1169 : vector<16x16xf32>
    %c145 = arith.constant 145 : index
    %1171 = memref.load %arg2[%c145] : memref<288xf32, #tpu.memory_space<smem>>
    %c0_663 = arith.constant 0 : index
    %c0_664 = arith.constant 0 : index
    %c1_665 = arith.constant 1 : index
    %1172 = vector.load %arg5[%c0_663, %c0_664, %c1_665] : memref<4x18x18xf32, #tpu.memory_space<vmem>>, vector<1x16x16xf32>
    %1173 = vector.shape_cast %1172 : vector<1x16x16xf32> to vector<16x16xf32>
    %1174 = vector.broadcast %1171 : f32 to vector<16x16xf32>
    %1175 = arith.mulf %1174, %1173 : vector<16x16xf32>
    %1176 = arith.addf %1170, %1175 : vector<16x16xf32>
    %c146 = arith.constant 146 : index
    %1177 = memref.load %arg2[%c146] : memref<288xf32, #tpu.memory_space<smem>>
    %c0_666 = arith.constant 0 : index
    %c0_667 = arith.constant 0 : index
    %c2_668 = arith.constant 2 : index
    %1178 = vector.load %arg5[%c0_666, %c0_667, %c2_668] : memref<4x18x18xf32, #tpu.memory_space<vmem>>, vector<1x16x16xf32>
    %1179 = vector.shape_cast %1178 : vector<1x16x16xf32> to vector<16x16xf32>
    %1180 = vector.broadcast %1177 : f32 to vector<16x16xf32>
    %1181 = arith.mulf %1180, %1179 : vector<16x16xf32>
    %1182 = arith.addf %1176, %1181 : vector<16x16xf32>
    %c147 = arith.constant 147 : index
    %1183 = memref.load %arg2[%c147] : memref<288xf32, #tpu.memory_space<smem>>
    %c0_669 = arith.constant 0 : index
    %c1_670 = arith.constant 1 : index
    %c0_671 = arith.constant 0 : index
    %1184 = vector.load %arg5[%c0_669, %c1_670, %c0_671] : memref<4x18x18xf32, #tpu.memory_space<vmem>>, vector<1x16x16xf32>
    %1185 = vector.shape_cast %1184 : vector<1x16x16xf32> to vector<16x16xf32>
    %1186 = vector.broadcast %1183 : f32 to vector<16x16xf32>
    %1187 = arith.mulf %1186, %1185 : vector<16x16xf32>
    %1188 = arith.addf %1182, %1187 : vector<16x16xf32>
    %c148 = arith.constant 148 : index
    %1189 = memref.load %arg2[%c148] : memref<288xf32, #tpu.memory_space<smem>>
    %c0_672 = arith.constant 0 : index
    %c1_673 = arith.constant 1 : index
    %c1_674 = arith.constant 1 : index
    %1190 = vector.load %arg5[%c0_672, %c1_673, %c1_674] : memref<4x18x18xf32, #tpu.memory_space<vmem>>, vector<1x16x16xf32>
    %1191 = vector.shape_cast %1190 : vector<1x16x16xf32> to vector<16x16xf32>
    %1192 = vector.broadcast %1189 : f32 to vector<16x16xf32>
    %1193 = arith.mulf %1192, %1191 : vector<16x16xf32>
    %1194 = arith.addf %1188, %1193 : vector<16x16xf32>
    %c149 = arith.constant 149 : index
    %1195 = memref.load %arg2[%c149] : memref<288xf32, #tpu.memory_space<smem>>
    %c0_675 = arith.constant 0 : index
    %c1_676 = arith.constant 1 : index
    %c2_677 = arith.constant 2 : index
    %1196 = vector.load %arg5[%c0_675, %c1_676, %c2_677] : memref<4x18x18xf32, #tpu.memory_space<vmem>>, vector<1x16x16xf32>
    %1197 = vector.shape_cast %1196 : vector<1x16x16xf32> to vector<16x16xf32>
    %1198 = vector.broadcast %1195 : f32 to vector<16x16xf32>
    %1199 = arith.mulf %1198, %1197 : vector<16x16xf32>
    %1200 = arith.addf %1194, %1199 : vector<16x16xf32>
    %c150 = arith.constant 150 : index
    %1201 = memref.load %arg2[%c150] : memref<288xf32, #tpu.memory_space<smem>>
    %c0_678 = arith.constant 0 : index
    %c2_679 = arith.constant 2 : index
    %c0_680 = arith.constant 0 : index
    %1202 = vector.load %arg5[%c0_678, %c2_679, %c0_680] : memref<4x18x18xf32, #tpu.memory_space<vmem>>, vector<1x16x16xf32>
    %1203 = vector.shape_cast %1202 : vector<1x16x16xf32> to vector<16x16xf32>
    %1204 = vector.broadcast %1201 : f32 to vector<16x16xf32>
    %1205 = arith.mulf %1204, %1203 : vector<16x16xf32>
    %1206 = arith.addf %1200, %1205 : vector<16x16xf32>
    %c151 = arith.constant 151 : index
    %1207 = memref.load %arg2[%c151] : memref<288xf32, #tpu.memory_space<smem>>
    %c0_681 = arith.constant 0 : index
    %c2_682 = arith.constant 2 : index
    %c1_683 = arith.constant 1 : index
    %1208 = vector.load %arg5[%c0_681, %c2_682, %c1_683] : memref<4x18x18xf32, #tpu.memory_space<vmem>>, vector<1x16x16xf32>
    %1209 = vector.shape_cast %1208 : vector<1x16x16xf32> to vector<16x16xf32>
    %1210 = vector.broadcast %1207 : f32 to vector<16x16xf32>
    %1211 = arith.mulf %1210, %1209 : vector<16x16xf32>
    %1212 = arith.addf %1206, %1211 : vector<16x16xf32>
    %c152 = arith.constant 152 : index
    %1213 = memref.load %arg2[%c152] : memref<288xf32, #tpu.memory_space<smem>>
    %c0_684 = arith.constant 0 : index
    %c2_685 = arith.constant 2 : index
    %c2_686 = arith.constant 2 : index
    %1214 = vector.load %arg5[%c0_684, %c2_685, %c2_686] : memref<4x18x18xf32, #tpu.memory_space<vmem>>, vector<1x16x16xf32>
    %1215 = vector.shape_cast %1214 : vector<1x16x16xf32> to vector<16x16xf32>
    %1216 = vector.broadcast %1213 : f32 to vector<16x16xf32>
    %1217 = arith.mulf %1216, %1215 : vector<16x16xf32>
    %1218 = arith.addf %1212, %1217 : vector<16x16xf32>
    %c153 = arith.constant 153 : index
    %1219 = memref.load %arg2[%c153] : memref<288xf32, #tpu.memory_space<smem>>
    %c1_687 = arith.constant 1 : index
    %c0_688 = arith.constant 0 : index
    %c0_689 = arith.constant 0 : index
    %1220 = vector.load %arg5[%c1_687, %c0_688, %c0_689] : memref<4x18x18xf32, #tpu.memory_space<vmem>>, vector<1x16x16xf32>
    %1221 = vector.shape_cast %1220 : vector<1x16x16xf32> to vector<16x16xf32>
    %1222 = vector.broadcast %1219 : f32 to vector<16x16xf32>
    %1223 = arith.mulf %1222, %1221 : vector<16x16xf32>
    %1224 = arith.addf %1218, %1223 : vector<16x16xf32>
    %c154 = arith.constant 154 : index
    %1225 = memref.load %arg2[%c154] : memref<288xf32, #tpu.memory_space<smem>>
    %c1_690 = arith.constant 1 : index
    %c0_691 = arith.constant 0 : index
    %c1_692 = arith.constant 1 : index
    %1226 = vector.load %arg5[%c1_690, %c0_691, %c1_692] : memref<4x18x18xf32, #tpu.memory_space<vmem>>, vector<1x16x16xf32>
    %1227 = vector.shape_cast %1226 : vector<1x16x16xf32> to vector<16x16xf32>
    %1228 = vector.broadcast %1225 : f32 to vector<16x16xf32>
    %1229 = arith.mulf %1228, %1227 : vector<16x16xf32>
    %1230 = arith.addf %1224, %1229 : vector<16x16xf32>
    %c155 = arith.constant 155 : index
    %1231 = memref.load %arg2[%c155] : memref<288xf32, #tpu.memory_space<smem>>
    %c1_693 = arith.constant 1 : index
    %c0_694 = arith.constant 0 : index
    %c2_695 = arith.constant 2 : index
    %1232 = vector.load %arg5[%c1_693, %c0_694, %c2_695] : memref<4x18x18xf32, #tpu.memory_space<vmem>>, vector<1x16x16xf32>
    %1233 = vector.shape_cast %1232 : vector<1x16x16xf32> to vector<16x16xf32>
    %1234 = vector.broadcast %1231 : f32 to vector<16x16xf32>
    %1235 = arith.mulf %1234, %1233 : vector<16x16xf32>
    %1236 = arith.addf %1230, %1235 : vector<16x16xf32>
    %c156 = arith.constant 156 : index
    %1237 = memref.load %arg2[%c156] : memref<288xf32, #tpu.memory_space<smem>>
    %c1_696 = arith.constant 1 : index
    %c1_697 = arith.constant 1 : index
    %c0_698 = arith.constant 0 : index
    %1238 = vector.load %arg5[%c1_696, %c1_697, %c0_698] : memref<4x18x18xf32, #tpu.memory_space<vmem>>, vector<1x16x16xf32>
    %1239 = vector.shape_cast %1238 : vector<1x16x16xf32> to vector<16x16xf32>
    %1240 = vector.broadcast %1237 : f32 to vector<16x16xf32>
    %1241 = arith.mulf %1240, %1239 : vector<16x16xf32>
    %1242 = arith.addf %1236, %1241 : vector<16x16xf32>
    %c157 = arith.constant 157 : index
    %1243 = memref.load %arg2[%c157] : memref<288xf32, #tpu.memory_space<smem>>
    %c1_699 = arith.constant 1 : index
    %c1_700 = arith.constant 1 : index
    %c1_701 = arith.constant 1 : index
    %1244 = vector.load %arg5[%c1_699, %c1_700, %c1_701] : memref<4x18x18xf32, #tpu.memory_space<vmem>>, vector<1x16x16xf32>
    %1245 = vector.shape_cast %1244 : vector<1x16x16xf32> to vector<16x16xf32>
    %1246 = vector.broadcast %1243 : f32 to vector<16x16xf32>
    %1247 = arith.mulf %1246, %1245 : vector<16x16xf32>
    %1248 = arith.addf %1242, %1247 : vector<16x16xf32>
    %c158 = arith.constant 158 : index
    %1249 = memref.load %arg2[%c158] : memref<288xf32, #tpu.memory_space<smem>>
    %c1_702 = arith.constant 1 : index
    %c1_703 = arith.constant 1 : index
    %c2_704 = arith.constant 2 : index
    %1250 = vector.load %arg5[%c1_702, %c1_703, %c2_704] : memref<4x18x18xf32, #tpu.memory_space<vmem>>, vector<1x16x16xf32>
    %1251 = vector.shape_cast %1250 : vector<1x16x16xf32> to vector<16x16xf32>
    %1252 = vector.broadcast %1249 : f32 to vector<16x16xf32>
    %1253 = arith.mulf %1252, %1251 : vector<16x16xf32>
    %1254 = arith.addf %1248, %1253 : vector<16x16xf32>
    %c159 = arith.constant 159 : index
    %1255 = memref.load %arg2[%c159] : memref<288xf32, #tpu.memory_space<smem>>
    %c1_705 = arith.constant 1 : index
    %c2_706 = arith.constant 2 : index
    %c0_707 = arith.constant 0 : index
    %1256 = vector.load %arg5[%c1_705, %c2_706, %c0_707] : memref<4x18x18xf32, #tpu.memory_space<vmem>>, vector<1x16x16xf32>
    %1257 = vector.shape_cast %1256 : vector<1x16x16xf32> to vector<16x16xf32>
    %1258 = vector.broadcast %1255 : f32 to vector<16x16xf32>
    %1259 = arith.mulf %1258, %1257 : vector<16x16xf32>
    %1260 = arith.addf %1254, %1259 : vector<16x16xf32>
    %c160 = arith.constant 160 : index
    %1261 = memref.load %arg2[%c160] : memref<288xf32, #tpu.memory_space<smem>>
    %c1_708 = arith.constant 1 : index
    %c2_709 = arith.constant 2 : index
    %c1_710 = arith.constant 1 : index
    %1262 = vector.load %arg5[%c1_708, %c2_709, %c1_710] : memref<4x18x18xf32, #tpu.memory_space<vmem>>, vector<1x16x16xf32>
    %1263 = vector.shape_cast %1262 : vector<1x16x16xf32> to vector<16x16xf32>
    %1264 = vector.broadcast %1261 : f32 to vector<16x16xf32>
    %1265 = arith.mulf %1264, %1263 : vector<16x16xf32>
    %1266 = arith.addf %1260, %1265 : vector<16x16xf32>
    %c161 = arith.constant 161 : index
    %1267 = memref.load %arg2[%c161] : memref<288xf32, #tpu.memory_space<smem>>
    %c1_711 = arith.constant 1 : index
    %c2_712 = arith.constant 2 : index
    %c2_713 = arith.constant 2 : index
    %1268 = vector.load %arg5[%c1_711, %c2_712, %c2_713] : memref<4x18x18xf32, #tpu.memory_space<vmem>>, vector<1x16x16xf32>
    %1269 = vector.shape_cast %1268 : vector<1x16x16xf32> to vector<16x16xf32>
    %1270 = vector.broadcast %1267 : f32 to vector<16x16xf32>
    %1271 = arith.mulf %1270, %1269 : vector<16x16xf32>
    %1272 = arith.addf %1266, %1271 : vector<16x16xf32>
    %c162 = arith.constant 162 : index
    %1273 = memref.load %arg2[%c162] : memref<288xf32, #tpu.memory_space<smem>>
    %c2_714 = arith.constant 2 : index
    %c0_715 = arith.constant 0 : index
    %c0_716 = arith.constant 0 : index
    %1274 = vector.load %arg5[%c2_714, %c0_715, %c0_716] : memref<4x18x18xf32, #tpu.memory_space<vmem>>, vector<1x16x16xf32>
    %1275 = vector.shape_cast %1274 : vector<1x16x16xf32> to vector<16x16xf32>
    %1276 = vector.broadcast %1273 : f32 to vector<16x16xf32>
    %1277 = arith.mulf %1276, %1275 : vector<16x16xf32>
    %1278 = arith.addf %1272, %1277 : vector<16x16xf32>
    %c163 = arith.constant 163 : index
    %1279 = memref.load %arg2[%c163] : memref<288xf32, #tpu.memory_space<smem>>
    %c2_717 = arith.constant 2 : index
    %c0_718 = arith.constant 0 : index
    %c1_719 = arith.constant 1 : index
    %1280 = vector.load %arg5[%c2_717, %c0_718, %c1_719] : memref<4x18x18xf32, #tpu.memory_space<vmem>>, vector<1x16x16xf32>
    %1281 = vector.shape_cast %1280 : vector<1x16x16xf32> to vector<16x16xf32>
    %1282 = vector.broadcast %1279 : f32 to vector<16x16xf32>
    %1283 = arith.mulf %1282, %1281 : vector<16x16xf32>
    %1284 = arith.addf %1278, %1283 : vector<16x16xf32>
    %c164 = arith.constant 164 : index
    %1285 = memref.load %arg2[%c164] : memref<288xf32, #tpu.memory_space<smem>>
    %c2_720 = arith.constant 2 : index
    %c0_721 = arith.constant 0 : index
    %c2_722 = arith.constant 2 : index
    %1286 = vector.load %arg5[%c2_720, %c0_721, %c2_722] : memref<4x18x18xf32, #tpu.memory_space<vmem>>, vector<1x16x16xf32>
    %1287 = vector.shape_cast %1286 : vector<1x16x16xf32> to vector<16x16xf32>
    %1288 = vector.broadcast %1285 : f32 to vector<16x16xf32>
    %1289 = arith.mulf %1288, %1287 : vector<16x16xf32>
    %1290 = arith.addf %1284, %1289 : vector<16x16xf32>
    %c165 = arith.constant 165 : index
    %1291 = memref.load %arg2[%c165] : memref<288xf32, #tpu.memory_space<smem>>
    %c2_723 = arith.constant 2 : index
    %c1_724 = arith.constant 1 : index
    %c0_725 = arith.constant 0 : index
    %1292 = vector.load %arg5[%c2_723, %c1_724, %c0_725] : memref<4x18x18xf32, #tpu.memory_space<vmem>>, vector<1x16x16xf32>
    %1293 = vector.shape_cast %1292 : vector<1x16x16xf32> to vector<16x16xf32>
    %1294 = vector.broadcast %1291 : f32 to vector<16x16xf32>
    %1295 = arith.mulf %1294, %1293 : vector<16x16xf32>
    %1296 = arith.addf %1290, %1295 : vector<16x16xf32>
    %c166 = arith.constant 166 : index
    %1297 = memref.load %arg2[%c166] : memref<288xf32, #tpu.memory_space<smem>>
    %c2_726 = arith.constant 2 : index
    %c1_727 = arith.constant 1 : index
    %c1_728 = arith.constant 1 : index
    %1298 = vector.load %arg5[%c2_726, %c1_727, %c1_728] : memref<4x18x18xf32, #tpu.memory_space<vmem>>, vector<1x16x16xf32>
    %1299 = vector.shape_cast %1298 : vector<1x16x16xf32> to vector<16x16xf32>
    %1300 = vector.broadcast %1297 : f32 to vector<16x16xf32>
    %1301 = arith.mulf %1300, %1299 : vector<16x16xf32>
    %1302 = arith.addf %1296, %1301 : vector<16x16xf32>
    %c167 = arith.constant 167 : index
    %1303 = memref.load %arg2[%c167] : memref<288xf32, #tpu.memory_space<smem>>
    %c2_729 = arith.constant 2 : index
    %c1_730 = arith.constant 1 : index
    %c2_731 = arith.constant 2 : index
    %1304 = vector.load %arg5[%c2_729, %c1_730, %c2_731] : memref<4x18x18xf32, #tpu.memory_space<vmem>>, vector<1x16x16xf32>
    %1305 = vector.shape_cast %1304 : vector<1x16x16xf32> to vector<16x16xf32>
    %1306 = vector.broadcast %1303 : f32 to vector<16x16xf32>
    %1307 = arith.mulf %1306, %1305 : vector<16x16xf32>
    %1308 = arith.addf %1302, %1307 : vector<16x16xf32>
    %c168 = arith.constant 168 : index
    %1309 = memref.load %arg2[%c168] : memref<288xf32, #tpu.memory_space<smem>>
    %c2_732 = arith.constant 2 : index
    %c2_733 = arith.constant 2 : index
    %c0_734 = arith.constant 0 : index
    %1310 = vector.load %arg5[%c2_732, %c2_733, %c0_734] : memref<4x18x18xf32, #tpu.memory_space<vmem>>, vector<1x16x16xf32>
    %1311 = vector.shape_cast %1310 : vector<1x16x16xf32> to vector<16x16xf32>
    %1312 = vector.broadcast %1309 : f32 to vector<16x16xf32>
    %1313 = arith.mulf %1312, %1311 : vector<16x16xf32>
    %1314 = arith.addf %1308, %1313 : vector<16x16xf32>
    %c169 = arith.constant 169 : index
    %1315 = memref.load %arg2[%c169] : memref<288xf32, #tpu.memory_space<smem>>
    %c2_735 = arith.constant 2 : index
    %c2_736 = arith.constant 2 : index
    %c1_737 = arith.constant 1 : index
    %1316 = vector.load %arg5[%c2_735, %c2_736, %c1_737] : memref<4x18x18xf32, #tpu.memory_space<vmem>>, vector<1x16x16xf32>
    %1317 = vector.shape_cast %1316 : vector<1x16x16xf32> to vector<16x16xf32>
    %1318 = vector.broadcast %1315 : f32 to vector<16x16xf32>
    %1319 = arith.mulf %1318, %1317 : vector<16x16xf32>
    %1320 = arith.addf %1314, %1319 : vector<16x16xf32>
    %c170 = arith.constant 170 : index
    %1321 = memref.load %arg2[%c170] : memref<288xf32, #tpu.memory_space<smem>>
    %c2_738 = arith.constant 2 : index
    %c2_739 = arith.constant 2 : index
    %c2_740 = arith.constant 2 : index
    %1322 = vector.load %arg5[%c2_738, %c2_739, %c2_740] : memref<4x18x18xf32, #tpu.memory_space<vmem>>, vector<1x16x16xf32>
    %1323 = vector.shape_cast %1322 : vector<1x16x16xf32> to vector<16x16xf32>
    %1324 = vector.broadcast %1321 : f32 to vector<16x16xf32>
    %1325 = arith.mulf %1324, %1323 : vector<16x16xf32>
    %1326 = arith.addf %1320, %1325 : vector<16x16xf32>
    %c171 = arith.constant 171 : index
    %1327 = memref.load %arg2[%c171] : memref<288xf32, #tpu.memory_space<smem>>
    %c3_741 = arith.constant 3 : index
    %c0_742 = arith.constant 0 : index
    %c0_743 = arith.constant 0 : index
    %1328 = vector.load %arg5[%c3_741, %c0_742, %c0_743] : memref<4x18x18xf32, #tpu.memory_space<vmem>>, vector<1x16x16xf32>
    %1329 = vector.shape_cast %1328 : vector<1x16x16xf32> to vector<16x16xf32>
    %1330 = vector.broadcast %1327 : f32 to vector<16x16xf32>
    %1331 = arith.mulf %1330, %1329 : vector<16x16xf32>
    %1332 = arith.addf %1326, %1331 : vector<16x16xf32>
    %c172 = arith.constant 172 : index
    %1333 = memref.load %arg2[%c172] : memref<288xf32, #tpu.memory_space<smem>>
    %c3_744 = arith.constant 3 : index
    %c0_745 = arith.constant 0 : index
    %c1_746 = arith.constant 1 : index
    %1334 = vector.load %arg5[%c3_744, %c0_745, %c1_746] : memref<4x18x18xf32, #tpu.memory_space<vmem>>, vector<1x16x16xf32>
    %1335 = vector.shape_cast %1334 : vector<1x16x16xf32> to vector<16x16xf32>
    %1336 = vector.broadcast %1333 : f32 to vector<16x16xf32>
    %1337 = arith.mulf %1336, %1335 : vector<16x16xf32>
    %1338 = arith.addf %1332, %1337 : vector<16x16xf32>
    %c173 = arith.constant 173 : index
    %1339 = memref.load %arg2[%c173] : memref<288xf32, #tpu.memory_space<smem>>
    %c3_747 = arith.constant 3 : index
    %c0_748 = arith.constant 0 : index
    %c2_749 = arith.constant 2 : index
    %1340 = vector.load %arg5[%c3_747, %c0_748, %c2_749] : memref<4x18x18xf32, #tpu.memory_space<vmem>>, vector<1x16x16xf32>
    %1341 = vector.shape_cast %1340 : vector<1x16x16xf32> to vector<16x16xf32>
    %1342 = vector.broadcast %1339 : f32 to vector<16x16xf32>
    %1343 = arith.mulf %1342, %1341 : vector<16x16xf32>
    %1344 = arith.addf %1338, %1343 : vector<16x16xf32>
    %c174 = arith.constant 174 : index
    %1345 = memref.load %arg2[%c174] : memref<288xf32, #tpu.memory_space<smem>>
    %c3_750 = arith.constant 3 : index
    %c1_751 = arith.constant 1 : index
    %c0_752 = arith.constant 0 : index
    %1346 = vector.load %arg5[%c3_750, %c1_751, %c0_752] : memref<4x18x18xf32, #tpu.memory_space<vmem>>, vector<1x16x16xf32>
    %1347 = vector.shape_cast %1346 : vector<1x16x16xf32> to vector<16x16xf32>
    %1348 = vector.broadcast %1345 : f32 to vector<16x16xf32>
    %1349 = arith.mulf %1348, %1347 : vector<16x16xf32>
    %1350 = arith.addf %1344, %1349 : vector<16x16xf32>
    %c175 = arith.constant 175 : index
    %1351 = memref.load %arg2[%c175] : memref<288xf32, #tpu.memory_space<smem>>
    %c3_753 = arith.constant 3 : index
    %c1_754 = arith.constant 1 : index
    %c1_755 = arith.constant 1 : index
    %1352 = vector.load %arg5[%c3_753, %c1_754, %c1_755] : memref<4x18x18xf32, #tpu.memory_space<vmem>>, vector<1x16x16xf32>
    %1353 = vector.shape_cast %1352 : vector<1x16x16xf32> to vector<16x16xf32>
    %1354 = vector.broadcast %1351 : f32 to vector<16x16xf32>
    %1355 = arith.mulf %1354, %1353 : vector<16x16xf32>
    %1356 = arith.addf %1350, %1355 : vector<16x16xf32>
    %c176 = arith.constant 176 : index
    %1357 = memref.load %arg2[%c176] : memref<288xf32, #tpu.memory_space<smem>>
    %c3_756 = arith.constant 3 : index
    %c1_757 = arith.constant 1 : index
    %c2_758 = arith.constant 2 : index
    %1358 = vector.load %arg5[%c3_756, %c1_757, %c2_758] : memref<4x18x18xf32, #tpu.memory_space<vmem>>, vector<1x16x16xf32>
    %1359 = vector.shape_cast %1358 : vector<1x16x16xf32> to vector<16x16xf32>
    %1360 = vector.broadcast %1357 : f32 to vector<16x16xf32>
    %1361 = arith.mulf %1360, %1359 : vector<16x16xf32>
    %1362 = arith.addf %1356, %1361 : vector<16x16xf32>
    %c177 = arith.constant 177 : index
    %1363 = memref.load %arg2[%c177] : memref<288xf32, #tpu.memory_space<smem>>
    %c3_759 = arith.constant 3 : index
    %c2_760 = arith.constant 2 : index
    %c0_761 = arith.constant 0 : index
    %1364 = vector.load %arg5[%c3_759, %c2_760, %c0_761] : memref<4x18x18xf32, #tpu.memory_space<vmem>>, vector<1x16x16xf32>
    %1365 = vector.shape_cast %1364 : vector<1x16x16xf32> to vector<16x16xf32>
    %1366 = vector.broadcast %1363 : f32 to vector<16x16xf32>
    %1367 = arith.mulf %1366, %1365 : vector<16x16xf32>
    %1368 = arith.addf %1362, %1367 : vector<16x16xf32>
    %c178 = arith.constant 178 : index
    %1369 = memref.load %arg2[%c178] : memref<288xf32, #tpu.memory_space<smem>>
    %c3_762 = arith.constant 3 : index
    %c2_763 = arith.constant 2 : index
    %c1_764 = arith.constant 1 : index
    %1370 = vector.load %arg5[%c3_762, %c2_763, %c1_764] : memref<4x18x18xf32, #tpu.memory_space<vmem>>, vector<1x16x16xf32>
    %1371 = vector.shape_cast %1370 : vector<1x16x16xf32> to vector<16x16xf32>
    %1372 = vector.broadcast %1369 : f32 to vector<16x16xf32>
    %1373 = arith.mulf %1372, %1371 : vector<16x16xf32>
    %1374 = arith.addf %1368, %1373 : vector<16x16xf32>
    %c179 = arith.constant 179 : index
    %1375 = memref.load %arg2[%c179] : memref<288xf32, #tpu.memory_space<smem>>
    %c3_765 = arith.constant 3 : index
    %c2_766 = arith.constant 2 : index
    %c2_767 = arith.constant 2 : index
    %1376 = vector.load %arg5[%c3_765, %c2_766, %c2_767] : memref<4x18x18xf32, #tpu.memory_space<vmem>>, vector<1x16x16xf32>
    %1377 = vector.shape_cast %1376 : vector<1x16x16xf32> to vector<16x16xf32>
    %1378 = vector.broadcast %1375 : f32 to vector<16x16xf32>
    %1379 = arith.mulf %1378, %1377 : vector<16x16xf32>
    %1380 = arith.addf %1374, %1379 : vector<16x16xf32>
    %1381 = vector.shape_cast %1380 : vector<16x16xf32> to vector<1x16x16xf32>
    %cst_768 = arith.constant dense<0.000000e+00> : vector<1xf32>
    %1382 = vector.multi_reduction <add>, %1381, %cst_768 [1, 2] : vector<1x16x16xf32> to vector<1xf32>
    %1383 = vector.shape_cast %1382 : vector<1xf32> to vector<1x1x1xf32>
    %1384 = vector.extract %1383[0, 0, 0] : f32 from vector<1x1x1xf32>
    %1385 = vector.broadcast %1384 : f32 to vector<1x1xf32>
    %cst_769 = arith.constant 2.560000e+02 : f32
    %1386 = vector.broadcast %cst_769 : f32 to vector<1x1xf32>
    %1387 = arith.divf %1385, %1386 : vector<1x1xf32>
    %1388 = vector.broadcast %1387 : vector<1x1xf32> to vector<16x16xf32>
    %1389 = arith.subf %1380, %1388 : vector<16x16xf32>
    %1390 = arith.mulf %1389, %1389 : vector<16x16xf32>
    %1391 = vector.shape_cast %1390 : vector<16x16xf32> to vector<1x16x16xf32>
    %cst_770 = arith.constant dense<0.000000e+00> : vector<1xf32>
    %1392 = vector.multi_reduction <add>, %1391, %cst_770 [1, 2] : vector<1x16x16xf32> to vector<1xf32>
    %1393 = vector.shape_cast %1392 : vector<1xf32> to vector<1x1x1xf32>
    %1394 = vector.extract %1393[0, 0, 0] : f32 from vector<1x1x1xf32>
    %1395 = vector.broadcast %1394 : f32 to vector<1x1xf32>
    %cst_771 = arith.constant 2.560000e+02 : f32
    %1396 = vector.broadcast %cst_771 : f32 to vector<1x1xf32>
    %1397 = arith.divf %1395, %1396 : vector<1x1xf32>
    %cst_772 = arith.constant 9.99999974E-6 : f32
    %1398 = vector.broadcast %cst_772 : f32 to vector<1x1xf32>
    %1399 = arith.addf %1397, %1398 : vector<1x1xf32>
    %1400 = math.rsqrt %1399 : vector<1x1xf32>
    %1401 = vector.broadcast %1400 : vector<1x1xf32> to vector<16x16xf32>
    %1402 = arith.mulf %1389, %1401 : vector<16x16xf32>
    %c2_773 = arith.constant 2 : index
    %c0_774 = arith.constant 0 : index
    %1403 = memref.load %arg3[%c2_773, %c0_774] : memref<4x4xf32, #tpu.memory_space<smem>>
    %1404 = vector.broadcast %1403 : f32 to vector<16x16xf32>
    %1405 = arith.mulf %1402, %1404 : vector<16x16xf32>
    %c3_775 = arith.constant 3 : index
    %c0_776 = arith.constant 0 : index
    %1406 = memref.load %arg3[%c3_775, %c0_776] : memref<4x4xf32, #tpu.memory_space<smem>>
    %1407 = vector.broadcast %1406 : f32 to vector<16x16xf32>
    %1408 = arith.addf %1405, %1407 : vector<16x16xf32>
    %cst_777 = arith.constant 0.000000e+00 : f32
    %1409 = vector.broadcast %cst_777 : f32 to vector<16x16xf32>
    %c180 = arith.constant 180 : index
    %1410 = memref.load %arg2[%c180] : memref<288xf32, #tpu.memory_space<smem>>
    %c0_778 = arith.constant 0 : index
    %c0_779 = arith.constant 0 : index
    %c0_780 = arith.constant 0 : index
    %1411 = vector.load %arg5[%c0_778, %c0_779, %c0_780] : memref<4x18x18xf32, #tpu.memory_space<vmem>>, vector<1x16x16xf32>
    %1412 = vector.shape_cast %1411 : vector<1x16x16xf32> to vector<16x16xf32>
    %1413 = vector.broadcast %1410 : f32 to vector<16x16xf32>
    %1414 = arith.mulf %1413, %1412 : vector<16x16xf32>
    %1415 = arith.addf %1409, %1414 : vector<16x16xf32>
    %c181 = arith.constant 181 : index
    %1416 = memref.load %arg2[%c181] : memref<288xf32, #tpu.memory_space<smem>>
    %c0_781 = arith.constant 0 : index
    %c0_782 = arith.constant 0 : index
    %c1_783 = arith.constant 1 : index
    %1417 = vector.load %arg5[%c0_781, %c0_782, %c1_783] : memref<4x18x18xf32, #tpu.memory_space<vmem>>, vector<1x16x16xf32>
    %1418 = vector.shape_cast %1417 : vector<1x16x16xf32> to vector<16x16xf32>
    %1419 = vector.broadcast %1416 : f32 to vector<16x16xf32>
    %1420 = arith.mulf %1419, %1418 : vector<16x16xf32>
    %1421 = arith.addf %1415, %1420 : vector<16x16xf32>
    %c182 = arith.constant 182 : index
    %1422 = memref.load %arg2[%c182] : memref<288xf32, #tpu.memory_space<smem>>
    %c0_784 = arith.constant 0 : index
    %c0_785 = arith.constant 0 : index
    %c2_786 = arith.constant 2 : index
    %1423 = vector.load %arg5[%c0_784, %c0_785, %c2_786] : memref<4x18x18xf32, #tpu.memory_space<vmem>>, vector<1x16x16xf32>
    %1424 = vector.shape_cast %1423 : vector<1x16x16xf32> to vector<16x16xf32>
    %1425 = vector.broadcast %1422 : f32 to vector<16x16xf32>
    %1426 = arith.mulf %1425, %1424 : vector<16x16xf32>
    %1427 = arith.addf %1421, %1426 : vector<16x16xf32>
    %c183 = arith.constant 183 : index
    %1428 = memref.load %arg2[%c183] : memref<288xf32, #tpu.memory_space<smem>>
    %c0_787 = arith.constant 0 : index
    %c1_788 = arith.constant 1 : index
    %c0_789 = arith.constant 0 : index
    %1429 = vector.load %arg5[%c0_787, %c1_788, %c0_789] : memref<4x18x18xf32, #tpu.memory_space<vmem>>, vector<1x16x16xf32>
    %1430 = vector.shape_cast %1429 : vector<1x16x16xf32> to vector<16x16xf32>
    %1431 = vector.broadcast %1428 : f32 to vector<16x16xf32>
    %1432 = arith.mulf %1431, %1430 : vector<16x16xf32>
    %1433 = arith.addf %1427, %1432 : vector<16x16xf32>
    %c184 = arith.constant 184 : index
    %1434 = memref.load %arg2[%c184] : memref<288xf32, #tpu.memory_space<smem>>
    %c0_790 = arith.constant 0 : index
    %c1_791 = arith.constant 1 : index
    %c1_792 = arith.constant 1 : index
    %1435 = vector.load %arg5[%c0_790, %c1_791, %c1_792] : memref<4x18x18xf32, #tpu.memory_space<vmem>>, vector<1x16x16xf32>
    %1436 = vector.shape_cast %1435 : vector<1x16x16xf32> to vector<16x16xf32>
    %1437 = vector.broadcast %1434 : f32 to vector<16x16xf32>
    %1438 = arith.mulf %1437, %1436 : vector<16x16xf32>
    %1439 = arith.addf %1433, %1438 : vector<16x16xf32>
    %c185 = arith.constant 185 : index
    %1440 = memref.load %arg2[%c185] : memref<288xf32, #tpu.memory_space<smem>>
    %c0_793 = arith.constant 0 : index
    %c1_794 = arith.constant 1 : index
    %c2_795 = arith.constant 2 : index
    %1441 = vector.load %arg5[%c0_793, %c1_794, %c2_795] : memref<4x18x18xf32, #tpu.memory_space<vmem>>, vector<1x16x16xf32>
    %1442 = vector.shape_cast %1441 : vector<1x16x16xf32> to vector<16x16xf32>
    %1443 = vector.broadcast %1440 : f32 to vector<16x16xf32>
    %1444 = arith.mulf %1443, %1442 : vector<16x16xf32>
    %1445 = arith.addf %1439, %1444 : vector<16x16xf32>
    %c186 = arith.constant 186 : index
    %1446 = memref.load %arg2[%c186] : memref<288xf32, #tpu.memory_space<smem>>
    %c0_796 = arith.constant 0 : index
    %c2_797 = arith.constant 2 : index
    %c0_798 = arith.constant 0 : index
    %1447 = vector.load %arg5[%c0_796, %c2_797, %c0_798] : memref<4x18x18xf32, #tpu.memory_space<vmem>>, vector<1x16x16xf32>
    %1448 = vector.shape_cast %1447 : vector<1x16x16xf32> to vector<16x16xf32>
    %1449 = vector.broadcast %1446 : f32 to vector<16x16xf32>
    %1450 = arith.mulf %1449, %1448 : vector<16x16xf32>
    %1451 = arith.addf %1445, %1450 : vector<16x16xf32>
    %c187 = arith.constant 187 : index
    %1452 = memref.load %arg2[%c187] : memref<288xf32, #tpu.memory_space<smem>>
    %c0_799 = arith.constant 0 : index
    %c2_800 = arith.constant 2 : index
    %c1_801 = arith.constant 1 : index
    %1453 = vector.load %arg5[%c0_799, %c2_800, %c1_801] : memref<4x18x18xf32, #tpu.memory_space<vmem>>, vector<1x16x16xf32>
    %1454 = vector.shape_cast %1453 : vector<1x16x16xf32> to vector<16x16xf32>
    %1455 = vector.broadcast %1452 : f32 to vector<16x16xf32>
    %1456 = arith.mulf %1455, %1454 : vector<16x16xf32>
    %1457 = arith.addf %1451, %1456 : vector<16x16xf32>
    %c188 = arith.constant 188 : index
    %1458 = memref.load %arg2[%c188] : memref<288xf32, #tpu.memory_space<smem>>
    %c0_802 = arith.constant 0 : index
    %c2_803 = arith.constant 2 : index
    %c2_804 = arith.constant 2 : index
    %1459 = vector.load %arg5[%c0_802, %c2_803, %c2_804] : memref<4x18x18xf32, #tpu.memory_space<vmem>>, vector<1x16x16xf32>
    %1460 = vector.shape_cast %1459 : vector<1x16x16xf32> to vector<16x16xf32>
    %1461 = vector.broadcast %1458 : f32 to vector<16x16xf32>
    %1462 = arith.mulf %1461, %1460 : vector<16x16xf32>
    %1463 = arith.addf %1457, %1462 : vector<16x16xf32>
    %c189 = arith.constant 189 : index
    %1464 = memref.load %arg2[%c189] : memref<288xf32, #tpu.memory_space<smem>>
    %c1_805 = arith.constant 1 : index
    %c0_806 = arith.constant 0 : index
    %c0_807 = arith.constant 0 : index
    %1465 = vector.load %arg5[%c1_805, %c0_806, %c0_807] : memref<4x18x18xf32, #tpu.memory_space<vmem>>, vector<1x16x16xf32>
    %1466 = vector.shape_cast %1465 : vector<1x16x16xf32> to vector<16x16xf32>
    %1467 = vector.broadcast %1464 : f32 to vector<16x16xf32>
    %1468 = arith.mulf %1467, %1466 : vector<16x16xf32>
    %1469 = arith.addf %1463, %1468 : vector<16x16xf32>
    %c190 = arith.constant 190 : index
    %1470 = memref.load %arg2[%c190] : memref<288xf32, #tpu.memory_space<smem>>
    %c1_808 = arith.constant 1 : index
    %c0_809 = arith.constant 0 : index
    %c1_810 = arith.constant 1 : index
    %1471 = vector.load %arg5[%c1_808, %c0_809, %c1_810] : memref<4x18x18xf32, #tpu.memory_space<vmem>>, vector<1x16x16xf32>
    %1472 = vector.shape_cast %1471 : vector<1x16x16xf32> to vector<16x16xf32>
    %1473 = vector.broadcast %1470 : f32 to vector<16x16xf32>
    %1474 = arith.mulf %1473, %1472 : vector<16x16xf32>
    %1475 = arith.addf %1469, %1474 : vector<16x16xf32>
    %c191 = arith.constant 191 : index
    %1476 = memref.load %arg2[%c191] : memref<288xf32, #tpu.memory_space<smem>>
    %c1_811 = arith.constant 1 : index
    %c0_812 = arith.constant 0 : index
    %c2_813 = arith.constant 2 : index
    %1477 = vector.load %arg5[%c1_811, %c0_812, %c2_813] : memref<4x18x18xf32, #tpu.memory_space<vmem>>, vector<1x16x16xf32>
    %1478 = vector.shape_cast %1477 : vector<1x16x16xf32> to vector<16x16xf32>
    %1479 = vector.broadcast %1476 : f32 to vector<16x16xf32>
    %1480 = arith.mulf %1479, %1478 : vector<16x16xf32>
    %1481 = arith.addf %1475, %1480 : vector<16x16xf32>
    %c192 = arith.constant 192 : index
    %1482 = memref.load %arg2[%c192] : memref<288xf32, #tpu.memory_space<smem>>
    %c1_814 = arith.constant 1 : index
    %c1_815 = arith.constant 1 : index
    %c0_816 = arith.constant 0 : index
    %1483 = vector.load %arg5[%c1_814, %c1_815, %c0_816] : memref<4x18x18xf32, #tpu.memory_space<vmem>>, vector<1x16x16xf32>
    %1484 = vector.shape_cast %1483 : vector<1x16x16xf32> to vector<16x16xf32>
    %1485 = vector.broadcast %1482 : f32 to vector<16x16xf32>
    %1486 = arith.mulf %1485, %1484 : vector<16x16xf32>
    %1487 = arith.addf %1481, %1486 : vector<16x16xf32>
    %c193 = arith.constant 193 : index
    %1488 = memref.load %arg2[%c193] : memref<288xf32, #tpu.memory_space<smem>>
    %c1_817 = arith.constant 1 : index
    %c1_818 = arith.constant 1 : index
    %c1_819 = arith.constant 1 : index
    %1489 = vector.load %arg5[%c1_817, %c1_818, %c1_819] : memref<4x18x18xf32, #tpu.memory_space<vmem>>, vector<1x16x16xf32>
    %1490 = vector.shape_cast %1489 : vector<1x16x16xf32> to vector<16x16xf32>
    %1491 = vector.broadcast %1488 : f32 to vector<16x16xf32>
    %1492 = arith.mulf %1491, %1490 : vector<16x16xf32>
    %1493 = arith.addf %1487, %1492 : vector<16x16xf32>
    %c194 = arith.constant 194 : index
    %1494 = memref.load %arg2[%c194] : memref<288xf32, #tpu.memory_space<smem>>
    %c1_820 = arith.constant 1 : index
    %c1_821 = arith.constant 1 : index
    %c2_822 = arith.constant 2 : index
    %1495 = vector.load %arg5[%c1_820, %c1_821, %c2_822] : memref<4x18x18xf32, #tpu.memory_space<vmem>>, vector<1x16x16xf32>
    %1496 = vector.shape_cast %1495 : vector<1x16x16xf32> to vector<16x16xf32>
    %1497 = vector.broadcast %1494 : f32 to vector<16x16xf32>
    %1498 = arith.mulf %1497, %1496 : vector<16x16xf32>
    %1499 = arith.addf %1493, %1498 : vector<16x16xf32>
    %c195 = arith.constant 195 : index
    %1500 = memref.load %arg2[%c195] : memref<288xf32, #tpu.memory_space<smem>>
    %c1_823 = arith.constant 1 : index
    %c2_824 = arith.constant 2 : index
    %c0_825 = arith.constant 0 : index
    %1501 = vector.load %arg5[%c1_823, %c2_824, %c0_825] : memref<4x18x18xf32, #tpu.memory_space<vmem>>, vector<1x16x16xf32>
    %1502 = vector.shape_cast %1501 : vector<1x16x16xf32> to vector<16x16xf32>
    %1503 = vector.broadcast %1500 : f32 to vector<16x16xf32>
    %1504 = arith.mulf %1503, %1502 : vector<16x16xf32>
    %1505 = arith.addf %1499, %1504 : vector<16x16xf32>
    %c196 = arith.constant 196 : index
    %1506 = memref.load %arg2[%c196] : memref<288xf32, #tpu.memory_space<smem>>
    %c1_826 = arith.constant 1 : index
    %c2_827 = arith.constant 2 : index
    %c1_828 = arith.constant 1 : index
    %1507 = vector.load %arg5[%c1_826, %c2_827, %c1_828] : memref<4x18x18xf32, #tpu.memory_space<vmem>>, vector<1x16x16xf32>
    %1508 = vector.shape_cast %1507 : vector<1x16x16xf32> to vector<16x16xf32>
    %1509 = vector.broadcast %1506 : f32 to vector<16x16xf32>
    %1510 = arith.mulf %1509, %1508 : vector<16x16xf32>
    %1511 = arith.addf %1505, %1510 : vector<16x16xf32>
    %c197 = arith.constant 197 : index
    %1512 = memref.load %arg2[%c197] : memref<288xf32, #tpu.memory_space<smem>>
    %c1_829 = arith.constant 1 : index
    %c2_830 = arith.constant 2 : index
    %c2_831 = arith.constant 2 : index
    %1513 = vector.load %arg5[%c1_829, %c2_830, %c2_831] : memref<4x18x18xf32, #tpu.memory_space<vmem>>, vector<1x16x16xf32>
    %1514 = vector.shape_cast %1513 : vector<1x16x16xf32> to vector<16x16xf32>
    %1515 = vector.broadcast %1512 : f32 to vector<16x16xf32>
    %1516 = arith.mulf %1515, %1514 : vector<16x16xf32>
    %1517 = arith.addf %1511, %1516 : vector<16x16xf32>
    %c198 = arith.constant 198 : index
    %1518 = memref.load %arg2[%c198] : memref<288xf32, #tpu.memory_space<smem>>
    %c2_832 = arith.constant 2 : index
    %c0_833 = arith.constant 0 : index
    %c0_834 = arith.constant 0 : index
    %1519 = vector.load %arg5[%c2_832, %c0_833, %c0_834] : memref<4x18x18xf32, #tpu.memory_space<vmem>>, vector<1x16x16xf32>
    %1520 = vector.shape_cast %1519 : vector<1x16x16xf32> to vector<16x16xf32>
    %1521 = vector.broadcast %1518 : f32 to vector<16x16xf32>
    %1522 = arith.mulf %1521, %1520 : vector<16x16xf32>
    %1523 = arith.addf %1517, %1522 : vector<16x16xf32>
    %c199 = arith.constant 199 : index
    %1524 = memref.load %arg2[%c199] : memref<288xf32, #tpu.memory_space<smem>>
    %c2_835 = arith.constant 2 : index
    %c0_836 = arith.constant 0 : index
    %c1_837 = arith.constant 1 : index
    %1525 = vector.load %arg5[%c2_835, %c0_836, %c1_837] : memref<4x18x18xf32, #tpu.memory_space<vmem>>, vector<1x16x16xf32>
    %1526 = vector.shape_cast %1525 : vector<1x16x16xf32> to vector<16x16xf32>
    %1527 = vector.broadcast %1524 : f32 to vector<16x16xf32>
    %1528 = arith.mulf %1527, %1526 : vector<16x16xf32>
    %1529 = arith.addf %1523, %1528 : vector<16x16xf32>
    %c200 = arith.constant 200 : index
    %1530 = memref.load %arg2[%c200] : memref<288xf32, #tpu.memory_space<smem>>
    %c2_838 = arith.constant 2 : index
    %c0_839 = arith.constant 0 : index
    %c2_840 = arith.constant 2 : index
    %1531 = vector.load %arg5[%c2_838, %c0_839, %c2_840] : memref<4x18x18xf32, #tpu.memory_space<vmem>>, vector<1x16x16xf32>
    %1532 = vector.shape_cast %1531 : vector<1x16x16xf32> to vector<16x16xf32>
    %1533 = vector.broadcast %1530 : f32 to vector<16x16xf32>
    %1534 = arith.mulf %1533, %1532 : vector<16x16xf32>
    %1535 = arith.addf %1529, %1534 : vector<16x16xf32>
    %c201 = arith.constant 201 : index
    %1536 = memref.load %arg2[%c201] : memref<288xf32, #tpu.memory_space<smem>>
    %c2_841 = arith.constant 2 : index
    %c1_842 = arith.constant 1 : index
    %c0_843 = arith.constant 0 : index
    %1537 = vector.load %arg5[%c2_841, %c1_842, %c0_843] : memref<4x18x18xf32, #tpu.memory_space<vmem>>, vector<1x16x16xf32>
    %1538 = vector.shape_cast %1537 : vector<1x16x16xf32> to vector<16x16xf32>
    %1539 = vector.broadcast %1536 : f32 to vector<16x16xf32>
    %1540 = arith.mulf %1539, %1538 : vector<16x16xf32>
    %1541 = arith.addf %1535, %1540 : vector<16x16xf32>
    %c202 = arith.constant 202 : index
    %1542 = memref.load %arg2[%c202] : memref<288xf32, #tpu.memory_space<smem>>
    %c2_844 = arith.constant 2 : index
    %c1_845 = arith.constant 1 : index
    %c1_846 = arith.constant 1 : index
    %1543 = vector.load %arg5[%c2_844, %c1_845, %c1_846] : memref<4x18x18xf32, #tpu.memory_space<vmem>>, vector<1x16x16xf32>
    %1544 = vector.shape_cast %1543 : vector<1x16x16xf32> to vector<16x16xf32>
    %1545 = vector.broadcast %1542 : f32 to vector<16x16xf32>
    %1546 = arith.mulf %1545, %1544 : vector<16x16xf32>
    %1547 = arith.addf %1541, %1546 : vector<16x16xf32>
    %c203 = arith.constant 203 : index
    %1548 = memref.load %arg2[%c203] : memref<288xf32, #tpu.memory_space<smem>>
    %c2_847 = arith.constant 2 : index
    %c1_848 = arith.constant 1 : index
    %c2_849 = arith.constant 2 : index
    %1549 = vector.load %arg5[%c2_847, %c1_848, %c2_849] : memref<4x18x18xf32, #tpu.memory_space<vmem>>, vector<1x16x16xf32>
    %1550 = vector.shape_cast %1549 : vector<1x16x16xf32> to vector<16x16xf32>
    %1551 = vector.broadcast %1548 : f32 to vector<16x16xf32>
    %1552 = arith.mulf %1551, %1550 : vector<16x16xf32>
    %1553 = arith.addf %1547, %1552 : vector<16x16xf32>
    %c204 = arith.constant 204 : index
    %1554 = memref.load %arg2[%c204] : memref<288xf32, #tpu.memory_space<smem>>
    %c2_850 = arith.constant 2 : index
    %c2_851 = arith.constant 2 : index
    %c0_852 = arith.constant 0 : index
    %1555 = vector.load %arg5[%c2_850, %c2_851, %c0_852] : memref<4x18x18xf32, #tpu.memory_space<vmem>>, vector<1x16x16xf32>
    %1556 = vector.shape_cast %1555 : vector<1x16x16xf32> to vector<16x16xf32>
    %1557 = vector.broadcast %1554 : f32 to vector<16x16xf32>
    %1558 = arith.mulf %1557, %1556 : vector<16x16xf32>
    %1559 = arith.addf %1553, %1558 : vector<16x16xf32>
    %c205 = arith.constant 205 : index
    %1560 = memref.load %arg2[%c205] : memref<288xf32, #tpu.memory_space<smem>>
    %c2_853 = arith.constant 2 : index
    %c2_854 = arith.constant 2 : index
    %c1_855 = arith.constant 1 : index
    %1561 = vector.load %arg5[%c2_853, %c2_854, %c1_855] : memref<4x18x18xf32, #tpu.memory_space<vmem>>, vector<1x16x16xf32>
    %1562 = vector.shape_cast %1561 : vector<1x16x16xf32> to vector<16x16xf32>
    %1563 = vector.broadcast %1560 : f32 to vector<16x16xf32>
    %1564 = arith.mulf %1563, %1562 : vector<16x16xf32>
    %1565 = arith.addf %1559, %1564 : vector<16x16xf32>
    %c206 = arith.constant 206 : index
    %1566 = memref.load %arg2[%c206] : memref<288xf32, #tpu.memory_space<smem>>
    %c2_856 = arith.constant 2 : index
    %c2_857 = arith.constant 2 : index
    %c2_858 = arith.constant 2 : index
    %1567 = vector.load %arg5[%c2_856, %c2_857, %c2_858] : memref<4x18x18xf32, #tpu.memory_space<vmem>>, vector<1x16x16xf32>
    %1568 = vector.shape_cast %1567 : vector<1x16x16xf32> to vector<16x16xf32>
    %1569 = vector.broadcast %1566 : f32 to vector<16x16xf32>
    %1570 = arith.mulf %1569, %1568 : vector<16x16xf32>
    %1571 = arith.addf %1565, %1570 : vector<16x16xf32>
    %c207 = arith.constant 207 : index
    %1572 = memref.load %arg2[%c207] : memref<288xf32, #tpu.memory_space<smem>>
    %c3_859 = arith.constant 3 : index
    %c0_860 = arith.constant 0 : index
    %c0_861 = arith.constant 0 : index
    %1573 = vector.load %arg5[%c3_859, %c0_860, %c0_861] : memref<4x18x18xf32, #tpu.memory_space<vmem>>, vector<1x16x16xf32>
    %1574 = vector.shape_cast %1573 : vector<1x16x16xf32> to vector<16x16xf32>
    %1575 = vector.broadcast %1572 : f32 to vector<16x16xf32>
    %1576 = arith.mulf %1575, %1574 : vector<16x16xf32>
    %1577 = arith.addf %1571, %1576 : vector<16x16xf32>
    %c208 = arith.constant 208 : index
    %1578 = memref.load %arg2[%c208] : memref<288xf32, #tpu.memory_space<smem>>
    %c3_862 = arith.constant 3 : index
    %c0_863 = arith.constant 0 : index
    %c1_864 = arith.constant 1 : index
    %1579 = vector.load %arg5[%c3_862, %c0_863, %c1_864] : memref<4x18x18xf32, #tpu.memory_space<vmem>>, vector<1x16x16xf32>
    %1580 = vector.shape_cast %1579 : vector<1x16x16xf32> to vector<16x16xf32>
    %1581 = vector.broadcast %1578 : f32 to vector<16x16xf32>
    %1582 = arith.mulf %1581, %1580 : vector<16x16xf32>
    %1583 = arith.addf %1577, %1582 : vector<16x16xf32>
    %c209 = arith.constant 209 : index
    %1584 = memref.load %arg2[%c209] : memref<288xf32, #tpu.memory_space<smem>>
    %c3_865 = arith.constant 3 : index
    %c0_866 = arith.constant 0 : index
    %c2_867 = arith.constant 2 : index
    %1585 = vector.load %arg5[%c3_865, %c0_866, %c2_867] : memref<4x18x18xf32, #tpu.memory_space<vmem>>, vector<1x16x16xf32>
    %1586 = vector.shape_cast %1585 : vector<1x16x16xf32> to vector<16x16xf32>
    %1587 = vector.broadcast %1584 : f32 to vector<16x16xf32>
    %1588 = arith.mulf %1587, %1586 : vector<16x16xf32>
    %1589 = arith.addf %1583, %1588 : vector<16x16xf32>
    %c210 = arith.constant 210 : index
    %1590 = memref.load %arg2[%c210] : memref<288xf32, #tpu.memory_space<smem>>
    %c3_868 = arith.constant 3 : index
    %c1_869 = arith.constant 1 : index
    %c0_870 = arith.constant 0 : index
    %1591 = vector.load %arg5[%c3_868, %c1_869, %c0_870] : memref<4x18x18xf32, #tpu.memory_space<vmem>>, vector<1x16x16xf32>
    %1592 = vector.shape_cast %1591 : vector<1x16x16xf32> to vector<16x16xf32>
    %1593 = vector.broadcast %1590 : f32 to vector<16x16xf32>
    %1594 = arith.mulf %1593, %1592 : vector<16x16xf32>
    %1595 = arith.addf %1589, %1594 : vector<16x16xf32>
    %c211 = arith.constant 211 : index
    %1596 = memref.load %arg2[%c211] : memref<288xf32, #tpu.memory_space<smem>>
    %c3_871 = arith.constant 3 : index
    %c1_872 = arith.constant 1 : index
    %c1_873 = arith.constant 1 : index
    %1597 = vector.load %arg5[%c3_871, %c1_872, %c1_873] : memref<4x18x18xf32, #tpu.memory_space<vmem>>, vector<1x16x16xf32>
    %1598 = vector.shape_cast %1597 : vector<1x16x16xf32> to vector<16x16xf32>
    %1599 = vector.broadcast %1596 : f32 to vector<16x16xf32>
    %1600 = arith.mulf %1599, %1598 : vector<16x16xf32>
    %1601 = arith.addf %1595, %1600 : vector<16x16xf32>
    %c212 = arith.constant 212 : index
    %1602 = memref.load %arg2[%c212] : memref<288xf32, #tpu.memory_space<smem>>
    %c3_874 = arith.constant 3 : index
    %c1_875 = arith.constant 1 : index
    %c2_876 = arith.constant 2 : index
    %1603 = vector.load %arg5[%c3_874, %c1_875, %c2_876] : memref<4x18x18xf32, #tpu.memory_space<vmem>>, vector<1x16x16xf32>
    %1604 = vector.shape_cast %1603 : vector<1x16x16xf32> to vector<16x16xf32>
    %1605 = vector.broadcast %1602 : f32 to vector<16x16xf32>
    %1606 = arith.mulf %1605, %1604 : vector<16x16xf32>
    %1607 = arith.addf %1601, %1606 : vector<16x16xf32>
    %c213 = arith.constant 213 : index
    %1608 = memref.load %arg2[%c213] : memref<288xf32, #tpu.memory_space<smem>>
    %c3_877 = arith.constant 3 : index
    %c2_878 = arith.constant 2 : index
    %c0_879 = arith.constant 0 : index
    %1609 = vector.load %arg5[%c3_877, %c2_878, %c0_879] : memref<4x18x18xf32, #tpu.memory_space<vmem>>, vector<1x16x16xf32>
    %1610 = vector.shape_cast %1609 : vector<1x16x16xf32> to vector<16x16xf32>
    %1611 = vector.broadcast %1608 : f32 to vector<16x16xf32>
    %1612 = arith.mulf %1611, %1610 : vector<16x16xf32>
    %1613 = arith.addf %1607, %1612 : vector<16x16xf32>
    %c214 = arith.constant 214 : index
    %1614 = memref.load %arg2[%c214] : memref<288xf32, #tpu.memory_space<smem>>
    %c3_880 = arith.constant 3 : index
    %c2_881 = arith.constant 2 : index
    %c1_882 = arith.constant 1 : index
    %1615 = vector.load %arg5[%c3_880, %c2_881, %c1_882] : memref<4x18x18xf32, #tpu.memory_space<vmem>>, vector<1x16x16xf32>
    %1616 = vector.shape_cast %1615 : vector<1x16x16xf32> to vector<16x16xf32>
    %1617 = vector.broadcast %1614 : f32 to vector<16x16xf32>
    %1618 = arith.mulf %1617, %1616 : vector<16x16xf32>
    %1619 = arith.addf %1613, %1618 : vector<16x16xf32>
    %c215 = arith.constant 215 : index
    %1620 = memref.load %arg2[%c215] : memref<288xf32, #tpu.memory_space<smem>>
    %c3_883 = arith.constant 3 : index
    %c2_884 = arith.constant 2 : index
    %c2_885 = arith.constant 2 : index
    %1621 = vector.load %arg5[%c3_883, %c2_884, %c2_885] : memref<4x18x18xf32, #tpu.memory_space<vmem>>, vector<1x16x16xf32>
    %1622 = vector.shape_cast %1621 : vector<1x16x16xf32> to vector<16x16xf32>
    %1623 = vector.broadcast %1620 : f32 to vector<16x16xf32>
    %1624 = arith.mulf %1623, %1622 : vector<16x16xf32>
    %1625 = arith.addf %1619, %1624 : vector<16x16xf32>
    %1626 = vector.shape_cast %1625 : vector<16x16xf32> to vector<1x16x16xf32>
    %cst_886 = arith.constant dense<0.000000e+00> : vector<1xf32>
    %1627 = vector.multi_reduction <add>, %1626, %cst_886 [1, 2] : vector<1x16x16xf32> to vector<1xf32>
    %1628 = vector.shape_cast %1627 : vector<1xf32> to vector<1x1x1xf32>
    %1629 = vector.extract %1628[0, 0, 0] : f32 from vector<1x1x1xf32>
    %1630 = vector.broadcast %1629 : f32 to vector<1x1xf32>
    %cst_887 = arith.constant 2.560000e+02 : f32
    %1631 = vector.broadcast %cst_887 : f32 to vector<1x1xf32>
    %1632 = arith.divf %1630, %1631 : vector<1x1xf32>
    %1633 = vector.broadcast %1632 : vector<1x1xf32> to vector<16x16xf32>
    %1634 = arith.subf %1625, %1633 : vector<16x16xf32>
    %1635 = arith.mulf %1634, %1634 : vector<16x16xf32>
    %1636 = vector.shape_cast %1635 : vector<16x16xf32> to vector<1x16x16xf32>
    %cst_888 = arith.constant dense<0.000000e+00> : vector<1xf32>
    %1637 = vector.multi_reduction <add>, %1636, %cst_888 [1, 2] : vector<1x16x16xf32> to vector<1xf32>
    %1638 = vector.shape_cast %1637 : vector<1xf32> to vector<1x1x1xf32>
    %1639 = vector.extract %1638[0, 0, 0] : f32 from vector<1x1x1xf32>
    %1640 = vector.broadcast %1639 : f32 to vector<1x1xf32>
    %cst_889 = arith.constant 2.560000e+02 : f32
    %1641 = vector.broadcast %cst_889 : f32 to vector<1x1xf32>
    %1642 = arith.divf %1640, %1641 : vector<1x1xf32>
    %cst_890 = arith.constant 9.99999974E-6 : f32
    %1643 = vector.broadcast %cst_890 : f32 to vector<1x1xf32>
    %1644 = arith.addf %1642, %1643 : vector<1x1xf32>
    %1645 = math.rsqrt %1644 : vector<1x1xf32>
    %1646 = vector.broadcast %1645 : vector<1x1xf32> to vector<16x16xf32>
    %1647 = arith.mulf %1634, %1646 : vector<16x16xf32>
    %c2_891 = arith.constant 2 : index
    %c1_892 = arith.constant 1 : index
    %1648 = memref.load %arg3[%c2_891, %c1_892] : memref<4x4xf32, #tpu.memory_space<smem>>
    %1649 = vector.broadcast %1648 : f32 to vector<16x16xf32>
    %1650 = arith.mulf %1647, %1649 : vector<16x16xf32>
    %c3_893 = arith.constant 3 : index
    %c1_894 = arith.constant 1 : index
    %1651 = memref.load %arg3[%c3_893, %c1_894] : memref<4x4xf32, #tpu.memory_space<smem>>
    %1652 = vector.broadcast %1651 : f32 to vector<16x16xf32>
    %1653 = arith.addf %1650, %1652 : vector<16x16xf32>
    %cst_895 = arith.constant 0.000000e+00 : f32
    %1654 = vector.broadcast %cst_895 : f32 to vector<16x16xf32>
    %c216 = arith.constant 216 : index
    %1655 = memref.load %arg2[%c216] : memref<288xf32, #tpu.memory_space<smem>>
    %c0_896 = arith.constant 0 : index
    %c0_897 = arith.constant 0 : index
    %c0_898 = arith.constant 0 : index
    %1656 = vector.load %arg5[%c0_896, %c0_897, %c0_898] : memref<4x18x18xf32, #tpu.memory_space<vmem>>, vector<1x16x16xf32>
    %1657 = vector.shape_cast %1656 : vector<1x16x16xf32> to vector<16x16xf32>
    %1658 = vector.broadcast %1655 : f32 to vector<16x16xf32>
    %1659 = arith.mulf %1658, %1657 : vector<16x16xf32>
    %1660 = arith.addf %1654, %1659 : vector<16x16xf32>
    %c217 = arith.constant 217 : index
    %1661 = memref.load %arg2[%c217] : memref<288xf32, #tpu.memory_space<smem>>
    %c0_899 = arith.constant 0 : index
    %c0_900 = arith.constant 0 : index
    %c1_901 = arith.constant 1 : index
    %1662 = vector.load %arg5[%c0_899, %c0_900, %c1_901] : memref<4x18x18xf32, #tpu.memory_space<vmem>>, vector<1x16x16xf32>
    %1663 = vector.shape_cast %1662 : vector<1x16x16xf32> to vector<16x16xf32>
    %1664 = vector.broadcast %1661 : f32 to vector<16x16xf32>
    %1665 = arith.mulf %1664, %1663 : vector<16x16xf32>
    %1666 = arith.addf %1660, %1665 : vector<16x16xf32>
    %c218 = arith.constant 218 : index
    %1667 = memref.load %arg2[%c218] : memref<288xf32, #tpu.memory_space<smem>>
    %c0_902 = arith.constant 0 : index
    %c0_903 = arith.constant 0 : index
    %c2_904 = arith.constant 2 : index
    %1668 = vector.load %arg5[%c0_902, %c0_903, %c2_904] : memref<4x18x18xf32, #tpu.memory_space<vmem>>, vector<1x16x16xf32>
    %1669 = vector.shape_cast %1668 : vector<1x16x16xf32> to vector<16x16xf32>
    %1670 = vector.broadcast %1667 : f32 to vector<16x16xf32>
    %1671 = arith.mulf %1670, %1669 : vector<16x16xf32>
    %1672 = arith.addf %1666, %1671 : vector<16x16xf32>
    %c219 = arith.constant 219 : index
    %1673 = memref.load %arg2[%c219] : memref<288xf32, #tpu.memory_space<smem>>
    %c0_905 = arith.constant 0 : index
    %c1_906 = arith.constant 1 : index
    %c0_907 = arith.constant 0 : index
    %1674 = vector.load %arg5[%c0_905, %c1_906, %c0_907] : memref<4x18x18xf32, #tpu.memory_space<vmem>>, vector<1x16x16xf32>
    %1675 = vector.shape_cast %1674 : vector<1x16x16xf32> to vector<16x16xf32>
    %1676 = vector.broadcast %1673 : f32 to vector<16x16xf32>
    %1677 = arith.mulf %1676, %1675 : vector<16x16xf32>
    %1678 = arith.addf %1672, %1677 : vector<16x16xf32>
    %c220 = arith.constant 220 : index
    %1679 = memref.load %arg2[%c220] : memref<288xf32, #tpu.memory_space<smem>>
    %c0_908 = arith.constant 0 : index
    %c1_909 = arith.constant 1 : index
    %c1_910 = arith.constant 1 : index
    %1680 = vector.load %arg5[%c0_908, %c1_909, %c1_910] : memref<4x18x18xf32, #tpu.memory_space<vmem>>, vector<1x16x16xf32>
    %1681 = vector.shape_cast %1680 : vector<1x16x16xf32> to vector<16x16xf32>
    %1682 = vector.broadcast %1679 : f32 to vector<16x16xf32>
    %1683 = arith.mulf %1682, %1681 : vector<16x16xf32>
    %1684 = arith.addf %1678, %1683 : vector<16x16xf32>
    %c221 = arith.constant 221 : index
    %1685 = memref.load %arg2[%c221] : memref<288xf32, #tpu.memory_space<smem>>
    %c0_911 = arith.constant 0 : index
    %c1_912 = arith.constant 1 : index
    %c2_913 = arith.constant 2 : index
    %1686 = vector.load %arg5[%c0_911, %c1_912, %c2_913] : memref<4x18x18xf32, #tpu.memory_space<vmem>>, vector<1x16x16xf32>
    %1687 = vector.shape_cast %1686 : vector<1x16x16xf32> to vector<16x16xf32>
    %1688 = vector.broadcast %1685 : f32 to vector<16x16xf32>
    %1689 = arith.mulf %1688, %1687 : vector<16x16xf32>
    %1690 = arith.addf %1684, %1689 : vector<16x16xf32>
    %c222 = arith.constant 222 : index
    %1691 = memref.load %arg2[%c222] : memref<288xf32, #tpu.memory_space<smem>>
    %c0_914 = arith.constant 0 : index
    %c2_915 = arith.constant 2 : index
    %c0_916 = arith.constant 0 : index
    %1692 = vector.load %arg5[%c0_914, %c2_915, %c0_916] : memref<4x18x18xf32, #tpu.memory_space<vmem>>, vector<1x16x16xf32>
    %1693 = vector.shape_cast %1692 : vector<1x16x16xf32> to vector<16x16xf32>
    %1694 = vector.broadcast %1691 : f32 to vector<16x16xf32>
    %1695 = arith.mulf %1694, %1693 : vector<16x16xf32>
    %1696 = arith.addf %1690, %1695 : vector<16x16xf32>
    %c223 = arith.constant 223 : index
    %1697 = memref.load %arg2[%c223] : memref<288xf32, #tpu.memory_space<smem>>
    %c0_917 = arith.constant 0 : index
    %c2_918 = arith.constant 2 : index
    %c1_919 = arith.constant 1 : index
    %1698 = vector.load %arg5[%c0_917, %c2_918, %c1_919] : memref<4x18x18xf32, #tpu.memory_space<vmem>>, vector<1x16x16xf32>
    %1699 = vector.shape_cast %1698 : vector<1x16x16xf32> to vector<16x16xf32>
    %1700 = vector.broadcast %1697 : f32 to vector<16x16xf32>
    %1701 = arith.mulf %1700, %1699 : vector<16x16xf32>
    %1702 = arith.addf %1696, %1701 : vector<16x16xf32>
    %c224 = arith.constant 224 : index
    %1703 = memref.load %arg2[%c224] : memref<288xf32, #tpu.memory_space<smem>>
    %c0_920 = arith.constant 0 : index
    %c2_921 = arith.constant 2 : index
    %c2_922 = arith.constant 2 : index
    %1704 = vector.load %arg5[%c0_920, %c2_921, %c2_922] : memref<4x18x18xf32, #tpu.memory_space<vmem>>, vector<1x16x16xf32>
    %1705 = vector.shape_cast %1704 : vector<1x16x16xf32> to vector<16x16xf32>
    %1706 = vector.broadcast %1703 : f32 to vector<16x16xf32>
    %1707 = arith.mulf %1706, %1705 : vector<16x16xf32>
    %1708 = arith.addf %1702, %1707 : vector<16x16xf32>
    %c225 = arith.constant 225 : index
    %1709 = memref.load %arg2[%c225] : memref<288xf32, #tpu.memory_space<smem>>
    %c1_923 = arith.constant 1 : index
    %c0_924 = arith.constant 0 : index
    %c0_925 = arith.constant 0 : index
    %1710 = vector.load %arg5[%c1_923, %c0_924, %c0_925] : memref<4x18x18xf32, #tpu.memory_space<vmem>>, vector<1x16x16xf32>
    %1711 = vector.shape_cast %1710 : vector<1x16x16xf32> to vector<16x16xf32>
    %1712 = vector.broadcast %1709 : f32 to vector<16x16xf32>
    %1713 = arith.mulf %1712, %1711 : vector<16x16xf32>
    %1714 = arith.addf %1708, %1713 : vector<16x16xf32>
    %c226 = arith.constant 226 : index
    %1715 = memref.load %arg2[%c226] : memref<288xf32, #tpu.memory_space<smem>>
    %c1_926 = arith.constant 1 : index
    %c0_927 = arith.constant 0 : index
    %c1_928 = arith.constant 1 : index
    %1716 = vector.load %arg5[%c1_926, %c0_927, %c1_928] : memref<4x18x18xf32, #tpu.memory_space<vmem>>, vector<1x16x16xf32>
    %1717 = vector.shape_cast %1716 : vector<1x16x16xf32> to vector<16x16xf32>
    %1718 = vector.broadcast %1715 : f32 to vector<16x16xf32>
    %1719 = arith.mulf %1718, %1717 : vector<16x16xf32>
    %1720 = arith.addf %1714, %1719 : vector<16x16xf32>
    %c227 = arith.constant 227 : index
    %1721 = memref.load %arg2[%c227] : memref<288xf32, #tpu.memory_space<smem>>
    %c1_929 = arith.constant 1 : index
    %c0_930 = arith.constant 0 : index
    %c2_931 = arith.constant 2 : index
    %1722 = vector.load %arg5[%c1_929, %c0_930, %c2_931] : memref<4x18x18xf32, #tpu.memory_space<vmem>>, vector<1x16x16xf32>
    %1723 = vector.shape_cast %1722 : vector<1x16x16xf32> to vector<16x16xf32>
    %1724 = vector.broadcast %1721 : f32 to vector<16x16xf32>
    %1725 = arith.mulf %1724, %1723 : vector<16x16xf32>
    %1726 = arith.addf %1720, %1725 : vector<16x16xf32>
    %c228 = arith.constant 228 : index
    %1727 = memref.load %arg2[%c228] : memref<288xf32, #tpu.memory_space<smem>>
    %c1_932 = arith.constant 1 : index
    %c1_933 = arith.constant 1 : index
    %c0_934 = arith.constant 0 : index
    %1728 = vector.load %arg5[%c1_932, %c1_933, %c0_934] : memref<4x18x18xf32, #tpu.memory_space<vmem>>, vector<1x16x16xf32>
    %1729 = vector.shape_cast %1728 : vector<1x16x16xf32> to vector<16x16xf32>
    %1730 = vector.broadcast %1727 : f32 to vector<16x16xf32>
    %1731 = arith.mulf %1730, %1729 : vector<16x16xf32>
    %1732 = arith.addf %1726, %1731 : vector<16x16xf32>
    %c229 = arith.constant 229 : index
    %1733 = memref.load %arg2[%c229] : memref<288xf32, #tpu.memory_space<smem>>
    %c1_935 = arith.constant 1 : index
    %c1_936 = arith.constant 1 : index
    %c1_937 = arith.constant 1 : index
    %1734 = vector.load %arg5[%c1_935, %c1_936, %c1_937] : memref<4x18x18xf32, #tpu.memory_space<vmem>>, vector<1x16x16xf32>
    %1735 = vector.shape_cast %1734 : vector<1x16x16xf32> to vector<16x16xf32>
    %1736 = vector.broadcast %1733 : f32 to vector<16x16xf32>
    %1737 = arith.mulf %1736, %1735 : vector<16x16xf32>
    %1738 = arith.addf %1732, %1737 : vector<16x16xf32>
    %c230 = arith.constant 230 : index
    %1739 = memref.load %arg2[%c230] : memref<288xf32, #tpu.memory_space<smem>>
    %c1_938 = arith.constant 1 : index
    %c1_939 = arith.constant 1 : index
    %c2_940 = arith.constant 2 : index
    %1740 = vector.load %arg5[%c1_938, %c1_939, %c2_940] : memref<4x18x18xf32, #tpu.memory_space<vmem>>, vector<1x16x16xf32>
    %1741 = vector.shape_cast %1740 : vector<1x16x16xf32> to vector<16x16xf32>
    %1742 = vector.broadcast %1739 : f32 to vector<16x16xf32>
    %1743 = arith.mulf %1742, %1741 : vector<16x16xf32>
    %1744 = arith.addf %1738, %1743 : vector<16x16xf32>
    %c231 = arith.constant 231 : index
    %1745 = memref.load %arg2[%c231] : memref<288xf32, #tpu.memory_space<smem>>
    %c1_941 = arith.constant 1 : index
    %c2_942 = arith.constant 2 : index
    %c0_943 = arith.constant 0 : index
    %1746 = vector.load %arg5[%c1_941, %c2_942, %c0_943] : memref<4x18x18xf32, #tpu.memory_space<vmem>>, vector<1x16x16xf32>
    %1747 = vector.shape_cast %1746 : vector<1x16x16xf32> to vector<16x16xf32>
    %1748 = vector.broadcast %1745 : f32 to vector<16x16xf32>
    %1749 = arith.mulf %1748, %1747 : vector<16x16xf32>
    %1750 = arith.addf %1744, %1749 : vector<16x16xf32>
    %c232 = arith.constant 232 : index
    %1751 = memref.load %arg2[%c232] : memref<288xf32, #tpu.memory_space<smem>>
    %c1_944 = arith.constant 1 : index
    %c2_945 = arith.constant 2 : index
    %c1_946 = arith.constant 1 : index
    %1752 = vector.load %arg5[%c1_944, %c2_945, %c1_946] : memref<4x18x18xf32, #tpu.memory_space<vmem>>, vector<1x16x16xf32>
    %1753 = vector.shape_cast %1752 : vector<1x16x16xf32> to vector<16x16xf32>
    %1754 = vector.broadcast %1751 : f32 to vector<16x16xf32>
    %1755 = arith.mulf %1754, %1753 : vector<16x16xf32>
    %1756 = arith.addf %1750, %1755 : vector<16x16xf32>
    %c233 = arith.constant 233 : index
    %1757 = memref.load %arg2[%c233] : memref<288xf32, #tpu.memory_space<smem>>
    %c1_947 = arith.constant 1 : index
    %c2_948 = arith.constant 2 : index
    %c2_949 = arith.constant 2 : index
    %1758 = vector.load %arg5[%c1_947, %c2_948, %c2_949] : memref<4x18x18xf32, #tpu.memory_space<vmem>>, vector<1x16x16xf32>
    %1759 = vector.shape_cast %1758 : vector<1x16x16xf32> to vector<16x16xf32>
    %1760 = vector.broadcast %1757 : f32 to vector<16x16xf32>
    %1761 = arith.mulf %1760, %1759 : vector<16x16xf32>
    %1762 = arith.addf %1756, %1761 : vector<16x16xf32>
    %c234 = arith.constant 234 : index
    %1763 = memref.load %arg2[%c234] : memref<288xf32, #tpu.memory_space<smem>>
    %c2_950 = arith.constant 2 : index
    %c0_951 = arith.constant 0 : index
    %c0_952 = arith.constant 0 : index
    %1764 = vector.load %arg5[%c2_950, %c0_951, %c0_952] : memref<4x18x18xf32, #tpu.memory_space<vmem>>, vector<1x16x16xf32>
    %1765 = vector.shape_cast %1764 : vector<1x16x16xf32> to vector<16x16xf32>
    %1766 = vector.broadcast %1763 : f32 to vector<16x16xf32>
    %1767 = arith.mulf %1766, %1765 : vector<16x16xf32>
    %1768 = arith.addf %1762, %1767 : vector<16x16xf32>
    %c235 = arith.constant 235 : index
    %1769 = memref.load %arg2[%c235] : memref<288xf32, #tpu.memory_space<smem>>
    %c2_953 = arith.constant 2 : index
    %c0_954 = arith.constant 0 : index
    %c1_955 = arith.constant 1 : index
    %1770 = vector.load %arg5[%c2_953, %c0_954, %c1_955] : memref<4x18x18xf32, #tpu.memory_space<vmem>>, vector<1x16x16xf32>
    %1771 = vector.shape_cast %1770 : vector<1x16x16xf32> to vector<16x16xf32>
    %1772 = vector.broadcast %1769 : f32 to vector<16x16xf32>
    %1773 = arith.mulf %1772, %1771 : vector<16x16xf32>
    %1774 = arith.addf %1768, %1773 : vector<16x16xf32>
    %c236 = arith.constant 236 : index
    %1775 = memref.load %arg2[%c236] : memref<288xf32, #tpu.memory_space<smem>>
    %c2_956 = arith.constant 2 : index
    %c0_957 = arith.constant 0 : index
    %c2_958 = arith.constant 2 : index
    %1776 = vector.load %arg5[%c2_956, %c0_957, %c2_958] : memref<4x18x18xf32, #tpu.memory_space<vmem>>, vector<1x16x16xf32>
    %1777 = vector.shape_cast %1776 : vector<1x16x16xf32> to vector<16x16xf32>
    %1778 = vector.broadcast %1775 : f32 to vector<16x16xf32>
    %1779 = arith.mulf %1778, %1777 : vector<16x16xf32>
    %1780 = arith.addf %1774, %1779 : vector<16x16xf32>
    %c237 = arith.constant 237 : index
    %1781 = memref.load %arg2[%c237] : memref<288xf32, #tpu.memory_space<smem>>
    %c2_959 = arith.constant 2 : index
    %c1_960 = arith.constant 1 : index
    %c0_961 = arith.constant 0 : index
    %1782 = vector.load %arg5[%c2_959, %c1_960, %c0_961] : memref<4x18x18xf32, #tpu.memory_space<vmem>>, vector<1x16x16xf32>
    %1783 = vector.shape_cast %1782 : vector<1x16x16xf32> to vector<16x16xf32>
    %1784 = vector.broadcast %1781 : f32 to vector<16x16xf32>
    %1785 = arith.mulf %1784, %1783 : vector<16x16xf32>
    %1786 = arith.addf %1780, %1785 : vector<16x16xf32>
    %c238 = arith.constant 238 : index
    %1787 = memref.load %arg2[%c238] : memref<288xf32, #tpu.memory_space<smem>>
    %c2_962 = arith.constant 2 : index
    %c1_963 = arith.constant 1 : index
    %c1_964 = arith.constant 1 : index
    %1788 = vector.load %arg5[%c2_962, %c1_963, %c1_964] : memref<4x18x18xf32, #tpu.memory_space<vmem>>, vector<1x16x16xf32>
    %1789 = vector.shape_cast %1788 : vector<1x16x16xf32> to vector<16x16xf32>
    %1790 = vector.broadcast %1787 : f32 to vector<16x16xf32>
    %1791 = arith.mulf %1790, %1789 : vector<16x16xf32>
    %1792 = arith.addf %1786, %1791 : vector<16x16xf32>
    %c239 = arith.constant 239 : index
    %1793 = memref.load %arg2[%c239] : memref<288xf32, #tpu.memory_space<smem>>
    %c2_965 = arith.constant 2 : index
    %c1_966 = arith.constant 1 : index
    %c2_967 = arith.constant 2 : index
    %1794 = vector.load %arg5[%c2_965, %c1_966, %c2_967] : memref<4x18x18xf32, #tpu.memory_space<vmem>>, vector<1x16x16xf32>
    %1795 = vector.shape_cast %1794 : vector<1x16x16xf32> to vector<16x16xf32>
    %1796 = vector.broadcast %1793 : f32 to vector<16x16xf32>
    %1797 = arith.mulf %1796, %1795 : vector<16x16xf32>
    %1798 = arith.addf %1792, %1797 : vector<16x16xf32>
    %c240 = arith.constant 240 : index
    %1799 = memref.load %arg2[%c240] : memref<288xf32, #tpu.memory_space<smem>>
    %c2_968 = arith.constant 2 : index
    %c2_969 = arith.constant 2 : index
    %c0_970 = arith.constant 0 : index
    %1800 = vector.load %arg5[%c2_968, %c2_969, %c0_970] : memref<4x18x18xf32, #tpu.memory_space<vmem>>, vector<1x16x16xf32>
    %1801 = vector.shape_cast %1800 : vector<1x16x16xf32> to vector<16x16xf32>
    %1802 = vector.broadcast %1799 : f32 to vector<16x16xf32>
    %1803 = arith.mulf %1802, %1801 : vector<16x16xf32>
    %1804 = arith.addf %1798, %1803 : vector<16x16xf32>
    %c241 = arith.constant 241 : index
    %1805 = memref.load %arg2[%c241] : memref<288xf32, #tpu.memory_space<smem>>
    %c2_971 = arith.constant 2 : index
    %c2_972 = arith.constant 2 : index
    %c1_973 = arith.constant 1 : index
    %1806 = vector.load %arg5[%c2_971, %c2_972, %c1_973] : memref<4x18x18xf32, #tpu.memory_space<vmem>>, vector<1x16x16xf32>
    %1807 = vector.shape_cast %1806 : vector<1x16x16xf32> to vector<16x16xf32>
    %1808 = vector.broadcast %1805 : f32 to vector<16x16xf32>
    %1809 = arith.mulf %1808, %1807 : vector<16x16xf32>
    %1810 = arith.addf %1804, %1809 : vector<16x16xf32>
    %c242 = arith.constant 242 : index
    %1811 = memref.load %arg2[%c242] : memref<288xf32, #tpu.memory_space<smem>>
    %c2_974 = arith.constant 2 : index
    %c2_975 = arith.constant 2 : index
    %c2_976 = arith.constant 2 : index
    %1812 = vector.load %arg5[%c2_974, %c2_975, %c2_976] : memref<4x18x18xf32, #tpu.memory_space<vmem>>, vector<1x16x16xf32>
    %1813 = vector.shape_cast %1812 : vector<1x16x16xf32> to vector<16x16xf32>
    %1814 = vector.broadcast %1811 : f32 to vector<16x16xf32>
    %1815 = arith.mulf %1814, %1813 : vector<16x16xf32>
    %1816 = arith.addf %1810, %1815 : vector<16x16xf32>
    %c243 = arith.constant 243 : index
    %1817 = memref.load %arg2[%c243] : memref<288xf32, #tpu.memory_space<smem>>
    %c3_977 = arith.constant 3 : index
    %c0_978 = arith.constant 0 : index
    %c0_979 = arith.constant 0 : index
    %1818 = vector.load %arg5[%c3_977, %c0_978, %c0_979] : memref<4x18x18xf32, #tpu.memory_space<vmem>>, vector<1x16x16xf32>
    %1819 = vector.shape_cast %1818 : vector<1x16x16xf32> to vector<16x16xf32>
    %1820 = vector.broadcast %1817 : f32 to vector<16x16xf32>
    %1821 = arith.mulf %1820, %1819 : vector<16x16xf32>
    %1822 = arith.addf %1816, %1821 : vector<16x16xf32>
    %c244 = arith.constant 244 : index
    %1823 = memref.load %arg2[%c244] : memref<288xf32, #tpu.memory_space<smem>>
    %c3_980 = arith.constant 3 : index
    %c0_981 = arith.constant 0 : index
    %c1_982 = arith.constant 1 : index
    %1824 = vector.load %arg5[%c3_980, %c0_981, %c1_982] : memref<4x18x18xf32, #tpu.memory_space<vmem>>, vector<1x16x16xf32>
    %1825 = vector.shape_cast %1824 : vector<1x16x16xf32> to vector<16x16xf32>
    %1826 = vector.broadcast %1823 : f32 to vector<16x16xf32>
    %1827 = arith.mulf %1826, %1825 : vector<16x16xf32>
    %1828 = arith.addf %1822, %1827 : vector<16x16xf32>
    %c245 = arith.constant 245 : index
    %1829 = memref.load %arg2[%c245] : memref<288xf32, #tpu.memory_space<smem>>
    %c3_983 = arith.constant 3 : index
    %c0_984 = arith.constant 0 : index
    %c2_985 = arith.constant 2 : index
    %1830 = vector.load %arg5[%c3_983, %c0_984, %c2_985] : memref<4x18x18xf32, #tpu.memory_space<vmem>>, vector<1x16x16xf32>
    %1831 = vector.shape_cast %1830 : vector<1x16x16xf32> to vector<16x16xf32>
    %1832 = vector.broadcast %1829 : f32 to vector<16x16xf32>
    %1833 = arith.mulf %1832, %1831 : vector<16x16xf32>
    %1834 = arith.addf %1828, %1833 : vector<16x16xf32>
    %c246 = arith.constant 246 : index
    %1835 = memref.load %arg2[%c246] : memref<288xf32, #tpu.memory_space<smem>>
    %c3_986 = arith.constant 3 : index
    %c1_987 = arith.constant 1 : index
    %c0_988 = arith.constant 0 : index
    %1836 = vector.load %arg5[%c3_986, %c1_987, %c0_988] : memref<4x18x18xf32, #tpu.memory_space<vmem>>, vector<1x16x16xf32>
    %1837 = vector.shape_cast %1836 : vector<1x16x16xf32> to vector<16x16xf32>
    %1838 = vector.broadcast %1835 : f32 to vector<16x16xf32>
    %1839 = arith.mulf %1838, %1837 : vector<16x16xf32>
    %1840 = arith.addf %1834, %1839 : vector<16x16xf32>
    %c247 = arith.constant 247 : index
    %1841 = memref.load %arg2[%c247] : memref<288xf32, #tpu.memory_space<smem>>
    %c3_989 = arith.constant 3 : index
    %c1_990 = arith.constant 1 : index
    %c1_991 = arith.constant 1 : index
    %1842 = vector.load %arg5[%c3_989, %c1_990, %c1_991] : memref<4x18x18xf32, #tpu.memory_space<vmem>>, vector<1x16x16xf32>
    %1843 = vector.shape_cast %1842 : vector<1x16x16xf32> to vector<16x16xf32>
    %1844 = vector.broadcast %1841 : f32 to vector<16x16xf32>
    %1845 = arith.mulf %1844, %1843 : vector<16x16xf32>
    %1846 = arith.addf %1840, %1845 : vector<16x16xf32>
    %c248 = arith.constant 248 : index
    %1847 = memref.load %arg2[%c248] : memref<288xf32, #tpu.memory_space<smem>>
    %c3_992 = arith.constant 3 : index
    %c1_993 = arith.constant 1 : index
    %c2_994 = arith.constant 2 : index
    %1848 = vector.load %arg5[%c3_992, %c1_993, %c2_994] : memref<4x18x18xf32, #tpu.memory_space<vmem>>, vector<1x16x16xf32>
    %1849 = vector.shape_cast %1848 : vector<1x16x16xf32> to vector<16x16xf32>
    %1850 = vector.broadcast %1847 : f32 to vector<16x16xf32>
    %1851 = arith.mulf %1850, %1849 : vector<16x16xf32>
    %1852 = arith.addf %1846, %1851 : vector<16x16xf32>
    %c249 = arith.constant 249 : index
    %1853 = memref.load %arg2[%c249] : memref<288xf32, #tpu.memory_space<smem>>
    %c3_995 = arith.constant 3 : index
    %c2_996 = arith.constant 2 : index
    %c0_997 = arith.constant 0 : index
    %1854 = vector.load %arg5[%c3_995, %c2_996, %c0_997] : memref<4x18x18xf32, #tpu.memory_space<vmem>>, vector<1x16x16xf32>
    %1855 = vector.shape_cast %1854 : vector<1x16x16xf32> to vector<16x16xf32>
    %1856 = vector.broadcast %1853 : f32 to vector<16x16xf32>
    %1857 = arith.mulf %1856, %1855 : vector<16x16xf32>
    %1858 = arith.addf %1852, %1857 : vector<16x16xf32>
    %c250 = arith.constant 250 : index
    %1859 = memref.load %arg2[%c250] : memref<288xf32, #tpu.memory_space<smem>>
    %c3_998 = arith.constant 3 : index
    %c2_999 = arith.constant 2 : index
    %c1_1000 = arith.constant 1 : index
    %1860 = vector.load %arg5[%c3_998, %c2_999, %c1_1000] : memref<4x18x18xf32, #tpu.memory_space<vmem>>, vector<1x16x16xf32>
    %1861 = vector.shape_cast %1860 : vector<1x16x16xf32> to vector<16x16xf32>
    %1862 = vector.broadcast %1859 : f32 to vector<16x16xf32>
    %1863 = arith.mulf %1862, %1861 : vector<16x16xf32>
    %1864 = arith.addf %1858, %1863 : vector<16x16xf32>
    %c251 = arith.constant 251 : index
    %1865 = memref.load %arg2[%c251] : memref<288xf32, #tpu.memory_space<smem>>
    %c3_1001 = arith.constant 3 : index
    %c2_1002 = arith.constant 2 : index
    %c2_1003 = arith.constant 2 : index
    %1866 = vector.load %arg5[%c3_1001, %c2_1002, %c2_1003] : memref<4x18x18xf32, #tpu.memory_space<vmem>>, vector<1x16x16xf32>
    %1867 = vector.shape_cast %1866 : vector<1x16x16xf32> to vector<16x16xf32>
    %1868 = vector.broadcast %1865 : f32 to vector<16x16xf32>
    %1869 = arith.mulf %1868, %1867 : vector<16x16xf32>
    %1870 = arith.addf %1864, %1869 : vector<16x16xf32>
    %1871 = vector.shape_cast %1870 : vector<16x16xf32> to vector<1x16x16xf32>
    %cst_1004 = arith.constant dense<0.000000e+00> : vector<1xf32>
    %1872 = vector.multi_reduction <add>, %1871, %cst_1004 [1, 2] : vector<1x16x16xf32> to vector<1xf32>
    %1873 = vector.shape_cast %1872 : vector<1xf32> to vector<1x1x1xf32>
    %1874 = vector.extract %1873[0, 0, 0] : f32 from vector<1x1x1xf32>
    %1875 = vector.broadcast %1874 : f32 to vector<1x1xf32>
    %cst_1005 = arith.constant 2.560000e+02 : f32
    %1876 = vector.broadcast %cst_1005 : f32 to vector<1x1xf32>
    %1877 = arith.divf %1875, %1876 : vector<1x1xf32>
    %1878 = vector.broadcast %1877 : vector<1x1xf32> to vector<16x16xf32>
    %1879 = arith.subf %1870, %1878 : vector<16x16xf32>
    %1880 = arith.mulf %1879, %1879 : vector<16x16xf32>
    %1881 = vector.shape_cast %1880 : vector<16x16xf32> to vector<1x16x16xf32>
    %cst_1006 = arith.constant dense<0.000000e+00> : vector<1xf32>
    %1882 = vector.multi_reduction <add>, %1881, %cst_1006 [1, 2] : vector<1x16x16xf32> to vector<1xf32>
    %1883 = vector.shape_cast %1882 : vector<1xf32> to vector<1x1x1xf32>
    %1884 = vector.extract %1883[0, 0, 0] : f32 from vector<1x1x1xf32>
    %1885 = vector.broadcast %1884 : f32 to vector<1x1xf32>
    %cst_1007 = arith.constant 2.560000e+02 : f32
    %1886 = vector.broadcast %cst_1007 : f32 to vector<1x1xf32>
    %1887 = arith.divf %1885, %1886 : vector<1x1xf32>
    %cst_1008 = arith.constant 9.99999974E-6 : f32
    %1888 = vector.broadcast %cst_1008 : f32 to vector<1x1xf32>
    %1889 = arith.addf %1887, %1888 : vector<1x1xf32>
    %1890 = math.rsqrt %1889 : vector<1x1xf32>
    %1891 = vector.broadcast %1890 : vector<1x1xf32> to vector<16x16xf32>
    %1892 = arith.mulf %1879, %1891 : vector<16x16xf32>
    %c2_1009 = arith.constant 2 : index
    %c2_1010 = arith.constant 2 : index
    %1893 = memref.load %arg3[%c2_1009, %c2_1010] : memref<4x4xf32, #tpu.memory_space<smem>>
    %1894 = vector.broadcast %1893 : f32 to vector<16x16xf32>
    %1895 = arith.mulf %1892, %1894 : vector<16x16xf32>
    %c3_1011 = arith.constant 3 : index
    %c2_1012 = arith.constant 2 : index
    %1896 = memref.load %arg3[%c3_1011, %c2_1012] : memref<4x4xf32, #tpu.memory_space<smem>>
    %1897 = vector.broadcast %1896 : f32 to vector<16x16xf32>
    %1898 = arith.addf %1895, %1897 : vector<16x16xf32>
    %cst_1013 = arith.constant 0.000000e+00 : f32
    %1899 = vector.broadcast %cst_1013 : f32 to vector<16x16xf32>
    %c252 = arith.constant 252 : index
    %1900 = memref.load %arg2[%c252] : memref<288xf32, #tpu.memory_space<smem>>
    %c0_1014 = arith.constant 0 : index
    %c0_1015 = arith.constant 0 : index
    %c0_1016 = arith.constant 0 : index
    %1901 = vector.load %arg5[%c0_1014, %c0_1015, %c0_1016] : memref<4x18x18xf32, #tpu.memory_space<vmem>>, vector<1x16x16xf32>
    %1902 = vector.shape_cast %1901 : vector<1x16x16xf32> to vector<16x16xf32>
    %1903 = vector.broadcast %1900 : f32 to vector<16x16xf32>
    %1904 = arith.mulf %1903, %1902 : vector<16x16xf32>
    %1905 = arith.addf %1899, %1904 : vector<16x16xf32>
    %c253 = arith.constant 253 : index
    %1906 = memref.load %arg2[%c253] : memref<288xf32, #tpu.memory_space<smem>>
    %c0_1017 = arith.constant 0 : index
    %c0_1018 = arith.constant 0 : index
    %c1_1019 = arith.constant 1 : index
    %1907 = vector.load %arg5[%c0_1017, %c0_1018, %c1_1019] : memref<4x18x18xf32, #tpu.memory_space<vmem>>, vector<1x16x16xf32>
    %1908 = vector.shape_cast %1907 : vector<1x16x16xf32> to vector<16x16xf32>
    %1909 = vector.broadcast %1906 : f32 to vector<16x16xf32>
    %1910 = arith.mulf %1909, %1908 : vector<16x16xf32>
    %1911 = arith.addf %1905, %1910 : vector<16x16xf32>
    %c254 = arith.constant 254 : index
    %1912 = memref.load %arg2[%c254] : memref<288xf32, #tpu.memory_space<smem>>
    %c0_1020 = arith.constant 0 : index
    %c0_1021 = arith.constant 0 : index
    %c2_1022 = arith.constant 2 : index
    %1913 = vector.load %arg5[%c0_1020, %c0_1021, %c2_1022] : memref<4x18x18xf32, #tpu.memory_space<vmem>>, vector<1x16x16xf32>
    %1914 = vector.shape_cast %1913 : vector<1x16x16xf32> to vector<16x16xf32>
    %1915 = vector.broadcast %1912 : f32 to vector<16x16xf32>
    %1916 = arith.mulf %1915, %1914 : vector<16x16xf32>
    %1917 = arith.addf %1911, %1916 : vector<16x16xf32>
    %c255 = arith.constant 255 : index
    %1918 = memref.load %arg2[%c255] : memref<288xf32, #tpu.memory_space<smem>>
    %c0_1023 = arith.constant 0 : index
    %c1_1024 = arith.constant 1 : index
    %c0_1025 = arith.constant 0 : index
    %1919 = vector.load %arg5[%c0_1023, %c1_1024, %c0_1025] : memref<4x18x18xf32, #tpu.memory_space<vmem>>, vector<1x16x16xf32>
    %1920 = vector.shape_cast %1919 : vector<1x16x16xf32> to vector<16x16xf32>
    %1921 = vector.broadcast %1918 : f32 to vector<16x16xf32>
    %1922 = arith.mulf %1921, %1920 : vector<16x16xf32>
    %1923 = arith.addf %1917, %1922 : vector<16x16xf32>
    %c256 = arith.constant 256 : index
    %1924 = memref.load %arg2[%c256] : memref<288xf32, #tpu.memory_space<smem>>
    %c0_1026 = arith.constant 0 : index
    %c1_1027 = arith.constant 1 : index
    %c1_1028 = arith.constant 1 : index
    %1925 = vector.load %arg5[%c0_1026, %c1_1027, %c1_1028] : memref<4x18x18xf32, #tpu.memory_space<vmem>>, vector<1x16x16xf32>
    %1926 = vector.shape_cast %1925 : vector<1x16x16xf32> to vector<16x16xf32>
    %1927 = vector.broadcast %1924 : f32 to vector<16x16xf32>
    %1928 = arith.mulf %1927, %1926 : vector<16x16xf32>
    %1929 = arith.addf %1923, %1928 : vector<16x16xf32>
    %c257 = arith.constant 257 : index
    %1930 = memref.load %arg2[%c257] : memref<288xf32, #tpu.memory_space<smem>>
    %c0_1029 = arith.constant 0 : index
    %c1_1030 = arith.constant 1 : index
    %c2_1031 = arith.constant 2 : index
    %1931 = vector.load %arg5[%c0_1029, %c1_1030, %c2_1031] : memref<4x18x18xf32, #tpu.memory_space<vmem>>, vector<1x16x16xf32>
    %1932 = vector.shape_cast %1931 : vector<1x16x16xf32> to vector<16x16xf32>
    %1933 = vector.broadcast %1930 : f32 to vector<16x16xf32>
    %1934 = arith.mulf %1933, %1932 : vector<16x16xf32>
    %1935 = arith.addf %1929, %1934 : vector<16x16xf32>
    %c258 = arith.constant 258 : index
    %1936 = memref.load %arg2[%c258] : memref<288xf32, #tpu.memory_space<smem>>
    %c0_1032 = arith.constant 0 : index
    %c2_1033 = arith.constant 2 : index
    %c0_1034 = arith.constant 0 : index
    %1937 = vector.load %arg5[%c0_1032, %c2_1033, %c0_1034] : memref<4x18x18xf32, #tpu.memory_space<vmem>>, vector<1x16x16xf32>
    %1938 = vector.shape_cast %1937 : vector<1x16x16xf32> to vector<16x16xf32>
    %1939 = vector.broadcast %1936 : f32 to vector<16x16xf32>
    %1940 = arith.mulf %1939, %1938 : vector<16x16xf32>
    %1941 = arith.addf %1935, %1940 : vector<16x16xf32>
    %c259 = arith.constant 259 : index
    %1942 = memref.load %arg2[%c259] : memref<288xf32, #tpu.memory_space<smem>>
    %c0_1035 = arith.constant 0 : index
    %c2_1036 = arith.constant 2 : index
    %c1_1037 = arith.constant 1 : index
    %1943 = vector.load %arg5[%c0_1035, %c2_1036, %c1_1037] : memref<4x18x18xf32, #tpu.memory_space<vmem>>, vector<1x16x16xf32>
    %1944 = vector.shape_cast %1943 : vector<1x16x16xf32> to vector<16x16xf32>
    %1945 = vector.broadcast %1942 : f32 to vector<16x16xf32>
    %1946 = arith.mulf %1945, %1944 : vector<16x16xf32>
    %1947 = arith.addf %1941, %1946 : vector<16x16xf32>
    %c260 = arith.constant 260 : index
    %1948 = memref.load %arg2[%c260] : memref<288xf32, #tpu.memory_space<smem>>
    %c0_1038 = arith.constant 0 : index
    %c2_1039 = arith.constant 2 : index
    %c2_1040 = arith.constant 2 : index
    %1949 = vector.load %arg5[%c0_1038, %c2_1039, %c2_1040] : memref<4x18x18xf32, #tpu.memory_space<vmem>>, vector<1x16x16xf32>
    %1950 = vector.shape_cast %1949 : vector<1x16x16xf32> to vector<16x16xf32>
    %1951 = vector.broadcast %1948 : f32 to vector<16x16xf32>
    %1952 = arith.mulf %1951, %1950 : vector<16x16xf32>
    %1953 = arith.addf %1947, %1952 : vector<16x16xf32>
    %c261 = arith.constant 261 : index
    %1954 = memref.load %arg2[%c261] : memref<288xf32, #tpu.memory_space<smem>>
    %c1_1041 = arith.constant 1 : index
    %c0_1042 = arith.constant 0 : index
    %c0_1043 = arith.constant 0 : index
    %1955 = vector.load %arg5[%c1_1041, %c0_1042, %c0_1043] : memref<4x18x18xf32, #tpu.memory_space<vmem>>, vector<1x16x16xf32>
    %1956 = vector.shape_cast %1955 : vector<1x16x16xf32> to vector<16x16xf32>
    %1957 = vector.broadcast %1954 : f32 to vector<16x16xf32>
    %1958 = arith.mulf %1957, %1956 : vector<16x16xf32>
    %1959 = arith.addf %1953, %1958 : vector<16x16xf32>
    %c262 = arith.constant 262 : index
    %1960 = memref.load %arg2[%c262] : memref<288xf32, #tpu.memory_space<smem>>
    %c1_1044 = arith.constant 1 : index
    %c0_1045 = arith.constant 0 : index
    %c1_1046 = arith.constant 1 : index
    %1961 = vector.load %arg5[%c1_1044, %c0_1045, %c1_1046] : memref<4x18x18xf32, #tpu.memory_space<vmem>>, vector<1x16x16xf32>
    %1962 = vector.shape_cast %1961 : vector<1x16x16xf32> to vector<16x16xf32>
    %1963 = vector.broadcast %1960 : f32 to vector<16x16xf32>
    %1964 = arith.mulf %1963, %1962 : vector<16x16xf32>
    %1965 = arith.addf %1959, %1964 : vector<16x16xf32>
    %c263 = arith.constant 263 : index
    %1966 = memref.load %arg2[%c263] : memref<288xf32, #tpu.memory_space<smem>>
    %c1_1047 = arith.constant 1 : index
    %c0_1048 = arith.constant 0 : index
    %c2_1049 = arith.constant 2 : index
    %1967 = vector.load %arg5[%c1_1047, %c0_1048, %c2_1049] : memref<4x18x18xf32, #tpu.memory_space<vmem>>, vector<1x16x16xf32>
    %1968 = vector.shape_cast %1967 : vector<1x16x16xf32> to vector<16x16xf32>
    %1969 = vector.broadcast %1966 : f32 to vector<16x16xf32>
    %1970 = arith.mulf %1969, %1968 : vector<16x16xf32>
    %1971 = arith.addf %1965, %1970 : vector<16x16xf32>
    %c264 = arith.constant 264 : index
    %1972 = memref.load %arg2[%c264] : memref<288xf32, #tpu.memory_space<smem>>
    %c1_1050 = arith.constant 1 : index
    %c1_1051 = arith.constant 1 : index
    %c0_1052 = arith.constant 0 : index
    %1973 = vector.load %arg5[%c1_1050, %c1_1051, %c0_1052] : memref<4x18x18xf32, #tpu.memory_space<vmem>>, vector<1x16x16xf32>
    %1974 = vector.shape_cast %1973 : vector<1x16x16xf32> to vector<16x16xf32>
    %1975 = vector.broadcast %1972 : f32 to vector<16x16xf32>
    %1976 = arith.mulf %1975, %1974 : vector<16x16xf32>
    %1977 = arith.addf %1971, %1976 : vector<16x16xf32>
    %c265 = arith.constant 265 : index
    %1978 = memref.load %arg2[%c265] : memref<288xf32, #tpu.memory_space<smem>>
    %c1_1053 = arith.constant 1 : index
    %c1_1054 = arith.constant 1 : index
    %c1_1055 = arith.constant 1 : index
    %1979 = vector.load %arg5[%c1_1053, %c1_1054, %c1_1055] : memref<4x18x18xf32, #tpu.memory_space<vmem>>, vector<1x16x16xf32>
    %1980 = vector.shape_cast %1979 : vector<1x16x16xf32> to vector<16x16xf32>
    %1981 = vector.broadcast %1978 : f32 to vector<16x16xf32>
    %1982 = arith.mulf %1981, %1980 : vector<16x16xf32>
    %1983 = arith.addf %1977, %1982 : vector<16x16xf32>
    %c266 = arith.constant 266 : index
    %1984 = memref.load %arg2[%c266] : memref<288xf32, #tpu.memory_space<smem>>
    %c1_1056 = arith.constant 1 : index
    %c1_1057 = arith.constant 1 : index
    %c2_1058 = arith.constant 2 : index
    %1985 = vector.load %arg5[%c1_1056, %c1_1057, %c2_1058] : memref<4x18x18xf32, #tpu.memory_space<vmem>>, vector<1x16x16xf32>
    %1986 = vector.shape_cast %1985 : vector<1x16x16xf32> to vector<16x16xf32>
    %1987 = vector.broadcast %1984 : f32 to vector<16x16xf32>
    %1988 = arith.mulf %1987, %1986 : vector<16x16xf32>
    %1989 = arith.addf %1983, %1988 : vector<16x16xf32>
    %c267 = arith.constant 267 : index
    %1990 = memref.load %arg2[%c267] : memref<288xf32, #tpu.memory_space<smem>>
    %c1_1059 = arith.constant 1 : index
    %c2_1060 = arith.constant 2 : index
    %c0_1061 = arith.constant 0 : index
    %1991 = vector.load %arg5[%c1_1059, %c2_1060, %c0_1061] : memref<4x18x18xf32, #tpu.memory_space<vmem>>, vector<1x16x16xf32>
    %1992 = vector.shape_cast %1991 : vector<1x16x16xf32> to vector<16x16xf32>
    %1993 = vector.broadcast %1990 : f32 to vector<16x16xf32>
    %1994 = arith.mulf %1993, %1992 : vector<16x16xf32>
    %1995 = arith.addf %1989, %1994 : vector<16x16xf32>
    %c268 = arith.constant 268 : index
    %1996 = memref.load %arg2[%c268] : memref<288xf32, #tpu.memory_space<smem>>
    %c1_1062 = arith.constant 1 : index
    %c2_1063 = arith.constant 2 : index
    %c1_1064 = arith.constant 1 : index
    %1997 = vector.load %arg5[%c1_1062, %c2_1063, %c1_1064] : memref<4x18x18xf32, #tpu.memory_space<vmem>>, vector<1x16x16xf32>
    %1998 = vector.shape_cast %1997 : vector<1x16x16xf32> to vector<16x16xf32>
    %1999 = vector.broadcast %1996 : f32 to vector<16x16xf32>
    %2000 = arith.mulf %1999, %1998 : vector<16x16xf32>
    %2001 = arith.addf %1995, %2000 : vector<16x16xf32>
    %c269 = arith.constant 269 : index
    %2002 = memref.load %arg2[%c269] : memref<288xf32, #tpu.memory_space<smem>>
    %c1_1065 = arith.constant 1 : index
    %c2_1066 = arith.constant 2 : index
    %c2_1067 = arith.constant 2 : index
    %2003 = vector.load %arg5[%c1_1065, %c2_1066, %c2_1067] : memref<4x18x18xf32, #tpu.memory_space<vmem>>, vector<1x16x16xf32>
    %2004 = vector.shape_cast %2003 : vector<1x16x16xf32> to vector<16x16xf32>
    %2005 = vector.broadcast %2002 : f32 to vector<16x16xf32>
    %2006 = arith.mulf %2005, %2004 : vector<16x16xf32>
    %2007 = arith.addf %2001, %2006 : vector<16x16xf32>
    %c270 = arith.constant 270 : index
    %2008 = memref.load %arg2[%c270] : memref<288xf32, #tpu.memory_space<smem>>
    %c2_1068 = arith.constant 2 : index
    %c0_1069 = arith.constant 0 : index
    %c0_1070 = arith.constant 0 : index
    %2009 = vector.load %arg5[%c2_1068, %c0_1069, %c0_1070] : memref<4x18x18xf32, #tpu.memory_space<vmem>>, vector<1x16x16xf32>
    %2010 = vector.shape_cast %2009 : vector<1x16x16xf32> to vector<16x16xf32>
    %2011 = vector.broadcast %2008 : f32 to vector<16x16xf32>
    %2012 = arith.mulf %2011, %2010 : vector<16x16xf32>
    %2013 = arith.addf %2007, %2012 : vector<16x16xf32>
    %c271 = arith.constant 271 : index
    %2014 = memref.load %arg2[%c271] : memref<288xf32, #tpu.memory_space<smem>>
    %c2_1071 = arith.constant 2 : index
    %c0_1072 = arith.constant 0 : index
    %c1_1073 = arith.constant 1 : index
    %2015 = vector.load %arg5[%c2_1071, %c0_1072, %c1_1073] : memref<4x18x18xf32, #tpu.memory_space<vmem>>, vector<1x16x16xf32>
    %2016 = vector.shape_cast %2015 : vector<1x16x16xf32> to vector<16x16xf32>
    %2017 = vector.broadcast %2014 : f32 to vector<16x16xf32>
    %2018 = arith.mulf %2017, %2016 : vector<16x16xf32>
    %2019 = arith.addf %2013, %2018 : vector<16x16xf32>
    %c272 = arith.constant 272 : index
    %2020 = memref.load %arg2[%c272] : memref<288xf32, #tpu.memory_space<smem>>
    %c2_1074 = arith.constant 2 : index
    %c0_1075 = arith.constant 0 : index
    %c2_1076 = arith.constant 2 : index
    %2021 = vector.load %arg5[%c2_1074, %c0_1075, %c2_1076] : memref<4x18x18xf32, #tpu.memory_space<vmem>>, vector<1x16x16xf32>
    %2022 = vector.shape_cast %2021 : vector<1x16x16xf32> to vector<16x16xf32>
    %2023 = vector.broadcast %2020 : f32 to vector<16x16xf32>
    %2024 = arith.mulf %2023, %2022 : vector<16x16xf32>
    %2025 = arith.addf %2019, %2024 : vector<16x16xf32>
    %c273 = arith.constant 273 : index
    %2026 = memref.load %arg2[%c273] : memref<288xf32, #tpu.memory_space<smem>>
    %c2_1077 = arith.constant 2 : index
    %c1_1078 = arith.constant 1 : index
    %c0_1079 = arith.constant 0 : index
    %2027 = vector.load %arg5[%c2_1077, %c1_1078, %c0_1079] : memref<4x18x18xf32, #tpu.memory_space<vmem>>, vector<1x16x16xf32>
    %2028 = vector.shape_cast %2027 : vector<1x16x16xf32> to vector<16x16xf32>
    %2029 = vector.broadcast %2026 : f32 to vector<16x16xf32>
    %2030 = arith.mulf %2029, %2028 : vector<16x16xf32>
    %2031 = arith.addf %2025, %2030 : vector<16x16xf32>
    %c274 = arith.constant 274 : index
    %2032 = memref.load %arg2[%c274] : memref<288xf32, #tpu.memory_space<smem>>
    %c2_1080 = arith.constant 2 : index
    %c1_1081 = arith.constant 1 : index
    %c1_1082 = arith.constant 1 : index
    %2033 = vector.load %arg5[%c2_1080, %c1_1081, %c1_1082] : memref<4x18x18xf32, #tpu.memory_space<vmem>>, vector<1x16x16xf32>
    %2034 = vector.shape_cast %2033 : vector<1x16x16xf32> to vector<16x16xf32>
    %2035 = vector.broadcast %2032 : f32 to vector<16x16xf32>
    %2036 = arith.mulf %2035, %2034 : vector<16x16xf32>
    %2037 = arith.addf %2031, %2036 : vector<16x16xf32>
    %c275 = arith.constant 275 : index
    %2038 = memref.load %arg2[%c275] : memref<288xf32, #tpu.memory_space<smem>>
    %c2_1083 = arith.constant 2 : index
    %c1_1084 = arith.constant 1 : index
    %c2_1085 = arith.constant 2 : index
    %2039 = vector.load %arg5[%c2_1083, %c1_1084, %c2_1085] : memref<4x18x18xf32, #tpu.memory_space<vmem>>, vector<1x16x16xf32>
    %2040 = vector.shape_cast %2039 : vector<1x16x16xf32> to vector<16x16xf32>
    %2041 = vector.broadcast %2038 : f32 to vector<16x16xf32>
    %2042 = arith.mulf %2041, %2040 : vector<16x16xf32>
    %2043 = arith.addf %2037, %2042 : vector<16x16xf32>
    %c276 = arith.constant 276 : index
    %2044 = memref.load %arg2[%c276] : memref<288xf32, #tpu.memory_space<smem>>
    %c2_1086 = arith.constant 2 : index
    %c2_1087 = arith.constant 2 : index
    %c0_1088 = arith.constant 0 : index
    %2045 = vector.load %arg5[%c2_1086, %c2_1087, %c0_1088] : memref<4x18x18xf32, #tpu.memory_space<vmem>>, vector<1x16x16xf32>
    %2046 = vector.shape_cast %2045 : vector<1x16x16xf32> to vector<16x16xf32>
    %2047 = vector.broadcast %2044 : f32 to vector<16x16xf32>
    %2048 = arith.mulf %2047, %2046 : vector<16x16xf32>
    %2049 = arith.addf %2043, %2048 : vector<16x16xf32>
    %c277 = arith.constant 277 : index
    %2050 = memref.load %arg2[%c277] : memref<288xf32, #tpu.memory_space<smem>>
    %c2_1089 = arith.constant 2 : index
    %c2_1090 = arith.constant 2 : index
    %c1_1091 = arith.constant 1 : index
    %2051 = vector.load %arg5[%c2_1089, %c2_1090, %c1_1091] : memref<4x18x18xf32, #tpu.memory_space<vmem>>, vector<1x16x16xf32>
    %2052 = vector.shape_cast %2051 : vector<1x16x16xf32> to vector<16x16xf32>
    %2053 = vector.broadcast %2050 : f32 to vector<16x16xf32>
    %2054 = arith.mulf %2053, %2052 : vector<16x16xf32>
    %2055 = arith.addf %2049, %2054 : vector<16x16xf32>
    %c278 = arith.constant 278 : index
    %2056 = memref.load %arg2[%c278] : memref<288xf32, #tpu.memory_space<smem>>
    %c2_1092 = arith.constant 2 : index
    %c2_1093 = arith.constant 2 : index
    %c2_1094 = arith.constant 2 : index
    %2057 = vector.load %arg5[%c2_1092, %c2_1093, %c2_1094] : memref<4x18x18xf32, #tpu.memory_space<vmem>>, vector<1x16x16xf32>
    %2058 = vector.shape_cast %2057 : vector<1x16x16xf32> to vector<16x16xf32>
    %2059 = vector.broadcast %2056 : f32 to vector<16x16xf32>
    %2060 = arith.mulf %2059, %2058 : vector<16x16xf32>
    %2061 = arith.addf %2055, %2060 : vector<16x16xf32>
    %c279 = arith.constant 279 : index
    %2062 = memref.load %arg2[%c279] : memref<288xf32, #tpu.memory_space<smem>>
    %c3_1095 = arith.constant 3 : index
    %c0_1096 = arith.constant 0 : index
    %c0_1097 = arith.constant 0 : index
    %2063 = vector.load %arg5[%c3_1095, %c0_1096, %c0_1097] : memref<4x18x18xf32, #tpu.memory_space<vmem>>, vector<1x16x16xf32>
    %2064 = vector.shape_cast %2063 : vector<1x16x16xf32> to vector<16x16xf32>
    %2065 = vector.broadcast %2062 : f32 to vector<16x16xf32>
    %2066 = arith.mulf %2065, %2064 : vector<16x16xf32>
    %2067 = arith.addf %2061, %2066 : vector<16x16xf32>
    %c280 = arith.constant 280 : index
    %2068 = memref.load %arg2[%c280] : memref<288xf32, #tpu.memory_space<smem>>
    %c3_1098 = arith.constant 3 : index
    %c0_1099 = arith.constant 0 : index
    %c1_1100 = arith.constant 1 : index
    %2069 = vector.load %arg5[%c3_1098, %c0_1099, %c1_1100] : memref<4x18x18xf32, #tpu.memory_space<vmem>>, vector<1x16x16xf32>
    %2070 = vector.shape_cast %2069 : vector<1x16x16xf32> to vector<16x16xf32>
    %2071 = vector.broadcast %2068 : f32 to vector<16x16xf32>
    %2072 = arith.mulf %2071, %2070 : vector<16x16xf32>
    %2073 = arith.addf %2067, %2072 : vector<16x16xf32>
    %c281 = arith.constant 281 : index
    %2074 = memref.load %arg2[%c281] : memref<288xf32, #tpu.memory_space<smem>>
    %c3_1101 = arith.constant 3 : index
    %c0_1102 = arith.constant 0 : index
    %c2_1103 = arith.constant 2 : index
    %2075 = vector.load %arg5[%c3_1101, %c0_1102, %c2_1103] : memref<4x18x18xf32, #tpu.memory_space<vmem>>, vector<1x16x16xf32>
    %2076 = vector.shape_cast %2075 : vector<1x16x16xf32> to vector<16x16xf32>
    %2077 = vector.broadcast %2074 : f32 to vector<16x16xf32>
    %2078 = arith.mulf %2077, %2076 : vector<16x16xf32>
    %2079 = arith.addf %2073, %2078 : vector<16x16xf32>
    %c282 = arith.constant 282 : index
    %2080 = memref.load %arg2[%c282] : memref<288xf32, #tpu.memory_space<smem>>
    %c3_1104 = arith.constant 3 : index
    %c1_1105 = arith.constant 1 : index
    %c0_1106 = arith.constant 0 : index
    %2081 = vector.load %arg5[%c3_1104, %c1_1105, %c0_1106] : memref<4x18x18xf32, #tpu.memory_space<vmem>>, vector<1x16x16xf32>
    %2082 = vector.shape_cast %2081 : vector<1x16x16xf32> to vector<16x16xf32>
    %2083 = vector.broadcast %2080 : f32 to vector<16x16xf32>
    %2084 = arith.mulf %2083, %2082 : vector<16x16xf32>
    %2085 = arith.addf %2079, %2084 : vector<16x16xf32>
    %c283 = arith.constant 283 : index
    %2086 = memref.load %arg2[%c283] : memref<288xf32, #tpu.memory_space<smem>>
    %c3_1107 = arith.constant 3 : index
    %c1_1108 = arith.constant 1 : index
    %c1_1109 = arith.constant 1 : index
    %2087 = vector.load %arg5[%c3_1107, %c1_1108, %c1_1109] : memref<4x18x18xf32, #tpu.memory_space<vmem>>, vector<1x16x16xf32>
    %2088 = vector.shape_cast %2087 : vector<1x16x16xf32> to vector<16x16xf32>
    %2089 = vector.broadcast %2086 : f32 to vector<16x16xf32>
    %2090 = arith.mulf %2089, %2088 : vector<16x16xf32>
    %2091 = arith.addf %2085, %2090 : vector<16x16xf32>
    %c284 = arith.constant 284 : index
    %2092 = memref.load %arg2[%c284] : memref<288xf32, #tpu.memory_space<smem>>
    %c3_1110 = arith.constant 3 : index
    %c1_1111 = arith.constant 1 : index
    %c2_1112 = arith.constant 2 : index
    %2093 = vector.load %arg5[%c3_1110, %c1_1111, %c2_1112] : memref<4x18x18xf32, #tpu.memory_space<vmem>>, vector<1x16x16xf32>
    %2094 = vector.shape_cast %2093 : vector<1x16x16xf32> to vector<16x16xf32>
    %2095 = vector.broadcast %2092 : f32 to vector<16x16xf32>
    %2096 = arith.mulf %2095, %2094 : vector<16x16xf32>
    %2097 = arith.addf %2091, %2096 : vector<16x16xf32>
    %c285 = arith.constant 285 : index
    %2098 = memref.load %arg2[%c285] : memref<288xf32, #tpu.memory_space<smem>>
    %c3_1113 = arith.constant 3 : index
    %c2_1114 = arith.constant 2 : index
    %c0_1115 = arith.constant 0 : index
    %2099 = vector.load %arg5[%c3_1113, %c2_1114, %c0_1115] : memref<4x18x18xf32, #tpu.memory_space<vmem>>, vector<1x16x16xf32>
    %2100 = vector.shape_cast %2099 : vector<1x16x16xf32> to vector<16x16xf32>
    %2101 = vector.broadcast %2098 : f32 to vector<16x16xf32>
    %2102 = arith.mulf %2101, %2100 : vector<16x16xf32>
    %2103 = arith.addf %2097, %2102 : vector<16x16xf32>
    %c286 = arith.constant 286 : index
    %2104 = memref.load %arg2[%c286] : memref<288xf32, #tpu.memory_space<smem>>
    %c3_1116 = arith.constant 3 : index
    %c2_1117 = arith.constant 2 : index
    %c1_1118 = arith.constant 1 : index
    %2105 = vector.load %arg5[%c3_1116, %c2_1117, %c1_1118] : memref<4x18x18xf32, #tpu.memory_space<vmem>>, vector<1x16x16xf32>
    %2106 = vector.shape_cast %2105 : vector<1x16x16xf32> to vector<16x16xf32>
    %2107 = vector.broadcast %2104 : f32 to vector<16x16xf32>
    %2108 = arith.mulf %2107, %2106 : vector<16x16xf32>
    %2109 = arith.addf %2103, %2108 : vector<16x16xf32>
    %c287 = arith.constant 287 : index
    %2110 = memref.load %arg2[%c287] : memref<288xf32, #tpu.memory_space<smem>>
    %c3_1119 = arith.constant 3 : index
    %c2_1120 = arith.constant 2 : index
    %c2_1121 = arith.constant 2 : index
    %2111 = vector.load %arg5[%c3_1119, %c2_1120, %c2_1121] : memref<4x18x18xf32, #tpu.memory_space<vmem>>, vector<1x16x16xf32>
    %2112 = vector.shape_cast %2111 : vector<1x16x16xf32> to vector<16x16xf32>
    %2113 = vector.broadcast %2110 : f32 to vector<16x16xf32>
    %2114 = arith.mulf %2113, %2112 : vector<16x16xf32>
    %2115 = arith.addf %2109, %2114 : vector<16x16xf32>
    %2116 = vector.shape_cast %2115 : vector<16x16xf32> to vector<1x16x16xf32>
    %cst_1122 = arith.constant dense<0.000000e+00> : vector<1xf32>
    %2117 = vector.multi_reduction <add>, %2116, %cst_1122 [1, 2] : vector<1x16x16xf32> to vector<1xf32>
    %2118 = vector.shape_cast %2117 : vector<1xf32> to vector<1x1x1xf32>
    %2119 = vector.extract %2118[0, 0, 0] : f32 from vector<1x1x1xf32>
    %2120 = vector.broadcast %2119 : f32 to vector<1x1xf32>
    %cst_1123 = arith.constant 2.560000e+02 : f32
    %2121 = vector.broadcast %cst_1123 : f32 to vector<1x1xf32>
    %2122 = arith.divf %2120, %2121 : vector<1x1xf32>
    %2123 = vector.broadcast %2122 : vector<1x1xf32> to vector<16x16xf32>
    %2124 = arith.subf %2115, %2123 : vector<16x16xf32>
    %2125 = arith.mulf %2124, %2124 : vector<16x16xf32>
    %2126 = vector.shape_cast %2125 : vector<16x16xf32> to vector<1x16x16xf32>
    %cst_1124 = arith.constant dense<0.000000e+00> : vector<1xf32>
    %2127 = vector.multi_reduction <add>, %2126, %cst_1124 [1, 2] : vector<1x16x16xf32> to vector<1xf32>
    %2128 = vector.shape_cast %2127 : vector<1xf32> to vector<1x1x1xf32>
    %2129 = vector.extract %2128[0, 0, 0] : f32 from vector<1x1x1xf32>
    %2130 = vector.broadcast %2129 : f32 to vector<1x1xf32>
    %cst_1125 = arith.constant 2.560000e+02 : f32
    %2131 = vector.broadcast %cst_1125 : f32 to vector<1x1xf32>
    %2132 = arith.divf %2130, %2131 : vector<1x1xf32>
    %cst_1126 = arith.constant 9.99999974E-6 : f32
    %2133 = vector.broadcast %cst_1126 : f32 to vector<1x1xf32>
    %2134 = arith.addf %2132, %2133 : vector<1x1xf32>
    %2135 = math.rsqrt %2134 : vector<1x1xf32>
    %2136 = vector.broadcast %2135 : vector<1x1xf32> to vector<16x16xf32>
    %2137 = arith.mulf %2124, %2136 : vector<16x16xf32>
    %c2_1127 = arith.constant 2 : index
    %c3_1128 = arith.constant 3 : index
    %2138 = memref.load %arg3[%c2_1127, %c3_1128] : memref<4x4xf32, #tpu.memory_space<smem>>
    %2139 = vector.broadcast %2138 : f32 to vector<16x16xf32>
    %2140 = arith.mulf %2137, %2139 : vector<16x16xf32>
    %c3_1129 = arith.constant 3 : index
    %c3_1130 = arith.constant 3 : index
    %2141 = memref.load %arg3[%c3_1129, %c3_1130] : memref<4x4xf32, #tpu.memory_space<smem>>
    %2142 = vector.broadcast %2141 : f32 to vector<16x16xf32>
    %2143 = arith.addf %2140, %2142 : vector<16x16xf32>
    %c0_1131 = arith.constant 0 : index
    %c0_1132 = arith.constant 0 : index
    %c0_1133 = arith.constant 0 : index
    %c0_1134 = arith.constant 0 : index
    %2144 = vector.load %arg1[%c0_1131, %c0_1132, %c0_1133, %c0_1134] : memref<1x4x16x16xf32, #tpu.memory_space<vmem>>, vector<1x1x16x16xf32>
    %2145 = vector.shape_cast %2144 : vector<1x1x16x16xf32> to vector<16x16xf32>
    %2146 = arith.addf %1408, %2145 : vector<16x16xf32>
    %c0_1135 = arith.constant 0 : index
    %c0_1136 = arith.constant 0 : index
    %c0_1137 = arith.constant 0 : index
    %c0_1138 = arith.constant 0 : index
    %2147 = vector.load %arg4[%c0_1135, %c0_1136, %c0_1137, %c0_1138] : memref<1x4x16x16xf32, #tpu.memory_space<vmem>>, vector<1x1x16x16xf32>
    %2148 = vector.shape_cast %2147 : vector<1x1x16x16xf32> to vector<16x16xf32>
    %2149 = vector.shape_cast %2146 : vector<16x16xf32> to vector<1x1x16x16xf32>
    tpu.vector_store %arg4[%c0_1135, %c0_1136, %c0_1137, %c0_1138], %2149 {strides = array<i32>} : memref<1x4x16x16xf32, #tpu.memory_space<vmem>>, vector<1x1x16x16xf32>,
    %c0_1139 = arith.constant 0 : index
    %c1_1140 = arith.constant 1 : index
    %c0_1141 = arith.constant 0 : index
    %c0_1142 = arith.constant 0 : index
    %2150 = vector.load %arg1[%c0_1139, %c1_1140, %c0_1141, %c0_1142] : memref<1x4x16x16xf32, #tpu.memory_space<vmem>>, vector<1x1x16x16xf32>
    %2151 = vector.shape_cast %2150 : vector<1x1x16x16xf32> to vector<16x16xf32>
    %2152 = arith.addf %1653, %2151 : vector<16x16xf32>
    %c0_1143 = arith.constant 0 : index
    %c1_1144 = arith.constant 1 : index
    %c0_1145 = arith.constant 0 : index
    %c0_1146 = arith.constant 0 : index
    %2153 = vector.load %arg4[%c0_1143, %c1_1144, %c0_1145, %c0_1146] : memref<1x4x16x16xf32, #tpu.memory_space<vmem>>, vector<1x1x16x16xf32>
    %2154 = vector.shape_cast %2153 : vector<1x1x16x16xf32> to vector<16x16xf32>
    %2155 = vector.shape_cast %2152 : vector<16x16xf32> to vector<1x1x16x16xf32>
    tpu.vector_store %arg4[%c0_1143, %c1_1144, %c0_1145, %c0_1146], %2155 {strides = array<i32>} : memref<1x4x16x16xf32, #tpu.memory_space<vmem>>, vector<1x1x16x16xf32>,
    %c0_1147 = arith.constant 0 : index
    %c2_1148 = arith.constant 2 : index
    %c0_1149 = arith.constant 0 : index
    %c0_1150 = arith.constant 0 : index
    %2156 = vector.load %arg1[%c0_1147, %c2_1148, %c0_1149, %c0_1150] : memref<1x4x16x16xf32, #tpu.memory_space<vmem>>, vector<1x1x16x16xf32>
    %2157 = vector.shape_cast %2156 : vector<1x1x16x16xf32> to vector<16x16xf32>
    %2158 = arith.addf %1898, %2157 : vector<16x16xf32>
    %c0_1151 = arith.constant 0 : index
    %c2_1152 = arith.constant 2 : index
    %c0_1153 = arith.constant 0 : index
    %c0_1154 = arith.constant 0 : index
    %2159 = vector.load %arg4[%c0_1151, %c2_1152, %c0_1153, %c0_1154] : memref<1x4x16x16xf32, #tpu.memory_space<vmem>>, vector<1x1x16x16xf32>
    %2160 = vector.shape_cast %2159 : vector<1x1x16x16xf32> to vector<16x16xf32>
    %2161 = vector.shape_cast %2158 : vector<16x16xf32> to vector<1x1x16x16xf32>
    tpu.vector_store %arg4[%c0_1151, %c2_1152, %c0_1153, %c0_1154], %2161 {strides = array<i32>} : memref<1x4x16x16xf32, #tpu.memory_space<vmem>>, vector<1x1x16x16xf32>,
    %c0_1155 = arith.constant 0 : index
    %c3_1156 = arith.constant 3 : index
    %c0_1157 = arith.constant 0 : index
    %c0_1158 = arith.constant 0 : index
    %2162 = vector.load %arg1[%c0_1155, %c3_1156, %c0_1157, %c0_1158] : memref<1x4x16x16xf32, #tpu.memory_space<vmem>>, vector<1x1x16x16xf32>
    %2163 = vector.shape_cast %2162 : vector<1x1x16x16xf32> to vector<16x16xf32>
    %2164 = arith.addf %2143, %2163 : vector<16x16xf32>
    %c0_1159 = arith.constant 0 : index
    %c3_1160 = arith.constant 3 : index
    %c0_1161 = arith.constant 0 : index
    %c0_1162 = arith.constant 0 : index
    %2165 = vector.load %arg4[%c0_1159, %c3_1160, %c0_1161, %c0_1162] : memref<1x4x16x16xf32, #tpu.memory_space<vmem>>, vector<1x1x16x16xf32>
    %2166 = vector.shape_cast %2165 : vector<1x1x16x16xf32> to vector<16x16xf32>
    %2167 = vector.shape_cast %2164 : vector<16x16xf32> to vector<1x1x16x16xf32>
    tpu.vector_store %arg4[%c0_1159, %c3_1160, %c0_1161, %c0_1162], %2167 {strides = array<i32>} : memref<1x4x16x16xf32, #tpu.memory_space<vmem>>, vector<1x1x16x16xf32>,
    return
  }
  func.func @transform_0(%arg0: i32) -> (i32, i32, i32, i32) {
    %c0_i32 = arith.constant 0 : i32
    %c0_i32_0 = arith.constant 0 : i32
    %c0_i32_1 = arith.constant 0 : i32
    %c0_i32_2 = arith.constant 0 : i32
    return %arg0, %c0_i32, %c0_i32_0, %c0_i32_1 : i32, i32, i32, i32
  }
  func.func @transform_1(%arg0: i32) -> i32 {
    %c0_i32 = arith.constant 0 : i32
    %c0_i32_0 = arith.constant 0 : i32
    return %c0_i32 : i32
  }
  func.func @transform_2(%arg0: i32) -> (i32, i32) {
    %c0_i32 = arith.constant 0 : i32
    %c0_i32_0 = arith.constant 0 : i32
    %c0_i32_1 = arith.constant 0 : i32
    return %c0_i32, %c0_i32_0 : i32, i32
  }
  func.func @transform_3(%arg0: i32) -> (i32, i32, i32, i32) {
    %c0_i32 = arith.constant 0 : i32
    %c0_i32_0 = arith.constant 0 : i32
    %c0_i32_1 = arith.constant 0 : i32
    %c0_i32_2 = arith.constant 0 : i32
    return %arg0, %c0_i32, %c0_i32_0, %c0_i32_1 : i32, i32, i32, i32
  }
}

</mosaic_0001>

<bundles_post_ra>
// kernel: residual_block.1
= control target key start
LH: loop header
LB: loop body
LE: loop exit
PB: predicated region body
PF: predicated region fallthrough
CT: control target
= control target key end

     0   :  { %s8023_s0 = inlined_call_operand.vmem [shape: f32[2,4,16,16], index: 0, kind: input, shape index: {}]   ;;  %s8024_s1 = inlined_call_operand.vmem [shape: f32[288], index: 1, kind: input, shape index: {}]   ;;  %s8025_s2 = inlined_call_operand.vmem [shape: f32[4,4], index: 2, kind: input, shape index: {}]   ;;  %s8026_s3 = inlined_call_operand.hbm [shape: f32[2,4,16,16], index: 3, kind: output, shape index: {}]  }
   0x1   :  { %8078 = sst [smem:[#allocation32_spill]] %s8023_s0 }
   0x2   :  { %8079 = sst [smem:[#allocation33_spill]] %s8024_s1 }
   0x3   :  { %8080 = sst [smem:[#allocation34_spill]] %s8025_s2 }
   0x4   :  { %8081 = sst [smem:[#allocation35_spill]] %s8026_s3 }
   0x5   :  { %8 = vsyncpa [#allocation5], 0 }
   0x6   :  { %9 = vsyncpa [#allocation7], 0 }
   0x7   :  { %10 = vsyncpa [#allocation4], 0 }
   0x8   :  { %12 = vsyncpa [#allocation4 + $0x1], 0  ;;  %s5147_s12 = smov 0   ;;  %s5149_s13 = smov 0  }
   0x9   :  { %s5151_s14 = smov 0   ;;  %s5153_s15 = smov 0  }
   0xa LB: > { %8082 = sst [smem:[#allocation12_spill]] %s5104_s12  ;;  %s5168_s16 = sadd.s32 4294967295, %s5116_s15   ;;  %s5116_s15 = sphi %s5153_s15, %s8174_s15   ;;  %s5112_s14 = sphi %s5151_s14, %s8176_s14   ;;  %s5108_s13 = sphi %s5149_s13, %s8178_s13   ;;  %s5104_s12 = sphi %s5147_s12, %s8177_s12  }
   0xb   : > { %8083 = sst [smem:[#allocation13_spill]] %s5112_s14  ;;  %s4480_s17 = sadd.s32 4294967294, %s5116_s15  }
   0xc   : > { %8084 = sst [smem:[#allocation14_spill]] %s5116_s15  ;;  %s5172_s18 = sadd.s32 1, %s5116_s15  }
   0xd   : > { %8085 = sst [smem:[#allocation15_spill]] %s5172_s18  ;;  %s93_s19 = sadd.s32 1, %s5112_s14 }
   0xe   : > { %s90_s20 = ssub.s32 %s5116_s15, %s5172_s18  ;;  %p103_p0 = scmp.ne.s32.totalorder %s5112_s14, %s5108_s13 }
   0xf   : > { %p91_p1 = scmp.eq.s32.totalorder %s90_s20, 0  ;;  %p104_p2 = scmp.eq.s32.totalorder %s5168_s16, 1 }
  0x10   : > { %p109_p3 = scmp.ne.s32.totalorder %s5108_s13, %s5104_s12  ;;  %p110_p4 = scmp.eq.s32.totalorder %s4480_s17, 1 }
  0x11   : > { %s5183_s21 = scalar_select %p91_p1, %s5112_s14, %s93_s19  }
  0x12   : > { %p5185_p5 = por %p104_p2, %p103_p0  ;;  %p5189_p6 = por %p110_p4, %p109_p3 }
  0x13   : > { %8086 = sst [smem:[#allocation16_spill]] %s5183_s21  ;;  %p4481_p7 = scmp.ge.s32.totalorder %s5116_s15, 1 }
  0x14   : > { %s8087_s22 = scalar_select %p5185_p5, 1, 0 }
  0x15   : > { %s8089_s23 = scalar_select %p5189_p6, 1, 0 }
  0x16   : > { %8088 = sst [smem:[#allocation17_spill]] %s8087_s22  ;;  %p117_p8 = scmp.lt.s32.totalorder %s5116_s15, 3 }
  0x17   : > { %8090 = sst [smem:[#allocation18_spill]] %s8089_s23  ;;  %p4871_p9 = scmp.eq.s32.totalorder %s5168_s16, 0 }
  0x18   : > { %p118_p10 = pnand %p4481_p7, %p117_p8  ;;  %s8091_s1 = sld [smem:[#allocation33_spill]] }
  0x19   : > { %s8092_s2 = sld [smem:[#allocation34_spill]]  ;;  %s5118_s30 = smov [#allocation3]  }
  0x1a   : > { %p4860_p11 = pneg %p118_p10  ;;  %s5119_s4 = smov [#allocation6]  }
  0x1c   : > { %p4861_p12 = pnand %p4871_p9, %p4860_p11 }
  0x1d   : > { %160 = sbr.rel (%p118_p10) target bundleno = 3459 (0xd83), region = 32 }
  0x1e   : > { %s129_s26 = sshll.u32 %s8091_s1, 4  ;;  %s130_s26 = int_to_ptr.vmem [resolvable:$true] %s129_s26 }
  0x1f   : > { %s139_s29 = sshll.u32 %s8092_s2, 4  ;;  %s140_s29 = int_to_ptr.vmem [resolvable:$true] %s139_s29 }
  0x20   : > { %4863 = dma.vmem_to_smem (!%p4861_p12), %s130_s26, 48, %s5118_s30, [#allocation5]  }
  0x21   : > { %4866 = dma.vmem_to_smem (!%p4861_p12), %s140_s29, 64, %s5119_s4, [#allocation7]  }
  0x22   : > { %5091 = dma.done.wait (%p4871_p9), [#allocation5], 48  }
  0x23   : > { %5093 = vsyncadd (%p4871_p9), [#allocation5], 4294967248 }
  0x24   : > { %5095 = dma.done.wait (%p4871_p9), [#allocation7], 64  }
  0x25   : > { %5097 = vsyncadd (%p4871_p9), [#allocation7], 4294967232 }
  0x26   : > { %172 = sfence }
  0x27   : > { %p191_p13 = scmp.lt.s32.totalorder %s5168_s16, 1  ;;  %s8093_s0 = sld [smem:[#allocation32_spill]]  ;;  %vm206_vm0 = vcmask 138248   ;;  %vm209_vm1 = vcmask 132105   ;;  %vm211_vm2 = vcmask 137230   ;;  %vm279_vm3 = vcmask 1024  }
  0x28   : > { %s8038_s10 = smov 1   ;;  %s8051_s11 = smov 126   ;;  %vm276_vm4 = vcmask 7168   ;;  %vm296_vm5 = vcmask 146568   ;;  %vm299_vm6 = vcmask 140424   ;;  %vm841_vm7 = vcmask 130048  }
  0x29   : > { %s192_s5 = scalar_select %p191_p13, %s5168_s16, 1 }
  0x2a   : > { %s8036_s17 = smov 2   ;;  %s5287_s19 = sld [smem:[#allocation3 + $0x1]] }
  0x2b   : > { %s4816_s6 = sshll.u32 %s192_s5, 6  ;;  %s4498_s20 = sld [smem:[#allocation3 + $0x2]] }
  0x2c   : > { %s8049_s24 = smov 127   ;;  %s5300_s25 = sld [smem:[#allocation3 + $0x5]] }
  0x2d   : > { %s5217_s9 = scalar_lea.vmem %s8093_s0, %s4816_s6  ;;  %s5303_s26 = sld [smem:[#allocation3 + $0x7]] }
  0x2e   : > { %v196_v0 = vld [vmem:[%s5217_s9] sm:$0xff]  ;;  %v4491_v1 = vld [vmem:[%s5217_s9 + $0x10] sm:$0xff]  ;;  %v197_v3 = vld [vmem:[%s5217_s9 + $0x8] sm:$0xff]  ;;  %s4500_s27 = sld [smem:[#allocation3 + $0x4]]  ;;  %s8137_s23 = smov 126  }
  0x2f   : > { %200 = vrot.lane.b32.xlu0 %v196_v0, %s8038_s10  ;;  %218 = vrot.lane.b32.xlu1 %v4491_v1, %s8038_s10  ;;  %v4493_v2 = vld [vmem:[%s5217_s9 + $0x20] sm:$0xff]  ;;  %v4492_v4 = vld [vmem:[%s5217_s9 + $0x18] sm:$0xff]  ;;  %s4504_s28 = sld [smem:[#allocation3 + $0x8]]  ;;  %s8138_s12 = smov 127  }
  0x30   : > { %234 = vrot.lane.b32.xlu2 %v4493_v2, %s8038_s10  ;;  %v4494_v5 = vld [vmem:[%s5217_s9 + $0x28] sm:$0xff]  ;;  %v4496_v6 = vld [vmem:[%s5217_s9 + $0x38] sm:$0xff]  ;;  %v4495_v7 = vld [vmem:[%s5217_s9 + $0x30] sm:$0xff]  ;;  %s5332_s29 = sld [smem:[#allocation3 + $0xb]] }
  0x31   : > { %v418_v53 = vstv %s5287_s19  ;;  %v432_v54 = vstv %s4498_s20  ;;  %s4506_s30 = sld [smem:[#allocation3 + $0xa]] }
  0x32   : > { %v468_v62 = vstv %s5300_s25  ;;  %s4509_s4 = sld [smem:[#allocation3 + $0xd]] }
  0x33   : > { %s5354_s5 = sld [smem:[#allocation3 + $0x10]] }
  0x34   : > { %s4510_s6 = sld [smem:[#allocation3 + $0xe]] }
  0x35   : > { %s4513_s7 = sld [smem:[#allocation3 + $0x11]] }
  0x36   : > { %s5377_s8 = sld [smem:[#allocation3 + $0x14]] }
  0x37   : > { %202 = vrot.lane.b32.xlu0 %v197_v3, %s8038_s10  ;;  %220 = vrot.lane.b32.xlu1 %v4492_v4, %s8038_s10  ;;  %s4515_s19 = sld [smem:[#allocation3 + $0x13]] }
  0x38   : > { %236 = vrot.lane.b32.xlu2 %v4494_v5, %s8038_s10  ;;  %s4518_s20 = sld [smem:[#allocation3 + $0x16]] }
  0x39   : > { %s5399_s25 = sld [smem:[#allocation3 + $0x19]] }
  0x3a   : > { %s7154_s0 = sld [smem:[#allocation3 + $0x115]] }
  0x3b   : > { %s7157_s1 = sld [smem:[#allocation3 + $0xc8]] }
  0x3c   : > { %s4704_s2 = sld [smem:[#allocation3 + $0xc7]] }
  0x3d   : > { %s4708_s21 = sld [smem:[#allocation3 + $0xcb]] }
  0x3e   : > { %s7296_s14 = sld [smem:[#allocation3 + $0xcf]] }
  0x3f   : > { %252 = vrot.lane.b32.xlu1 %v4496_v6, %s8038_s10  ;;  %250 = vrot.lane.b32.xlu0 %v4495_v7, %s8038_s10  ;;  %v490_v7 = vstv %s5303_s26  ;;  %s4519_s26 = sld [smem:[#allocation3 + $0x17]] }
  0x40   : > { %s4577_s10 = sld [smem:[#allocation3 + $0x4e]] }
  0x41   : > { %s7314_s18 = sld [smem:[#allocation3 + $0xfb]] }
  0x42   : > { %s7351_s15 = sld [smem:[#allocation3 + $0xe0]] }
  0x43   : > { %s7400_s22 = sld [smem:[#allocation3 + $0xe3]] }
  0x44   : > { %s7547_s3 = sld [smem:[#allocation3 + $0xf4]] }
  0x8a   : > { %v235_v8 = vpop.permute.xlu2 %234 }
  0x8b   : > { %241 = vst.msk [vmem:[#allocation2 + $0x31] sm:$0xff] %vm206_vm0, %v235_v8 }
  0x8c   : > { %243 = vst.msk [vmem:[#allocation2 + $0x2f] sm:$0x2] %vm209_vm1, %v235_v8  ;;  %v454_v8 = vstv %s4500_s27  ;;  %s4522_s27 = sld [smem:[#allocation3 + $0x1a]] }
  0x92   : > { %v237_v9 = vpop.permute.xlu2 %236 }
  0x93   : > { %242 = vst.msk [vmem:[#allocation2 + $0x39] sm:$0xff] %vm206_vm0, %v237_v9  ;;  %v337_v24 = vld [vmem:[#allocation2 + $0x30] sm:$0xff] }
  0x94   : > { %244 = vst.msk [vmem:[#allocation2 + $0x3b] sm:$0x40] %vm211_vm2, %v237_v9 }
  0x9a   : > { %v338_v22 = vld [vmem:[#allocation2 + $0x38] sm:$0xff] }
  0x9b   : > { %v339_v23 = vld [vmem:[#allocation2 + $0x40] sm:$0x3] }
  0xa1   : > { %v201_v10 = vpop.permute.xlu0 %200  ;;  %v219_v11 = vpop.permute.xlu1 %218 }
  0xa2   : > { %207 = vst.msk [vmem:[#allocation2 + $0x1] sm:$0xff] %vm206_vm0, %v201_v10 }
  0xa3   : > { %210 = vst.msk [vmem:[#allocation2 - $0x1] sm:$0x2] %vm209_vm1, %v201_v10 }
  0xa4   : > { %225 = vst.msk [vmem:[#allocation2 + $0x19] sm:$0xff] %vm206_vm0, %v219_v11 }
  0xa5   : > { %227 = vst.msk [vmem:[#allocation2 + $0x17] sm:$0x2] %vm209_vm1, %v219_v11 }
  0xa9   : > { %v203_v12 = vpop.permute.xlu0 %202  ;;  %v221_v13 = vpop.permute.xlu1 %220 }
  0xaa   : > { %208 = vst.msk [vmem:[#allocation2 + $0x9] sm:$0xff] %vm206_vm0, %v203_v12  ;;  %v261_v14 = vld [vmem:[#allocation2] sm:$0xff] }
  0xab   : > { %212 = vst.msk [vmem:[#allocation2 + $0xb] sm:$0x40] %vm211_vm2, %v203_v12  ;;  %267 = vrot.lane.b32.xlu0 %v261_v14, %s8051_s11 }
  0xac   : > { %226 = vst.msk [vmem:[#allocation2 + $0x21] sm:$0xff] %vm206_vm0, %v221_v13  ;;  %v301_v21 = vld [vmem:[#allocation2 + $0x18] sm:$0xff] }
  0xad   : > { %228 = vst.msk [vmem:[#allocation2 + $0x23] sm:$0x40] %vm211_vm2, %v221_v13 }
  0xb1   : > { %v262_v15 = vld [vmem:[#allocation2 + $0x8] sm:$0xff]  ;;  %v253_v16 = vpop.permute.xlu1 %252  ;;  %v251_v17 = vpop.permute.xlu0 %250 }
  0xb2   : > { %v263_v18 = vld [vmem:[#allocation2 + $0x10] sm:$0x3]  ;;  %269 = vrot.lane.b32.xlu1 %v262_v15, %s8051_s11  ;;  %258 = vst.msk [vmem:[#allocation2 + $0x51] sm:$0xff] %vm206_vm0, %v253_v16  ;;  %v504_v15 = vstv %s4504_s28  ;;  %s5420_s28 = sld [smem:[#allocation3 + $0x1d]] }
  0xb3   : > { %271 = vrot.lane.b32.xlu2 %v263_v18, %s8051_s11  ;;  %v302_v19 = vld [vmem:[#allocation2 + $0x20] sm:$0xff]  ;;  %260 = vst.msk [vmem:[#allocation2 + $0x53] sm:$0x40] %vm211_vm2, %v253_v16 }
  0xb4   : > { %309 = vrot.lane.b32.xlu0 %v302_v19, %s8051_s11  ;;  %257 = vst.msk [vmem:[#allocation2 + $0x49] sm:$0xff] %vm206_vm0, %v251_v17  ;;  %v303_v20 = vld [vmem:[#allocation2 + $0x28] sm:$0x3] }
  0xb5   : > { %259 = vst.msk [vmem:[#allocation2 + $0x47] sm:$0x2] %vm209_vm1, %v251_v17 }
  0xba   : > { %311 = vrot.lane.b32.xlu1 %v303_v20, %s8051_s11  ;;  %v375_v26 = vld [vmem:[#allocation2 + $0x58] sm:$0x3] }
  0xbb   : > { %307 = vrot.lane.b32.xlu2 %v301_v21, %s8051_s11  ;;  %v374_v25 = vld [vmem:[#allocation2 + $0x50] sm:$0xff] }
  0xbc   : > { %345 = vrot.lane.b32.xlu0 %v338_v22, %s8051_s11  ;;  %v373_v27 = vld [vmem:[#allocation2 + $0x48] sm:$0xff]  ;;  %v540_v22 = vstv %s5332_s29  ;;  %s4524_s29 = sld [smem:[#allocation3 + $0x1c]] }
  0xc2   : > { %347 = vrot.lane.b32.xlu1 %v339_v23, %s8051_s11  ;;  %v526_v23 = vstv %s4506_s30  ;;  %s4527_s30 = sld [smem:[#allocation3 + $0x1f]] }
  0xc3   : > { %343 = vrot.lane.b32.xlu2 %v337_v24, %s8051_s11 }
  0xc4   : > { %381 = vrot.lane.b32.xlu0 %v374_v25, %s8051_s11 }
  0xca   : > { %383 = vrot.lane.b32.xlu1 %v375_v26, %s8051_s11 }
  0xcb   : > { %379 = vrot.lane.b32.xlu2 %v373_v27, %s8051_s11 }
 0x10d   : > { %v272_v28 = vpop.permute.xlu2 %271 }
 0x10e   : > { %280 = vst.msk [vmem:[#allocation2 + $0x10] sm:$0x3] %vm279_vm3, %v272_v28  ;;  %v562_v28 = vstv %s4509_s4  ;;  %s5445_s4 = sld [smem:[#allocation3 + $0x22]] }
 0x115   : > { %v283_v29 = vld [vmem:[#allocation2 + $0x10] sm:$0x3]  ;;  %v308_v30 = vpop.permute.xlu2 %307 }
 0x116   : > { %291 = vrot.lane.b32.xlu1 %v283_v29, %s8036_s17  ;;  %316 = vst.msk [vmem:[#allocation2 + $0x18] sm:$0xff] %vm276_vm4, %v308_v30 }
 0x11d   : > { %v268_v31 = vpop.permute.xlu0 %267  ;;  %v344_v32 = vpop.permute.xlu2 %343  ;;  %v319_v36 = vld [vmem:[#allocation2 + $0x18] sm:$0xff] }
 0x11e   : > { %277 = vst.msk [vmem:[#allocation2] sm:$0xff] %vm276_vm4, %v268_v31 }
 0x11f   : > { %352 = vst.msk [vmem:[#allocation2 + $0x30] sm:$0xff] %vm276_vm4, %v344_v32 }
 0x124   : > { %v270_v33 = vpop.permute.xlu1 %269 }
 0x125   : > { %278 = vst.msk [vmem:[#allocation2 + $0x8] sm:$0xff] %vm276_vm4, %v270_v33  ;;  %v281_v34 = vld [vmem:[#allocation2] sm:$0xff]  ;;  %v380_v48 = vpop.permute.xlu2 %379 }
 0x126   : > { %287 = vrot.lane.b32.xlu2 %v281_v34, %s8036_s17  ;;  %v310_v35 = vpop.permute.xlu0 %309  ;;  %v355_v41 = vld [vmem:[#allocation2 + $0x30] sm:$0xff]  ;;  %388 = vst.msk [vmem:[#allocation2 + $0x48] sm:$0xff] %vm276_vm4, %v380_v48  ;;  %v648_v48 = vstv %s5377_s8  ;;  %s5484_s8 = sld [smem:[#allocation3 + $0x2c]] }
 0x127   : > { %317 = vst.msk [vmem:[#allocation2 + $0x20] sm:$0xff] %vm276_vm4, %v310_v35 }
 0x12c   : > { %v282_v37 = vld [vmem:[#allocation2 + $0x8] sm:$0xff]  ;;  %v312_v38 = vpop.permute.xlu1 %311 }
 0x12d   : > { %289 = vrot.lane.b32.xlu0 %v282_v37, %s8036_s17  ;;  %318 = vst.msk [vmem:[#allocation2 + $0x28] sm:$0x3] %vm279_vm3, %v312_v38  ;;  %v391_v49 = vld [vmem:[#allocation2 + $0x48] sm:$0xff] }
 0x12e   : > { %v346_v39 = vpop.permute.xlu0 %345  ;;  %325 = vrot.lane.b32.xlu2 %v319_v36, %s8036_s17  ;;  %v320_v40 = vld [vmem:[#allocation2 + $0x20] sm:$0xff]  ;;  %v598_v36 = vstv %s5354_s5  ;;  %s4528_s5 = sld [smem:[#allocation3 + $0x20]] }
 0x12f   : > { %353 = vst.msk [vmem:[#allocation2 + $0x38] sm:$0xff] %vm276_vm4, %v346_v39  ;;  %v576_v39 = vstv %s4510_s6  ;;  %s4531_s6 = sld [smem:[#allocation3 + $0x23]] }
 0x134   : > { %v321_v42 = vld [vmem:[#allocation2 + $0x28] sm:$0x3]  ;;  %v348_v43 = vpop.permute.xlu1 %347 }
 0x135   : > { %327 = vrot.lane.b32.xlu0 %v320_v40, %s8036_s17  ;;  %329 = vrot.lane.b32.xlu1 %v321_v42, %s8036_s17  ;;  %354 = vst.msk [vmem:[#allocation2 + $0x40] sm:$0x3] %vm279_vm3, %v348_v43  ;;  %v612_v42 = vstv %s4513_s7  ;;  %s4534_s7 = sld [smem:[#allocation3 + $0x25]] }
 0x136   : > { %361 = vrot.lane.b32.xlu2 %v355_v41, %s8036_s17  ;;  %v382_v44 = vpop.permute.xlu0 %381  ;;  %v356_v45 = vld [vmem:[#allocation2 + $0x38] sm:$0xff] }
 0x137   : > { %389 = vst.msk [vmem:[#allocation2 + $0x50] sm:$0xff] %vm276_vm4, %v382_v44 }
 0x13c   : > { %v357_v46 = vld [vmem:[#allocation2 + $0x40] sm:$0x3]  ;;  %v384_v50 = vpop.permute.xlu1 %383 }
 0x13d   : > { %363 = vrot.lane.b32.xlu0 %v356_v45, %s8036_s17  ;;  %365 = vrot.lane.b32.xlu1 %v357_v46, %s8036_s17  ;;  %390 = vst.msk [vmem:[#allocation2 + $0x58] sm:$0x3] %vm279_vm3, %v384_v50 }
 0x13e   : > { %v392_v47 = vld [vmem:[#allocation2 + $0x50] sm:$0xff] }
 0x144   : > { %v393_v51 = vld [vmem:[#allocation2 + $0x58] sm:$0x3] }
 0x145   : > { %399 = vrot.lane.b32.xlu1 %v392_v47, %s8036_s17  ;;  %397 = vrot.lane.b32.xlu0 %v391_v49, %s8036_s17  ;;  %v634_v49 = vstv %s4515_s19  ;;  %s4535_s19 = sld [smem:[#allocation3 + $0x26]] }
 0x14d   : > { %401 = vrot.lane.b32.xlu0 %v393_v51, %s8036_s17  ;;  %s6122_s17 = sld [smem:[#allocation3 + $0x67]] }
 0x180   : > { %v288_v52 = vpop.permute.xlu2 %287 }
 0x181   : > { %297 = vst.msk [vmem:[#allocation2] sm:$0xff] %vm296_vm5, %v288_v52 }
 0x188   : > { %v5291_v55 = vld [vmem:[#allocation2] sm:$0xff]  ;;  %v292_v56 = vpop.permute.xlu1 %291  ;;  %v326_v57 = vpop.permute.xlu2 %325 }
 0x189   : > { %300 = vst.msk [vmem:[#allocation2 + $0x10] sm:$0x3] %vm299_vm6, %v292_v56  ;;  %v419_v58 = vmul.f32 %v418_v53, %v5291_v55  ;;  %v433_v59 = vmul.f32 %v432_v54, %v5291_v55  ;;  %v670_v56 = vstv %s4518_s20  ;;  %s4537_s20 = sld [smem:[#allocation3 + $0x28]] }
 0x18a   : > { %334 = vst.msk [vmem:[#allocation2 + $0x18] sm:$0xff] %vm296_vm5, %v326_v57 }
 0x18b   : > { %423 = vrot.lane.b32.xlu2 %v419_v58, %s8049_s24  ;;  %437 = vrot.lane.b32.xlu1 %v433_v59, %s8051_s11 }
 0x190   : > { %v362_v60 = vpop.permute.xlu2 %361 }
 0x191   : > { %370 = vst.msk [vmem:[#allocation2 + $0x30] sm:$0xff] %vm296_vm5, %v362_v60  ;;  %v5343_v21 = vld [vmem:[#allocation2 + $0x18] sm:$0xff] }
 0x192   : > { %v541_v25 = vmul.f32 %v540_v22, %v5343_v21  ;;  %v527_v31 = vmul.f32 %v526_v23, %v5343_v21 }
 0x198   : > { %v5387_v47 = vld [vmem:[#allocation2 + $0x30] sm:$0xff] }
 0x199   : > { %v649_v52 = vmul.f32 %v648_v48, %v5387_v47  ;;  %v635_v59 = vmul.f32 %v634_v49, %v5387_v47 }
 0x19f   : > { %v290_v61 = vpop.permute.xlu0 %289 }
 0x1a0   : > { %298 = vst.msk [vmem:[#allocation2 + $0x8] sm:$0xff] %vm296_vm5, %v290_v61 }
 0x1a7   : > { %v5306_v63 = vld [vmem:[#allocation2 + $0x8] sm:$0xff]  ;;  %v328_v1 = vpop.permute.xlu0 %327  ;;  %v330_v2 = vpop.permute.xlu1 %329 }
 0x1a8   : > { %v5308_v0 = vld [vmem:[#allocation2 + $0x1] sm:$0xff]  ;;  %335 = vst.msk [vmem:[#allocation2 + $0x20] sm:$0xff] %vm296_vm5, %v328_v1  ;;  %v434_v4 = vmul.f32 %v432_v54, %v5306_v63  ;;  %v420_v5 = vmul.f32 %v418_v53, %v5306_v63  ;;  %v5321_v9 = vld [vmem:[#allocation2 + $0x9] sm:$0xff] }
 0x1a9   : > { %v469_v3 = vmul.f32 %v468_v62, %v5308_v0  ;;  %336 = vst.msk [vmem:[#allocation2 + $0x28] sm:$0x3] %vm299_vm6, %v330_v2  ;;  %v5318_v6 = vld [vmem:[#allocation2 + $0x2] sm:$0xff]  ;;  %v455_v12 = vmul.f32 %v454_v8, %v5308_v0  ;;  %v456_v13 = vmul.f32 %v454_v8, %v5321_v9  ;;  %v5330_v14 = vld [vmem:[#allocation2 + $0xa] sm:$0xff]  ;;  %v470_v17 = vmul.f32 %v468_v62, %v5321_v9 }
 0x1aa   : > { %439 = vrot.lane.b32.xlu2 %v434_v4, %s8051_s11  ;;  %425 = vrot.lane.b32.xlu0 %v420_v5, %s8049_s24  ;;  %v491_v11 = vmul.f32 %v490_v7, %v5318_v6  ;;  %v506_v16 = vmul.f32 %v504_v15, %v5330_v14  ;;  %v505_v18 = vmul.f32 %v504_v15, %v5318_v6  ;;  %v706_v62 = vstv %s5399_s25  ;;  %s5499_s25 = sld [smem:[#allocation3 + $0x31]] }
 0x1ab   : > { %473 = vrot.lane.b32.xlu1 %v469_v3, %s8051_s11  ;;  %v492_v26 = vmul.f32 %v490_v7, %v5330_v14  ;;  %v684_v3 = vstv %s4519_s26  ;;  %v720_v7 = vstv %s4522_s27  ;;  %s4538_s26 = sld [smem:[#allocation3 + $0x29]] }
 0x1ac   : > { %s5513_s27 = sld [smem:[#allocation3 + $0x34]] }
 0x1af   : > { %v364_v10 = vpop.permute.xlu0 %363  ;;  %v366_v19 = vpop.permute.xlu1 %365  ;;  %v5340_v20 = vld [vmem:[#allocation2 + $0x20] sm:$0xff] }
 0x1b0   : > { %371 = vst.msk [vmem:[#allocation2 + $0x38] sm:$0xff] %vm296_vm5, %v364_v10  ;;  %v528_v24 = vmul.f32 %v526_v23, %v5340_v20  ;;  %v5351_v27 = vld [vmem:[#allocation2 + $0x21] sm:$0xff]  ;;  %v5356_v29 = vld [vmem:[#allocation2 + $0x19] sm:$0xff]  ;;  %v542_v38 = vmul.f32 %v540_v22, %v5340_v20 }
 0x1b1   : > { %372 = vst.msk [vmem:[#allocation2 + $0x40] sm:$0x3] %vm299_vm6, %v366_v19  ;;  %v564_v30 = vmul.f32 %v562_v28, %v5351_v27  ;;  %v563_v32 = vmul.f32 %v562_v28, %v5356_v29  ;;  %v5365_v35 = vld [vmem:[#allocation2 + $0x1a] sm:$0xff]  ;;  %v578_v40 = vmul.f32 %v576_v39, %v5351_v27  ;;  %v5375_v41 = vld [vmem:[#allocation2 + $0x22] sm:$0xff]  ;;  %v577_v44 = vmul.f32 %v576_v39, %v5356_v29 }
 0x1b2   : > { %459 = vrot.lane.b32.xlu2 %v455_v12, %s8049_s24  ;;  %461 = vrot.lane.b32.xlu0 %v456_v13, %s8049_s24  ;;  %v599_v37 = vmul.f32 %v598_v36, %v5365_v35  ;;  %v614_v43 = vmul.f32 %v612_v42, %v5375_v41  ;;  %v613_v45 = vmul.f32 %v612_v42, %v5365_v35 }
 0x1b3   : > { %495 = vrot.lane.b32.xlu1 %v491_v11, %s8049_s24  ;;  %v600_v53 = vmul.f32 %v598_v36, %v5375_v41 }
 0x1b7   : > { %v400_v33 = vpop.permute.xlu1 %399  ;;  %v398_v34 = vpop.permute.xlu0 %397  ;;  %v5385_v46 = vld [vmem:[#allocation2 + $0x38] sm:$0xff] }
 0x1b8   : > { %407 = vst.msk [vmem:[#allocation2 + $0x50] sm:$0xff] %vm296_vm5, %v400_v33  ;;  %v636_v51 = vmul.f32 %v634_v49, %v5385_v46  ;;  %v5396_v54 = vld [vmem:[#allocation2 + $0x39] sm:$0xff]  ;;  %v5401_v57 = vld [vmem:[#allocation2 + $0x31] sm:$0xff]  ;;  %v650_v2 = vmul.f32 %v648_v48, %v5385_v46 }
 0x1b9   : > { %406 = vst.msk [vmem:[#allocation2 + $0x48] sm:$0xff] %vm296_vm5, %v398_v34  ;;  %v672_v58 = vmul.f32 %v670_v56, %v5396_v54  ;;  %v671_v60 = vmul.f32 %v670_v56, %v5401_v57  ;;  %v5409_v61 = vld [vmem:[#allocation2 + $0x32] sm:$0xff]  ;;  %v686_v4 = vmul.f32 %v684_v3, %v5396_v54  ;;  %v5418_v5 = vld [vmem:[#allocation2 + $0x3a] sm:$0xff]  ;;  %v685_v10 = vmul.f32 %v684_v3, %v5401_v57 }
 0x1ba   : > { %475 = vrot.lane.b32.xlu2 %v470_v17, %s8051_s11  ;;  %509 = vrot.lane.b32.xlu0 %v505_v18, %s8051_s11  ;;  %v707_v1 = vmul.f32 %v706_v62, %v5409_v61  ;;  %v722_v8 = vmul.f32 %v720_v7, %v5418_v5  ;;  %v721_v11 = vmul.f32 %v720_v7, %v5409_v61  ;;  %v742_v17 = vstv %s4524_s29  ;;  %s5531_s29 = sld [smem:[#allocation3 + $0x35]] }
 0x1bb   : > { %511 = vrot.lane.b32.xlu1 %v506_v16, %s8051_s11  ;;  %v756_v16 = vstv %s5420_s28  ;;  %v708_v19 = vmul.f32 %v706_v62, %v5418_v5  ;;  %v814_v34 = vstv %s5445_s4  ;;  %v925_v3 = vstv %s4535_s19  ;;  %s4540_s28 = sld [smem:[#allocation3 + $0x2b]] }
 0x1bc   : > { %v927_v7 = vmul.f32 %v925_v3, %v5306_v63  ;;  %s5547_s4 = sld [smem:[#allocation3 + $0x38]] }
 0x1bd   : > { %s5598_s19 = sld [smem:[#allocation3 + $0x3e]] }
 0x1bf   : > { %v402_v50 = vpop.permute.xlu0 %401  ;;  %v5430_v13 = vld [vmem:[#allocation2 + $0x50] sm:$0xff] }
 0x1c0   : > { %408 = vst.msk [vmem:[#allocation2 + $0x58] sm:$0x3] %vm299_vm6, %v402_v50  ;;  %v5432_v15 = vld [vmem:[#allocation2 + $0x48] sm:$0xff]  ;;  %v744_v18 = vmul.f32 %v742_v17, %v5430_v13  ;;  %v758_v36 = vmul.f32 %v756_v16, %v5430_v13 }
 0x1c1   : > { %v757_v22 = vmul.f32 %v756_v16, %v5432_v15  ;;  %v5457_v33 = vld [vmem:[#allocation2 + $0x4a] sm:$0xff] }
 0x1c2   : > { %497 = vrot.lane.b32.xlu2 %v492_v26, %s8049_s24  ;;  %533 = vrot.lane.b32.xlu0 %v528_v24, %s8049_s24  ;;  %v5447_v26 = vld [vmem:[#allocation2 + $0x49] sm:$0xff]  ;;  %v815_v39 = vmul.f32 %v814_v34, %v5457_v33 }
 0x1c3   : > { %545 = vrot.lane.b32.xlu1 %v541_v25, %s8051_s11  ;;  %v778_v25 = vstv %s4527_s30  ;;  %s5543_s30 = sld [smem:[#allocation3 + $0x2e]] }
 0x1c7   : > { %v5440_v23 = vld [vmem:[#allocation2 + $0x51] sm:$0xff] }
 0x1c8   : > { %v780_v28 = vmul.f32 %v778_v25, %v5440_v23 }
 0x1ca   : > { %531 = vrot.lane.b32.xlu2 %v527_v31, %s8049_s24  ;;  %567 = vrot.lane.b32.xlu0 %v563_v32, %s8049_s24  ;;  %v779_v31 = vmul.f32 %v778_v25, %v5447_v26 }
 0x1cb   : > { %569 = vrot.lane.b32.xlu1 %v564_v30, %s8049_s24  ;;  %v743_v30 = vmul.f32 %v742_v17, %v5432_v15  ;;  %v945_v17 = vstv %s4537_s20  ;;  %s5616_s20 = sld [smem:[#allocation3 + $0x41]] }
 0x1cc   : > { %v946_v25 = vmul.f32 %v945_v17, %v5308_v0 }
 0x1d2   : > { %547 = vrot.lane.b32.xlu2 %v542_v38, %s8051_s11  ;;  %583 = vrot.lane.b32.xlu0 %v578_v40, %s8051_s11 }
 0x1d3   : > { %603 = vrot.lane.b32.xlu1 %v599_v37, %s8049_s24  ;;  %v792_v37 = vstv %s4528_s5  ;;  %s4544_s5 = sld [smem:[#allocation3 + $0x2f]] }
 0x1d4   : > { %v794_v38 = vmul.f32 %v792_v37, %v5440_v23 }
 0x1da   : > { %581 = vrot.lane.b32.xlu2 %v577_v44, %s8051_s11  ;;  %617 = vrot.lane.b32.xlu0 %v613_v45, %s8051_s11  ;;  %v828_v44 = vstv %s4531_s6  ;;  %v793_v45 = vmul.f32 %v792_v37, %v5447_v26  ;;  %s5564_s6 = sld [smem:[#allocation3 + $0x3a]] }
 0x1db   : > { %619 = vrot.lane.b32.xlu1 %v614_v43, %s8051_s11  ;;  %v5470_v43 = vld [vmem:[#allocation2 + $0x52] sm:$0xff]  ;;  %v829_v49 = vmul.f32 %v828_v44, %v5457_v33 }
 0x1dc   : > { %v830_v48 = vmul.f32 %v828_v44, %v5470_v43  ;;  %v816_v56 = vmul.f32 %v814_v34, %v5470_v43  ;;  %v8030_v34 = vstv %s5513_s27 }
 0x1dd   : > { %v1082_v37 = vmul.f32 %v8030_v34, %v5365_v35  ;;  %v8032_v34 = vstv %s5616_s20 }
 0x1e2   : > { %605 = vrot.lane.b32.xlu2 %v600_v53, %s8049_s24  ;;  %641 = vrot.lane.b32.xlu0 %v636_v51, %s8049_s24  ;;  %v911_v53 = vstv %s4534_s7  ;;  %s5580_s7 = sld [smem:[#allocation3 + $0x3d]] }
 0x1e3   : > { %653 = vrot.lane.b32.xlu1 %v649_v52, %s8051_s11 }
 0x1e5   : > { %v5428_v12 = vpop.permute.xlu2 %423 }
 0x1ea   : > { %639 = vrot.lane.b32.xlu2 %v635_v59, %s8049_s24  ;;  %675 = vrot.lane.b32.xlu0 %v671_v60, %s8049_s24  ;;  %v912_v59 = vmul.f32 %v911_v53, %v5291_v55 }
 0x1eb   : > { %677 = vrot.lane.b32.xlu1 %v672_v58, %s8049_s24  ;;  %v913_v58 = vmul.f32 %v911_v53, %v5306_v63  ;;  %v1095_v53 = vstv %s5531_s29  ;;  %s5652_s29 = sld [smem:[#allocation3 + $0x46]] }
 0x1f2   : > { %655 = vrot.lane.b32.xlu2 %v650_v2, %s8051_s11  ;;  %691 = vrot.lane.b32.xlu0 %v686_v4, %s8051_s11  ;;  %v993_v2 = vstv %s5484_s8  ;;  %s4547_s8 = sld [smem:[#allocation3 + $0x32]] }
 0x1f3   : > { %711 = vrot.lane.b32.xlu1 %v707_v1, %s8049_s24  ;;  %v994_v4 = vmul.f32 %v993_v2, %v5318_v6 }
 0x1fa   : > { %689 = vrot.lane.b32.xlu2 %v685_v10, %s8051_s11  ;;  %725 = vrot.lane.b32.xlu0 %v721_v11, %s8051_s11 }
 0x1fb   : > { %727 = vrot.lane.b32.xlu1 %v722_v8, %s8051_s11  ;;  %v926_v8 = vmul.f32 %v925_v3, %v5291_v55 }
 0x1fd   : > { %v5466_v40 = vpop.permute.xlu1 %437 }
 0x202   : > { %713 = vrot.lane.b32.xlu2 %v708_v19, %s8049_s24  ;;  %749 = vrot.lane.b32.xlu0 %v744_v18, %s8049_s24  ;;  %v1047_v18 = vstv %s5499_s25  ;;  %s4552_s25 = sld [smem:[#allocation3 + $0x37]] }
 0x203   : > { %761 = vrot.lane.b32.xlu1 %v757_v22, %s8051_s11  ;;  %v1049_v19 = vmul.f32 %v1047_v18, %v5351_v27  ;;  %v947_v22 = vmul.f32 %v945_v17, %v5321_v9 }
 0x204   : > { %v5443_v24 = vpop.permute.xlu2 %439 }
 0x20a   : > { %747 = vrot.lane.b32.xlu2 %v743_v30, %s8049_s24  ;;  %783 = vrot.lane.b32.xlu0 %v779_v31, %s8049_s24 }
 0x20b   : > { %785 = vrot.lane.b32.xlu1 %v780_v28, %s8049_s24 }
 0x20c   : > { %v5455_v32 = vpop.permute.xlu2 %459 }
 0x212   : > { %763 = vrot.lane.b32.xlu2 %v758_v36, %s8051_s11  ;;  %799 = vrot.lane.b32.xlu0 %v794_v38, %s8051_s11  ;;  %v959_v36 = vstv %s4538_s26  ;;  %s5634_s26 = sld [smem:[#allocation3 + $0x43]] }
 0x213   : > { %819 = vrot.lane.b32.xlu1 %v815_v39, %s8049_s24  ;;  %v961_v38 = vmul.f32 %v959_v36, %v5321_v9  ;;  %v960_v39 = vmul.f32 %v959_v36, %v5308_v0 }
 0x214   : > { %v5468_v42 = vpop.permute.xlu2 %475 }
 0x21a   : > { %797 = vrot.lane.b32.xlu2 %v793_v45, %s8051_s11  ;;  %833 = vrot.lane.b32.xlu0 %v829_v49, %s8051_s11 }
 0x21b   : > { %835 = vrot.lane.b32.xlu1 %v830_v48, %s8051_s11  ;;  %v979_v48 = vstv %s4540_s28  ;;  %s5640_s28 = sld [smem:[#allocation3]] }
 0x21c   : > { %v5480_v51 = vpop.permute.xlu2 %497  ;;  %v5482_v52 = vpop.permute.xlu0 %425 }
 0x21d   : > { %v5478_v50 = vpop.permute.xlu1 %473 }
 0x222   : > { %821 = vrot.lane.b32.xlu2 %v816_v56, %s8049_s24  ;;  %916 = vrot.lane.b32.xlu0 %v912_v59, %s8049_s24  ;;  %v1097_v56 = vmul.f32 %v1095_v53, %v5375_v41  ;;  %v980_v59 = vmul.f32 %v979_v48, %v5318_v6 }
 0x223   : > { %918 = vrot.lane.b32.xlu1 %v913_v58, %s8049_s24  ;;  %v981_v58 = vmul.f32 %v979_v48, %v5330_v14 }
 0x224   : > { %v5494_v62 = vpop.permute.xlu2 %531  ;;  %v5496_v1 = vpop.permute.xlu0 %461 }
 0x225   : > { %v5492_v60 = vpop.permute.xlu1 %495 }
 0x22a   : > { %998 = vrot.lane.b32.xlu2 %v994_v4, %s8051_s11  ;;  %930 = vrot.lane.b32.xlu0 %v926_v8, %s8051_s11  ;;  %v1013_v8 = vstv %s5543_s30  ;;  %s5654_s30 = sld [smem:[#allocation3 + $0x3]] }
 0x22b   : > { %932 = vrot.lane.b32.xlu1 %v927_v7, %s8051_s11  ;;  %v8027_v7 = vstv %s5547_s4 }
 0x22c   : > { %v5509_v11 = vpop.permute.xlu2 %547  ;;  %v5511_v16 = vpop.permute.xlu0 %509 }
 0x22d   : > { %v5507_v10 = vpop.permute.xlu1 %511 }
 0x232   : > { %1054 = vrot.lane.b32.xlu2 %v1049_v19, %s8049_s24  ;;  %950 = vrot.lane.b32.xlu0 %v946_v25, %s8049_s24  ;;  %v1130_v19 = vmul.f32 %v8027_v7, %v5387_v47  ;;  %v995_v25 = vmul.f32 %v993_v2, %v5330_v14 }
 0x233   : > { %952 = vrot.lane.b32.xlu1 %v947_v22, %s8049_s24  ;;  %v1014_v22 = vmul.f32 %v1013_v8, %v5343_v21 }
 0x234   : > { %v5526_v30 = vpop.permute.xlu2 %581  ;;  %v5528_v31 = vpop.permute.xlu0 %533 }
 0x235   : > { %v5524_v28 = vpop.permute.xlu1 %545 }
 0x23a   : > { %1086 = vrot.lane.b32.xlu2 %v1082_v37, %s8049_s24  ;;  %964 = vrot.lane.b32.xlu0 %v960_v39, %s8051_s11  ;;  %v8029_v39 = vstv %s5564_s6 }
 0x23b   : > { %966 = vrot.lane.b32.xlu1 %v961_v38, %s8051_s11  ;;  %v1027_v38 = vstv %s4544_s5  ;;  %v1151_v2 = vmul.f32 %v8029_v39, %v5396_v54  ;;  %s5676_s5 = sld [smem:[#allocation3 + $0x47]] }
 0x23c   : > { %v5545_v45 = vpop.permute.xlu0 %567  ;;  %v5549_v49 = vpop.permute.xlu2 %605  ;;  %v1028_v48 = vmul.f32 %v1027_v38, %v5343_v21 }
 0x23d   : > { %v5541_v44 = vpop.permute.xlu1 %569 }
 0x242   : > { %1102 = vrot.lane.b32.xlu2 %v1097_v56, %s8051_s11  ;;  %984 = vrot.lane.b32.xlu0 %v980_v59, %s8049_s24  ;;  %v1015_v56 = vmul.f32 %v1013_v8, %v5340_v20 }
 0x243   : > { %986 = vrot.lane.b32.xlu1 %v981_v58, %s8049_s24 }
 0x244   : > { %v5560_v4 = vpop.permute.xlu0 %583  ;;  %v5566_v17 = vpop.permute.xlu2 %639 }
 0x245   : > { %v5558_v3 = vpop.permute.xlu1 %603 }
 0x24a   : > { %1134 = vrot.lane.b32.xlu2 %v1130_v19, %s8051_s11  ;;  %1000 = vrot.lane.b32.xlu0 %v995_v25, %s8051_s11  ;;  %v1048_v25 = vmul.f32 %v1047_v18, %v5356_v29  ;;  %v8031_v18 = vstv %s5598_s19 }
 0x24b   : > { %1018 = vrot.lane.b32.xlu1 %v1014_v22, %s8049_s24  ;;  %v8028_v22 = vstv %s5580_s7 }
 0x24c   : > { %v5578_v37 = vpop.permute.xlu0 %617  ;;  %v5588_v58 = vpop.permute.xlu2 %655  ;;  %v1184_v8 = vmul.f32 %v8028_v22, %v5409_v61  ;;  %v1061_v22 = vstv %s4547_s8  ;;  %s5685_s8 = sld [smem:[#allocation3 + $0x6]] }
 0x24d   : > { %v5576_v36 = vpop.permute.xlu1 %619  ;;  %8094 = vst [vmem:[#allocation19_spill] sm:$0xff] %v5588_v58  ;;  %v8035_v58 = vstv %s5676_s5 }
 0x252   : > { %1156 = vrot.lane.b32.xlu2 %v1151_v2, %s8049_s24  ;;  %1020 = vrot.lane.b32.xlu0 %v1015_v56, %s8049_s24  ;;  %v1029_v2 = vmul.f32 %v1027_v38, %v5340_v20  ;;  %v1199_v38 = vmul.f32 %v8031_v18, %v5418_v5 }
 0x253   : > { %1032 = vrot.lane.b32.xlu1 %v1028_v48, %s8051_s11 }
 0x254   : > { %v5595_v19 = vpop.permute.xlu0 %641  ;;  %v5610_v48 = vpop.permute.xlu2 %689 }
 0x255   : > { %v5593_v59 = vpop.permute.xlu1 %653  ;;  %8095 = vst [vmem:[#allocation20_spill] sm:$0xff] %v5610_v48 }
 0x25a   : > { %1188 = vrot.lane.b32.xlu2 %v1184_v8, %s8049_s24  ;;  %1034 = vrot.lane.b32.xlu0 %v1029_v2, %s8051_s11  ;;  %v1063_v8 = vmul.f32 %v1061_v22, %v5351_v27 }
 0x25b   : > { %1052 = vrot.lane.b32.xlu1 %v1048_v25, %s8049_s24  ;;  %v1062_v25 = vmul.f32 %v1061_v22, %v5356_v29  ;;  %v1232_v22 = vmul.f32 %v8032_v34, %v5432_v15  ;;  %v8033_v34 = vstv %s5634_s26 }
 0x25c   : > { %v5614_v7 = vpop.permute.xlu0 %675  ;;  %v5632_v48 = vpop.permute.xlu2 %713 }
 0x25d   : > { %v5612_v56 = vpop.permute.xlu1 %677  ;;  %8097 = vst [vmem:[#allocation22_spill] sm:$0xff] %v5614_v7  ;;  %v448_v7 = vstv %s5654_s30  ;;  %s4511_s30 = sld [smem:[#allocation3 + $0xf]] }
 0x25e   : > { %8096 = vst [vmem:[#allocation21_spill] sm:$0xff] %v5612_v56 }
 0x25f   : > { %8100 = vst [vmem:[#allocation25_spill] sm:$0xff] %v5632_v48 }
 0x262   : > { %1204 = vrot.lane.b32.xlu2 %v1199_v38, %s8051_s11  ;;  %1066 = vrot.lane.b32.xlu0 %v1062_v25, %s8051_s11  ;;  %v1096_v38 = vmul.f32 %v1095_v53, %v5365_v35  ;;  %v1115_v53 = vstv %s4552_s25  ;;  %s4561_s25 = sld [smem:[#allocation3 + $0x40]] }
 0x263   : > { %1068 = vrot.lane.b32.xlu1 %v1063_v8, %s8051_s11  ;;  %v8101_v8 = vstv %s5513_s27  ;;  %s4556_s27 = sld [smem:[#allocation3 + $0x3b]] }
 0x264   : > { %v5629_v39 = vpop.permute.xlu0 %691  ;;  %v1083_v25 = vmul.f32 %v8101_v8, %v5375_v41  ;;  %v412_v8 = vstv %s5640_s28  ;;  %s4565_s28 = sld [smem:[#allocation3 + $0x44]] }
 0x265   : > { %v5627_v2 = vpop.permute.xlu1 %711  ;;  %8099 = vst [vmem:[#allocation24_spill] sm:$0xff] %v5629_v39  ;;  %v8034_v39 = vstv %s5652_s29 }
 0x266   : > { %8098 = vst [vmem:[#allocation23_spill] sm:$0xff] %v5627_v2  ;;  %v5657_v2 = vpop.permute.xlu2 %747 }
 0x267   : > { %8104 = vst [vmem:[#allocation28_spill] sm:$0xff] %v5657_v2 }
 0x26a   : > { %1236 = vrot.lane.b32.xlu2 %v1232_v22, %s8051_s11  ;;  %1088 = vrot.lane.b32.xlu0 %v1083_v25, %s8049_s24  ;;  %v1253_v22 = vmul.f32 %v8033_v34, %v5440_v23  ;;  %v1116_v25 = vmul.f32 %v1115_v53, %v5387_v47 }
 0x26b   : > { %1100 = vrot.lane.b32.xlu1 %v1096_v38, %s8051_s11  ;;  %v1117_v38 = vmul.f32 %v1115_v53, %v5385_v46 }
 0x26c   : > { %v5650_v48 = vpop.permute.xlu0 %725 }
 0x26d   : > { %v5648_v18 = vpop.permute.xlu1 %727  ;;  %8103 = vst [vmem:[#allocation27_spill] sm:$0xff] %v5650_v48  ;;  %v414_v48 = vmul.f32 %v412_v8, %v5306_v63 }
 0x26e   : > { %8102 = vst [vmem:[#allocation26_spill] sm:$0xff] %v5648_v18 }
 0x26f   : > { %v430_v2 = vadd.f32 %v5482_v52, %v414_v48  ;;  %v8108_v52 = vstv %s5547_s4  ;;  %s5702_s4 = sld [smem:[#allocation3 + $0x49]] }
 0x270   : > { %v1131_v48 = vmul.f32 %v8108_v52, %v5385_v46 }
 0x271   : > { %v444_v53 = vadd.f32 %v5443_v24, %v430_v2 }
 0x272   : > { %1258 = vrot.lane.b32.xlu2 %v1253_v22, %s8049_s24  ;;  %1120 = vrot.lane.b32.xlu0 %v1116_v25, %s8049_s24  ;;  %v1286_v22 = vmul.f32 %v8034_v39, %v5457_v33  ;;  %v413_v25 = vmul.f32 %v412_v8, %v5291_v55 }
 0x273   : > { %1122 = vrot.lane.b32.xlu1 %v1117_v38, %s8049_s24  ;;  %v8107_v38 = vstv %s5564_s6  ;;  %s4505_s6 = sld [smem:[#allocation3 + $0x9]] }
 0x274   : > { %v5672_v34 = vpop.permute.xlu0 %749  ;;  %v1150_v56 = vmul.f32 %v8107_v38, %v5401_v57  ;;  %v429_v24 = vadd.f32 %v5428_v12, %v413_v25 }
 0x275   : > { %v5670_v18 = vpop.permute.xlu1 %761  ;;  %8106 = vst [vmem:[#allocation30_spill] sm:$0xff] %v5672_v34  ;;  %v5692_v34 = vpop.permute.xlu2 %763 }
 0x276   : > { %8105 = vst [vmem:[#allocation29_spill] sm:$0xff] %v5670_v18  ;;  %v450_v18 = vmul.f32 %v448_v7, %v5321_v9  ;;  %v443_v8 = vadd.f32 %v5466_v40, %v429_v24 }
 0x277   : > { %8109 = vst [vmem:[#allocation31_spill] sm:$0xff] %v5692_v34  ;;  %v1163_v34 = vstv %s4556_s27  ;;  %s4576_s27 = sld [smem:[#allocation3 + $0x4d]] }
 0x278   : > { %v452_v2 = vadd.f32 %v450_v18, %v444_v53  ;;  %v1165_v12 = vmul.f32 %v1163_v34, %v5396_v54  ;;  %v484_v18 = vstv %s5685_s8  ;;  %v1164_v53 = vmul.f32 %v1163_v34, %v5401_v57  ;;  %s4517_s8 = sld [smem:[#allocation3 + $0x15]] }
 0x27a   : > { %1290 = vrot.lane.b32.xlu2 %v1286_v22, %s8049_s24  ;;  %1136 = vrot.lane.b32.xlu0 %v1131_v48, %s8051_s11  ;;  %v466_v39 = vadd.f32 %v5496_v1, %v452_v2  ;;  %v449_v22 = vmul.f32 %v448_v7, %v5308_v0  ;;  %v486_v1 = vmul.f32 %v484_v18, %v5330_v14 }
 0x27b   : > { %1154 = vrot.lane.b32.xlu1 %v1150_v56, %s8049_s24  ;;  %v1301_v56 = vmul.f32 %v8035_v58, %v5470_v43 }
 0x27c   : > { %v5700_v52 = vpop.permute.xlu0 %783  ;;  %v451_v48 = vadd.f32 %v449_v22, %v443_v8  ;;  %v480_v25 = vadd.f32 %v5468_v42, %v466_v39  ;;  %v1374_v42 = vstv %s5702_s4  ;;  %v485_v8 = vmul.f32 %v484_v18, %v5318_v6  ;;  %s5833_s4 = sld [smem:[#allocation3 + $0x50]] }
 0x27d   : > { %v5698_v38 = vpop.permute.xlu1 %785  ;;  %v5720_v7 = vpop.permute.xlu2 %797  ;;  %v1375_v22 = vmul.f32 %v1374_v42, %v5291_v55 }
 0x27e   : > { %v465_v40 = vadd.f32 %v5455_v32, %v451_v48  ;;  %v488_v2 = vadd.f32 %v486_v1, %v480_v25  ;;  %v8110_v32 = vstv %s5598_s19  ;;  %v520_v25 = vstv %s4505_s6  ;;  %s5745_s19 = sld [smem:[#allocation3 + $0x4a]] }
 0x27f   : > { %s4520_s6 = sld [smem:[#allocation3 + $0x18]] }
 0x280   : > { %v479_v39 = vadd.f32 %v5478_v50, %v465_v40  ;;  %v502_v58 = vadd.f32 %v5480_v51, %v488_v2  ;;  %v1217_v2 = vstv %s4561_s25  ;;  %s5856_s25 = sld [smem:[#allocation3 + $0x53]] }
 0x282   : > { %1306 = vrot.lane.b32.xlu2 %v1301_v56, %s8051_s11  ;;  %1168 = vrot.lane.b32.xlu0 %v1164_v53, %s8051_s11  ;;  %v1198_v56 = vmul.f32 %v8110_v32, %v5409_v61  ;;  %v487_v48 = vadd.f32 %v485_v8, %v479_v39  ;;  %v516_v1 = vadd.f32 %v5507_v10, %v502_v58 }
 0x283   : > { %1170 = vrot.lane.b32.xlu1 %v1165_v12, %s8051_s11  ;;  %v8111_v12 = vstv %s5580_s7  ;;  %s4508_s7 = sld [smem:[#allocation3 + $0xc]]  ;;  %v521_v8 = vmul.f32 %v520_v25, %v5343_v21  ;;  %v1219_v32 = vmul.f32 %v1217_v2, %v5430_v13 }
 0x284   : > { %v5724_v34 = vpop.permute.xlu0 %799  ;;  %v1185_v53 = vmul.f32 %v8111_v12, %v5418_v5  ;;  %v501_v50 = vadd.f32 %v5492_v60, %v487_v48  ;;  %v522_v60 = vmul.f32 %v520_v25, %v5340_v20 }
 0x285   : > { %v5722_v24 = vpop.permute.xlu1 %819  ;;  %v5749_v51 = vpop.permute.xlu2 %821 }
 0x286   : > { %v515_v39 = vadd.f32 %v5511_v16, %v501_v50  ;;  %v524_v10 = vadd.f32 %v522_v60, %v516_v1  ;;  %v8113_v60 = vstv %s5616_s20  ;;  %s4514_s20 = sld [smem:[#allocation3 + $0x12]] }
 0x288   : > { %v523_v12 = vadd.f32 %v521_v8, %v515_v39  ;;  %v538_v16 = vadd.f32 %v5528_v31, %v524_v10  ;;  %v8112_v8 = vstv %s5634_s26  ;;  %s5786_s26 = sld [smem:[#allocation3 + $0x4c]] }
 0x289   : > { %v556_v50 = vstv %s4508_s7  ;;  %v1252_v31 = vmul.f32 %v8112_v8, %v5447_v26  ;;  %s4523_s7 = sld [smem:[#allocation3 + $0x1b]] }
 0x28a   : > { %1379 = vrot.lane.b32.xlu2 %v1375_v22, %s8049_s24  ;;  %1190 = vrot.lane.b32.xlu0 %v1185_v53, %s8049_s24  ;;  %v1376_v22 = vmul.f32 %v1374_v42, %v5306_v63  ;;  %v1388_v42 = vstv %s5745_s19  ;;  %v537_v48 = vadd.f32 %v5494_v62, %v523_v12  ;;  %v552_v1 = vadd.f32 %v5509_v11, %v538_v16  ;;  %s5871_s19 = sld [smem:[#allocation3 + $0x56]] }
 0x28b   : > { %1202 = vrot.lane.b32.xlu1 %v1198_v56, %s8051_s11  ;;  %v1218_v56 = vmul.f32 %v1217_v2, %v5432_v15  ;;  %v1389_v2 = vmul.f32 %v1388_v42, %v5291_v55  ;;  %v557_v62 = vmul.f32 %v556_v50, %v5356_v29  ;;  %v1265_v16 = vstv %s4565_s28  ;;  %s5877_s28 = sld [smem:[#allocation3 + $0x55]] }
 0x28c   : > { %v5743_v40 = vpop.permute.xlu0 %833  ;;  %v551_v25 = vadd.f32 %v5524_v28, %v537_v48 }
 0x28d   : > { %v5741_v18 = vpop.permute.xlu1 %835  ;;  %v5768_v39 = vpop.permute.xlu2 %998 }
 0x28e   : > { %v559_v28 = vadd.f32 %v557_v62, %v551_v25  ;;  %v1266_v25 = vmul.f32 %v1265_v16, %v5447_v26 }
 0x290   : > { %v573_v10 = vadd.f32 %v5545_v45, %v559_v28 }
 0x292   : > { %1381 = vrot.lane.b32.xlu2 %v1376_v22, %s8049_s24  ;;  %1222 = vrot.lane.b32.xlu0 %v1218_v56, %s8049_s24  ;;  %v1233_v22 = vmul.f32 %v8113_v60, %v5430_v13  ;;  %v587_v8 = vadd.f32 %v5526_v30, %v573_v10  ;;  %v1408_v30 = vstv %s5786_s26  ;;  %s5897_s26 = sld [smem:[#allocation3 + $0x27]] }
 0x293   : > { %1224 = vrot.lane.b32.xlu1 %v1219_v32, %s8049_s24  ;;  %v558_v32 = vmul.f32 %v556_v50, %v5351_v27  ;;  %v1390_v50 = vmul.f32 %v1388_v42, %v5306_v63  ;;  %v1409_v62 = vmul.f32 %v1408_v30, %v5308_v0 }
 0x294   : > { %v5762_v53 = vpop.permute.xlu0 %916 }
 0x295   : > { %v5760_v58 = vpop.permute.xlu1 %918  ;;  %v560_v11 = vadd.f32 %v558_v32, %v552_v1  ;;  %v592_v1 = vstv %s4511_s30  ;;  %s5888_s30 = sld [smem:[#allocation3 + $0x24]] }
 0x296   : > { %v593_v63 = vmul.f32 %v592_v1, %v5365_v35  ;;  %v8115_v35 = vstv %s5652_s29  ;;  %s5827_s29 = sld [smem:[#allocation3 + $0x4f]] }
 0x297   : > { %v574_v12 = vadd.f32 %v5541_v44, %v560_v11  ;;  %v5796_v44 = vpop.permute.xlu2 %1054  ;;  %v8114_v11 = vstv %s5676_s5  ;;  %v1287_v10 = vmul.f32 %v8115_v35, %v5470_v43  ;;  %s5831_s5 = sld [smem:[#allocation3 + $0x52]] }
 0x298   : > { %v595_v60 = vadd.f32 %v593_v63, %v587_v8  ;;  %v1300_v28 = vmul.f32 %v8114_v11, %v5457_v33 }
 0x299   : > { %v588_v48 = vadd.f32 %v5560_v4, %v574_v12  ;;  %v628_v12 = vstv %s4514_s20  ;;  %s5905_s20 = sld [smem:[#allocation3 + $0x58]] }
 0x29a   : > { %1393 = vrot.lane.b32.xlu2 %v1389_v2, %s8051_s11  ;;  %1238 = vrot.lane.b32.xlu0 %v1233_v22, %s8051_s11  ;;  %v1267_v2 = vmul.f32 %v1265_v16, %v5440_v23  ;;  %v609_v22 = vadd.f32 %v5558_v3, %v595_v60  ;;  %v630_v3 = vmul.f32 %v628_v12, %v5385_v46  ;;  %v664_v60 = vstv %s4517_s8  ;;  %s5924_s8 = sld [smem:[#allocation3 + $0x2a]] }
 0x29b   : > { %1256 = vrot.lane.b32.xlu1 %v1252_v31, %s8049_s24  ;;  %v594_v31 = vmul.f32 %v592_v1, %v5375_v41  ;;  %v1410_v46 = vmul.f32 %v1408_v30, %v5321_v9  ;;  %v665_v11 = vmul.f32 %v664_v60, %v5401_v57  ;;  %v8119_v57 = vld [vmem:[#allocation24_spill] sm:$0xff] }
 0x29c   : > { %v5784_v56 = vpop.permute.xlu0 %930 }
 0x29d   : > { %v5782_v55 = vpop.permute.xlu1 %932  ;;  %v596_v45 = vadd.f32 %v594_v31, %v588_v48  ;;  %v623_v48 = vadd.f32 %v5578_v37, %v609_v22  ;;  %v1422_v37 = vstv %s4576_s27  ;;  %s5907_s27 = sld [smem:[#allocation3 + $0x1e]] }
 0x29e   : > { %v1424_v31 = vmul.f32 %v1422_v37, %v5321_v9  ;;  %v1423_v63 = vmul.f32 %v1422_v37, %v5308_v0  ;;  %v1442_v0 = vstv %s5827_s29  ;;  %s5934_s29 = sld [smem:[#allocation3 + $0x5b]] }
 0x29f   : > { %v610_v32 = vadd.f32 %v5549_v49, %v596_v45  ;;  %v629_v49 = vmul.f32 %v628_v12, %v5387_v47  ;;  %v1456_v12 = vstv %s5833_s4  ;;  %s4557_s4 = sld [smem:[#allocation3 + $0x3c]] }
 0x2a1   : > { %v624_v16 = vadd.f32 %v5576_v36, %v610_v32  ;;  %v631_v1 = vadd.f32 %v629_v49, %v623_v48  ;;  %v8116_v32 = vld [vmem:[#allocation19_spill] sm:$0xff]  ;;  %v1457_v48 = vmul.f32 %v1456_v12, %v5318_v6  ;;  %v8117_v49 = vld [vmem:[#allocation21_spill] sm:$0xff] }
 0x2a2   : > { %1395 = vrot.lane.b32.xlu2 %v1390_v50, %s8051_s11  ;;  %1270 = vrot.lane.b32.xlu0 %v1266_v25, %s8051_s11  ;;  %v5823_v50 = vpop.permute.xlu2 %1086 }
 0x2a3   : > { %1272 = vrot.lane.b32.xlu1 %v1267_v2, %s8051_s11  ;;  %v632_v25 = vadd.f32 %v630_v3, %v624_v16  ;;  %v645_v45 = vadd.f32 %v5566_v17, %v631_v1  ;;  %v666_v17 = vmul.f32 %v664_v60, %v5396_v54  ;;  %v8118_v54 = vld [vmem:[#allocation22_spill] sm:$0xff] }
 0x2a4   : > { %v5804_v42 = vpop.permute.xlu0 %950 }
 0x2a5   : > { %v5802_v4 = vpop.permute.xlu1 %952  ;;  %v646_v8 = vadd.f32 %v5595_v19, %v632_v25  ;;  %v659_v22 = vadd.f32 %v5593_v59, %v645_v45 }
 0x2a7   : > { %v660_v19 = vadd.f32 %v8116_v32, %v646_v8  ;;  %v667_v35 = vadd.f32 %v665_v11, %v659_v22  ;;  %v8120_v8 = vld [vmem:[#allocation20_spill] sm:$0xff]  ;;  %v1444_v32 = vmul.f32 %v1442_v0, %v5330_v14 }
 0x2a9   : > { %v668_v59 = vadd.f32 %v666_v17, %v660_v19  ;;  %v681_v37 = vadd.f32 %v8118_v54, %v667_v35  ;;  %v736_v35 = vstv %s4523_s7  ;;  %s5980_s7 = sld [smem:[#allocation3 + $0x2d]] }
 0x2aa   : > { %1413 = vrot.lane.b32.xlu2 %v1409_v62, %s8049_s24  ;;  %1292 = vrot.lane.b32.xlu0 %v1287_v10, %s8049_s24  ;;  %v1476_v62 = vstv %s5831_s5  ;;  %v1443_v10 = vmul.f32 %v1442_v0, %v5318_v6  ;;  %v737_v54 = vmul.f32 %v736_v35, %v5432_v15  ;;  %s5938_s5 = sld [smem:[#allocation3 + $0x59]] }
 0x2ab   : > { %1304 = vrot.lane.b32.xlu1 %v1300_v28, %s8051_s11  ;;  %v5853_v28 = vpop.permute.xlu2 %1102  ;;  %v1477_v16 = vmul.f32 %v1476_v62, %v5343_v21  ;;  %v682_v3 = vadd.f32 %v8117_v49, %v668_v59  ;;  %v700_v21 = vstv %s4520_s6  ;;  %v1478_v17 = vmul.f32 %v1476_v62, %v5340_v20  ;;  %v8122_v59 = vld [vmem:[#allocation25_spill] sm:$0xff]  ;;  %s5949_s6 = sld [smem:[#allocation3 + $0x21]] }
 0x2ac   : > { %v5829_v36 = vpop.permute.xlu0 %964  ;;  %v701_v45 = vmul.f32 %v700_v21, %v5409_v61  ;;  %v8121_v61 = vld [vmem:[#allocation23_spill] sm:$0xff]  ;;  %v1524_v62 = vstv %s5871_s19  ;;  %s5977_s19 = sld [smem:[#allocation3 + $0x5c]] }
 0x2ad   : > { %v5825_v2 = vpop.permute.xlu1 %966  ;;  %v696_v1 = vadd.f32 %v8119_v57, %v682_v3  ;;  %v1510_v3 = vstv %s5877_s28  ;;  %v1525_v57 = vmul.f32 %v1524_v62, %v5356_v29  ;;  %s4563_s28 = sld [smem:[#allocation3 + $0x42]] }
 0x2b2   : > { %1415 = vrot.lane.b32.xlu2 %v1410_v46, %s8049_s24  ;;  %1427 = vrot.lane.b32.xlu0 %v1423_v63, %s8051_s11  ;;  %v695_v46 = vadd.f32 %v8120_v8, %v681_v37  ;;  %v1490_v63 = vstv %s5856_s25  ;;  %v738_v37 = vmul.f32 %v736_v35, %v5430_v13  ;;  %v8125_v13 = vld [vmem:[#allocation30_spill] sm:$0xff]  ;;  %s4560_s25 = sld [smem:[#allocation3 + $0x3f]] }
 0x2b3   : > { %1429 = vrot.lane.b32.xlu1 %v1424_v31, %s8051_s11  ;;  %v702_v31 = vmul.f32 %v700_v21, %v5418_v5  ;;  %v5881_v22 = vpop.permute.xlu2 %1134  ;;  %v1492_v19 = vmul.f32 %v1490_v63, %v5340_v20 }
 0x2b4   : > { %v5847_v9 = vpop.permute.xlu0 %984  ;;  %v703_v11 = vadd.f32 %v701_v45, %v695_v46  ;;  %v905_v46 = vstv %s5888_s30  ;;  %v5919_v45 = vld [vmem:[#allocation2 + $0x8] sm:$0xff]  ;;  %s6004_s30 = sld [smem:[#allocation3 + $0x5f]] }
 0x2b5   : > { %v5845_v30 = vpop.permute.xlu1 %986  ;;  %v704_v60 = vadd.f32 %v702_v31, %v696_v1  ;;  %v1511_v1 = vmul.f32 %v1510_v3, %v5356_v29  ;;  %v907_v15 = vmul.f32 %v5919_v45, %v905_v46 }
 0x2b6   : > { %v717_v5 = vadd.f32 %v8121_v61, %v703_v11  ;;  %v8126_v61 = vld [vmem:[#allocation28_spill] sm:$0xff] }
 0x2b7   : > { %v718_v14 = vadd.f32 %v8122_v59, %v704_v60  ;;  %v939_v59 = vstv %s5897_s26  ;;  %s6008_s26 = sld [smem:[#allocation3 + $0x5e]] }
 0x2ba   : > { %1447 = vrot.lane.b32.xlu2 %v1443_v10, %s8049_s24  ;;  %1461 = vrot.lane.b32.xlu0 %v1457_v48, %s8051_s11  ;;  %v8123_v10 = vld [vmem:[#allocation26_spill] sm:$0xff]  ;;  %v8124_v48 = vld [vmem:[#allocation27_spill] sm:$0xff] }
 0x2bb   : > { %1481 = vrot.lane.b32.xlu1 %v1477_v16, %s8049_s24  ;;  %v732_v16 = vadd.f32 %v8123_v10, %v718_v14  ;;  %v731_v49 = vadd.f32 %v8124_v48, %v717_v5  ;;  %v5916_v31 = vpop.permute.xlu2 %1156  ;;  %v772_v14 = vstv %s5907_s27  ;;  %s6016_s27 = sld [smem:[#allocation3 + $0x30]] }
 0x2bc   : > { %v5873_v6 = vpop.permute.xlu0 %1000 }
 0x2bd   : > { %v5869_v25 = vpop.permute.xlu1 %1018  ;;  %v739_v21 = vadd.f32 %v737_v54, %v731_v49  ;;  %v740_v8 = vadd.f32 %v738_v37, %v732_v16  ;;  %v1544_v16 = vstv %s5905_s20  ;;  %v8128_v49 = vld [vmem:[#allocation31_spill] sm:$0xff]  ;;  %s4566_s20 = sld [smem:[#allocation3 + $0x45]] }
 0x2be   : > { %v1546_v37 = vmul.f32 %v1544_v16, %v5375_v41 }
 0x2bf   : > { %v754_v60 = vadd.f32 %v8125_v13, %v740_v8  ;;  %v753_v5 = vadd.f32 %v8126_v61, %v739_v21  ;;  %v773_v8 = vmul.f32 %v772_v14, %v5447_v26  ;;  %v1578_v26 = vstv %s5934_s29  ;;  %s4548_s29 = sld [smem:[#allocation3 + $0x33]] }
 0x2c0   : > { %v973_v61 = vstv %s5924_s8  ;;  %s6051_s8 = sld [smem:[#allocation3 + $0x61]] }
 0x2c1   : > { %v768_v54 = vadd.f32 %v8128_v49, %v754_v60  ;;  %v5988_v49 = vld [vmem:[#allocation2 + $0x1a] sm:$0xff] }
 0x2c2   : > { %1449 = vrot.lane.b32.xlu2 %v1444_v32, %s8049_s24  ;;  %1483 = vrot.lane.b32.xlu0 %v1478_v17, %s8049_s24  ;;  %v923_v32 = vadd.f32 %v5760_v58, %v907_v15  ;;  %v8127_v58 = vld [vmem:[#allocation29_spill] sm:$0xff] }
 0x2c3   : > { %1497 = vrot.lane.b32.xlu1 %v1492_v19, %s8051_s11  ;;  %v5929_v19 = vld [vmem:[#allocation2] sm:$0xff]  ;;  %v767_v48 = vadd.f32 %v8127_v58, %v753_v5  ;;  %v5963_v60 = vpop.permute.xlu2 %1188 }
 0x2c4   : > { %v5899_v20 = vpop.permute.xlu0 %1020  ;;  %v906_v17 = vmul.f32 %v5929_v19, %v905_v46  ;;  %v937_v10 = vadd.f32 %v5782_v55, %v923_v32  ;;  %v774_v55 = vmul.f32 %v772_v14, %v5440_v23  ;;  %v5959_v46 = vld [vmem:[#allocation2 + $0x1] sm:$0xff] }
 0x2c5   : > { %v5895_v0 = vpop.permute.xlu1 %1032  ;;  %v775_v13 = vadd.f32 %v773_v8, %v767_v48 }
 0x2c6   : > { %v922_v35 = vadd.f32 %v5762_v53, %v906_v17  ;;  %v1526_v53 = vmul.f32 %v1524_v62, %v5351_v27  ;;  %v776_v15 = vadd.f32 %v774_v55, %v768_v54  ;;  %v5996_v54 = vld [vmem:[#allocation2 + $0x2] sm:$0xff] }
 0x2c7   : > { %v789_v17 = vadd.f32 %v5700_v52, %v775_v13  ;;  %v5985_v52 = vld [vmem:[#allocation2 + $0xa] sm:$0xff] }
 0x2c8   : > { %v790_v32 = vadd.f32 %v5698_v38, %v776_v15  ;;  %v808_v38 = vstv %s5949_s6  ;;  %v975_v48 = vmul.f32 %v5985_v52, %v973_v61  ;;  %v1007_v15 = vstv %s5980_s7  ;;  %s6072_s6 = sld [smem:[#allocation3 + $0x64]] }
 0x2c9   : > { %s6074_s7 = sld [smem:[#allocation3 + $0x62]] }
 0x2ca   : > { %1515 = vrot.lane.b32.xlu0 %v1511_v1, %s8049_s24  ;;  %v5952_v1 = vld [vmem:[#allocation2 + $0x9] sm:$0xff] }
 0x2cb   : > { %1529 = vrot.lane.b32.xlu1 %v1525_v57, %s8051_s11  ;;  %v936_v57 = vadd.f32 %v5784_v56, %v922_v35  ;;  %v941_v21 = vmul.f32 %v5952_v1, %v939_v59  ;;  %v940_v56 = vmul.f32 %v5959_v46, %v939_v59  ;;  %v1558_v59 = vstv %s5938_s5  ;;  %v6006_v55 = vpop.permute.xlu2 %1204  ;;  %s6239_s5 = sld [smem:[#allocation3 + $0x70]] }
 0x2cc   : > { %v5932_v11 = vpop.permute.xlu0 %1034 }
 0x2cd   : > { %v5926_v29 = vpop.permute.xlu1 %1052  ;;  %v943_v41 = vadd.f32 %v941_v21, %v937_v10  ;;  %v942_v23 = vadd.f32 %v940_v56, %v936_v57  ;;  %v1579_v10 = vmul.f32 %v1578_v26, %v5387_v47  ;;  %v1592_v56 = vstv %s5977_s19  ;;  %s6248_s19 = sld [smem:[#allocation3 + $0x74]] }
 0x2cf   : > { %v957_v27 = vadd.f32 %v5802_v4, %v943_v41  ;;  %v956_v14 = vadd.f32 %v5804_v42, %v942_v23  ;;  %v804_v4 = vadd.f32 %v5724_v34, %v790_v32  ;;  %v1559_v42 = vmul.f32 %v5988_v49, %v1558_v59 }
 0x2d0   : > { %v810_v34 = vmul.f32 %v808_v38, %v5470_v43 }
 0x2d1   : > { %v971_v35 = vadd.f32 %v5825_v2, %v957_v27  ;;  %v970_v58 = vadd.f32 %v5829_v36, %v956_v14  ;;  %v803_v2 = vadd.f32 %v5720_v7, %v789_v17  ;;  %v974_v36 = vmul.f32 %v5996_v54, %v973_v61  ;;  %v6020_v27 = vld [vmem:[#allocation2 + $0x38] sm:$0xff] }
 0x2d2   : > { %1531 = vrot.lane.b32.xlu0 %v1526_v53, %s8051_s11  ;;  %v812_v57 = vadd.f32 %v810_v34, %v804_v4  ;;  %v1594_v23 = vmul.f32 %v6020_v27, %v1592_v56  ;;  %v6038_v14 = vld [vmem:[#allocation2 + $0x18] sm:$0xff] }
 0x2d3   : > { %1551 = vrot.lane.b32.xlu1 %v1546_v37, %s8049_s24  ;;  %v977_v47 = vadd.f32 %v975_v48, %v971_v35  ;;  %v809_v37 = vmul.f32 %v808_v38, %v5457_v33  ;;  %v976_v7 = vadd.f32 %v974_v36, %v970_v58  ;;  %v1008_v35 = vmul.f32 %v6038_v14, %v1007_v15  ;;  %v6053_v48 = vpop.permute.xlu2 %1236 }
 0x2d4   : > { %v5966_v62 = vpop.permute.xlu0 %1066 }
 0x2d5   : > { %v5972_v5 = vpop.permute.xlu1 %1068  ;;  %v991_v21 = vadd.f32 %v5845_v30, %v977_v47  ;;  %v811_v43 = vadd.f32 %v809_v37, %v803_v2  ;;  %v990_v8 = vadd.f32 %v5847_v9, %v976_v7  ;;  %v826_v30 = vadd.f32 %v5749_v51, %v812_v57  ;;  %v6025_v9 = vld [vmem:[#allocation2 + $0x20] sm:$0xff] }
 0x2d6   : > { %v6060_v47 = vld [vmem:[#allocation2 + $0x21] sm:$0xff] }
 0x2d7   : > { %v1005_v41 = vadd.f32 %v5873_v6, %v991_v21  ;;  %v825_v33 = vadd.f32 %v5722_v24, %v811_v43  ;;  %v1009_v6 = vmul.f32 %v6025_v9, %v1007_v15  ;;  %v1580_v24 = vmul.f32 %v6020_v27, %v1578_v26  ;;  %v6078_v15 = vld [vmem:[#allocation2 + $0x3a] sm:$0xff] }
 0x2d8   : > { %v6030_v51 = vadd.f32 %v5741_v18, %v826_v30  ;;  %v1004_v17 = vadd.f32 %v5768_v39, %v990_v8  ;;  %v1626_v18 = vstv %s6004_s30  ;;  %s4551_s30 = sld [smem:[#allocation3 + $0x36]] }
 0x2d9   : > { %v6033_v32 = vadd.f32 %v5743_v40, %v825_v33  ;;  %v1011_v61 = vadd.f32 %v1009_v6, %v1005_v41  ;;  %v1612_v40 = vstv %s6008_s26  ;;  %v1646_v33 = vstv %s6051_s8  ;;  %s6258_s26 = sld [smem:[#allocation3 + $0x77]] }
 0x2da   : > { %1563 = vrot.lane.b32.xlu0 %v1559_v42, %s8051_s11  ;;  %v843_v39 = vsel %vm841_vm7, %v6030_v51, 0.0  ;;  %v1010_v38 = vadd.f32 %v1008_v35, %v1004_v17  ;;  %v1041_v42 = vstv %s6016_s27  ;;  %s6100_s27 = sld [smem:[#allocation3 + $0x65]] }
 0x2db   : > { %1583 = vrot.lane.b32.xlu1 %v1579_v10, %s8049_s24  ;;  %v1025_v26 = vadd.f32 %v5899_v20, %v1011_v61  ;;  %v842_v10 = vsel %vm841_vm7, %v6033_v32, 0.0  ;;  %v6056_v20 = vld [vmem:[#allocation2 + $0x31] sm:$0xff]  ;;  %v1043_v36 = vmul.f32 %v6060_v47, %v1041_v42  ;;  %v6088_v61 = vpop.permute.xlu2 %1258  ;;  %s6261_s8 = sld [smem:[#allocation3 + $0x6b]] }
 0x2dc   : > { %v6002_v53 = vpop.permute.xlu0 %1088  ;;  %v1627_v2 = vmul.f32 %v6056_v20, %v1626_v18  ;;  %v1024_v34 = vadd.f32 %v5869_v25, %v1010_v38  ;;  %v1613_v37 = vmul.f32 %v6056_v20, %v1612_v40  ;;  %v6069_v25 = vld [vmem:[#allocation2 + $0x19] sm:$0xff]  ;;  %v1660_v38 = vstv %s6074_s7  ;;  %s6276_s7 = sld [smem:[#allocation3 + $0x79]] }
 0x2dd   : > { %v6018_v13 = vpop.permute.xlu1 %1100  ;;  %v1039_v58 = vadd.f32 %v5932_v11, %v1025_v26  ;;  %v844_v11 = vadd.f32 %v843_v39, %v842_v10  ;;  %v1042_v43 = vmul.f32 %v6069_v25, %v1041_v42  ;;  %v6092_v26 = vld [vmem:[#allocation2 + $0x22] sm:$0xff] }
 0x2de   : > { %v1038_v21 = vadd.f32 %v5895_v0, %v1024_v34  ;;  %v1648_v0 = vmul.f32 %v6078_v15, %v1646_v33  ;;  %v6105_v34 = vld [vmem:[#allocation2 + $0x32] sm:$0xff] }
 0x2df   : > { %v1045_v7 = vadd.f32 %v1043_v36, %v1039_v58  ;;  %v1661_v36 = vmul.f32 %v6105_v34, %v1660_v38 }
 0x2e0   : > { %v1044_v8 = vadd.f32 %v1042_v43, %v1038_v21 }
 0x2e1   : > { %v1059_v41 = vadd.f32 %v5796_v44, %v1045_v7  ;;  %v1075_v44 = vstv %s4548_s29  ;;  %v1109_v7 = vstv %s4551_s30  ;;  %s6116_s29 = sld [smem:[#allocation3 + $0x39]] }
 0x2e2   : > { %1585 = vrot.lane.b32.xlu0 %v1580_v24, %s8049_s24  ;;  %v6085_v24 = vld [vmem:[#allocation2 + $0x39] sm:$0xff]  ;;  %v1077_v10 = vmul.f32 %v6092_v26, %v1075_v44  ;;  %s6148_s30 = sld [smem:[#allocation3 + $0x6a]] }
 0x2e3   : > { %1599 = vrot.lane.b32.xlu1 %v1594_v23, %s8051_s11  ;;  %v1058_v23 = vadd.f32 %v5926_v29, %v1044_v8  ;;  %v1073_v6 = vadd.f32 %v5972_v5, %v1059_v41  ;;  %v1628_v17 = vmul.f32 %v6085_v24, %v1626_v18  ;;  %v1076_v5 = vmul.f32 %v5988_v49, %v1075_v44  ;;  %v6114_v21 = vpop.permute.xlu2 %1290 }
 0x2e4   : > { %v6043_v4 = vpop.permute.xlu0 %1120  ;;  %v1680_v18 = vstv %s6072_s6  ;;  %v1111_v8 = vmul.f32 %v6020_v27, %v1109_v7  ;;  %s6120_s6 = sld [smem:[#allocation3 + $0x68]] }
 0x2e5   : > { %v1123_v57 = vpop.permute.xlu1 %1122  ;;  %v1072_v35 = vadd.f32 %v5966_v62, %v1058_v23  ;;  %v1079_v39 = vadd.f32 %v1077_v10, %v1073_v6  ;;  %v6102_v62 = vld [vmem:[#allocation2 + $0x48] sm:$0xff]  ;;  %v1694_v23 = vstv %s6100_s27  ;;  %v6128_v6 = vld [vmem:[#allocation2 + $0x50] sm:$0xff]  ;;  %v1458_v10 = vmul.f32 %v5985_v52, %v1456_v12  ;;  %s6283_s27 = sld [smem:[#allocation3 + $0x7c]] }
 0x2e6   : > { %v1714_v12 = vstv %s6122_s17  ;;  %s4610_s17 = sld [smem:[#allocation3 + $0x6d]] }
 0x2e7   : > { %v1078_v58 = vadd.f32 %v1076_v5, %v1072_v35  ;;  %v1093_v42 = vadd.f32 %v6002_v53, %v1079_v39  ;;  %v1682_v35 = vmul.f32 %v6128_v6, %v1680_v18 }
 0x2e9   : > { %v1107_v53 = vadd.f32 %v5853_v28, %v1093_v42  ;;  %v6124_v28 = vld [vmem:[#allocation2 + $0x30] sm:$0xff] }
 0x2ea   : > { %1617 = vrot.lane.b32.xlu0 %v1613_v37, %s8049_s24 }
 0x2eb   : > { %1631 = vrot.lane.b32.xlu1 %v1627_v2, %s8051_s11  ;;  %845 = vadd.xlane.f32.xlu2 %v844_v11  ;;  %v1681_v2 = vmul.f32 %v6102_v62, %v1680_v18  ;;  %v1092_v11 = vadd.f32 %v5823_v50, %v1078_v58  ;;  %v1113_v50 = vadd.f32 %v1111_v8, %v1107_v53  ;;  %v1143_v58 = vstv %s6116_s29  ;;  %v6144_v18 = vpop.permute.xlu2 %1306  ;;  %s4611_s29 = sld [smem:[#allocation3 + $0x6e]] }
 0x2ec   : > { %v1137_v30 = vpop.permute.xlu0 %1136  ;;  %v1491_v8 = vmul.f32 %v6038_v14, %v1490_v63 }
 0x2ed   : > { %v1155_v29 = vpop.permute.xlu1 %1154  ;;  %v1106_v43 = vadd.f32 %v6018_v13, %v1092_v11  ;;  %v1696_v13 = vmul.f32 %v6128_v6, %v1694_v23 }
 0x2f2   : > { %1633 = vrot.lane.b32.xlu0 %v1628_v17, %s8051_s11  ;;  %v1127_v17 = vadd.f32 %v1123_v57, %v1113_v50  ;;  %v1145_v57 = vmul.f32 %v6085_v24, %v1143_v58 }
 0x2f3   : > { %1653 = vrot.lane.b32.xlu1 %v1648_v0, %s8049_s24  ;;  %v1110_v0 = vmul.f32 %v6124_v28, %v1109_v7  ;;  %v1144_v7 = vmul.f32 %v6056_v20, %v1143_v58  ;;  %v6166_v63 = vpop.permute.xlu2 %1379  ;;  %v1512_v58 = vmul.f32 %v6060_v47, %v1510_v3 }
 0x2f4   : > { %v1169_v37 = vpop.permute.xlu0 %1168  ;;  %v1141_v39 = vadd.f32 %v1137_v30, %v1127_v17  ;;  %v6150_v30 = vld [vmem:[#allocation2 + $0x49] sm:$0xff]  ;;  %v1177_v17 = vstv %s4557_s4  ;;  %s6301_s4 = sld [smem:[#allocation3 + $0x80]] }
 0x2f5   : > { %v1171_v41 = vpop.permute.xlu1 %1170  ;;  %v1112_v44 = vadd.f32 %v1110_v0, %v1106_v43  ;;  %v1715_v43 = vmul.f32 %v6150_v30, %v1714_v12 }
 0x2f6   : > { %v1147_v11 = vadd.f32 %v1145_v57, %v1141_v39  ;;  %v6168_v39 = vld [vmem:[#allocation2 + $0x52] sm:$0xff] }
 0x2f7   : > { %v1126_v5 = vadd.f32 %v6043_v4, %v1112_v44  ;;  %v6177_v57 = vld [vmem:[#allocation2 + $0x51] sm:$0xff] }
 0x2f8   : > { %v1161_v50 = vadd.f32 %v5916_v31, %v1147_v11 }
 0x2fa   : > { %1665 = vrot.lane.b32.xlu0 %v1661_v36, %s8051_s11  ;;  %v1140_v36 = vadd.f32 %v5881_v22, %v1126_v5  ;;  %v1748_v5 = vstv %s6148_s30  ;;  %s6312_s30 = sld [smem:[#allocation3 + $0x82]] }
 0x2fb   : > { %1685 = vrot.lane.b32.xlu1 %v1681_v2, %s8049_s24  ;;  %v1728_v2 = vstv %s6120_s6  ;;  %v1750_v31 = vmul.f32 %v6168_v39, %v1748_v5  ;;  %s6294_s6 = sld [smem:[#allocation3 + $0x7d]] }
 0x2fc   : > { %v1191_v42 = vpop.permute.xlu0 %1190  ;;  %v1729_v53 = vmul.f32 %v6150_v30, %v1728_v2  ;;  %v1146_v22 = vadd.f32 %v1144_v7, %v1140_v36 }
 0x2fd   : > { %v1203_v4 = vpop.permute.xlu1 %1202 }
 0x2fe   : > { %v1160_v0 = vadd.f32 %v1155_v29, %v1146_v22  ;;  %v1178_v29 = vmul.f32 %v6105_v34, %v1177_v17 }
 0x302   : > { %1687 = vrot.lane.b32.xlu0 %v1682_v35, %s8049_s24  ;;  %v1174_v35 = vadd.f32 %v1169_v37, %v1160_v0  ;;  %v1730_v37 = vmul.f32 %v6177_v57, %v1728_v2  ;;  %v6189_v0 = vpop.permute.xlu2 %1381 }
 0x303   : > { %1701 = vrot.lane.b32.xlu1 %v1696_v13, %s8051_s11  ;;  %1463 = vrot.lane.b32.xlu2 %v1458_v10, %s8051_s11  ;;  %v1175_v13 = vadd.f32 %v1171_v41, %v1161_v50  ;;  %v1179_v10 = vmul.f32 %v6078_v15, %v1177_v17  ;;  %v1545_v50 = vmul.f32 %v5988_v49, %v1544_v16 }
 0x304   : > { %v1223_v44 = vpop.permute.xlu0 %1222  ;;  %v1180_v11 = vadd.f32 %v1178_v29, %v1174_v35 }
 0x305   : > { %v1181_v41 = vadd.f32 %v1179_v10, %v1175_v13  ;;  %v1225_v36 = vpop.permute.xlu1 %1224 }
 0x306   : > { %v1194_v7 = vadd.f32 %v5963_v60, %v1180_v11 }
 0x308   : > { %v1208_v22 = vadd.f32 %v1203_v4, %v1194_v7 }
 0x30a   : > { %1719 = vrot.lane.b32.xlu0 %v1715_v43, %s8049_s24  ;;  %v1211_v43 = vstv %s4560_s25  ;;  %s6319_s25 = sld [smem:[#allocation3 + $0x71]] }
 0x30b   : > { %1733 = vrot.lane.b32.xlu1 %v1729_v53, %s8051_s11  ;;  %1495 = vrot.lane.b32.xlu2 %v1491_v8, %s8051_s11  ;;  %v1195_v53 = vadd.f32 %v1191_v42, %v1181_v41  ;;  %v1213_v2 = vmul.f32 %v6128_v6, %v1211_v43  ;;  %v1212_v13 = vmul.f32 %v6102_v62, %v1211_v43  ;;  %v1279_v43 = vstv %s4566_s20  ;;  %s4616_s20 = sld [smem:[#allocation3 + $0x73]] }
 0x30c   : > { %v1239_v8 = vpop.permute.xlu0 %1238 }
 0x30d   : > { %v1209_v3 = vadd.f32 %v6006_v55, %v1195_v53  ;;  %v1257_v60 = vpop.permute.xlu1 %1256  ;;  %v1214_v55 = vadd.f32 %v1212_v13, %v1208_v22 }
 0x30f   : > { %v1215_v42 = vadd.f32 %v1213_v2, %v1209_v3  ;;  %v1228_v35 = vadd.f32 %v1223_v44, %v1214_v55  ;;  %v6208_v2 = vld [vmem:[#allocation2 + $0x4a] sm:$0xff] }
 0x311   : > { %v1229_v17 = vadd.f32 %v1225_v36, %v1215_v42  ;;  %v1242_v29 = vadd.f32 %v6053_v48, %v1228_v35  ;;  %v1281_v48 = vmul.f32 %v6168_v39, %v1279_v43 }
 0x312   : > { %1735 = vrot.lane.b32.xlu0 %v1730_v37, %s8051_s11  ;;  %v6199_v37 = vpop.permute.xlu2 %1393 }
 0x313   : > { %1755 = vrot.lane.b32.xlu1 %v1750_v31, %s8049_s24  ;;  %1517 = vrot.lane.b32.xlu2 %v1512_v58, %s8049_s24  ;;  %v1243_v10 = vadd.f32 %v1239_v8, %v1229_v17  ;;  %v1245_v31 = vstv %s4563_s28  ;;  %v1560_v58 = vmul.f32 %v6092_v26, %v1558_v59  ;;  %v1593_v59 = vmul.f32 %v6124_v28, %v1592_v56  ;;  %s6321_s28 = sld [smem:[#allocation3 + $0x85]] }
 0x314   : > { %v1247_v4 = vmul.f32 %v6177_v57, %v1245_v31  ;;  %v1271_v16 = vpop.permute.xlu0 %1270  ;;  %v1246_v36 = vmul.f32 %v6150_v30, %v1245_v31  ;;  %v1614_v56 = vmul.f32 %v6085_v24, %v1612_v40 }
 0x315   : > { %v1273_v44 = vpop.permute.xlu1 %1272 }
 0x316   : > { %v1249_v41 = vadd.f32 %v1247_v4, %v1243_v10  ;;  %v1248_v11 = vadd.f32 %v1246_v36, %v1242_v29  ;;  %v1695_v29 = vmul.f32 %v6102_v62, %v1694_v23  ;;  %v1919_v23 = vstv %s6248_s19  ;;  %s4635_s19 = sld [smem:[#allocation3 + $0x86]] }
 0x318   : > { %v1263_v53 = vadd.f32 %v6088_v61, %v1249_v41  ;;  %v1262_v7 = vadd.f32 %v1257_v60, %v1248_v11  ;;  %v1871_v41 = vstv %s6239_s5  ;;  %v1921_v11 = vmul.f32 %v5985_v52, %v1919_v23 }
 0x319   : > { %v1873_v36 = vmul.f32 %v5952_v1, %v1871_v41 }
 0x31a   : > { %v1277_v3 = vadd.f32 %v1273_v44, %v1263_v53  ;;  %v1276_v8 = vadd.f32 %v1271_v16, %v1262_v7  ;;  %v6211_v13 = vpop.permute.xlu2 %1395 }
 0x31b   : > { %1549 = vrot.lane.b32.xlu2 %v1545_v50, %s8049_s24  ;;  %v1280_v50 = vmul.f32 %v6208_v2, %v1279_v43 }
 0x31c   : > { %v1293_v22 = vpop.permute.xlu0 %1292  ;;  %v1283_v42 = vadd.f32 %v1281_v48, %v1277_v3  ;;  %v1762_v3 = vstv %s6261_s8  ;;  %s4580_s8 = sld [smem:[#allocation3 + $0x51]] }
 0x31d   : > { %v1282_v61 = vadd.f32 %v1280_v50, %v1276_v8  ;;  %v1305_v17 = vpop.permute.xlu1 %1304  ;;  %v1764_v8 = vmul.f32 %v6168_v39, %v1762_v3  ;;  %v1837_v50 = vstv %s4610_s17  ;;  %s6351_s17 = sld [smem:[#allocation3 + $0x76]] }
 0x31e   : > { %v1297_v60 = vadd.f32 %v1293_v22, %v1283_v42 }
 0x31f   : > { %v1296_v55 = vadd.f32 %v6114_v21, %v1282_v61  ;;  %v1838_v61 = vmul.f32 %v5929_v19, %v1837_v50 }
 0x320   : > { %v6218_v35 = vadd.f32 %v6144_v18, %v1297_v60  ;;  %v1662_v18 = vmul.f32 %v6078_v15, %v1660_v38  ;;  %v1716_v38 = vmul.f32 %v6177_v57, %v1714_v12  ;;  %v1749_v12 = vmul.f32 %v6208_v2, %v1748_v5 }
 0x321   : > { %v6221_v10 = vadd.f32 %v1305_v17, %v1296_v55  ;;  %v2007_v55 = vstv %s6283_s27  ;;  %s4583_s27 = sld [smem:[#allocation3 + $0x54]] }
 0x322   : > { %v1313_v31 = vsel %vm841_vm7, %v6218_v35, 0.0  ;;  %v6225_v4 = vpop.permute.xlu2 %1413 }
 0x323   : > { %1565 = vrot.lane.b32.xlu2 %v1560_v58, %s8051_s11  ;;  %v1312_v40 = vsel %vm841_vm7, %v6221_v10, 0.0  ;;  %v1647_v58 = vmul.f32 %v6105_v34, %v1646_v33 }
 0x324   : > { %v1314_v21 = vadd.f32 %v1313_v31, %v1312_v40  ;;  %v1839_v31 = vmul.f32 %v5919_v45, %v1837_v50  ;;  %v2008_v40 = vmul.f32 %v5988_v49, %v2007_v55 }
 0x32a   : > { %v6236_v16 = vpop.permute.xlu2 %1415 }
 0x32b   : > { %1597 = vrot.lane.b32.xlu2 %v1593_v59, %s8051_s11  ;;  %v1953_v59 = vstv %s6258_s26  ;;  %s6404_s26 = sld [smem:[#allocation3 + $0x7f]] }
 0x32c   : > { %v1954_v5 = vmul.f32 %v6038_v14, %v1953_v59 }
 0x332   : > { %v6245_v33 = vpop.permute.xlu2 %1447 }
 0x333   : > { %1619 = vrot.lane.b32.xlu2 %v1614_v56, %s8049_s24  ;;  %v8042_v56 = vstv %s6276_s7 }
 0x334   : > { %v1975_v17 = vmul.f32 %v6060_v47, %v8042_v56 }
 0x33a   : > { %v6256_v44 = vpop.permute.xlu2 %1449 }
 0x33b   : > { %1651 = vrot.lane.b32.xlu2 %v1647_v58, %s8049_s24  ;;  %v1851_v58 = vstv %s4611_s29  ;;  %s4571_s29 = sld [smem:[#allocation3 + $0x48]] }
 0x33d   : > { %1315 = vadd.xlane.f32.xlu1 %v1314_v21  ;;  %v1852_v21 = vmul.f32 %v5929_v19, %v1851_v58 }
 0x343   : > { %1667 = vrot.lane.b32.xlu2 %v1662_v18, %s8051_s11  ;;  %v8041_v18 = vstv %s6294_s6 }
 0x34b   : > { %1699 = vrot.lane.b32.xlu2 %v1695_v29, %s8051_s11  ;;  %v2023_v29 = vmul.f32 %v6092_v26, %v8041_v18 }
 0x353   : > { %1721 = vrot.lane.b32.xlu2 %v1716_v38, %s8049_s24  ;;  %v2055_v38 = vstv %s6301_s4  ;;  %s4586_s4 = sld [smem:[#allocation3 + $0x57]] }
 0x356   : > { %1878 = vrot.lane.b32.xlu1 %v1873_v36, %s8049_s24  ;;  %v1853_v36 = vmul.f32 %v5919_v45, %v1851_v58 }
 0x35b   : > { %1753 = vrot.lane.b32.xlu2 %v1749_v12, %s8049_s24  ;;  %v5124_v12 = vmov 256.0  }
 0x35c   : > { %4917 = vrcp.f32 %v5124_v12 }
 0x35e   : > { %1926 = vrot.lane.b32.xlu1 %v1921_v11, %s8051_s11  ;;  %v846_v53 = vpop.xlane.xlu2 %845  ;;  %v2056_v11 = vmul.f32 %v6124_v28, %v2055_v38 }
 0x35f   : > { %v847_v7 = vrot.slane %v846_v53, 4 }
 0x361   : > { %v848_v43 = vadd.f32 %v847_v7, %v846_v53  ;;  %v1872_v7 = vmul.f32 %v5959_v46, %v1871_v41 }
 0x362   : > { %v4918_v53 = vpop.eup %4917 }
 0x363   : > { %1769 = vrot.lane.b32.xlu2 %v1764_v8, %s8051_s11  ;;  %v849_v48 = vrot.slane %v848_v43, 2  ;;  %vm860_vm8 = vweird.f32 %v4918_v53 }
 0x365   : > { %v850_v22 = vadd.f32 %v849_v48, %v848_v43  ;;  %v8040_v43 = vstv %s6312_s30  ;;  %v1885_v48 = vstv %s6319_s25 }
 0x366   : > { %1958 = vrot.lane.b32.xlu1 %v1954_v5, %s8051_s11  ;;  %v2077_v8 = vmul.f32 %v6085_v24, %v8040_v43  ;;  %v856_v5 = vmul.f32 256.0, %v4918_v53 }
 0x367   : > { %v851_v42 = vrot.slane %v850_v22, 1 }
 0x368   : > { %v857_v50 = vsub.f32 1.0, %v856_v5 }
 0x369   : > { %v852_v60 = vadd.f32 %v851_v42, %v850_v22  ;;  %v6331_v22 = vpop.permute.xlu1 %1429  ;;  %v2109_v42 = vstv %s6321_s28  ;;  %s6471_s28 = sld [smem:[#allocation3 + $0x8c]] }
 0x36a   : > { %v2110_v41 = vmul.f32 %v6105_v34, %v2109_v42 }
 0x36b   : > { %1842 = vrot.lane.b32.xlu2 %v1838_v61, %s8049_s24  ;;  %4818 = vpush %v852_v60  ;;  %v1887_v61 = vmul.f32 %v5952_v1, %v1885_v48  ;;  %v858_v60 = vmul.f32 %v4918_v53, %v857_v50 }
 0x36e   : > { %1980 = vrot.lane.b32.xlu1 %v1975_v17, %s8049_s24  ;;  %v1905_v17 = vstv %s4616_s20  ;;  %s6378_s20 = sld [smem:[#allocation3 + $0x7a]] }
 0x36f   : > { %v1906_v58 = vmul.f32 %v5996_v54, %v1905_v17 }
 0x373   : > { %1844 = vrot.lane.b32.xlu2 %v1839_v31, %s8049_s24  ;;  %v859_v31 = vadd.f32 %v4918_v53, %v858_v60  ;;  %v1939_v60 = vstv %s6351_s17  ;;  %s4612_s17 = sld [smem:[#allocation3 + $0x6f]] }
 0x376   : > { %2012 = vrot.lane.b32.xlu1 %v2008_v40, %s8049_s24  ;;  %v6342_v40 = vpop.permute.xlu1 %1481 }
 0x37b   : > { %1856 = vrot.lane.b32.xlu2 %v1852_v21, %s8051_s11  ;;  %v6345_v21 = vpop.permute.xlu0 %1427 }
 0x37e   : > { %2028 = vrot.lane.b32.xlu1 %v2023_v29, %s8051_s11  ;;  %v6348_v29 = vsel %vm860_vm8, %v4918_v53, %v859_v31  ;;  %v6364_v50 = vpop.permute.xlu1 %1497 }
 0x383   : > { %1858 = vrot.lane.b32.xlu2 %v1853_v36, %s8051_s11 }
 0x386   : > { %2060 = vrot.lane.b32.xlu1 %v2056_v11, %s8051_s11  ;;  %v6376_v31 = vpop.permute.xlu1 %1529 }
 0x38b   : > { %1876 = vrot.lane.b32.xlu2 %v1872_v7, %s8049_s24 }
 0x38e   : > { %2082 = vrot.lane.b32.xlu1 %v2077_v8, %s8049_s24  ;;  %v1907_v8 = vmul.f32 %v5985_v52, %v1905_v17  ;;  %v1940_v17 = vmul.f32 %v6038_v14, %v1939_v60 }
 0x393   : > { %1892 = vrot.lane.b32.xlu2 %v1887_v61, %s8051_s11  ;;  %v6367_v61 = vpop.permute.xlu0 %1461 }
 0x396   : > { %2114 = vrot.lane.b32.xlu1 %v2110_v41, %s8049_s24 }
 0x39b   : > { %1910 = vrot.lane.b32.xlu2 %v1906_v58, %s8049_s24  ;;  %v1484_v58 = vpop.permute.xlu0 %1483 }
 0x39c   : > { %s4819_s5 = spop %4818 }
 0x39d   : > { %v854_v36 = vstv %s4819_s5  ;;  %s4574_s5 = sld [smem:[#allocation3 + $0x4b]] }
 0x39e   : > { %v862_v12 = vmul.f32 %v6348_v29, %v854_v36  ;;  %v1464_v36 = vpop.permute.xlu2 %1463 }
 0x3a0   : > { %v6354_v11 = vsub.f32 %v6033_v32, %v862_v12  ;;  %v6357_v7 = vsub.f32 %v6030_v51, %v862_v12  ;;  %v1955_v12 = vmul.f32 %v6025_v9, %v1953_v59  ;;  %v1763_v59 = vmul.f32 %v6208_v2, %v1762_v3 }
 0x3a2   : > { %v865_v53 = vmul.f32 %v6354_v11, %v6354_v11  ;;  %v866_v5 = vmul.f32 %v6357_v7, %v6357_v7 }
 0x3a3   : > { %1912 = vrot.lane.b32.xlu2 %v1907_v8, %s8049_s24  ;;  %v1368_v8 = vstv %s4571_s29  ;;  %s6448_s29 = sld [smem:[#allocation3 + $0x88]] }
 0x3a4   : > { %v867_v32 = vsel %vm841_vm7, %v865_v53, 0.0  ;;  %v868_v51 = vsel %vm841_vm7, %v866_v5, 0.0  ;;  %v1370_v53 = vmul.f32 %v5919_v45, %v1368_v8  ;;  %v8043_v5 = vstv %s6378_s20 }
 0x3a5   : > { %v869_v41 = vadd.f32 %v868_v51, %v867_v32  ;;  %v6386_v32 = vpop.permute.xlu1 %1551  ;;  %v1988_v43 = vmul.f32 %v6069_v25, %v8043_v5 }
 0x3a6   : > { %v1386_v51 = vadd.f32 %v6189_v0, %v1370_v53  ;;  %v1496_v18 = vpop.permute.xlu2 %1495 }
 0x3a7   : > { %870 = vadd.xlane.f32.xlu0 %v869_v41  ;;  %v6389_v41 = vpop.permute.xlu0 %1515 }
 0x3a8   : > { %v1400_v45 = vadd.f32 %v6211_v13, %v1386_v51  ;;  %v1436_v13 = vstv %s4577_s10  ;;  %s6429_s10 = sld [smem:[#allocation3 + $0x83]] }
 0x3ab   : > { %1944 = vrot.lane.b32.xlu2 %v1940_v17, %s8049_s24  ;;  %v1402_v17 = vstv %s4574_s5  ;;  %s4589_s5 = sld [smem:[#allocation3 + $0x5a]] }
 0x3ac   : > { %v1404_v53 = vmul.f32 %v5952_v1, %v1402_v17  ;;  %v1403_v3 = vmul.f32 %v5959_v46, %v1402_v17  ;;  %v2041_v17 = vstv %s6404_s26  ;;  %s4618_s26 = sld [smem:[#allocation3 + $0x75]] }
 0x3ae   : > { %v1406_v5 = vadd.f32 %v1404_v53, %v1400_v45  ;;  %v1518_v46 = vpop.permute.xlu2 %1517 }
 0x3af   : > { %v1532_v51 = vpop.permute.xlu0 %1531 }
 0x3b3   : > { %1960 = vrot.lane.b32.xlu2 %v1955_v12, %s8051_s11  ;;  %v1369_v12 = vmul.f32 %v5929_v19, %v1368_v8  ;;  %v1420_v19 = vadd.f32 %v6236_v16, %v1406_v5  ;;  %v6408_v8 = vpop.permute.xlu1 %1583 }
 0x3b5   : > { %v1385_v0 = vadd.f32 %v6166_v63, %v1369_v12  ;;  %v1434_v1 = vadd.f32 %v6331_v22, %v1420_v19  ;;  %v1437_v12 = vmul.f32 %v5996_v54, %v1436_v13 }
 0x3b6   : > { %v1550_v54 = vpop.permute.xlu2 %1549 }
 0x3b7   : > { %v1399_v56 = vadd.f32 %v6199_v37, %v1385_v0  ;;  %v1470_v0 = vstv %s4580_s8  ;;  %s6461_s8 = sld [smem:[#allocation3 + $0x89]] }
 0x3b9   : > { %v1405_v63 = vadd.f32 %v1403_v3, %v1399_v56  ;;  %v2042_v56 = vmul.f32 %v6124_v28, %v2041_v17 }
 0x3bb   : > { %1992 = vrot.lane.b32.xlu2 %v1988_v43, %s8051_s11  ;;  %1767 = vrot.lane.b32.xlu0 %v1763_v59, %s8051_s11  ;;  %v2009_v43 = vmul.f32 %v6092_v26, %v2007_v55  ;;  %v1419_v37 = vadd.f32 %v6225_v4, %v1405_v63  ;;  %v1438_v59 = vmul.f32 %v5985_v52, %v1436_v13  ;;  %v6424_v45 = vpop.permute.xlu1 %1599  ;;  %v1564_v52 = vpop.permute.xlu0 %1563 }
 0x3bc   : > { %v1471_v13 = vmul.f32 %v6038_v14, %v1470_v0 }
 0x3bd   : > { %v1440_v16 = vadd.f32 %v1438_v59, %v1434_v1  ;;  %v1433_v5 = vadd.f32 %v6345_v21, %v1419_v37  ;;  %v1472_v21 = vmul.f32 %v6025_v9, %v1470_v0  ;;  %v2089_v1 = vstv %s6429_s10  ;;  %s4621_s10 = sld [smem:[#allocation3 + $0x78]] }
 0x3be   : > { %v1504_v59 = vstv %s4583_s27  ;;  %v1538_v0 = vstv %s4586_s4  ;;  %s4592_s27 = sld [smem:[#allocation3 + $0x5d]] }
 0x3bf   : > { %v1439_v55 = vadd.f32 %v1437_v12, %v1433_v5  ;;  %v1454_v22 = vadd.f32 %v6256_v44, %v1440_v16  ;;  %v2057_v44 = vmul.f32 %v6020_v27, %v2055_v38  ;;  %v1566_v16 = vpop.permute.xlu2 %1565  ;;  %v2090_v38 = vmul.f32 %v6056_v20, %v2089_v1  ;;  %s6482_s4 = sld [smem:[#allocation3 + $0x8e]] }
 0x3c0   : > { %v1506_v14 = vmul.f32 %v6060_v47, %v1504_v59 }
 0x3c1   : > { %v1468_v4 = vadd.f32 %v1464_v36, %v1454_v22  ;;  %v1453_v53 = vadd.f32 %v6245_v33, %v1439_v55 }
 0x3c3   : > { %2014 = vrot.lane.b32.xlu2 %v2009_v43, %s8049_s24  ;;  %v1467_v3 = vadd.f32 %v6367_v61, %v1453_v53  ;;  %v1474_v19 = vadd.f32 %v1472_v21, %v1468_v4  ;;  %v6437_v43 = vpop.permute.xlu1 %1631  ;;  %v1586_v63 = vpop.permute.xlu0 %1585  ;;  %v1540_v21 = vmul.f32 %v6092_v26, %v1538_v0 }
 0x3c5   : > { %v1473_v36 = vadd.f32 %v1471_v13, %v1467_v3  ;;  %v1488_v33 = vadd.f32 %v1484_v58, %v1474_v19  ;;  %v1505_v58 = vmul.f32 %v6069_v25, %v1504_v59  ;;  %v2143_v19 = vstv %s6448_s29  ;;  %s4624_s29 = sld [smem:[#allocation3 + $0x7b]] }
 0x3c7   : > { %v1487_v37 = vadd.f32 %v6342_v40, %v1473_v36  ;;  %v1502_v61 = vadd.f32 %v6364_v50, %v1488_v33  ;;  %v1598_v53 = vpop.permute.xlu2 %1597  ;;  %v1572_v33 = vstv %s4589_s5  ;;  %s4595_s5 = sld [smem:[#allocation3 + $0x60]] }
 0x3c9   : > { %v1501_v5 = vadd.f32 %v1496_v18, %v1487_v37  ;;  %v1508_v12 = vadd.f32 %v1506_v14, %v1502_v61  ;;  %v2111_v18 = vmul.f32 %v6078_v15, %v2109_v42 }
 0x3cb   : > { %2046 = vrot.lane.b32.xlu2 %v2042_v56, %s8049_s24  ;;  %v1507_v56 = vadd.f32 %v1505_v58, %v1501_v5  ;;  %v1522_v55 = vadd.f32 %v1518_v46, %v1508_v12  ;;  %v6450_v40 = vpop.permute.xlu1 %1653  ;;  %v1618_v50 = vpop.permute.xlu0 %1617 }
 0x3cd   : > { %v1521_v22 = vadd.f32 %v6389_v41, %v1507_v56  ;;  %v1536_v4 = vadd.f32 %v1532_v51, %v1522_v55  ;;  %v2144_v41 = vmul.f32 %v6102_v62, %v2143_v19  ;;  %v1606_v55 = vstv %s4592_s27  ;;  %s4598_s27 = sld [smem:[#allocation3 + $0x63]] }
 0x3cf   : > { %v1535_v46 = vadd.f32 %v6376_v31, %v1521_v22  ;;  %v1542_v3 = vadd.f32 %v1540_v21, %v1536_v4  ;;  %v1620_v37 = vpop.permute.xlu2 %1619  ;;  %v1608_v22 = vmul.f32 %v6085_v24, %v1606_v55 }
 0x3d1   : > { %v1556_v26 = vadd.f32 %v6386_v32, %v1542_v3  ;;  %v1573_v32 = vmul.f32 %v6124_v28, %v1572_v33 }
 0x3d3   : > { %2062 = vrot.lane.b32.xlu2 %v2057_v44, %s8051_s11  ;;  %v1539_v44 = vmul.f32 %v5988_v49, %v1538_v0  ;;  %v6463_v42 = vpop.permute.xlu1 %1685  ;;  %v1634_v51 = vpop.permute.xlu0 %1633  ;;  %v1570_v36 = vadd.f32 %v1566_v16, %v1556_v26  ;;  %v1574_v49 = vmul.f32 %v6020_v27, %v1572_v33  ;;  %v2191_v27 = vstv %s6471_s28  ;;  %s4630_s28 = sld [smem:[#allocation3 + $0x81]] }
 0x3d4   : > { %v2192_v28 = vmul.f32 %v6150_v30, %v2191_v27 }
 0x3d5   : > { %v1541_v13 = vadd.f32 %v1539_v44, %v1535_v46  ;;  %v1576_v59 = vadd.f32 %v1574_v49, %v1570_v36  ;;  %v2211_v46 = vstv %s6482_s4  ;;  %s4633_s4 = sld [smem:[#allocation3 + $0x84]] }
 0x3d6   : > { %v2213_v44 = vmul.f32 %v6168_v39, %v2211_v46 }
 0x3d7   : > { %v1555_v31 = vadd.f32 %v1550_v54, %v1541_v13  ;;  %v1590_v16 = vadd.f32 %v1586_v63, %v1576_v59  ;;  %v1652_v12 = vpop.permute.xlu2 %1651  ;;  %v1607_v63 = vmul.f32 %v6056_v20, %v1606_v55 }
 0x3d9   : > { %v1569_v61 = vadd.f32 %v1564_v52, %v1555_v31  ;;  %v1604_v52 = vadd.f32 %v6424_v45, %v1590_v16 }
 0x3db   : > { %2094 = vrot.lane.b32.xlu2 %v2090_v38, %s8051_s11  ;;  %v2157_v38 = vstv %s6461_s8  ;;  %v1702_v14 = vpop.permute.xlu1 %1701  ;;  %v1666_v54 = vpop.permute.xlu0 %1665  ;;  %v1575_v58 = vadd.f32 %v1573_v32, %v1569_v61  ;;  %v1610_v4 = vadd.f32 %v1608_v22, %v1604_v52  ;;  %s4627_s8 = sld [smem:[#allocation3 + $0x7e]] }
 0x3dc   : > { %v2159_v5 = vmul.f32 %v6128_v6, %v2157_v38 }
 0x3dd   : > { %v1589_v56 = vadd.f32 %v6408_v8, %v1575_v58  ;;  %v1624_v21 = vadd.f32 %v1620_v37, %v1610_v4 }
 0x3df   : > { %v1668_v3 = vpop.permute.xlu2 %1667  ;;  %v1638_v13 = vadd.f32 %v1634_v51, %v1624_v21  ;;  %v1674_v51 = vstv %s4598_s27  ;;  %s4604_s27 = sld [smem:[#allocation3 + $0x69]] }
 0x3e0   : > { %v1676_v32 = vmul.f32 %v6128_v6, %v1674_v51 }
 0x3e3   : > { %2116 = vrot.lane.b32.xlu2 %v2111_v18, %s8049_s24  ;;  %v1603_v18 = vadd.f32 %v1598_v53, %v1589_v56  ;;  %v1734_v8 = vpop.permute.xlu1 %1733  ;;  %v1688_v0 = vpop.permute.xlu0 %1687  ;;  %v1640_v53 = vstv %s4595_s5  ;;  %s4601_s5 = sld [smem:[#allocation3 + $0x66]] }
 0x3e4   : > { %v1642_v26 = vmul.f32 %v6078_v15, %v1640_v53  ;;  %v1641_v37 = vmul.f32 %v6105_v34, %v1640_v53 }
 0x3e5   : > { %v1609_v45 = vadd.f32 %v1607_v63, %v1603_v18 }
 0x3e6   : > { %v1644_v31 = vadd.f32 %v1642_v26, %v1638_v13 }
 0x3e7   : > { %v1700_v59 = vpop.permute.xlu2 %1699 }
 0x3e8   : > { %v1658_v61 = vadd.f32 %v6450_v40, %v1644_v31 }
 0x3eb   : > { %2148 = vrot.lane.b32.xlu2 %v2144_v41, %s8049_s24  ;;  %v1623_v41 = vadd.f32 %v1618_v50, %v1609_v45  ;;  %v1756_v36 = vpop.permute.xlu1 %1755  ;;  %v1720_v33 = vpop.permute.xlu0 %1719  ;;  %v1672_v50 = vadd.f32 %v1668_v3, %v1658_v61 }
 0x3ed   : > { %v1637_v20 = vadd.f32 %v6437_v43, %v1623_v41  ;;  %v1678_v56 = vadd.f32 %v1676_v32, %v1672_v50  ;;  %v1675_v43 = vmul.f32 %v6102_v62, %v1674_v51 }
 0x3ef   : > { %v1643_v49 = vadd.f32 %v1641_v37, %v1637_v20  ;;  %v1722_v22 = vpop.permute.xlu2 %1721 }
 0x3f3   : > { %2164 = vrot.lane.b32.xlu2 %v2159_v5, %s8051_s11  ;;  %v1657_v5 = vadd.f32 %v1652_v12, %v1643_v49  ;;  %v1316_v16 = vpop.xlane.xlu1 %1315  ;;  %v1736_v52 = vpop.permute.xlu0 %1735  ;;  %v1708_v12 = vstv %s4601_s5 }
 0x3f4   : > { %v1317_v55 = vrot.slane %v1316_v16, 4  ;;  %v1710_v21 = vmul.f32 %v6177_v57, %v1708_v12  ;;  %v1709_v41 = vmul.f32 %v6150_v30, %v1708_v12  ;;  %v6520_v12 = vld [vmem:[#allocation2 + $0x2] sm:$0xff] }
 0x3f5   : > { %v1671_v58 = vadd.f32 %v1666_v54, %v1657_v5 }
 0x3f6   : > { %v1318_v63 = vadd.f32 %v1317_v55, %v1316_v16 }
 0x3f7   : > { %v1677_v18 = vadd.f32 %v1675_v43, %v1671_v58  ;;  %v1754_v31 = vpop.permute.xlu2 %1753 }
 0x3f9   : > { %v1691_v40 = vadd.f32 %v6463_v42, %v1677_v18 }
 0x3fb   : > { %2196 = vrot.lane.b32.xlu2 %v2192_v28, %s8051_s11  ;;  %v1692_v28 = vadd.f32 %v1688_v0, %v1678_v56  ;;  %v1705_v45 = vadd.f32 %v1700_v59, %v1691_v40  ;;  %v1742_v59 = vstv %s4604_s27  ;;  %s4636_s27 = sld [smem:[#allocation3 + $0x87]] }
 0x3fc   : > { %v1744_v50 = vmul.f32 %v6168_v39, %v1742_v59  ;;  %v1743_v56 = vmul.f32 %v6208_v2, %v1742_v59 }
 0x3fd   : > { %v1706_v4 = vadd.f32 %v1702_v14, %v1692_v28  ;;  %v1711_v26 = vadd.f32 %v1709_v41, %v1705_v45  ;;  %v1920_v45 = vmul.f32 %v6520_v12, %v1919_v23 }
 0x3ff   : > { %v1712_v13 = vadd.f32 %v1710_v21, %v1706_v4  ;;  %v1725_v42 = vadd.f32 %v1720_v33, %v1711_v26  ;;  %v1770_v43 = vpop.permute.xlu2 %1769  ;;  %v6514_v4 = vld [vmem:[#allocation2 + $0x1] sm:$0xff]  ;;  %v1941_v21 = vmul.f32 %v6025_v9, %v1939_v60  ;;  %v8130_v26 = vstv %s6378_s20  ;;  %s4615_s20 = sld [smem:[#allocation3 + $0x72]] }
 0x401   : > { %v1726_v0 = vadd.f32 %v1722_v22, %v1712_v13  ;;  %v1739_v32 = vadd.f32 %v1734_v8, %v1725_v42  ;;  %v6561_v42 = vld [vmem:[#allocation2 + $0x38] sm:$0xff] }
 0x403   : > { %2218 = vrot.lane.b32.xlu2 %v2213_v44, %s8049_s24  ;;  %v1319_v44 = vrot.slane %v1318_v63, 2  ;;  %v1740_v14 = vadd.f32 %v1736_v52, %v1726_v0  ;;  %v1745_v55 = vadd.f32 %v1743_v56, %v1739_v32  ;;  %v1879_v32 = vpop.permute.xlu1 %1878 }
 0x405   : > { %v1320_v20 = vadd.f32 %v1319_v44, %v1318_v63  ;;  %v1746_v16 = vadd.f32 %v1744_v50, %v1740_v14  ;;  %v1759_v52 = vadd.f32 %v1754_v31, %v1745_v55  ;;  %v8131_v31 = vstv %s6294_s6  ;;  %s4644_s6 = sld [smem:[#allocation3 + $0x8f]] }
 0x406   : > { %v2123_v14 = vstv %s4635_s19  ;;  %v8132_v50 = vstv %s6312_s30  ;;  %s4609_s30 = sld [smem:[#allocation3 + $0x6c]] }
 0x407   : > { %v1321_v61 = vrot.slane %v1320_v20, 1  ;;  %v1760_v33 = vadd.f32 %v1756_v36, %v1746_v16  ;;  %v1886_v36 = vmul.f32 %v6514_v4, %v1885_v48  ;;  %v6542_v9 = vpop.permute.xlu2 %1842  ;;  %v2124_v55 = vmul.f32 %v6105_v34, %v2123_v14 }
 0x409   : > { %v1322_v58 = vadd.f32 %v1321_v61, %v1320_v20  ;;  %v6506_v28 = vadd.f32 %v1770_v43, %v1760_v33  ;;  %v6555_v20 = vld [vmem:[#allocation2 + $0x1a] sm:$0xff]  ;;  %v2125_v61 = vmul.f32 %v6078_v15, %v2123_v14  ;;  %v2091_v15 = vmul.f32 %v6085_v24, %v2089_v1 }
 0x40a   : > { %v2212_v24 = vmul.f32 %v6208_v2, %v2211_v46  ;;  %v2145_v1 = vmul.f32 %v6128_v6, %v2143_v19 }
 0x40b   : > { %v1776_v8 = vsel %vm841_vm7, %v6506_v28, 0.0  ;;  %v2225_v33 = vstv %s4644_s6  ;;  %s894_s6 = sld [smem:[#allocation6]] }
 0x40c   : > { %v2227_v34 = vmul.f32 %v6168_v39, %v2225_v33  ;;  %v1831_v19 = vstv %s4609_s30  ;;  %v2226_v39 = vmul.f32 %v6208_v2, %v2225_v33  ;;  %v4969_v33 = vld [vmem:[#allocation2 + $0x20] sm:$0xff]  ;;  %s4532_s30 = sld [smem:[#allocation6 + $0x80]] }
 0x40f   : > { %v1845_v0 = vpop.permute.xlu2 %1844 }
 0x41a   : > { %v871_v3 = vpop.xlane.xlu0 %870 }
 0x41b   : > { %v872_v54 = vrot.slane %v871_v3, 4 }
 0x41d   : > { %v873_v53 = vadd.f32 %v872_v54, %v871_v3  ;;  %v8129_v54 = vstv %s6276_s7  ;;  %s4640_s7 = sld [smem:[#allocation3 + $0x8b]] }
 0x41e   : > { %v1974_v41 = vmul.f32 %v6069_v25, %v8129_v54  ;;  %v1989_v25 = vmul.f32 %v6060_v47, %v8130_v26  ;;  %v2043_v47 = vmul.f32 %v6561_v42, %v2041_v17  ;;  %v2158_v17 = vmul.f32 %v6102_v62, %v2157_v38 }
 0x41f   : > { %v874_v37 = vrot.slane %v873_v53, 2  ;;  %v1899_v26 = vstv %s4615_s20  ;;  %s6671_s20 = sld [smem:[#allocation6 + $0x1]] }
 0x421   : > { %v875_v49 = vadd.f32 %v874_v37, %v873_v53  ;;  %v2022_v37 = vmul.f32 %v6555_v20, %v8131_v31 }
 0x423   : > { %v876_v5 = vrot.slane %v875_v49, 1  ;;  %v2177_v56 = vstv %s4640_s7 }
 0x424   : > { %v2179_v43 = vmul.f32 %v6177_v57, %v2177_v56 }
 0x425   : > { %v877_v51 = vadd.f32 %v876_v5, %v875_v49  ;;  %v1857_v49 = vpop.permute.xlu2 %1856  ;;  %v6569_v5 = vld [vmem:[#allocation2 + $0x31] sm:$0xff] }
 0x427   : > { %4820 = vpush %v877_v51  ;;  %v2076_v51 = vmul.f32 %v6569_v5, %v8132_v50 }
 0x428   : > { %4822 = vpush %v1322_v58  ;;  %v6583_v58 = vpop.permute.xlu1 %1926 }
 0x42d   : > { %v1768_v18 = vpop.permute.xlu0 %1767  ;;  %v1859_v59 = vpop.permute.xlu2 %1858 }
 0x42e   : > { %v6508_v22 = vadd.f32 %v1768_v18, %v1759_v52 }
 0x430   : > { %v1775_v63 = vsel %vm841_vm7, %v6508_v22, 0.0  ;;  %v6589_v38 = vpop.permute.xlu1 %1958 }
 0x431   : > { %v1777_v40 = vadd.f32 %v1776_v8, %v1775_v63  ;;  %v2178_v8 = vmul.f32 %v6150_v30, %v2177_v56  ;;  %v2193_v63 = vmul.f32 %v6177_v57, %v2191_v27  ;;  %v1865_v57 = vstv %s4612_s17  ;;  %s8133_s17 = smov 1  }
 0x432   : > { %v1866_v2 = vmul.f32 %v6514_v4, %v1865_v57  ;;  %v1933_v4 = vstv %s4618_s26  ;;  %s4570_s26 = sld [smem:[#allocation6 + $0x81]] }
 0x433   : > { %1778 = vadd.xlane.f32.xlu0 %v1777_v40  ;;  %v4964_v40 = vld [vmem:[#allocation2] sm:$0xff] }
 0x435   : > { %v1877_v16 = vpop.permute.xlu2 %1876 }
 0x438   : > { %v6600_v18 = vpop.permute.xlu1 %1980 }
 0x43d   : > { %v1893_v62 = vpop.permute.xlu2 %1892 }
 0x440   : > { %v6608_v6 = vpop.permute.xlu1 %2012 }
 0x445   : > { %v1911_v52 = vpop.permute.xlu2 %1910 }
 0x447   : > { %1890 = vrot.lane.b32.xlu0 %v1886_v36, %s8051_s11  ;;  %v1832_v36 = vmul.f32 %v4964_v40, %v1831_v19 }
 0x448   : > { %v6614_v27 = vpop.permute.xlu1 %2028 }
 0x44d   : > { %v1913_v46 = vpop.permute.xlu2 %1912 }
 0x44f   : > { %1924 = vrot.lane.b32.xlu0 %v1920_v45, %s8051_s11  ;;  %v4965_v45 = vld [vmem:[#allocation2 + $0x8] sm:$0xff] }
 0x450   : > { %v6618_v14 = vpop.permute.xlu1 %2060 }
 0x455   : > { %v1945_v30 = vpop.permute.xlu2 %1944 }
 0x457   : > { %1946 = vrot.lane.b32.xlu0 %v1941_v21, %s8049_s24  ;;  %v1833_v21 = vmul.f32 %v4965_v45, %v1831_v19 }
 0x458   : > { %s6530_s5 = spop %4820 }
 0x459   : > { %s4823_s25 = spop %4822 }
 0x45a   : > { %v1324_v3 = vstv %s4823_s25  ;;  %s4639_s25 = sld [smem:[#allocation3 + $0x8a]] }
 0x45b   : > { %v1325_v48 = vmul.f32 %v1324_v3, %v6348_v29  ;;  %v1848_v3 = vadd.f32 %v6542_v9, %v1832_v36  ;;  %v1900_v9 = vmul.f32 %v6520_v12, %v1899_v26 }
 0x45d   : > { %v6534_v44 = vsub.f32 %v6221_v10, %v1325_v48  ;;  %v6537_v23 = vsub.f32 %v6218_v35, %v1325_v48  ;;  %v1849_v48 = vadd.f32 %v1845_v0, %v1833_v21  ;;  %v1961_v31 = vpop.permute.xlu2 %1960  ;;  %v4970_v21 = vld [vmem:[#allocation2 + $0x19] sm:$0xff] }
 0x45f   : > { %v1328_v60 = vmul.f32 %v6534_v44, %v6534_v44  ;;  %v1329_v13 = vmul.f32 %v6537_v23, %v6537_v23  ;;  %1978 = vrot.lane.b32.xlu0 %v1974_v41, %s8049_s24  ;;  %v1862_v41 = vadd.f32 %v1857_v49, %v1848_v3 }
 0x461   : > { %v1330_v10 = vsel %vm841_vm7, %v1328_v60, 0.0  ;;  %v1331_v53 = vsel %vm841_vm7, %v1329_v13, 0.0  ;;  %v1863_v60 = vadd.f32 %v1859_v59, %v1849_v48  ;;  %v4966_v13 = vld [vmem:[#allocation2 + $0x9] sm:$0xff] }
 0x462   : > { %v1332_v35 = vadd.f32 %v1331_v53, %v1330_v10  ;;  %v1867_v10 = vmul.f32 %v4966_v13, %v1865_v57  ;;  %v4967_v59 = vld [vmem:[#allocation2 + $0xa] sm:$0xff]  ;;  %v4971_v57 = vld [vmem:[#allocation2 + $0x21] sm:$0xff] }
 0x463   : > { %v1901_v50 = vmul.f32 %v4967_v59, %v1899_v26 }
 0x464   : > { %1333 = vadd.xlane.f32.xlu1 %v1332_v35  ;;  %v1869_v53 = vadd.f32 %v1867_v10, %v1863_v60  ;;  %v1868_v35 = vadd.f32 %v1866_v2, %v1862_v41 }
 0x467   : > { %1994 = vrot.lane.b32.xlu0 %v1989_v25, %s8051_s11  ;;  %v1882_v25 = vadd.f32 %v1877_v16, %v1868_v35  ;;  %v1993_v16 = vpop.permute.xlu2 %1992 }
 0x46f   : > { %2026 = vrot.lane.b32.xlu0 %v2022_v37, %s8051_s11 }
 0x477   : > { %2048 = vrot.lane.b32.xlu0 %v2043_v47, %s8049_s24  ;;  %v1883_v47 = vadd.f32 %v1879_v32, %v1869_v53  ;;  %v2001_v53 = vstv %s4624_s29 }
 0x47d   : > { %2130 = vrot.lane.b32.xlu1 %v2125_v61, %s8051_s11  ;;  %v1897_v61 = vadd.f32 %v1893_v62, %v1883_v47  ;;  %v1935_v62 = vmul.f32 %v4969_v33, %v1933_v4 }
 0x47f   : > { %2080 = vrot.lane.b32.xlu0 %v2076_v51, %s8049_s24  ;;  %v1903_v51 = vadd.f32 %v1901_v50, %v1897_v61  ;;  %v4972_v61 = vld [vmem:[#allocation2 + $0x22] sm:$0xff] }
 0x481   : > { %v1917_v56 = vadd.f32 %v1913_v46, %v1903_v51 }
 0x483   : > { %v1931_v12 = vadd.f32 %v6583_v58, %v1917_v56 }
 0x485   : > { %2162 = vrot.lane.b32.xlu1 %v2158_v17, %s8051_s11 }
 0x487   : > { %2096 = vrot.lane.b32.xlu0 %v2091_v15, %s8051_s11 }
 0x48d   : > { %2184 = vrot.lane.b32.xlu1 %v2179_v43, %s8049_s24 }
 0x48f   : > { %2128 = vrot.lane.b32.xlu0 %v2124_v55, %s8051_s11  ;;  %v4968_v55 = vld [vmem:[#allocation2 + $0x18] sm:$0xff] }
 0x495   : > { %2216 = vrot.lane.b32.xlu1 %v2212_v24, %s8049_s24  ;;  %v1934_v24 = vmul.f32 %v4968_v55, %v1933_v4 }
 0x497   : > { %2150 = vrot.lane.b32.xlu0 %v2145_v1, %s8049_s24  ;;  %v6620_v1 = vpop.permute.xlu1 %2082 }
 0x49d   : > { %2232 = vrot.lane.b32.xlu1 %v2227_v34, %s8051_s11 }
 0x49f   : > { %2182 = vrot.lane.b32.xlu0 %v2178_v8, %s8049_s24  ;;  %v6624_v40 = vpop.permute.xlu1 %2114 }
 0x4a6   : > { %v1779_v54 = vpop.xlane.xlu0 %1778 }
 0x4a7   : > { %2198 = vrot.lane.b32.xlu0 %v2193_v63, %s8051_s11  ;;  %v1937_v63 = vadd.f32 %v1935_v62, %v1931_v12  ;;  %v1780_v36 = vrot.slane %v1779_v54, 4 }
 0x4a9   : > { %v1781_v60 = vadd.f32 %v1780_v36, %v1779_v54 }
 0x4ab   : > { %v1782_v35 = vrot.slane %v1781_v60, 2 }
 0x4af   : > { %2230 = vrot.lane.b32.xlu0 %v2226_v39, %s8051_s11  ;;  %v1967_v39 = vstv %s4621_s10  ;;  %s8134_s10 = smov 2  }
 0x4b0   : > { %v1968_v3 = vmul.f32 %v4970_v21, %v1967_v39  ;;  %v1969_v41 = vmul.f32 %v4971_v57, %v1967_v39 }
 0x4b9   : > { %v1891_v37 = vpop.permute.xlu0 %1890 }
 0x4ba   : > { %v1896_v0 = vadd.f32 %v1891_v37, %v1882_v25 }
 0x4bc   : > { %v1902_v49 = vadd.f32 %v1900_v9, %v1896_v0  ;;  %v2002_v9 = vmul.f32 %v6555_v20, %v2001_v53  ;;  %v1783_v0 = vadd.f32 %v1782_v35, %v1781_v60  ;;  %v2103_v60 = vstv %s4633_s4  ;;  %v4976_v35 = vld [vmem:[#allocation2 + $0x3a] sm:$0xff]  ;;  %s6714_s4 = sld [smem:[#allocation3 + $0x94]] }
 0x4be   : > { %v1916_v17 = vadd.f32 %v1911_v52, %v1902_v49  ;;  %v2015_v52 = vpop.permute.xlu2 %2014  ;;  %v2003_v49 = vmul.f32 %v4972_v61, %v2001_v53 }
 0x4c1   : > { %v1925_v15 = vpop.permute.xlu0 %1924 }
 0x4c2   : > { %v1930_v43 = vadd.f32 %v1925_v15, %v1916_v17  ;;  %v1784_v17 = vrot.slane %v1783_v0, 1 }
 0x4c4   : > { %v1936_v32 = vadd.f32 %v1934_v24, %v1930_v43  ;;  %v2035_v43 = vstv %s4627_s8  ;;  %v1785_v12 = vadd.f32 %v1784_v17, %v1783_v0 }
 0x4c6   : > { %v1950_v8 = vadd.f32 %v1945_v30, %v1936_v32  ;;  %v2047_v10 = vpop.permute.xlu2 %2046  ;;  %v4973_v32 = vld [vmem:[#allocation2 + $0x30] sm:$0xff] }
 0x4c7   : > { %v2036_v20 = vmul.f32 %v4973_v32, %v2035_v43 }
 0x4c8   : > { %v1964_v46 = vadd.f32 %v6589_v38, %v1950_v8 }
 0x4c9   : > { %v1947_v34 = vpop.permute.xlu0 %1946 }
 0x4ca   : > { %v1951_v19 = vadd.f32 %v1947_v34, %v1937_v63  ;;  %v1970_v58 = vadd.f32 %v1968_v3, %v1964_v46  ;;  %v2037_v34 = vmul.f32 %v6561_v42, %v2035_v43  ;;  %v2069_v46 = vstv %s4630_s28  ;;  %s4648_s28 = sld [smem:[#allocation3 + $0x91]] }
 0x4cc   : > { %v1965_v45 = vadd.f32 %v1961_v31, %v1951_v19 }
 0x4ce   : > { %v1971_v30 = vadd.f32 %v1969_v41, %v1965_v45  ;;  %v2063_v56 = vpop.permute.xlu2 %2062  ;;  %v2070_v45 = vmul.f32 %v6569_v5, %v2069_v46  ;;  %v2105_v5 = vmul.f32 %v4976_v35, %v2103_v60 }
 0x4d0   : > { %v1985_v25 = vadd.f32 %v6600_v18, %v1971_v30 }
 0x4d1   : > { %v1979_v48 = vpop.permute.xlu0 %1978 }
 0x4d2   : > { %v1984_v13 = vadd.f32 %v1979_v48, %v1970_v58  ;;  %v4974_v48 = vld [vmem:[#allocation2 + $0x39] sm:$0xff] }
 0x4d3   : > { %v2071_v58 = vmul.f32 %v4974_v48, %v2069_v46 }
 0x4d4   : > { %v1998_v26 = vadd.f32 %v1993_v16, %v1984_v13 }
 0x4d6   : > { %v2004_v54 = vadd.f32 %v2002_v9, %v1998_v26  ;;  %v2095_v19 = vpop.permute.xlu2 %2094  ;;  %v2137_v9 = vstv %s4636_s27  ;;  %s4649_s27 = sld [smem:[#allocation3 + $0x92]] }
 0x4d7   : > { %v1334_v2 = vpop.xlane.xlu1 %1333 }
 0x4d8   : > { %v1335_v38 = vrot.slane %v1334_v2, 4  ;;  %v2018_v4 = vadd.f32 %v6608_v6, %v2004_v54  ;;  %v4977_v54 = vld [vmem:[#allocation2 + $0x48] sm:$0xff] }
 0x4d9   : > { %v1995_v37 = vpop.permute.xlu0 %1994 }
 0x4da   : > { %v1336_v31 = vadd.f32 %v1335_v38, %v1334_v2  ;;  %v1999_v47 = vadd.f32 %v1995_v37, %v1985_v25  ;;  %v4975_v2 = vld [vmem:[#allocation2 + $0x32] sm:$0xff]  ;;  %v879_v37 = vstv %s6530_s5  ;;  %s4642_s5 = sld [smem:[#allocation3 + $0x8d]] }
 0x4db   : > { %v2104_v53 = vmul.f32 %v4975_v2, %v2103_v60  ;;  %v880_v61 = vmul.f32 %v879_v37, %v6348_v29 }
 0x4dc   : > { %v1337_v59 = vrot.slane %v1336_v31, 2  ;;  %v2005_v50 = vadd.f32 %v2003_v49, %v1999_v47 }
 0x4de   : > { %v1338_v51 = vadd.f32 %v1337_v59, %v1336_v31  ;;  %v2019_v16 = vadd.f32 %v2015_v52, %v2005_v50  ;;  %v2117_v42 = vpop.permute.xlu2 %2116  ;;  %v2138_v59 = vmul.f32 %v4977_v54, %v2137_v9  ;;  %v6637_v50 = vadd.f32 1e-05, %v880_v61 }
 0x4e0   : > { %v1339_v15 = vrot.slane %v1338_v51, 1  ;;  %v2033_v62 = vadd.f32 %v6614_v27, %v2019_v16  ;;  %4919 = vrsqrt.f32 %v6637_v50  ;;  %vm888_vm10 = vweird.f32 %v6637_v50 }
 0x4e1   : > { %v2027_v18 = vpop.permute.xlu0 %2026 }
 0x4e2   : > { %v2032_v55 = vadd.f32 %v2027_v18, %v2018_v4  ;;  %v1340_v24 = vadd.f32 %v1339_v15, %v1338_v51  ;;  %v2039_v63 = vadd.f32 %v2037_v34, %v2033_v62  ;;  %v4978_v4 = vld [vmem:[#allocation2 + $0x50] sm:$0xff] }
 0x4e3   : > { %v2139_v15 = vmul.f32 %v4978_v4, %v2137_v9 }
 0x4e4   : > { %4824 = vpush %v1340_v24  ;;  %v2038_v33 = vadd.f32 %v2036_v20, %v2032_v55  ;;  %v2171_v24 = vstv %s4639_s25  ;;  %s6727_s25 = sld [smem:[#allocation3 + $0x95]] }
 0x4e5   : > { %4826 = vpush %v1785_v12 }
 0x4e6   : > { %v2052_v6 = vadd.f32 %v2047_v10, %v2038_v33  ;;  %v2149_v25 = vpop.permute.xlu2 %2148  ;;  %v4920_v32 = vpop.eup %4919  ;;  %v4979_v33 = vld [vmem:[#allocation2 + $0x49] sm:$0xff] }
 0x4e7   : > { %v2172_v62 = vmul.f32 %v4979_v33, %v2171_v24  ;;  %vm889_vm9 = vweird.f32 %v4920_v32 }
 0x4e8   : > { %v2066_v52 = vadd.f32 %v6618_v14, %v2052_v6  ;;  %v4980_v6 = vld [vmem:[#allocation2 + $0x51] sm:$0xff]  ;;  %vm890_vm11 = vmor %vm888_vm10, %vm889_vm9 }
 0x4e9   : > { %v2049_v8 = vpop.permute.xlu0 %2048 }
 0x4ea   : > { %v2053_v39 = vadd.f32 %v2049_v8, %v2039_v63  ;;  %v2072_v3 = vadd.f32 %v2070_v45, %v2066_v52  ;;  %v2173_v63 = vmul.f32 %v4980_v6, %v2171_v24  ;;  %v2205_v45 = vstv %s4642_s5  ;;  %s6731_s5 = sld [smem:[#allocation3 + $0x98]] }
 0x4ec   : > { %v2067_v36 = vadd.f32 %v2063_v56, %v2053_v39 }
 0x4ee   : > { %v2073_v27 = vadd.f32 %v2071_v58, %v2067_v36  ;;  %v2165_v56 = vpop.permute.xlu2 %2164 }
 0x4ef   : > { %v2131_v41 = vpop.permute.xlu1 %2130 }
 0x4f0   : > { %v2087_v30 = vadd.f32 %v6620_v1, %v2073_v27 }
 0x4f1   : > { %v2081_v21 = vpop.permute.xlu0 %2080 }
 0x4f2   : > { %v2086_v57 = vadd.f32 %v2081_v21, %v2072_v3 }
 0x4f4   : > { %v2100_v13 = vadd.f32 %v2095_v19, %v2086_v57  ;;  %v883_v19 = vmul.f32 %v4920_v32, %v6637_v50 }
 0x4f6   : > { %v2106_v26 = vadd.f32 %v2104_v53, %v2100_v13  ;;  %v2197_v39 = vpop.permute.xlu2 %2196  ;;  %v884_v21 = vmul.f32 %v4920_v32, %v883_v19 }
 0x4f7   : > { %v2163_v47 = vpop.permute.xlu1 %2162 }
 0x4f8   : > { %v2120_v31 = vadd.f32 %v6624_v40, %v2106_v26  ;;  %v885_v2 = vmul.f32 0.5, %v884_v21 }
 0x4f9   : > { %v2097_v10 = vpop.permute.xlu0 %2096 }
 0x4fa   : > { %v2101_v14 = vadd.f32 %v2097_v10, %v2087_v30  ;;  %v4982_v30 = vld [vmem:[#allocation2 + $0x52] sm:$0xff] }
 0x4fb   : > { %v2207_v10 = vmul.f32 %v4982_v30, %v2205_v45 }
 0x4fc   : > { %v2107_v38 = vadd.f32 %v2105_v5, %v2101_v14 }
 0x4fe   : > { %v2121_v49 = vadd.f32 %v2117_v42, %v2107_v38  ;;  %v4981_v42 = vld [vmem:[#allocation2 + $0x4a] sm:$0xff]  ;;  %v2219_v38 = vpop.permute.xlu2 %2218 }
 0x4ff   : > { %v2185_v16 = vpop.permute.xlu1 %2184 }
 0x500   : > { %v2135_v17 = vadd.f32 %v2131_v41, %v2121_v49  ;;  %v2206_v41 = vmul.f32 %v4981_v42, %v2205_v45 }
 0x501   : > { %v2129_v0 = vpop.permute.xlu0 %2128 }
 0x502   : > { %v2134_v1 = vadd.f32 %v2129_v0, %v2120_v31  ;;  %v2141_v18 = vadd.f32 %v2139_v15, %v2135_v17  ;;  %v895_v15 = vstv %s894_s6  ;;  %s6753_s6 = sld [smem:[#allocation3 + $0x100]] }
 0x504   : > { %v2140_v51 = vadd.f32 %v2138_v59, %v2134_v1 }
 0x506   : > { %v2154_v40 = vadd.f32 %v2149_v25, %v2140_v51 }
 0x507   : > { %v2217_v36 = vpop.permute.xlu1 %2216 }
 0x508   : > { %v2168_v12 = vadd.f32 %v2163_v47, %v2154_v40  ;;  %v886_v47 = vsub.f32 1.5, %v885_v2  ;;  %v899_v40 = vstv %s4532_s30  ;;  %s6755_s30 = sld [smem:[#allocation3 + $0x104]] }
 0x509   : > { %v2151_v43 = vpop.permute.xlu0 %2150 }
 0x50a   : > { %v2155_v55 = vadd.f32 %v2151_v43, %v2141_v18  ;;  %v2174_v8 = vadd.f32 %v2172_v62, %v2168_v12  ;;  %v887_v1 = vmul.f32 %v4920_v32, %v886_v47 }
 0x50c   : > { %v2169_v20 = vadd.f32 %v2165_v56, %v2155_v55  ;;  %v891_v17 = vsel %vm890_vm11, %v4920_v32, %v887_v1 }
 0x50d   : > { %v892_v4 = vmul.f32 %v891_v17, %v6354_v11  ;;  %v893_v56 = vmul.f32 %v891_v17, %v6357_v7 }
 0x50e   : > { %v2175_v52 = vadd.f32 %v2173_v63, %v2169_v20 }
 0x50f   : > { %v896_v43 = vmul.f32 %v895_v15, %v892_v4  ;;  %v897_v18 = vmul.f32 %v895_v15, %v893_v56 }
 0x510   : > { %v2189_v57 = vadd.f32 %v2185_v16, %v2175_v52 }
 0x511   : > { %v2183_v34 = vpop.permute.xlu0 %2182  ;;  %v900_v16 = vadd.f32 %v899_v40, %v896_v43  ;;  %v901_v55 = vadd.f32 %v899_v40, %v897_v18 }
 0x512   : > { %v2188_v46 = vadd.f32 %v2183_v34, %v2174_v8 }
 0x513   : > { %v902_v24 = vmax.f32 %v900_v16, 0.0  ;;  %v903_v12 = vmax.f32 %v901_v55, 0.0 }
 0x514   : > { %v2202_v48 = vadd.f32 %v2197_v39, %v2188_v46 }
 0x515   : > { %s6641_s19 = spop %4824 }
 0x516   : > { %s4827_s7 = spop %4826  ;;  %v2208_v26 = vadd.f32 %v2206_v41, %v2202_v48  ;;  %v1342_v50 = vstv %s6641_s19  ;;  %v1358_v41 = vstv %s6671_s20  ;;  %s6742_s19 = sld [smem:[#allocation3 + $0x97]] }
 0x517   : > { %v1787_v3 = vstv %s4827_s7  ;;  %v1343_v32 = vmul.f32 %v1342_v50, %v6348_v29  ;;  %s6747_s7 = sld [smem:[#allocation3 + $0xb5]] }
 0x518   : > { %v1788_v58 = vmul.f32 %v1787_v3, %v6348_v29  ;;  %v2222_v9 = vadd.f32 %v2217_v36, %v2208_v26  ;;  %s6758_s20 = sld [smem:[#allocation3 + $0xb6]] }
 0x519   : > { %v2199_v27 = vpop.permute.xlu0 %2198  ;;  %v1344_v20 = vadd.f32 1e-05, %v1343_v32 }
 0x51a   : > { %v6645_v60 = vsub.f32 %v6508_v22, %v1788_v58  ;;  %v6648_v13 = vsub.f32 %v6506_v28, %v1788_v58  ;;  %v2203_v14 = vadd.f32 %v2199_v27, %v2189_v57  ;;  %v2233_v28 = vpop.permute.xlu1 %2232 }
 0x51b   : > { %4921 = vrsqrt.f32 %v1344_v20  ;;  %vm1351_vm13 = vweird.f32 %v1344_v20 }
 0x51c   : > { %v1791_v53 = vmul.f32 %v6645_v60, %v6645_v60  ;;  %v1792_v35 = vmul.f32 %v6648_v13, %v6648_v13  ;;  %v2209_v5 = vadd.f32 %v2207_v10, %v2203_v14 }
 0x51e   : > { %v2223_v25 = vadd.f32 %v2219_v38, %v2209_v5  ;;  %v1793_v22 = vsel %vm841_vm7, %v1791_v53, 0.0  ;;  %v1794_v37 = vsel %vm841_vm7, %v1792_v35, 0.0  ;;  %v1362_v53 = vstv %s4570_s26  ;;  %s6763_s26 = sld [smem:[#allocation3 + $0x101]] }
 0x51f   : > { %v1795_v31 = vadd.f32 %v1794_v37, %v1793_v22 }
 0x520   : > { %v6656_v0 = vadd.f32 %v2233_v28, %v2223_v25 }
 0x521   : > { %1796 = vadd.xlane.f32.xlu2 %v1795_v31  ;;  %v2231_v61 = vpop.permute.xlu0 %2230  ;;  %v4922_v11 = vpop.eup %4921 }
 0x522   : > { %v6658_v49 = vadd.f32 %v2231_v61, %v2222_v9  ;;  %v2239_v59 = vsel %vm841_vm7, %v6656_v0, 0.0  ;;  %v1346_v33 = vmul.f32 %v4922_v11, %v1344_v20  ;;  %vm1352_vm12 = vweird.f32 %v4922_v11 }
 0x523   : > { %vm1353_vm14 = vmor %vm1351_vm13, %vm1352_vm12  ;;  %v2494_v20 = vstv %s4648_s28  ;;  %s6789_s28 = sld [smem:[#allocation6 + $0x82]] }
 0x524   : > { %v2238_v54 = vsel %vm841_vm7, %v6658_v49, 0.0  ;;  %v1347_v62 = vmul.f32 %v4922_v11, %v1346_v33 }
 0x525   : > { %v2240_v51 = vadd.f32 %v2239_v59, %v2238_v54 }
 0x526   : > { %v1348_v7 = vmul.f32 0.5, %v1347_v62 }
 0x527   : > { %2241 = vadd.xlane.f32.xlu0 %v2240_v51 }
 0x528   : > { %v1349_v8 = vsub.f32 1.5, %v1348_v7 }
 0x52a   : > { %v1350_v19 = vmul.f32 %v4922_v11, %v1349_v8 }
 0x52c   : > { %v1354_v21 = vsel %vm1353_vm14, %v4922_v11, %v1350_v19  ;;  %v2508_v19 = vstv %s4649_s27  ;;  %s4692_s27 = sld [smem:[#allocation3 + $0xbb]] }
 0x52d   : > { %v1356_v27 = vmul.f32 %v1354_v21, %v6537_v23  ;;  %v1355_v23 = vmul.f32 %v1354_v21, %v6534_v44 }
 0x52f   : > { %v1360_v10 = vmul.f32 %v1358_v41, %v1356_v27  ;;  %v1359_v25 = vmul.f32 %v1358_v41, %v1355_v23  ;;  %v2580_v27 = vstv %s6731_s5  ;;  %s4647_s5 = sld [smem:[#allocation3 + $0x90]] }
 0x531   : > { %v1364_v35 = vadd.f32 %v1362_v53, %v1360_v10  ;;  %v1363_v37 = vadd.f32 %v1362_v53, %v1359_v25  ;;  %v2566_v10 = vstv %s6742_s19  ;;  %s4650_s19 = sld [smem:[#allocation3 + $0x93]] }
 0x533   : > { %v1366_v5 = vmax.f32 %v1364_v35, 0.0  ;;  %v1365_v28 = vmax.f32 %v1363_v37, 0.0  ;;  %v2977_v35 = vstv %s6747_s7  ;;  %s4685_s7 = sld [smem:[#allocation3 + $0xb4]] }
 0x539   : > { %2295 = vrot.lane.b32.xlu2 %v902_v24, %s8133_s17 }
 0x53b   : > { %2297 = vrot.lane.b32.xlu0 %v903_v12, %s8133_s17 }
 0x594   : > { %v1797_v34 = vpop.xlane.xlu2 %1796 }
 0x595   : > { %v1798_v6 = vrot.slane %v1797_v34, 4 }
 0x597   : > { %v1799_v63 = vadd.f32 %v1798_v6, %v1797_v34  ;;  %v2530_v6 = vstv %s6714_s4  ;;  %s4690_s4 = sld [smem:[#allocation3 + $0xb9]] }
 0x599   : > { %v1800_v39 = vrot.slane %v1799_v63, 2 }
 0x59a   : > { %v2242_v46 = vpop.xlane.xlu0 %2241 }
 0x59b   : > { %v2243_v52 = vrot.slane %v2242_v46, 4  ;;  %v1801_v36 = vadd.f32 %v1800_v39, %v1799_v63 }
 0x59c   : > { %v2296_v45 = vpop.permute.xlu2 %2295 }
 0x59d   : > { %2301 = vst.msk [vmem:[#allocation2 + $0x1] sm:$0xff] %vm206_vm0, %v2296_v45  ;;  %v2244_v3 = vadd.f32 %v2243_v52, %v2242_v46  ;;  %v1802_v48 = vrot.slane %v1801_v36, 1 }
 0x59e   : > { %2303 = vst.msk [vmem:[#allocation2 - $0x1] sm:$0x2] %vm209_vm1, %v2296_v45 }
 0x59f   : > { %v1803_v58 = vadd.f32 %v1802_v48, %v1801_v36  ;;  %v2245_v57 = vrot.slane %v2244_v3, 2  ;;  %v2544_v48 = vstv %s6727_s25  ;;  %s4693_s25 = sld [smem:[#allocation3 + $0xbc]] }
 0x5a1   : > { %4828 = vpush %v1803_v58  ;;  %v2246_v42 = vadd.f32 %v2245_v57, %v2244_v3 }
 0x5a3   : > { %v2247_v30 = vrot.slane %v2246_v42, 1 }
 0x5a5   : > { %v2341_v14 = vld [vmem:[#allocation2] sm:$0xff]  ;;  %v2248_v2 = vadd.f32 %v2247_v30, %v2246_v42 }
 0x5a6   : > { %2347 = vrot.lane.b32.xlu0 %v2341_v14, %s8051_s11 }
 0x5a7   : > { %4830 = vpush %v2248_v2 }
 0x5ad   : > { %v2298_v26 = vpop.permute.xlu0 %2297 }
 0x5ae   : > { %2309 = vrot.lane.b32.xlu0 %v1366_v5, %s8133_s17  ;;  %2302 = vst.msk [vmem:[#allocation2 + $0x9] sm:$0xff] %vm206_vm0, %v2298_v26 }
 0x5af   : > { %2304 = vst.msk [vmem:[#allocation2 + $0xb] sm:$0x40] %vm211_vm2, %v2298_v26 }
 0x5b5   : > { %v2342_v38 = vld [vmem:[#allocation2 + $0x8] sm:$0xff] }
 0x5b6   : > { %v2343_v22 = vld [vmem:[#allocation2 + $0x10] sm:$0x3]  ;;  %2349 = vrot.lane.b32.xlu2 %v2342_v38, %s8051_s11  ;;  %v8074_v38 = vstv %s6753_s6 }
 0x5b7   : > { %2351 = vrot.lane.b32.xlu1 %v2343_v22, %s8051_s11 }
 0x5bf   : > { %2307 = vrot.lane.b32.xlu1 %v1365_v28, %s8133_s17  ;;  %v8073_v28 = vstv %s6755_s30 }
 0x5d2   : > { %s4829_s29 = spop %4828 }
 0x5d8   : > { %s4831_s8 = spop %4830 }
 0x5d9   : > { %v2250_v15 = vstv %s4831_s8  ;;  %s6785_s8 = sld [smem:[#allocation3 + $0xb8]] }
 0x5da   : > { %v2251_v56 = vmul.f32 %v2250_v15, %v6348_v29 }
 0x5dc   : > { %v6700_v43 = vsub.f32 %v6658_v49, %v2251_v56  ;;  %v6703_v40 = vsub.f32 %v6656_v0, %v2251_v56  ;;  %v1805_v49 = vstv %s4829_s29  ;;  %s6779_s29 = sld [smem:[#allocation6 + $0x2]] }
 0x5dd   : > { %v1806_v0 = vmul.f32 %v1805_v49, %v6348_v29 }
 0x5de   : > { %v2254_v18 = vmul.f32 %v6700_v43, %v6700_v43  ;;  %v2255_v16 = vmul.f32 %v6703_v40, %v6703_v40 }
 0x5df   : > { %v1807_v62 = vadd.f32 1e-05, %v1806_v0  ;;  %v3011_v56 = vstv %s6785_s8  ;;  %v3045_v0 = vstv %s4692_s27  ;;  %s4691_s8 = sld [smem:[#allocation3 + $0xba]] }
 0x5e0   : > { %v2256_v55 = vsel %vm841_vm7, %v2254_v18, 0.0  ;;  %v2257_v24 = vsel %vm841_vm7, %v2255_v16, 0.0  ;;  %s6882_s27 = sld [smem:[#allocation3 + $0x99]] }
 0x5e1   : > { %v2258_v12 = vadd.f32 %v2257_v24, %v2256_v55  ;;  %4923 = vrsqrt.f32 %v1807_v62  ;;  %vm1814_vm8 = vweird.f32 %v1807_v62  ;;  %v1825_v55 = vstv %s6789_s28  ;;  %s6867_s28 = sld [smem:[#allocation3 + $0x9b]] }
 0x5e7   : > { %v4924_v36 = vpop.eup %4923 }
 0x5e8   : > { %v1809_v45 = vmul.f32 %v4924_v36, %v1807_v62  ;;  %vm1815_vm15 = vweird.f32 %v4924_v36 }
 0x5e9   : > { %vm1816_vm9 = vmor %vm1814_vm8, %vm1815_vm15 }
 0x5ea   : > { %v1810_v42 = vmul.f32 %v4924_v36, %v1809_v45 }
 0x5ec   : > { %v1811_v30 = vmul.f32 0.5, %v1810_v42 }
 0x5ee   : > { %v1812_v5 = vsub.f32 1.5, %v1811_v30 }
 0x5f0   : > { %v1813_v22 = vmul.f32 %v4924_v36, %v1812_v5 }
 0x610   : > { %v2350_v31 = vpop.permute.xlu2 %2349 }
 0x611   : > { %2357 = vst.msk [vmem:[#allocation2 + $0x8] sm:$0xff] %vm276_vm4, %v2350_v31 }
 0x618   : > { %v2348_v47 = vpop.permute.xlu0 %2347  ;;  %v2360_v9 = vld [vmem:[#allocation2 + $0x8] sm:$0xff] }
 0x619   : > { %2356 = vst.msk [vmem:[#allocation2] sm:$0xff] %vm276_vm4, %v2348_v47  ;;  %2367 = vrot.lane.b32.xlu0 %v2360_v9, %s8134_s10  ;;  %v2991_v9 = vstv %s6758_s20  ;;  %s6843_s20 = sld [smem:[#allocation3 + $0xb7]] }
 0x620   : > { %v2310_v44 = vpop.permute.xlu0 %2309  ;;  %v2359_v61 = vld [vmem:[#allocation2] sm:$0xff] }
 0x621   : > { %2314 = vst.msk [vmem:[#allocation2 + $0x21] sm:$0xff] %vm206_vm0, %v2310_v44  ;;  %2365 = vrot.lane.b32.xlu1 %v2359_v61, %s8134_s10  ;;  %v1817_v61 = vsel %vm1816_vm9, %v4924_v36, %v1813_v22 }
 0x622   : > { %2316 = vst.msk [vmem:[#allocation2 + $0x23] sm:$0x40] %vm211_vm2, %v2310_v44  ;;  %v8064_v44 = vstv %s6763_s26 }
 0x629   : > { %v2352_v1 = vpop.permute.xlu1 %2351  ;;  %v2379_v51 = vld [vmem:[#allocation2 + $0x28] sm:$0x3] }
 0x62a   : > { %2358 = vst.msk [vmem:[#allocation2 + $0x10] sm:$0x3] %vm279_vm3, %v2352_v1 }
 0x631   : > { %v2308_v54 = vpop.permute.xlu1 %2307  ;;  %v2361_v59 = vld [vmem:[#allocation2 + $0x10] sm:$0x3] }
 0x632   : > { %2313 = vst.msk [vmem:[#allocation2 + $0x19] sm:$0xff] %vm206_vm0, %v2308_v54  ;;  %2369 = vrot.lane.b32.xlu2 %v2361_v59, %s8134_s10 }
 0x633   : > { %2315 = vst.msk [vmem:[#allocation2 + $0x17] sm:$0x2] %vm209_vm1, %v2308_v54 }
 0x639   : > { %v2378_v17 = vld [vmem:[#allocation2 + $0x20] sm:$0xff] }
 0x63a   : > { %v2377_v4 = vld [vmem:[#allocation2 + $0x18] sm:$0xff]  ;;  %2387 = vrot.lane.b32.xlu2 %v2379_v51, %s8051_s11  ;;  %2385 = vrot.lane.b32.xlu0 %v2378_v17, %s8051_s11  ;;  %v1819_v51 = vmul.f32 %v1817_v61, %v6648_v13  ;;  %v1821_v17 = vstv %s6779_s29  ;;  %s4653_s29 = sld [smem:[#allocation3 + $0x96]] }
 0x63b   : > { %2383 = vrot.lane.b32.xlu1 %v2377_v4, %s8051_s11 }
 0x63c   : > { %v1823_v18 = vmul.f32 %v1821_v17, %v1819_v51 }
 0x63e   : > { %v1827_v24 = vadd.f32 %v1825_v55, %v1823_v18 }
 0x665   : > { %2259 = vadd.xlane.f32.xlu1 %v2258_v12  ;;  %v1829_v12 = vmax.f32 %v1827_v24, 0.0 }
 0x68b   : > { %v2368_v50 = vpop.permute.xlu0 %2367 }
 0x68c   : > { %v2370_v32 = vpop.permute.xlu2 %2369  ;;  %2375 = vst.msk [vmem:[#allocation2 + $0x8] sm:$0xff] %vm296_vm5, %v2368_v50  ;;  %v3025_v50 = vstv %s4690_s4  ;;  %s6879_s4 = sld [smem:[#allocation3 + $0x9a]] }
 0x68d   : > { %2376 = vst.msk [vmem:[#allocation2 + $0x10] sm:$0x3] %vm299_vm6, %v2370_v32 }
 0x693   : > { %v6716_v11 = vld [vmem:[#allocation2 + $0x8] sm:$0xff]  ;;  %v2366_v33 = vpop.permute.xlu1 %2365 }
 0x694   : > { %2374 = vst.msk [vmem:[#allocation2] sm:$0xff] %vm296_vm5, %v2366_v33  ;;  %v2388_v7 = vpop.permute.xlu2 %2387  ;;  %v2496_v34 = vmul.f32 %v2494_v20, %v6716_v11  ;;  %v6722_v8 = vld [vmem:[#allocation2 + $0x9] sm:$0xff]  ;;  %v2510_v57 = vmul.f32 %v2508_v19, %v6716_v11  ;;  %v2979_v4 = vmul.f32 %v2977_v35, %v6716_v11  ;;  %v2993_v13 = vmul.f32 %v2991_v9, %v6716_v11 }
 0x695   : > { %2394 = vst.msk [vmem:[#allocation2 + $0x28] sm:$0x3] %vm279_vm3, %v2388_v7  ;;  %v2532_v52 = vmul.f32 %v2530_v6, %v6722_v8  ;;  %v6777_v37 = vld [vmem:[#allocation2 + $0xa] sm:$0xff]  ;;  %v2546_v47 = vmul.f32 %v2544_v48, %v6722_v8  ;;  %v3013_v49 = vmul.f32 %v3011_v56, %v6722_v8  ;;  %v3027_v62 = vmul.f32 %v3025_v50, %v6722_v8 }
 0x696   : > { %2501 = vrot.lane.b32.xlu0 %v2496_v34, %s8049_s24  ;;  %v2582_v31 = vmul.f32 %v2580_v27, %v6777_v37  ;;  %v6799_v59 = vmul.f32 %v8073_v28, %v6777_v37  ;;  %v2568_v15 = vmul.f32 %v2566_v10, %v6777_v37  ;;  %v3059_v7 = vstv %s4693_s25  ;;  %s6884_s25 = sld [smem:[#allocation3 + $0xbd]] }
 0x69b   : > { %v6725_v63 = vld [vmem:[#allocation2] sm:$0xff] }
 0x69c   : > { %v2495_v39 = vmul.f32 %v2494_v20, %v6725_v63  ;;  %v2509_v46 = vmul.f32 %v2508_v19, %v6725_v63  ;;  %v6737_v21 = vld [vmem:[#allocation2 + $0x1] sm:$0xff]  ;;  %v2978_v23 = vmul.f32 %v2977_v35, %v6725_v63  ;;  %v2992_v1 = vmul.f32 %v2991_v9, %v6725_v63 }
 0x69d   : > { %v6739_v3 = vld [vmem:[#allocation2 + $0x2] sm:$0xff]  ;;  %v2545_v58 = vmul.f32 %v2544_v48, %v6737_v21  ;;  %v2531_v2 = vmul.f32 %v2530_v6, %v6737_v21  ;;  %v6775_v25 = vmul.f32 %v8074_v38, %v6737_v21  ;;  %v6794_v54 = vmul.f32 %v8064_v44, %v6737_v21 }
 0x69e   : > { %2499 = vrot.lane.b32.xlu1 %v2495_v39, %s8049_s24  ;;  %2513 = vrot.lane.b32.xlu2 %v2509_v46, %s8051_s11  ;;  %v2581_v41 = vmul.f32 %v2580_v27, %v6739_v3  ;;  %v2567_v14 = vmul.f32 %v2566_v10, %v6739_v3  ;;  %v3012_v16 = vmul.f32 %v3011_v56, %v6737_v21  ;;  %v2397_v10 = vld [vmem:[#allocation2 + $0x28] sm:$0x3]  ;;  %v2488_v35 = vstv %s4647_s5  ;;  %s6886_s5 = sld [smem:[#allocation3 + $0x106]] }
 0x69f   : > { %2537 = vrot.lane.b32.xlu0 %v2532_v52, %s8049_s24  ;;  %v3026_v32 = vmul.f32 %v3025_v50, %v6737_v21  ;;  %v3046_v33 = vmul.f32 %v3045_v0, %v6739_v3  ;;  %v3060_v34 = vmul.f32 %v3059_v7, %v6739_v3  ;;  %v3047_v46 = vmul.f32 %v3045_v0, %v6777_v37 }
 0x6a0   : > { %v1818_v48 = vmul.f32 %v1817_v61, %v6645_v60  ;;  %v3061_v27 = vmul.f32 %v3059_v7, %v6777_v37  ;;  %v2489_v5 = vmul.f32 %v2488_v35, %v6725_v63  ;;  %v2560_v7 = vstv %s4653_s29  ;;  %s6912_s29 = sld [smem:[#allocation3 + $0xa0]] }
 0x6a2   : > { %v1822_v42 = vmul.f32 %v1821_v17, %v1818_v48 }
 0x6a6   : > { %2549 = vrot.lane.b32.xlu2 %v2545_v58, %s8051_s11  ;;  %2515 = vrot.lane.b32.xlu1 %v2510_v57, %s8051_s11 }
 0x6a7   : > { %2585 = vrot.lane.b32.xlu0 %v2581_v41, %s8051_s11  ;;  %v1826_v41 = vadd.f32 %v1825_v55, %v1822_v42  ;;  %v2971_v55 = vstv %s4685_s7  ;;  %s6890_s7 = sld [smem:[#allocation3 + $0x107]] }
 0x6a9   : > { %v1828_v30 = vmax.f32 %v1826_v41, 0.0 }
 0x6ac   : > { %v2386_v53 = vpop.permute.xlu0 %2385 }
 0x6ad   : > { %v2384_v26 = vpop.permute.xlu1 %2383  ;;  %2393 = vst.msk [vmem:[#allocation2 + $0x20] sm:$0xff] %vm276_vm4, %v2386_v53 }
 0x6ae   : > { %2392 = vst.msk [vmem:[#allocation2 + $0x18] sm:$0xff] %vm276_vm4, %v2384_v26  ;;  %2571 = vrot.lane.b32.xlu2 %v2567_v14, %s8049_s24  ;;  %2535 = vrot.lane.b32.xlu1 %v2531_v2, %s8049_s24 }
 0x6af   : > { %2982 = vrot.lane.b32.xlu0 %v2978_v23, %s8049_s24 }
 0x6b4   : > { %v2396_v36 = vld [vmem:[#allocation2 + $0x20] sm:$0xff] }
 0x6b5   : > { %v2395_v20 = vld [vmem:[#allocation2 + $0x18] sm:$0xff] }
 0x6b6   : > { %2587 = vrot.lane.b32.xlu2 %v2582_v31, %s8051_s11  ;;  %2551 = vrot.lane.b32.xlu1 %v2546_v47, %s8051_s11  ;;  %v2524_v47 = vstv %s4650_s19  ;;  %s6888_s19 = sld [smem:[#allocation3 + $0x9d]] }
 0x6b7   : > { %2996 = vrot.lane.b32.xlu0 %v2992_v1, %s8051_s11  ;;  %v2525_v61 = vmul.f32 %v2524_v47, %v6737_v21  ;;  %v2490_v1 = vmul.f32 %v2488_v35, %v6716_v11  ;;  %v2526_v56 = vmul.f32 %v2524_v47, %v6722_v8 }
 0x6be   : > { %2984 = vrot.lane.b32.xlu2 %v2979_v4, %s8049_s24  ;;  %2573 = vrot.lane.b32.xlu1 %v2568_v15, %s8049_s24 }
 0x6bf   : > { %3016 = vrot.lane.b32.xlu0 %v3012_v16, %s8049_s24 }
 0x6c6   : > { %2998 = vrot.lane.b32.xlu2 %v2993_v13, %s8051_s11  ;;  %2321 = vrot.lane.b32.xlu1 %v1829_v12, %s8133_s17  ;;  %v2973_v13 = vmul.f32 %v2971_v55, %v6716_v11  ;;  %v3005_v12 = vstv %s6843_s20 }
 0x6c7   : > { %3030 = vrot.lane.b32.xlu0 %v3026_v32, %s8051_s11 }
 0x6ce   : > { %3018 = vrot.lane.b32.xlu2 %v3013_v49, %s8049_s24  ;;  %2401 = vrot.lane.b32.xlu1 %v2395_v20, %s8134_s10 }
 0x6cf   : > { %3050 = vrot.lane.b32.xlu0 %v3046_v33, %s8049_s24 }
 0x6d6   : > { %3032 = vrot.lane.b32.xlu2 %v3027_v62, %s8051_s11  ;;  %v3007_v62 = vmul.f32 %v3005_v12, %v6722_v8  ;;  %v3006_v8 = vmul.f32 %v3005_v12, %v6737_v21 }
 0x6d7   : > { %3064 = vrot.lane.b32.xlu0 %v3060_v34, %s8051_s11  ;;  %v2561_v34 = vmul.f32 %v2560_v7, %v6739_v3 }
 0x6d8   : > { %v2260_v6 = vpop.xlane.xlu1 %2259 }
 0x6d9   : > { %v2261_v19 = vrot.slane %v2260_v6, 4 }
 0x6db   : > { %v2262_v39 = vadd.f32 %v2261_v19, %v2260_v6 }
 0x6dd   : > { %v2263_v52 = vrot.slane %v2262_v39, 2 }
 0x6de   : > { %3052 = vrot.lane.b32.xlu2 %v3047_v46, %s8049_s24  ;;  %v2972_v46 = vmul.f32 %v2971_v55, %v6725_v63 }
 0x6df   : > { %2403 = vrot.lane.b32.xlu0 %v2396_v36, %s8134_s10  ;;  %v2264_v45 = vadd.f32 %v2263_v52, %v2262_v39 }
 0x6e1   : > { %v2265_v58 = vrot.slane %v2264_v45, 1 }
 0x6e3   : > { %v2266_v57 = vadd.f32 %v2265_v58, %v2264_v45 }
 0x6e5   : > { %4832 = vpush %v2266_v57  ;;  %v2562_v57 = vmul.f32 %v2560_v7, %v6777_v37  ;;  %v2602_v7 = vstv %s6879_s4  ;;  %s6951_s4 = sld [smem:[#allocation3 + $0xbf]] }
 0x6e6   : > { %3066 = vrot.lane.b32.xlu2 %v3061_v27, %s8051_s11 }
 0x6ee   : > { %2319 = vrot.lane.b32.xlu2 %v1828_v30, %s8133_s17  ;;  %v3039_v30 = vstv %s4691_s8  ;;  %s4661_s8 = sld [smem:[#allocation3 + $0x9e]] }
 0x6ef   : > { %v3041_v35 = vmul.f32 %v3039_v30, %v6777_v37 }
 0x6f6   : > { %2405 = vrot.lane.b32.xlu2 %v2397_v10, %s8134_s10 }
 0x6f8   : > { %v2514_v14 = vpop.permute.xlu2 %2513 }
 0x700   : > { %v2550_v2 = vpop.permute.xlu2 %2549 }
 0x708   : > { %v6836_v53 = vpop.permute.xlu2 %2571  ;;  %v2502_v60 = vpop.permute.xlu0 %2501 }
 0x709   : > { %v2506_v17 = vadd.f32 %v2502_v60, %v2490_v1 }
 0x710   : > { %v2500_v26 = vpop.permute.xlu1 %2499  ;;  %v6839_v23 = vpop.permute.xlu2 %2587 }
 0x711   : > { %v2505_v22 = vadd.f32 %v2500_v26, %v2489_v5  ;;  %v2538_v31 = vpop.permute.xlu0 %2537 }
 0x713   : > { %v2519_v9 = vadd.f32 %v2514_v14, %v2505_v22 }
 0x715   : > { %v2527_v51 = vadd.f32 %v2525_v61, %v2519_v9  ;;  %v3040_v9 = vmul.f32 %v3039_v30, %v6739_v3 }
 0x716   : > { %s4833_s20 = spop %4832 }
 0x718   : > { %v2985_v4 = vpop.permute.xlu2 %2984  ;;  %v2516_v15 = vpop.permute.xlu1 %2515 }
 0x719   : > { %v2520_v18 = vadd.f32 %v2516_v15, %v2506_v17  ;;  %v6846_v16 = vpop.permute.xlu0 %2585  ;;  %v2989_v50 = vadd.f32 %v2985_v4, %v2973_v13  ;;  %v2616_v4 = vstv %s6867_s28  ;;  %s6941_s28 = sld [smem:[#allocation3 + $0xa1]] }
 0x71b   : > { %v2528_v24 = vadd.f32 %v2526_v56, %v2520_v18 }
 0x71d   : > { %v2542_v52 = vadd.f32 %v2538_v31, %v2528_v24 }
 0x720   : > { %v2999_v32 = vpop.permute.xlu2 %2998  ;;  %v2536_v49 = vpop.permute.xlu1 %2535 }
 0x721   : > { %v3003_v0 = vadd.f32 %v2999_v32, %v2989_v50  ;;  %v2541_v20 = vadd.f32 %v2536_v49, %v2527_v51  ;;  %v2983_v33 = vpop.permute.xlu0 %2982  ;;  %v2268_v32 = vstv %s4833_s20  ;;  %s6975_s20 = sld [smem:[#allocation3 + $0x10c]] }
 0x722   : > { %v2988_v11 = vadd.f32 %v2983_v33, %v2972_v46  ;;  %v3073_v33 = vstv %s6884_s25  ;;  %v2638_v46 = vstv %s6888_s19  ;;  %s6964_s25 = sld [smem:[#allocation3 + $0x10a]] }
 0x723   : > { %v2555_v6 = vadd.f32 %v2550_v2, %v2541_v20  ;;  %v3009_v19 = vadd.f32 %v3007_v62, %v3003_v0  ;;  %v2596_v0 = vstv %s6882_s27  ;;  %s6959_s27 = sld [smem:[#allocation3 + $0x109]] }
 0x724   : > { %s6968_s19 = sld [smem:[#allocation3 + $0x10d]] }
 0x725   : > { %v2563_v39 = vadd.f32 %v2561_v34, %v2555_v6  ;;  %v8072_v34 = vstv %s6886_s5  ;;  %v2269_v6 = vmul.f32 %v2268_v32, %v6348_v29 }
 0x727   : > { %v2577_v13 = vadd.f32 %v6836_v53, %v2563_v39 }
 0x728   : > { %v3019_v36 = vpop.permute.xlu2 %3018  ;;  %v2552_v45 = vpop.permute.xlu1 %2551 }
 0x729   : > { %v2556_v48 = vadd.f32 %v2552_v45, %v2542_v52  ;;  %v2997_v58 = vpop.permute.xlu0 %2996  ;;  %v3023_v10 = vadd.f32 %v3019_v36, %v3009_v19  ;;  %v2591_v53 = vadd.f32 %v6846_v16, %v2577_v13 }
 0x72a   : > { %v3002_v27 = vadd.f32 %v2997_v58, %v2988_v11  ;;  %v8063_v11 = vstv %s6890_s7  ;;  %v8069_v13 = vstv %s6968_s19 }
 0x72b   : > { %v6855_v42 = vadd.f32 %v2562_v57, %v2556_v48  ;;  %v6928_v57 = vadd.f32 1e-05, %v2269_v6 }
 0x72c   : > { %v3008_v41 = vadd.f32 %v3006_v8, %v3002_v27 }
 0x72d   : > { %4925 = vrsqrt.f32 %v6928_v57  ;;  %vm2277_vm11 = vweird.f32 %v6928_v57 }
 0x730   : > { %v3033_v14 = vpop.permute.xlu2 %3032  ;;  %v6857_v2 = vpop.permute.xlu1 %2573 }
 0x731   : > { %v3037_v63 = vadd.f32 %v3033_v14, %v3023_v10  ;;  %v3017_v60 = vpop.permute.xlu0 %3016  ;;  %v2674_v10 = vstv %s6912_s29  ;;  %s4695_s29 = sld [smem:[#allocation3 + $0xbe]] }
 0x732   : > { %v3022_v26 = vadd.f32 %v3017_v60, %v3008_v41 }
 0x733   : > { %v6860_v5 = vadd.f32 %v3041_v35, %v3037_v63  ;;  %v4926_v35 = vpop.eup %4925 }
 0x734   : > { %vm2278_vm10 = vweird.f32 %v4926_v35 }
 0x735   : > { %vm2279_vm12 = vmor %vm2277_vm11, %vm2278_vm10 }
 0x738   : > { %v6862_v22 = vpop.permute.xlu2 %3052  ;;  %v2322_v31 = vpop.permute.xlu1 %2321 }
 0x739   : > { %2326 = vst.msk [vmem:[#allocation2 + $0x39] sm:$0xff] %vm206_vm0, %v2322_v31  ;;  %v3031_v21 = vpop.permute.xlu0 %3030 }
 0x73a   : > { %2328 = vst.msk [vmem:[#allocation2 + $0x3b] sm:$0x40] %vm211_vm2, %v2322_v31  ;;  %v3036_v47 = vadd.f32 %v3031_v21, %v3022_v26  ;;  %v2578_v26 = vadd.f32 %v6857_v2, %v6855_v42  ;;  %v2652_v31 = vstv %s4661_s8  ;;  %v2272_v21 = vmul.f32 %v4926_v35, %v6928_v57  ;;  %s6982_s8 = sld [smem:[#allocation3 + $0xc1]] }
 0x73c   : > { %v3042_v61 = vadd.f32 %v3040_v9, %v3036_v47  ;;  %v3057_v47 = vadd.f32 %v6862_v22, %v6860_v5 }
 0x740   : > { %v6869_v1 = vpop.permute.xlu2 %3066  ;;  %v2402_v37 = vpop.permute.xlu1 %2401  ;;  %v3113_v6 = vstv %s6982_s8  ;;  %s7026_s8 = sld [smem:[#allocation3 + $0xc5]] }
 0x741   : > { %2410 = vst.msk [vmem:[#allocation2 + $0x18] sm:$0xff] %vm296_vm5, %v2402_v37  ;;  %v2415_v51 = vld [vmem:[#allocation2 + $0x40] sm:$0x3]  ;;  %v3051_v17 = vpop.permute.xlu0 %3050  ;;  %v2592_v37 = vadd.f32 %v6839_v23, %v2578_v26 }
 0x742   : > { %2423 = vrot.lane.b32.xlu2 %v2415_v51, %s8051_s11  ;;  %v3056_v49 = vadd.f32 %v3051_v17, %v3042_v61  ;;  %v2688_v61 = vstv %s6941_s28  ;;  %v3071_v51 = vadd.f32 %v6869_v1, %v3057_v47  ;;  %s4699_s28 = sld [smem:[#allocation3 + $0xc2]] }
 0x746   : > { %v3161_v26 = vstv %s7026_s8  ;;  %s4700_s8 = sld [smem:[#allocation3 + $0xc3]] }
 0x748   : > { %v6874_v15 = vld [vmem:[#allocation2 + $0x18] sm:$0xff]  ;;  %v2320_v56 = vpop.permute.xlu2 %2319 }
 0x749   : > { %2325 = vst.msk [vmem:[#allocation2 + $0x31] sm:$0xff] %vm206_vm0, %v2320_v56  ;;  %v2617_v3 = vmul.f32 %v2616_v4, %v6874_v15  ;;  %v3065_v18 = vpop.permute.xlu0 %3064  ;;  %v2597_v20 = vmul.f32 %v2596_v0, %v6874_v15  ;;  %v6909_v39 = vmul.f32 %v8072_v34, %v6874_v15  ;;  %v3074_v52 = vmul.f32 %v3073_v33, %v6874_v15 }
 0x74a   : > { %2327 = vst.msk [vmem:[#allocation2 + $0x2f] sm:$0x2] %vm209_vm1, %v2320_v56  ;;  %v3070_v62 = vadd.f32 %v3065_v18, %v3056_v49  ;;  %v2603_v16 = vmul.f32 %v2602_v7, %v6874_v15  ;;  %v6920_v36 = vmul.f32 %v8063_v11, %v6874_v15  ;;  %v8058_v49 = vstv %s6975_s20 }
 0x74b   : > { %2621 = vrot.lane.b32.xlu2 %v2617_v3, %s8051_s11  ;;  %v6904_v19 = vadd.f32 %v2597_v20, %v2591_v53  ;;  %v3093_v3 = vstv %s6951_s4  ;;  %s7015_s4 = sld [smem:[#allocation6 + $0x3]] }
 0x74c   : > { %v6926_v58 = vadd.f32 %v3074_v52, %v3070_v62  ;;  %v3079_v62 = vstv %s4695_s29  ;;  %s7022_s29 = sld [smem:[#allocation6 + $0x83]] }
 0x750   : > { %v2406_v55 = vpop.permute.xlu2 %2405  ;;  %v2414_v24 = vld [vmem:[#allocation2 + $0x38] sm:$0xff] }
 0x751   : > { %2412 = vst.msk [vmem:[#allocation2 + $0x28] sm:$0x3] %vm299_vm6, %v2406_v55  ;;  %v2413_v12 = vld [vmem:[#allocation2 + $0x30] sm:$0xff]  ;;  %2421 = vrot.lane.b32.xlu0 %v2414_v24, %s8051_s11  ;;  %v2404_v50 = vpop.permute.xlu0 %2403  ;;  %v8071_v55 = vstv %s6959_s27  ;;  %v8070_v24 = vstv %s6964_s25  ;;  %v2284_v57 = vstv %s7015_s4  ;;  %s4659_s4 = sld [smem:[#allocation3 + $0x9c]] }
 0x752   : > { %2419 = vrot.lane.b32.xlu1 %v2413_v12, %s8051_s11  ;;  %2411 = vst.msk [vmem:[#allocation2 + $0x20] sm:$0xff] %vm296_vm5, %v2404_v50  ;;  %v3094_v12 = vmul.f32 %v3093_v3, %v6874_v15 }
 0x759   : > { %v6922_v45 = vld [vmem:[#allocation2 + $0x20] sm:$0xff] }
 0x75a   : > { %v6924_v48 = vld [vmem:[#allocation2 + $0x21] sm:$0xff]  ;;  %2607 = vrot.lane.b32.xlu1 %v2603_v16, %s8049_s24  ;;  %v2604_v8 = vmul.f32 %v2602_v7, %v6922_v45  ;;  %v6936_v41 = vld [vmem:[#allocation2 + $0x19] sm:$0xff]  ;;  %v2618_v14 = vmul.f32 %v2616_v4, %v6922_v45  ;;  %v2598_v2 = vmul.f32 %v2596_v0, %v6922_v45  ;;  %v3075_v17 = vmul.f32 %v3073_v33, %v6922_v45 }
 0x75b   : > { %v2640_v27 = vmul.f32 %v2638_v46, %v6924_v48  ;;  %v6938_v30 = vld [vmem:[#allocation2 + $0x1a] sm:$0xff]  ;;  %v2639_v60 = vmul.f32 %v2638_v46, %v6936_v41  ;;  %v6956_v9 = vld [vmem:[#allocation2 + $0x22] sm:$0xff]  ;;  %v2653_v42 = vmul.f32 %v2652_v31, %v6936_v41  ;;  %v2654_v5 = vmul.f32 %v2652_v31, %v6924_v48 }
 0x75c   : > { %2609 = vrot.lane.b32.xlu0 %v2604_v8, %s8049_s24  ;;  %v2675_v63 = vmul.f32 %v2674_v10, %v6938_v30  ;;  %v2690_v23 = vmul.f32 %v2688_v61, %v6956_v9  ;;  %v6973_v22 = vadd.f32 %v2598_v2, %v2592_v37  ;;  %v2273_v4 = vmul.f32 %v4926_v35, %v2272_v21  ;;  %v7404_v11 = vld [vmem:[#allocation2 + $0x20] sm:$0xff] }
 0x75d   : > { %2645 = vrot.lane.b32.xlu2 %v2640_v27, %s8049_s24  ;;  %v6977_v1 = vadd.f32 %v3075_v17, %v3071_v51  ;;  %v2676_v18 = vmul.f32 %v2674_v10, %v6956_v9  ;;  %v2689_v50 = vmul.f32 %v2688_v61, %v6938_v30  ;;  %v6994_v32 = vmul.f32 %v8070_v24, %v6936_v41 }
 0x75e   : > { %v2274_v56 = vmul.f32 0.5, %v2273_v4  ;;  %v7000_v20 = vmul.f32 %v8071_v55, %v6924_v48  ;;  %v7005_v53 = vmul.f32 %v8058_v49, %v6938_v30  ;;  %v7010_v33 = vmul.f32 %v8069_v13, %v6956_v9  ;;  %v7394_v49 = vld [vmem:[#allocation2 + $0x1] sm:$0xff] }
 0x75f   : > { %v3080_v46 = vmul.f32 %v3079_v62, %v6874_v15  ;;  %v3114_v52 = vmul.f32 %v3113_v6, %v6936_v41  ;;  %v3081_v16 = vmul.f32 %v3079_v62, %v6922_v45  ;;  %v3127_v8 = vstv %s4699_s28  ;;  %s4701_s28 = sld [smem:[#allocation3 + $0xc4]]  ;;  %v7440_v13 = vld [vmem:[#allocation2 + $0x1a] sm:$0xff] }
 0x760   : > { %v2275_v0 = vsub.f32 1.5, %v2274_v56  ;;  %v3129_v10 = vmul.f32 %v3127_v8, %v6924_v48  ;;  %v3115_v47 = vmul.f32 %v3113_v6, %v6924_v48  ;;  %v2632_v6 = vstv %s4659_s4  ;;  %s4667_s4 = sld [smem:[#allocation3 + $0xa4]] }
 0x762   : > { %2623 = vrot.lane.b32.xlu1 %v2618_v14, %s8051_s11  ;;  %v2276_v7 = vmul.f32 %v4926_v35, %v2275_v0  ;;  %v3128_v14 = vmul.f32 %v3127_v8, %v6936_v41  ;;  %v2633_v8 = vmul.f32 %v2632_v6, %v6936_v41 }
 0x764   : > { %2643 = vrot.lane.b32.xlu0 %v2639_v60, %s8049_s24  ;;  %v2280_v27 = vsel %vm2279_vm12, %v4926_v35, %v2276_v7  ;;  %v2288_v35 = vstv %s7022_s29  ;;  %s4697_s29 = sld [smem:[#allocation3 + $0xc0]] }
 0x765   : > { %2679 = vrot.lane.b32.xlu2 %v2675_v63, %s8049_s24  ;;  %v2282_v15 = vmul.f32 %v2280_v27, %v6703_v40  ;;  %v3095_v63 = vmul.f32 %v3093_v3, %v6922_v45  ;;  %v3162_v40 = vmul.f32 %v3161_v26, %v6938_v30  ;;  %v2281_v45 = vmul.f32 %v2280_v27, %v6700_v43 }
 0x766   : > { %v3147_v61 = vstv %s4701_s28  ;;  %s4666_s28 = sld [smem:[#allocation3 + $0xa3]] }
 0x767   : > { %v2286_v60 = vmul.f32 %v2284_v57, %v2282_v15  ;;  %v3149_v37 = vmul.f32 %v3147_v61, %v6956_v9  ;;  %v2285_v2 = vmul.f32 %v2284_v57, %v2281_v45 }
 0x769   : > { %v2290_v31 = vadd.f32 %v2288_v35, %v2286_v60  ;;  %v2289_v51 = vadd.f32 %v2288_v35, %v2285_v2 }
 0x76a   : > { %2657 = vrot.lane.b32.xlu1 %v2653_v42, %s8051_s11  ;;  %v3148_v42 = vmul.f32 %v3147_v61, %v6938_v30 }
 0x76b   : > { %v2292_v21 = vmax.f32 %v2290_v31, 0.0  ;;  %v2291_v17 = vmax.f32 %v2289_v51, 0.0 }
 0x76c   : > { %2659 = vrot.lane.b32.xlu0 %v2654_v5, %s8051_s11  ;;  %v3163_v5 = vmul.f32 %v3161_v26, %v6956_v9 }
 0x76d   : > { %2695 = vrot.lane.b32.xlu2 %v2690_v23, %s8051_s11 }
 0x772   : > { %2681 = vrot.lane.b32.xlu1 %v2676_v18, %s8049_s24 }
 0x774   : > { %2693 = vrot.lane.b32.xlu0 %v2689_v50, %s8051_s11 }
 0x775   : > { %3098 = vrot.lane.b32.xlu2 %v3094_v12, %s8051_s11 }
 0x77a   : > { %3084 = vrot.lane.b32.xlu1 %v3080_v46, %s8049_s24 }
 0x77c   : > { %3086 = vrot.lane.b32.xlu0 %v3081_v16, %s8049_s24 }
 0x77d   : > { %3118 = vrot.lane.b32.xlu2 %v3114_v52, %s8049_s24 }
 0x782   : > { %3134 = vrot.lane.b32.xlu1 %v3129_v10, %s8051_s11 }
 0x784   : > { %3100 = vrot.lane.b32.xlu0 %v3095_v63, %s8051_s11 }
 0x785   : > { %3132 = vrot.lane.b32.xlu2 %v3128_v14, %s8051_s11  ;;  %v2634_v14 = vmul.f32 %v2632_v6, %v6924_v48  ;;  %v3141_v6 = vstv %s4700_s8  ;;  %s4665_s8 = sld [smem:[#allocation3 + $0xa2]] }
 0x78a   : > { %3166 = vrot.lane.b32.xlu1 %v3162_v40, %s8051_s11 }
 0x78c   : > { %3120 = vrot.lane.b32.xlu0 %v3115_v47, %s8049_s24 }
 0x78d   : > { %2333 = vrot.lane.b32.xlu2 %v2292_v21, %s8133_s17 }
 0x794   : > { %3152 = vrot.lane.b32.xlu0 %v3148_v42, %s8049_s24 }
 0x795   : > { %3154 = vrot.lane.b32.xlu2 %v3149_v37, %s8049_s24 }
 0x79c   : > { %v2424_v23 = vpop.permute.xlu2 %2423  ;;  %2331 = vrot.lane.b32.xlu0 %v2291_v17, %s8133_s17  ;;  %s4662_s17 = sld [smem:[#allocation3 + $0x9f]] }
 0x79d   : > { %2430 = vst.msk [vmem:[#allocation2 + $0x40] sm:$0x3] %vm279_vm3, %v2424_v23 }
 0x7a4   : > { %v2433_v43 = vld [vmem:[#allocation2 + $0x40] sm:$0x3]  ;;  %3168 = vrot.lane.b32.xlu0 %v3163_v5, %s8051_s11 }
 0x7a5   : > { %2441 = vrot.lane.b32.xlu2 %v2433_v43, %s8134_s10  ;;  %v2622_v4 = vpop.permute.xlu2 %2621  ;;  %v3107_v43 = vstv %s4697_s29  ;;  %s7101_s29 = sld [smem:[#allocation3 + $0xa7]] }
 0x7b7   : > { %v2646_v56 = vpop.permute.xlu2 %2645 }
 0x7bf   : > { %v7053_v3 = vpop.permute.xlu2 %2679 }
 0x7c3   : > { %v2422_v18 = vpop.permute.xlu0 %2421 }
 0x7c4   : > { %v2420_v12 = vpop.permute.xlu1 %2419  ;;  %2429 = vst.msk [vmem:[#allocation2 + $0x38] sm:$0xff] %vm276_vm4, %v2422_v18 }
 0x7c5   : > { %2428 = vst.msk [vmem:[#allocation2 + $0x30] sm:$0xff] %vm276_vm4, %v2420_v12  ;;  %v3108_v12 = vmul.f32 %v3107_v43, %v6936_v41 }
 0x7c7   : > { %v7057_v50 = vpop.permute.xlu2 %2695 }
 0x7cb   : > { %v2432_v0 = vld [vmem:[#allocation2 + $0x38] sm:$0xff] }
 0x7cc   : > { %v2608_v62 = vpop.permute.xlu1 %2607  ;;  %v2431_v7 = vld [vmem:[#allocation2 + $0x30] sm:$0xff]  ;;  %2439 = vrot.lane.b32.xlu0 %v2432_v0, %s8134_s10 }
 0x7cd   : > { %v2613_v46 = vadd.f32 %v2608_v62, %v6904_v19  ;;  %2437 = vrot.lane.b32.xlu1 %v2431_v7, %s8134_s10  ;;  %v2668_v19 = vstv %s4662_s17  ;;  %s4669_s17 = sld [smem:[#allocation3 + $0xa6]] }
 0x7ce   : > { %v2610_v16 = vpop.permute.xlu0 %2609  ;;  %v2669_v21 = vmul.f32 %v2668_v19, %v6938_v30  ;;  %v2670_v2 = vmul.f32 %v2668_v19, %v6956_v9 }
 0x7cf   : > { %v3099_v52 = vpop.permute.xlu2 %3098  ;;  %v2627_v27 = vadd.f32 %v2622_v4, %v2613_v46  ;;  %v2614_v15 = vadd.f32 %v2610_v16, %v6973_v22 }
 0x7d1   : > { %v2635_v57 = vadd.f32 %v2633_v8, %v2627_v27  ;;  %v3142_v8 = vmul.f32 %v3141_v6, %v6938_v30 }
 0x7d4   : > { %v2624_v10 = vpop.permute.xlu1 %2623 }
 0x7d5   : > { %v2628_v63 = vadd.f32 %v2624_v10, %v2614_v15 }
 0x7d6   : > { %v2644_v35 = vpop.permute.xlu0 %2643 }
 0x7d7   : > { %v3119_v60 = vpop.permute.xlu2 %3118  ;;  %v2636_v26 = vadd.f32 %v2634_v14, %v2628_v63  ;;  %v2649_v31 = vadd.f32 %v2644_v35, %v2635_v57 }
 0x7d9   : > { %v2650_v45 = vadd.f32 %v2646_v56, %v2636_v26 }
 0x7dc   : > { %v2658_v40 = vpop.permute.xlu1 %2657 }
 0x7dd   : > { %v2663_v47 = vadd.f32 %v2658_v40, %v2649_v31 }
 0x7de   : > { %v2660_v37 = vpop.permute.xlu0 %2659 }
 0x7df   : > { %v3133_v61 = vpop.permute.xlu2 %3132  ;;  %v7066_v42 = vadd.f32 %v2669_v21, %v2663_v47  ;;  %v2664_v22 = vadd.f32 %v2660_v37, %v2650_v45 }
 0x7e1   : > { %v7069_v51 = vadd.f32 %v2670_v2, %v2664_v22  ;;  %v2724_v22 = vstv %s4667_s4  ;;  %s7108_s4 = sld [smem:[#allocation3 + $0xa9]] }
 0x7e4   : > { %v7071_v17 = vpop.permute.xlu1 %2681 }
 0x7e6   : > { %v7073_v5 = vpop.permute.xlu0 %2693 }
 0x7e7   : > { %v2334_v23 = vpop.permute.xlu2 %2333 }
 0x7e8   : > { %2338 = vst.msk [vmem:[#allocation2 + $0x51] sm:$0xff] %vm206_vm0, %v2334_v23 }
 0x7e9   : > { %2340 = vst.msk [vmem:[#allocation2 + $0x53] sm:$0x40] %vm211_vm2, %v2334_v23 }
 0x7ec   : > { %v3085_v4 = vpop.permute.xlu1 %3084 }
 0x7ed   : > { %v3090_v56 = vadd.f32 %v3085_v4, %v6926_v58  ;;  %v3109_v58 = vmul.f32 %v3107_v43, %v6924_v48 }
 0x7ee   : > { %v3087_v18 = vpop.permute.xlu0 %3086 }
 0x7ef   : > { %v3104_v0 = vadd.f32 %v3099_v52, %v3090_v56  ;;  %v3091_v16 = vadd.f32 %v3087_v18, %v6977_v1  ;;  %v3155_v57 = vpop.permute.xlu2 %3154 }
 0x7f0   : > { %v2451_v62 = vld [vmem:[#allocation2 + $0x58] sm:$0x3] }
 0x7f1   : > { %2459 = vrot.lane.b32.xlu2 %v2451_v62, %s8051_s11  ;;  %v3110_v7 = vadd.f32 %v3108_v12, %v3104_v0  ;;  %v2746_v0 = vstv %s4669_s17  ;;  %s7123_s17 = sld [smem:[#allocation3 + $0xaa]] }
 0x7f3   : > { %v3124_v46 = vadd.f32 %v3119_v60, %v3110_v7  ;;  %v3143_v60 = vmul.f32 %v3141_v6, %v6956_v9  ;;  %v2710_v9 = vstv %s4666_s28  ;;  %s4703_s28 = sld [smem:[#allocation3 + $0xc6]]  ;;  %v2686_v7 = vadd.f32 %v7071_v17, %v7069_v51 }
 0x7f4   : > { %v3135_v31 = vpop.permute.xlu1 %3134 }
 0x7f5   : > { %v3138_v27 = vadd.f32 %v3133_v61, %v3124_v46 }
 0x7f6   : > { %v3101_v15 = vpop.permute.xlu0 %3100 }
 0x7f7   : > { %v3105_v10 = vadd.f32 %v3101_v15, %v3091_v16  ;;  %v3144_v14 = vadd.f32 %v3142_v8, %v3138_v27  ;;  %v2685_v8 = vadd.f32 %v7053_v3, %v7066_v42  ;;  %v2700_v15 = vadd.f32 %v7057_v50, %v2686_v7 }
 0x7f8   : > { %v2782_v3 = vstv %s7108_s4  ;;  %s7152_s4 = sld [smem:[#allocation3 + $0x110]]  ;;  %v3195_v7 = vstv %s7157_s1 }
 0x7f9   : > { %v3111_v63 = vadd.f32 %v3109_v58, %v3105_v10  ;;  %v2699_v51 = vadd.f32 %v7073_v5, %v2685_v8  ;;  %v2760_v58 = vstv %s7101_s29  ;;  %s7139_s29 = sld [smem:[#allocation3 + $0x10f]] }
 0x7fa   : > { %s4710_s1 = sld [smem:[#allocation3 + $0xcd]] }
 0x7fc   : > { %v3167_v45 = vpop.permute.xlu1 %3166 }
 0x7fe   : > { %v3121_v35 = vpop.permute.xlu0 %3120 }
 0x7ff   : > { %v2442_v52 = vpop.permute.xlu2 %2441  ;;  %v3125_v26 = vadd.f32 %v3121_v35, %v3111_v63  ;;  %v3175_v63 = vstv %s4703_s28  ;;  %s7148_s28 = sld [smem:[#allocation3 + $0x112]] }
 0x800   : > { %2448 = vst.msk [vmem:[#allocation2 + $0x40] sm:$0x3] %vm299_vm6, %v2442_v52 }
 0x801   : > { %v3139_v19 = vadd.f32 %v3135_v31, %v3125_v26 }
 0x803   : > { %v3145_v1 = vadd.f32 %v3143_v60, %v3139_v19 }
 0x805   : > { %v3159_v17 = vadd.f32 %v3155_v57, %v3145_v1 }
 0x806   : > { %v3153_v40 = vpop.permute.xlu0 %3152 }
 0x807   : > { %v3158_v46 = vadd.f32 %v3153_v40, %v3144_v14  ;;  %v2704_v14 = vstv %s4665_s8  ;;  %s7145_s8 = sld [smem:[#allocation3 + $0x113]] }
 0x809   : > { %v3172_v10 = vadd.f32 %v3167_v45, %v3158_v46  ;;  %v8068_v45 = vstv %s7139_s29 }
 0x80e   : > { %v2332_v21 = vpop.permute.xlu0 %2331 }
 0x80f   : > { %2337 = vst.msk [vmem:[#allocation2 + $0x49] sm:$0xff] %vm206_vm0, %v2332_v21 }
 0x810   : > { %2339 = vst.msk [vmem:[#allocation2 + $0x47] sm:$0x2] %vm209_vm1, %v2332_v21 }
 0x816   : > { %v2450_v30 = vld [vmem:[#allocation2 + $0x50] sm:$0xff]  ;;  %v3169_v47 = vpop.permute.xlu0 %3168 }
 0x817   : > { %2457 = vrot.lane.b32.xlu0 %v2450_v30, %s8051_s11  ;;  %v2449_v48 = vld [vmem:[#allocation2 + $0x48] sm:$0xff]  ;;  %v3173_v31 = vadd.f32 %v3169_v47, %v3159_v17  ;;  %v2796_v30 = vstv %s7123_s17  ;;  %s4707_s17 = sld [smem:[#allocation3 + $0xca]] }
 0x818   : > { %2455 = vrot.lane.b32.xlu1 %v2449_v48, %s8051_s11 }
 0x83e   : > { %v2440_v61 = vpop.permute.xlu0 %2439 }
 0x83f   : > { %v2438_v37 = vpop.permute.xlu1 %2437  ;;  %2447 = vst.msk [vmem:[#allocation2 + $0x38] sm:$0xff] %vm296_vm5, %v2440_v61 }
 0x840   : > { %2446 = vst.msk [vmem:[#allocation2 + $0x30] sm:$0xff] %vm296_vm5, %v2438_v37 }
 0x846   : > { %v7091_v2 = vld [vmem:[#allocation2 + $0x38] sm:$0xff] }
 0x847   : > { %v7093_v23 = vld [vmem:[#allocation2 + $0x30] sm:$0xff]  ;;  %v2712_v43 = vmul.f32 %v2710_v9, %v7091_v2  ;;  %v7106_v62 = vld [vmem:[#allocation2 + $0x39] sm:$0xff]  ;;  %v2726_v27 = vmul.f32 %v2724_v22, %v7091_v2  ;;  %v2706_v52 = vmul.f32 %v2704_v14, %v7091_v2  ;;  %v3177_v50 = vmul.f32 %v3175_v63, %v7091_v2 }
 0x848   : > { %v2725_v4 = vmul.f32 %v2724_v22, %v7093_v23  ;;  %v2711_v56 = vmul.f32 %v2710_v9, %v7093_v23  ;;  %v7104_v12 = vld [vmem:[#allocation2 + $0x31] sm:$0xff]  ;;  %v2748_v16 = vmul.f32 %v2746_v0, %v7106_v62  ;;  %v2705_v42 = vmul.f32 %v2704_v14, %v7093_v23  ;;  %v7159_v48 = vld [vmem:[#allocation2 + $0x3a] sm:$0xff] }
 0x849   : > { %2717 = vrot.lane.b32.xlu0 %v2712_v43, %s8049_s24  ;;  %v2747_v6 = vmul.f32 %v2746_v0, %v7104_v12  ;;  %v7125_v35 = vld [vmem:[#allocation2 + $0x32] sm:$0xff]  ;;  %v3176_v26 = vmul.f32 %v3175_v63, %v7093_v23  ;;  %v2762_v5 = vmul.f32 %v2760_v58, %v7106_v62  ;;  %v7135_v19 = vadd.f32 %v2706_v52, %v2700_v15 }
 0x84a   : > { %2729 = vrot.lane.b32.xlu2 %v2725_v4, %s8051_s11  ;;  %2715 = vrot.lane.b32.xlu1 %v2711_v56, %s8049_s24  ;;  %v7133_v57 = vadd.f32 %v2705_v42, %v2699_v51  ;;  %v2783_v1 = vmul.f32 %v2782_v3, %v7125_v35  ;;  %v2761_v40 = vmul.f32 %v2760_v58, %v7104_v12  ;;  %v8066_v9 = vstv %s7145_s8 }
 0x84b   : > { %v2460_v18 = vpop.permute.xlu2 %2459  ;;  %v7137_v60 = vadd.f32 %v3176_v26, %v3172_v10  ;;  %v7143_v21 = vadd.f32 %v3177_v50, %v3173_v31  ;;  %v2797_v47 = vmul.f32 %v2796_v30, %v7125_v35  ;;  %v2798_v61 = vmul.f32 %v2796_v30, %v7159_v48 }
 0x84c   : > { %2466 = vst.msk [vmem:[#allocation2 + $0x58] sm:$0x3] %vm279_vm3, %v2460_v18  ;;  %v2784_v37 = vmul.f32 %v2782_v3, %v7159_v48  ;;  %v8067_v22 = vstv %s7148_s28  ;;  %v7173_v43 = vmul.f32 %v8068_v45, %v7093_v23  ;;  %v8045_v4 = vstv %s7152_s4 }
 0x84d   : > { %v7179_v56 = vmul.f32 %v8066_v9, %v7104_v12  ;;  %v8044_v18 = vstv %s7154_s0  ;;  %v7185_v0 = vmul.f32 %v8045_v4, %v7093_v23  ;;  %v3215_v51 = vstv %s4707_s17  ;;  %s4671_s17 = sld [smem:[#allocation3 + $0xa8]] }
 0x84e   : > { %v7196_v46 = vmul.f32 %v8044_v18, %v7125_v35  ;;  %v3217_v17 = vmul.f32 %v3215_v51, %v7106_v62  ;;  %v3197_v10 = vmul.f32 %v3195_v7, %v7091_v2  ;;  %v3216_v58 = vmul.f32 %v3215_v51, %v7104_v12 }
 0x84f   : > { %v3249_v14 = vstv %s4710_s1  ;;  %v3229_v63 = vstv %s4708_s21  ;;  %s4724_s21 = sld [smem:[#allocation3 + $0xd9]] }
 0x850   : > { %8135 = vst [vmem:[#allocation19_spill] sm:$0xff] %v7196_v46  ;;  %v3250_v3 = vmul.f32 %v3249_v14, %v7125_v35  ;;  %v3230_v42 = vmul.f32 %v3229_v63, %v7104_v12  ;;  %v3231_v52 = vmul.f32 %v3229_v63, %v7106_v62  ;;  %v3251_v31 = vmul.f32 %v3249_v14, %v7159_v48  ;;  %s4706_s1 = sld [smem:[#allocation3 + $0xc9]] }
 0x851   : > { %2751 = vrot.lane.b32.xlu0 %v2747_v6, %s8049_s24  ;;  %v7191_v6 = vmul.f32 %v8067_v22, %v7106_v62  ;;  %v7416_v22 = vld [vmem:[#allocation2 + $0x18] sm:$0xff] }
 0x852   : > { %2753 = vrot.lane.b32.xlu2 %v2748_v16, %s8049_s24  ;;  %2731 = vrot.lane.b32.xlu1 %v2726_v27, %s8051_s11  ;;  %v3181_v16 = vstv %s4704_s2  ;;  %v3196_v27 = vmul.f32 %v3195_v7, %v7093_v23  ;;  %s4711_s2 = sld [smem:[#allocation3 + $0xce]] }
 0x853   : > { %v3182_v8 = vmul.f32 %v3181_v16, %v7093_v23  ;;  %v3183_v15 = vmul.f32 %v3181_v16, %v7091_v2  ;;  %v7227_v16 = vld [vmem:[#allocation2] sm:$0xff] }
 0x855   : > { %v3438_v7 = vstv %s4724_s21  ;;  %s7250_s21 = sld [smem:[#allocation3 + $0xac]] }
 0x858   : > { %v3263_v26 = vstv %s4711_s2  ;;  %s4709_s2 = sld [smem:[#allocation3 + $0xcc]] }
 0x859   : > { %2767 = vrot.lane.b32.xlu0 %v2762_v5, %s8051_s11  ;;  %v3264_v50 = vmul.f32 %v3263_v26, %v7125_v35 }
 0x85a   : > { %2787 = vrot.lane.b32.xlu2 %v2783_v1, %s8049_s24  ;;  %2765 = vrot.lane.b32.xlu1 %v2761_v40, %s8051_s11 }
 0x861   : > { %2801 = vrot.lane.b32.xlu0 %v2797_v47, %s8051_s11  ;;  %v2469_v47 = vld [vmem:[#allocation2 + $0x58] sm:$0x3] }
 0x862   : > { %2803 = vrot.lane.b32.xlu2 %v2798_v61, %s8051_s11  ;;  %2789 = vrot.lane.b32.xlu1 %v2784_v37, %s8049_s24  ;;  %v3265_v61 = vmul.f32 %v3263_v26, %v7159_v48 }
 0x869   : > { %3200 = vrot.lane.b32.xlu0 %v3196_v27, %s8051_s11  ;;  %v3439_v27 = vmul.f32 %v7227_v16, %v3438_v7 }
 0x86a   : > { %3186 = vrot.lane.b32.xlu2 %v3182_v8, %s8049_s24  ;;  %3188 = vrot.lane.b32.xlu1 %v3183_v15, %s8049_s24  ;;  %v7231_v15 = vld [vmem:[#allocation2 + $0x8] sm:$0xff] }
 0x86b   : > { %v3440_v51 = vmul.f32 %v7231_v15, %v3438_v7  ;;  %v2776_v7 = vstv %s4671_s17  ;;  %s7261_s17 = sld [smem:[#allocation3 + $0x118]] }
 0x871   : > { %3222 = vrot.lane.b32.xlu0 %v3217_v17, %s8049_s24 }
 0x872   : > { %3202 = vrot.lane.b32.xlu2 %v3197_v10, %s8051_s11  ;;  %3220 = vrot.lane.b32.xlu1 %v3216_v58, %s8049_s24 }
 0x879   : > { %3254 = vrot.lane.b32.xlu0 %v3250_v3, %s8049_s24 }
 0x87a   : > { %3234 = vrot.lane.b32.xlu2 %v3230_v42, %s8051_s11  ;;  %3236 = vrot.lane.b32.xlu1 %v3231_v52, %s8051_s11 }
 0x882   : > { %3256 = vrot.lane.b32.xlu2 %v3251_v31, %s8049_s24  ;;  %3268 = vrot.lane.b32.xlu1 %v3264_v50, %s8051_s11 }
 0x889   : > { %v2458_v5 = vpop.permute.xlu0 %2457 }
 0x88a   : > { %v2456_v1 = vpop.permute.xlu1 %2455  ;;  %2465 = vst.msk [vmem:[#allocation2 + $0x50] sm:$0xff] %vm276_vm4, %v2458_v5 }
 0x88b   : > { %2464 = vst.msk [vmem:[#allocation2 + $0x48] sm:$0xff] %vm276_vm4, %v2456_v1 }
 0x891   : > { %v2468_v40 = vld [vmem:[#allocation2 + $0x50] sm:$0xff] }
 0x892   : > { %v2467_v30 = vld [vmem:[#allocation2 + $0x48] sm:$0xff]  ;;  %2475 = vrot.lane.b32.xlu2 %v2468_v40, %s8134_s10 }
 0x893   : > { %2473 = vrot.lane.b32.xlu0 %v2467_v30, %s8134_s10 }
 0x89b   : > { %2477 = vrot.lane.b32.xlu0 %v2469_v47, %s8134_s10  ;;  %s4668_s10 = sld [smem:[#allocation3 + $0xa5]] }
 0x8a1   : > { %v2740_v63 = vstv %s4668_s10  ;;  %s7259_s10 = sld [smem:[#allocation3 + $0xab]] }
 0x8a2   : > { %v2741_v52 = vmul.f32 %v2740_v63, %v7104_v12  ;;  %v2742_v30 = vmul.f32 %v2740_v63, %v7106_v62 }
 0x8a3   : > { %3270 = vrot.lane.b32.xlu0 %v3265_v61, %s8051_s11 }
 0x8a4   : > { %v2730_v37 = vpop.permute.xlu2 %2729 }
 0x8ab   : > { %3443 = vrot.lane.b32.xlu0 %v3439_v27, %s8049_s24 }
 0x8ac   : > { %v2754_v8 = vpop.permute.xlu2 %2753 }
 0x8b3   : > { %3445 = vrot.lane.b32.xlu0 %v3440_v51, %s8049_s24 }
 0x8b4   : > { %v2788_v17 = vpop.permute.xlu2 %2787 }
 0x8bb   : > { %v2718_v10 = vpop.permute.xlu0 %2717 }
 0x8bc   : > { %v2716_v58 = vpop.permute.xlu1 %2715  ;;  %v2804_v14 = vpop.permute.xlu2 %2803  ;;  %v2722_v31 = vadd.f32 %v2718_v10, %v7135_v19 }
 0x8bd   : > { %v2721_v3 = vadd.f32 %v2716_v58, %v7133_v57 }
 0x8bf   : > { %v2735_v42 = vadd.f32 %v2730_v37, %v2721_v3  ;;  %v2778_v3 = vmul.f32 %v2776_v7, %v7159_v48 }
 0x8c1   : > { %v2743_v26 = vadd.f32 %v2741_v52, %v2735_v42  ;;  %v2777_v42 = vmul.f32 %v2776_v7, %v7125_v35 }
 0x8c3   : > { %v2752_v50 = vpop.permute.xlu0 %2751 }
 0x8c4   : > { %v3187_v5 = vpop.permute.xlu2 %3186  ;;  %v2732_v1 = vpop.permute.xlu1 %2731  ;;  %v2757_v51 = vadd.f32 %v2752_v50, %v2743_v26  ;;  %v3209_v26 = vstv %s4706_s1  ;;  %s4678_s1 = sld [smem:[#allocation3 + $0xaf]] }
 0x8c5   : > { %v3192_v40 = vadd.f32 %v3187_v5, %v7137_v60  ;;  %v2736_v47 = vadd.f32 %v2732_v1, %v2722_v31 }
 0x8c7   : > { %v2744_v61 = vadd.f32 %v2742_v30, %v2736_v47  ;;  %v3210_v47 = vmul.f32 %v3209_v26, %v7104_v12 }
 0x8c9   : > { %v2758_v27 = vadd.f32 %v2754_v8, %v2744_v61 }
 0x8cb   : > { %v2768_v57 = vpop.permute.xlu0 %2767 }
 0x8cc   : > { %v2766_v37 = vpop.permute.xlu1 %2765  ;;  %v2772_v58 = vadd.f32 %v2768_v57, %v2758_v27  ;;  %v3203_v18 = vpop.permute.xlu2 %3202 }
 0x8cd   : > { %v2771_v19 = vadd.f32 %v2766_v37, %v2757_v51 }
 0x8ce   : > { %v2780_v10 = vadd.f32 %v2778_v3, %v2772_v58 }
 0x8cf   : > { %v2779_v52 = vadd.f32 %v2777_v42, %v2771_v19 }
 0x8d1   : > { %v7242_v4 = vadd.f32 %v2788_v17, %v2779_v52  ;;  %v3211_v17 = vmul.f32 %v3209_v26, %v7106_v62 }
 0x8d3   : > { %v7244_v60 = vpop.permute.xlu0 %2801 }
 0x8d4   : > { %v2790_v63 = vpop.permute.xlu1 %2789  ;;  %v3235_v50 = vpop.permute.xlu2 %3234 }
 0x8d5   : > { %v2794_v31 = vadd.f32 %v2790_v63, %v2780_v10 }
 0x8d7   : > { %v2808_v8 = vadd.f32 %v2804_v14, %v2794_v31  ;;  %v3243_v14 = vstv %s4709_s2  ;;  %s4676_s2 = sld [smem:[#allocation3 + $0xad]] }
 0x8d8   : > { %v3244_v10 = vmul.f32 %v3243_v14, %v7125_v35  ;;  %v3245_v31 = vmul.f32 %v3243_v14, %v7159_v48 }
 0x8db   : > { %v3201_v5 = vpop.permute.xlu0 %3200 }
 0x8dc   : > { %v3189_v1 = vpop.permute.xlu1 %3188  ;;  %v3206_v30 = vadd.f32 %v3201_v5, %v3192_v40  ;;  %v3257_v37 = vpop.permute.xlu2 %3256 }
 0x8dd   : > { %v3193_v61 = vadd.f32 %v3189_v1, %v7143_v21 }
 0x8de   : > { %v3212_v7 = vadd.f32 %v3210_v47, %v3206_v30  ;;  %v2818_v30 = vstv %s7250_s21  ;;  %s7278_s21 = sld [smem:[#allocation3 + $0xb0]] }
 0x8df   : > { %v3207_v27 = vadd.f32 %v3203_v18, %v3193_v61  ;;  %v2812_v61 = vstv %s7259_s10  ;;  %s7287_s10 = sld [smem:[#allocation3 + $0xd8]] }
 0x8e1   : > { %v3213_v51 = vadd.f32 %v3211_v17, %v3207_v27  ;;  %v8056_v27 = vstv %s7261_s17 }
 0x8e3   : > { %v3223_v57 = vpop.permute.xlu0 %3222 }
 0x8e4   : > { %v3221_v58 = vpop.permute.xlu1 %3220  ;;  %v3227_v3 = vadd.f32 %v3223_v57, %v3213_v51 }
 0x8e5   : > { %v3226_v42 = vadd.f32 %v3221_v58, %v3212_v7 }
 0x8e7   : > { %v3240_v19 = vadd.f32 %v3235_v50, %v3226_v42  ;;  %v2832_v42 = vstv %s4676_s2  ;;  %s7291_s2 = sld [smem:[#allocation3 + $0xb2]] }
 0x8e9   : > { %v3246_v40 = vadd.f32 %v3244_v10, %v3240_v19 }
 0x8eb   : > { %v3255_v52 = vpop.permute.xlu0 %3254 }
 0x8ec   : > { %v3237_v21 = vpop.permute.xlu1 %3236  ;;  %v3260_v63 = vadd.f32 %v3255_v52, %v3246_v40  ;;  %v2476_v18 = vpop.permute.xlu2 %2475 }
 0x8ed   : > { %v3241_v26 = vadd.f32 %v3237_v21, %v3227_v3  ;;  %2483 = vst.msk [vmem:[#allocation2 + $0x50] sm:$0xff] %vm296_vm5, %v2476_v18  ;;  %v2868_v21 = vstv %s7278_s21  ;;  %s7305_s21 = sld [smem:[#allocation3 + $0xdc]] }
 0x8ef   : > { %v3247_v5 = vadd.f32 %v3245_v31, %v3241_v26 }
 0x8f1   : > { %v3261_v1 = vadd.f32 %v3257_v37, %v3247_v5  ;;  %v2854_v37 = vstv %s4678_s1  ;;  %s7289_s1 = sld [smem:[#allocation3 + $0xb3]] }
 0x8f4   : > { %v7255_v47 = vld [vmem:[#allocation2 + $0x50] sm:$0xff] }
 0x8f5   : > { %v2820_v50 = vmul.f32 %v2818_v30, %v7255_v47  ;;  %v2814_v7 = vmul.f32 %v2812_v61, %v7255_v47  ;;  %v7271_v57 = vmul.f32 %v8056_v27, %v7255_v47  ;;  %v2834_v5 = vmul.f32 %v2832_v42, %v7255_v47 }
 0x8f6   : > { %v3520_v27 = vstv %s7351_s15  ;;  %s4736_s15 = sld [smem:[#allocation3 + $0xe5]] }
 0x8f7   : > { %2825 = vrot.lane.b32.xlu0 %v2820_v50, %s8049_s24  ;;  %v7266_v51 = vadd.f32 %v2814_v7, %v2808_v8  ;;  %8136 = vst [vmem:[#allocation21_spill] sm:$0xff] %v7271_v57  ;;  %v8075_v50 = vstv %s7287_s10 }
 0x905   : > { %v2474_v17 = vpop.permute.xlu0 %2473 }
 0x906   : > { %2482 = vst.msk [vmem:[#allocation2 + $0x48] sm:$0xff] %vm296_vm5, %v2474_v17  ;;  %v2904_v17 = vstv %s7289_s1  ;;  %s4713_s1 = sld [smem:[#allocation3 + $0xd0]] }
 0x90d   : > { %v7274_v58 = vld [vmem:[#allocation2 + $0x48] sm:$0xff]  ;;  %v2478_v14 = vpop.permute.xlu0 %2477 }
 0x90e   : > { %v7276_v3 = vld [vmem:[#allocation2 + $0x49] sm:$0xff]  ;;  %2484 = vst.msk [vmem:[#allocation2 + $0x58] sm:$0x3] %vm299_vm6, %v2478_v14  ;;  %v2833_v19 = vmul.f32 %v2832_v42, %v7274_v58  ;;  %v2819_v10 = vmul.f32 %v2818_v30, %v7274_v58  ;;  %v3269_v30 = vpop.permute.xlu1 %3268  ;;  %v2813_v14 = vmul.f32 %v2812_v61, %v7274_v58  ;;  %v3433_v42 = vmul.f32 %v7227_v16, %v8075_v50 }
 0x90f   : > { %v2855_v8 = vmul.f32 %v2854_v37, %v7276_v3  ;;  %v7309_v7 = vld [vmem:[#allocation2 + $0x4a] sm:$0xff] }
 0x910   : > { %2837 = vrot.lane.b32.xlu2 %v2833_v19, %s8051_s11  ;;  %2823 = vrot.lane.b32.xlu1 %v2819_v10, %s8049_s24 }
 0x911   : > { %2859 = vrot.lane.b32.xlu0 %v2855_v8, %s8049_s24  ;;  %v3274_v8 = vadd.f32 %v3269_v30, %v3260_v63  ;;  %v2869_v63 = vmul.f32 %v2868_v21, %v7276_v3  ;;  %v3472_v30 = vstv %s7305_s21  ;;  %s7357_s21 = sld [smem:[#allocation3 + $0xdd]] }
 0x915   : > { %v3271_v40 = vpop.permute.xlu0 %3270  ;;  %v7293_v52 = vld [vmem:[#allocation2 + $0x51] sm:$0xff] }
 0x916   : > { %v3275_v18 = vadd.f32 %v3271_v40, %v3261_v1  ;;  %v2870_v31 = vmul.f32 %v2868_v21, %v7293_v52  ;;  %v2856_v26 = vmul.f32 %v2854_v37, %v7293_v52  ;;  %v2807_v1 = vadd.f32 %v7244_v60, %v7242_v4 }
 0x917   : > { %v2890_v37 = vstv %s7291_s2  ;;  %v3277_v4 = vstv %s7296_s14  ;;  %v2905_v40 = vmul.f32 %v2904_v17, %v7309_v7  ;;  %s7331_s2 = sld [smem:[#allocation3 + $0x119]]  ;;  %v8065_v21 = vstv %s7314_s18 }
 0x918   : > { %2861 = vrot.lane.b32.xlu2 %v2856_v26, %s8049_s24  ;;  %2839 = vrot.lane.b32.xlu1 %v2834_v5, %s8051_s11  ;;  %s7319_s24 = sld [smem:[#allocation3 + $0xda]]  ;;  %v7321_v10 = vadd.f32 %v2813_v14, %v2807_v1  ;;  %v2891_v61 = vmul.f32 %v2890_v37, %v7309_v7  ;;  %v3279_v5 = vmul.f32 %v3277_v4, %v7255_v47  ;;  %v7346_v1 = vld [vmem:[#allocation2 + $0x52] sm:$0xff] }
 0x919   : > { %2875 = vrot.lane.b32.xlu0 %v2870_v31, %s8051_s11  ;;  %v3278_v31 = vmul.f32 %v3277_v4, %v7274_v58  ;;  %s7334_s11 = sld [smem:[#allocation3 + $0x11e]] }
 0x91a   : > { %s7340_s14 = sld [smem:[#allocation3 + $0x11c]]  ;;  %v7348_v14 = vadd.f32 %v3279_v5, %v3275_v18  ;;  %v2892_v18 = vmul.f32 %v2890_v37, %v7346_v1 }
 0x91b   : > { %v7338_v26 = vadd.f32 %v3278_v31, %v3274_v8 }
 0x91d   : > { %v3444_v19 = vpop.permute.xlu0 %3443  ;;  %v8059_v31 = vstv %s7331_s2 }
 0x91e   : > { %v7324_v60 = vadd.f32 %v3444_v19, %v3433_v42  ;;  %v3452_v42 = vstv %s7319_s24  ;;  %v7354_v19 = vld [vmem:[#allocation2 + $0x9] sm:$0xff]  ;;  %v7379_v5 = vmul.f32 %v8059_v31, %v7274_v58  ;;  %s7387_s24 = sld [smem:[#allocation3 + $0xe2]] }
 0x91f   : > { %v3453_v8 = vmul.f32 %v7227_v16, %v3452_v42  ;;  %v3474_v4 = vmul.f32 %v7354_v19, %v3472_v30 }
 0x920   : > { %2895 = vrot.lane.b32.xlu2 %v2891_v61, %s8138_s12  ;;  %2873 = vrot.lane.b32.xlu1 %v2869_v63, %s8137_s23  ;;  %v8062_v61 = vstv %s7334_s11  ;;  %v8057_v16 = vstv %s7340_s14  ;;  %8140 = vst [vmem:[#allocation24_spill] sm:$0xff] %v7379_v5 }
 0x921   : > { %2909 = vrot.lane.b32.xlu0 %v2905_v40, %s8137_s23  ;;  %v7362_v40 = vmul.f32 %v8065_v21, %v7309_v7  ;;  %v7374_v63 = vmul.f32 %v8057_v16, %v7293_v52  ;;  %v7384_v37 = vmul.f32 %v8062_v61, %v7309_v7  ;;  %v7407_v21 = vld [vmem:[#allocation2 + $0xa] sm:$0xff] }
 0x922   : > { %v3522_v9 = vmul.f32 %v7407_v21, %v3520_v27 }
 0x923   : > { %8139 = vst [vmem:[#allocation22_spill] sm:$0xff] %v7374_v63 }
 0x924   : > { %8141 = vst [vmem:[#allocation20_spill] sm:$0xff] %v7384_v37  ;;  %v3540_v61 = vstv %s7387_s24  ;;  %s7422_s24 = sld [smem:[#allocation3 + $0xe6]] }
 0x925   : > { %v3542_v44 = vmul.f32 %v7404_v11, %v3540_v61 }
 0x928   : > { %3479 = vrot.lane.b32.xlu2 %v3474_v4, %s8138_s12  ;;  %2897 = vrot.lane.b32.xlu1 %v2892_v18, %s8138_s12  ;;  %v3454_v4 = vmul.f32 %v7231_v15, %v3452_v42  ;;  %v7391_v18 = vld [vmem:[#allocation2 + $0x2] sm:$0xff]  ;;  %v3473_v42 = vmul.f32 %v7394_v49, %v3472_v30 }
 0x929   : > { %3457 = vrot.lane.b32.xlu0 %v3453_v8, %s8137_s23  ;;  %v3486_v8 = vstv %s7357_s21  ;;  %v3521_v16 = vmul.f32 %v7391_v18, %v3520_v27  ;;  %s4730_s21 = sld [smem:[#allocation3 + $0xdf]]  ;;  %v7430_v27 = vld [vmem:[#allocation2 + $0x21] sm:$0xff] }
 0x92a   : > { %v3487_v31 = vmul.f32 %v7394_v49, %v3486_v8  ;;  %v3488_v30 = vmul.f32 %v7354_v19, %v3486_v8 }
 0x930   : > { %3525 = vrot.lane.b32.xlu2 %v3521_v16, %s8137_s23  ;;  %3491 = vrot.lane.b32.xlu1 %v3487_v31, %s8137_s23  ;;  %v3574_v31 = vstv %s4736_s15  ;;  %v3554_v16 = vstv %s7400_s22  ;;  %s7424_s15 = sld [smem:[#allocation3 + $0xe8]] }
 0x931   : > { %3459 = vrot.lane.b32.xlu0 %v3454_v4, %s8137_s23  ;;  %v3575_v4 = vmul.f32 %v3574_v31, %v6936_v41  ;;  %v3555_v45 = vmul.f32 %v7416_v22, %v3554_v16  ;;  %v2906_v41 = vmul.f32 %v2904_v17, %v7346_v1  ;;  %v3576_v8 = vmul.f32 %v7430_v27, %v3574_v31  ;;  %s4740_s22 = sld [smem:[#allocation3 + $0xe9]] }
 0x937   : > { %v3622_v31 = vstv %s4740_s22  ;;  %s7474_s22 = sld [smem:[#allocation3 + $0xd7]] }
 0x938   : > { %3547 = vrot.lane.b32.xlu2 %v3542_v44, %s8138_s12  ;;  %3527 = vrot.lane.b32.xlu1 %v3522_v9, %s8137_s23  ;;  %v3506_v44 = vstv %s4730_s21  ;;  %s7454_s21 = sld [smem:[#allocation3 + $0xd1]] }
 0x939   : > { %3477 = vrot.lane.b32.xlu0 %v3473_v42, %s8138_s12  ;;  %v3507_v9 = vmul.f32 %v7391_v18, %v3506_v44  ;;  %v3608_v42 = vstv %s7424_s15  ;;  %s4717_s15 = sld [smem:[#allocation3 + $0xd4]] }
 0x93a   : > { %v3609_v17 = vmul.f32 %v7440_v13, %v3608_v42 }
 0x940   : > { %3579 = vrot.lane.b32.xlu2 %v3575_v4, %s8138_s12  ;;  %3559 = vrot.lane.b32.xlu1 %v3555_v45, %s8137_s23  ;;  %v3588_v45 = vstv %s7422_s24  ;;  %s7456_s24 = sld [smem:[#allocation3 + $0xd3]] }
 0x941   : > { %3493 = vrot.lane.b32.xlu0 %v3488_v30, %s8137_s23  ;;  %v3508_v30 = vmul.f32 %v7407_v21, %v3506_v44  ;;  %v3590_v4 = vmul.f32 %v7430_v27, %v3588_v45 }
 0x948   : > { %2911 = vrot.lane.b32.xlu2 %v2906_v41, %s8137_s23  ;;  %3581 = vrot.lane.b32.xlu1 %v3576_v8, %s8138_s12  ;;  %v3623_v41 = vmul.f32 %v7440_v13, %v3622_v31  ;;  %v7448_v8 = vld [vmem:[#allocation2 + $0x22] sm:$0xff] }
 0x949   : > { %3511 = vrot.lane.b32.xlu0 %v3507_v9, %s8138_s12  ;;  %v3541_v9 = vmul.f32 %v7416_v22, %v3540_v61  ;;  %v3624_v44 = vmul.f32 %v7448_v8, %v3622_v31  ;;  %v3556_v61 = vmul.f32 %v7404_v11, %v3554_v16  ;;  %v3297_v31 = vstv %s7454_s21  ;;  %s7486_s21 = sld [smem:[#allocation3 + $0xeb]] }
 0x94a   : > { %v3299_v24 = vmul.f32 %v3297_v31, %v7255_v47 }
 0x94f   : > { %v3642_v34 = vstv %s7486_s21  ;;  %s7516_s21 = sld [smem:[#allocation3 + $0xf1]] }
 0x950   : > { %3595 = vrot.lane.b32.xlu2 %v3590_v4, %s8137_s23  ;;  %3613 = vrot.lane.b32.xlu1 %v3609_v17, %s8138_s12  ;;  %v3644_v38 = vmul.f32 %v3642_v34, %v7091_v2 }
 0x951   : > { %3513 = vrot.lane.b32.xlu0 %v3508_v30, %s8138_s12  ;;  %v3283_v30 = vstv %s4713_s1  ;;  %s7476_s1 = sld [smem:[#allocation3 + $0xd6]] }
 0x952   : > { %v3284_v4 = vmul.f32 %v3283_v30, %v7274_v58  ;;  %v3285_v17 = vmul.f32 %v3283_v30, %v7255_v47 }
 0x958   : > { %3627 = vrot.lane.b32.xlu2 %v3623_v41, %s8137_s23  ;;  %3629 = vrot.lane.b32.xlu1 %v3624_v44, %s8137_s23  ;;  %v7466_v41 = vld [vmem:[#allocation2 + $0x19] sm:$0xff] }
 0x959   : > { %3545 = vrot.lane.b32.xlu0 %v3541_v9, %s8138_s12  ;;  %v3317_v9 = vstv %s7456_s24  ;;  %v3589_v44 = vmul.f32 %v7466_v41, %v3588_v45  ;;  %v3610_v45 = vmul.f32 %v7448_v8, %v3608_v42  ;;  %s7489_s24 = sld [smem:[#allocation3 + $0xec]]  ;;  %v3351_v42 = vstv %s7476_s1 }
 0x95a   : > { %v3318_v16 = vmul.f32 %v3317_v9, %v7276_v3  ;;  %s7513_s1 = sld [smem:[#allocation3 + $0xef]] }
 0x95f   : > { %v8076_v28 = vstv %s7489_s24 }
 0x960   : > { %3288 = vrot.lane.b32.xlu2 %v3284_v4, %s8138_s12  ;;  %3290 = vrot.lane.b32.xlu1 %v3285_v17, %s8138_s12 }
 0x961   : > { %3561 = vrot.lane.b32.xlu0 %v3556_v61, %s8137_s23  ;;  %v3331_v61 = vstv %s4717_s15  ;;  %s4745_s15 = sld [smem:[#allocation3 + $0xee]] }
 0x962   : > { %v3332_v4 = vmul.f32 %v3331_v61, %v7276_v3  ;;  %v3333_v17 = vmul.f32 %v3331_v61, %v7293_v52  ;;  %v3298_v61 = vmul.f32 %v3297_v31, %v7274_v58  ;;  %v3319_v31 = vmul.f32 %v3317_v9, %v7293_v52 }
 0x967   : > { %v3676_v37 = vstv %s4745_s15  ;;  %s4680_s15 = sld [smem:[#allocation3 + $0xb1]] }
 0x968   : > { %3304 = vrot.lane.b32.xlu2 %v3299_v24, %s8137_s23  ;;  %3322 = vrot.lane.b32.xlu1 %v3318_v16, %s8138_s12  ;;  %v7484_v24 = vpop.permute.xlu0 %3445  ;;  %v3365_v16 = vstv %s7474_s22  ;;  %s7501_s22 = sld [smem:[#allocation3 + $0xae]]  ;;  %v3678_v63 = vmul.f32 %v3676_v37, %v7106_v62 }
 0x969   : > { %3593 = vrot.lane.b32.xlu0 %v3589_v44, %s8137_s23 }
 0x96a   : > { %v2838_v30 = vpop.permute.xlu2 %2837 }
 0x96e   : > { %v2848_v50 = vstv %s7501_s22  ;;  %s7529_s22 = sld [smem:[#allocation3 + $0xf2]] }
 0x96f   : > { %v2850_v57 = vmul.f32 %v2848_v50, %v7293_v52 }
 0x970   : > { %3336 = vrot.lane.b32.xlu2 %v3332_v4, %s8137_s23  ;;  %3338 = vrot.lane.b32.xlu1 %v3333_v17, %s8137_s23  ;;  %v3366_v4 = vmul.f32 %v3365_v16, %v7309_v7  ;;  %v2826_v17 = vpop.permute.xlu0 %2825 }
 0x971   : > { %3615 = vrot.lane.b32.xlu0 %v3610_v45, %s8138_s12  ;;  %v3353_v45 = vmul.f32 %v3351_v42, %v7346_v1 }
 0x972   : > { %v2862_v44 = vpop.permute.xlu2 %2861 }
 0x978   : > { %3358 = vrot.lane.b32.xlu2 %v3353_v45, %s8138_s12  ;;  %3370 = vrot.lane.b32.xlu1 %v3366_v4, %s8137_s23 }
 0x979   : > { %3302 = vrot.lane.b32.xlu0 %v3298_v61, %s8137_s23  ;;  %v3657_v61 = vmul.f32 %v8076_v28, %v7093_v23 }
 0x97a   : > { %v7498_v55 = vpop.permute.xlu2 %2895 }
 0x980   : > { %3649 = vrot.lane.b32.xlu2 %v3644_v38, %s8138_s12  ;;  %3661 = vrot.lane.b32.xlu1 %v3657_v61, %s8137_s23  ;;  %v3352_v38 = vmul.f32 %v3351_v42, %v7309_v7  ;;  %v3677_v61 = vmul.f32 %v3676_v37, %v7104_v12  ;;  %v3710_v37 = vstv %s7516_s21  ;;  %s7599_s21 = sld [smem:[#allocation3 + $0xf5]] }
 0x981   : > { %3324 = vrot.lane.b32.xlu0 %v3319_v31, %s8138_s12  ;;  %v2849_v31 = vmul.f32 %v2848_v50, %v7276_v3  ;;  %v2884_v50 = vstv %s4680_s15  ;;  %s7560_s15 = sld [smem:[#allocation3 + $0xf7]] }
 0x982   : > { %v2824_v4 = vpop.permute.xlu1 %2823  ;;  %v7518_v9 = vpop.permute.xlu2 %3479 }
 0x983   : > { %v2860_v45 = vpop.permute.xlu0 %2859  ;;  %v2829_v5 = vadd.f32 %v2824_v4, %v7321_v10  ;;  %v2830_v10 = vadd.f32 %v2826_v17, %v7266_v51  ;;  %v3690_v4 = vstv %s7513_s1  ;;  %v3711_v51 = vmul.f32 %v3710_v37, %v7125_v35  ;;  %s4726_s1 = sld [smem:[#allocation3 + $0xdb]] }
 0x985   : > { %v2843_v28 = vadd.f32 %v2838_v30, %v2829_v5 }
 0x987   : > { %v2851_v46 = vadd.f32 %v2849_v31, %v2843_v28  ;;  %v3367_v31 = vmul.f32 %v3365_v16, %v7346_v1 }
 0x988   : > { %3681 = vrot.lane.b32.xlu2 %v3677_v61, %s8138_s12  ;;  %3683 = vrot.lane.b32.xlu1 %v3678_v63, %s8138_s12 }
 0x989   : > { %3356 = vrot.lane.b32.xlu0 %v3352_v38, %s8138_s12  ;;  %v3692_v38 = vmul.f32 %v3690_v4, %v7106_v62  ;;  %v2886_v62 = vmul.f32 %v2884_v50, %v7346_v1 }
 0x98a   : > { %v2840_v30 = vpop.permute.xlu1 %2839  ;;  %v7535_v61 = vpop.permute.xlu2 %3525 }
 0x98b   : > { %v2876_v5 = vpop.permute.xlu0 %2875  ;;  %v2844_v42 = vadd.f32 %v2840_v30, %v2830_v10  ;;  %v3724_v30 = vstv %s7529_s22  ;;  %s4718_s22 = sld [smem:[#allocation3 + $0xd5]] }
 0x98d   : > { %v2852_v28 = vadd.f32 %v2850_v57, %v2844_v42  ;;  %v2865_v57 = vadd.f32 %v2860_v45, %v2851_v46  ;;  %v3643_v46 = vmul.f32 %v3642_v34, %v7093_v23  ;;  %v3725_v45 = vmul.f32 %v3724_v30, %v7125_v35 }
 0x98e   : > { %v8142_v35 = vstv %s7489_s24  ;;  %s7597_s24 = sld [smem:[#allocation3 + $0xe1]] }
 0x98f   : > { %v2866_v63 = vadd.f32 %v2862_v44, %v2852_v28  ;;  %v2885_v44 = vmul.f32 %v2884_v50, %v7309_v7 }
 0x990   : > { %3697 = vrot.lane.b32.xlu2 %v3692_v38, %s8137_s23  ;;  %3715 = vrot.lane.b32.xlu1 %v3711_v51, %s8138_s12  ;;  %v3466_v51 = vstv %s4726_s1  ;;  %s4735_s1 = sld [smem:[#allocation3 + $0xe4]] }
 0x991   : > { %3372 = vrot.lane.b32.xlu0 %v3367_v31, %s8137_s23  ;;  %v2880_v17 = vadd.f32 %v2876_v5, %v2866_v63  ;;  %v3467_v34 = vmul.f32 %v7394_v49, %v3466_v51 }
 0x992   : > { %v2874_v16 = vpop.permute.xlu1 %2873  ;;  %v7556_v5 = vpop.permute.xlu2 %3547 }
 0x993   : > { %v7543_v10 = vpop.permute.xlu0 %2909  ;;  %v2879_v42 = vadd.f32 %v2874_v16, %v2865_v57  ;;  %v2888_v28 = vadd.f32 %v2886_v62, %v2880_v17  ;;  %v3744_v57 = vstv %s7547_s3  ;;  %v3658_v17 = vmul.f32 %v8142_v35, %v7091_v2  ;;  %s4729_s3 = sld [smem:[#allocation3 + $0xde]] }
 0x994   : > { %v3746_v62 = vmul.f32 %v3744_v57, %v7255_v47  ;;  %v8143_v16 = vstv %s7287_s10  ;;  %v3778_v2 = vstv %s7560_s15  ;;  %s7577_s10 = sld [smem:[#allocation3 + $0xf8]] }
 0x995   : > { %v2887_v31 = vadd.f32 %v2885_v44, %v2879_v42  ;;  %v3434_v44 = vmul.f32 %v7231_v15, %v8143_v16  ;;  %v3691_v15 = vmul.f32 %v3690_v4, %v7104_v12  ;;  %v3779_v35 = vmul.f32 %v3778_v2, %v7276_v3 }
 0x996   : > { %v3712_v12 = vmul.f32 %v3710_v37, %v7159_v48 }
 0x998   : > { %3729 = vrot.lane.b32.xlu2 %v3725_v45, %s8137_s23 }
 0x999   : > { %3647 = vrot.lane.b32.xlu0 %v3643_v46, %s8138_s12  ;;  %v3500_v16 = vstv %s4729_s3  ;;  %s7619_s3 = sld [smem:[#allocation3 + $0xfa]] }
 0x99a   : > { %v2898_v63 = vpop.permute.xlu1 %2897  ;;  %v7573_v46 = vpop.permute.xlu2 %3579  ;;  %v3502_v37 = vmul.f32 %v7407_v21, %v3500_v16 }
 0x99b   : > { %v3458_v38 = vpop.permute.xlu0 %3457 }
 0x99c   : > { %v3463_v50 = vadd.f32 %v3458_v38, %v7324_v60  ;;  %v3450_v60 = vadd.f32 %v7484_v24, %v3434_v44  ;;  %v3468_v38 = vmul.f32 %v7354_v19, %v3466_v51 }
 0x99e   : > { %v3469_v23 = vadd.f32 %v3467_v34, %v3463_v50 }
 0x9a0   : > { %3751 = vrot.lane.b32.xlu2 %v3746_v62, %s8138_s12 }
 0x9a1   : > { %3663 = vrot.lane.b32.xlu0 %v3658_v17, %s8137_s23 }
 0x9a2   : > { %v3492_v45 = vpop.permute.xlu1 %3491  ;;  %v2912_v44 = vpop.permute.xlu2 %2911 }
 0x9a3   : > { %v3460_v42 = vpop.permute.xlu0 %3459 }
 0x9a4   : > { %v3464_v50 = vadd.f32 %v3460_v42, %v3450_v60  ;;  %v3792_v42 = vstv %s7577_s10  ;;  %s7627_s10 = sld [smem:[#allocation3 + $0xd2]] }
 0x9a5   : > { %v3794_v4 = vmul.f32 %v3792_v42, %v7293_v52 }
 0x9a6   : > { %v3470_v34 = vadd.f32 %v3468_v38, %v3464_v50  ;;  %v3501_v38 = vmul.f32 %v7391_v18, %v3500_v16 }
 0x9a8   : > { %v3484_v24 = vadd.f32 %v7518_v9, %v3470_v34  ;;  %3783 = vrot.lane.b32.xlu2 %v3779_v35, %s8138_s12  ;;  %v2901_v9 = vadd.f32 %v7498_v55, %v2887_v31  ;;  %v2902_v34 = vadd.f32 %v2898_v63, %v2888_v28  ;;  %v3745_v63 = vmul.f32 %v3744_v57, %v7274_v58 }
 0x9a9   : > { %3695 = vrot.lane.b32.xlu0 %v3691_v15, %s8137_s23 }
 0x9aa   : > { %v3528_v17 = vpop.permute.xlu1 %3527  ;;  %v7603_v55 = vadd.f32 %v7543_v10, %v2901_v9  ;;  %v3758_v10 = vstv %s7599_s21 }
 0x9ab   : > { %v3478_v51 = vpop.permute.xlu0 %3477  ;;  %v3760_v9 = vmul.f32 %v3758_v10, %v7255_v47 }
 0x9ac   : > { %v3483_v62 = vadd.f32 %v3478_v51, %v3469_v23  ;;  %v7595_v23 = vadd.f32 %v2912_v44, %v2902_v34  ;;  %v3596_v51 = vpop.permute.xlu2 %3595 }
 0x9ae   : > { %v3497_v60 = vadd.f32 %v3492_v45, %v3483_v62  ;;  %v2918_v31 = vsel %vm841_vm7, %v7595_v23, 0.0  ;;  %v2917_v62 = vsel %vm841_vm7, %v7603_v55, 0.0 }
 0x9b0   : > { %v3503_v50 = vadd.f32 %v3501_v38, %v3497_v60  ;;  %3799 = vrot.lane.b32.xlu2 %v3794_v4, %s8137_s23  ;;  %v3534_v60 = vstv %s7597_s24  ;;  %s4738_s24 = sld [smem:[#allocation3 + $0xe7]] }
 0x9b1   : > { %3717 = vrot.lane.b32.xlu0 %v3712_v12, %s8138_s12  ;;  %v3535_v4 = vmul.f32 %v7416_v22, %v3534_v60 }
 0x9b2   : > { %v3560_v45 = vpop.permute.xlu1 %3559 }
 0x9b3   : > { %v3494_v15 = vpop.permute.xlu0 %3493 }
 0x9b4   : > { %v3498_v35 = vadd.f32 %v3494_v15, %v3484_v24  ;;  %v2919_v24 = vadd.f32 %v2918_v31, %v2917_v62  ;;  %v7617_v34 = vpop.permute.xlu2 %3627 }
 0x9b6   : > { %v3504_v28 = vadd.f32 %v3502_v37, %v3498_v35 }
 0x9b9   : > { %3749 = vrot.lane.b32.xlu0 %v3745_v63, %s8138_s12 }
 0x9ba   : > { %v3582_v38 = vpop.permute.xlu1 %3581  ;;  %2920 = vadd.xlane.f32.xlu1 %v2919_v24  ;;  %v3568_v24 = vstv %s4735_s1  ;;  %s4792_s1 = sld [smem:[#allocation3 + $0x11b]] }
 0x9bb   : > { %v3512_v44 = vpop.permute.xlu0 %3511 }
 0x9bc   : > { %v3517_v16 = vadd.f32 %v3512_v44, %v3503_v50  ;;  %v3536_v50 = vmul.f32 %v7404_v11, %v3534_v60  ;;  %v3289_v44 = vpop.permute.xlu2 %3288 }
 0x9be   : > { %v3531_v12 = vadd.f32 %v7535_v61, %v3517_v16  ;;  %v3793_v61 = vmul.f32 %v3792_v42, %v7276_v3 }
 0x9c0   : > { %v3537_v57 = vadd.f32 %v3535_v4, %v3531_v12  ;;  %v3569_v4 = vmul.f32 %v7466_v41, %v3568_v24 }
 0x9c1   : > { %3765 = vrot.lane.b32.xlu0 %v3760_v9, %s8137_s23 }
 0x9c2   : > { %v3614_v35 = vpop.permute.xlu1 %3613 }
 0x9c3   : > { %v3514_v15 = vpop.permute.xlu0 %3513 }
 0x9c4   : > { %v3518_v37 = vadd.f32 %v3514_v15, %v3504_v28  ;;  %v3570_v15 = vmul.f32 %v7430_v27, %v3568_v24 }
 0x9c6   : > { %v3532_v31 = vadd.f32 %v3528_v17, %v3518_v37  ;;  %v3812_v17 = vstv %s7619_s3  ;;  %s4796_s3 = sld [smem:[#allocation3 + $0x11f]] }
 0x9c7   : > { %v3814_v42 = vmul.f32 %v3812_v17, %v7346_v1 }
 0x9c8   : > { %v3538_v22 = vadd.f32 %v3536_v50, %v3532_v31  ;;  %v3305_v50 = vpop.permute.xlu2 %3304 }
 0x9c9   : > { %3797 = vrot.lane.b32.xlu0 %v3793_v61, %s8137_s23 }
 0x9ca   : > { %v3552_v63 = vadd.f32 %v7556_v5, %v3538_v22  ;;  %v3630_v16 = vpop.permute.xlu1 %3629  ;;  %v3311_v22 = vstv %s7627_s10  ;;  %s4770_s10 = sld [smem:[#allocation3 + $0x105]] }
 0x9cb   : > { %v3546_v62 = vpop.permute.xlu0 %3545 }
 0x9cc   : > { %v3551_v12 = vadd.f32 %v3546_v62, %v3537_v57  ;;  %v3726_v57 = vmul.f32 %v3724_v30, %v7159_v48 }
 0x9ce   : > { %v3565_v28 = vadd.f32 %v3560_v45, %v3551_v12  ;;  %v8144_v12 = vstv %s6753_s6  ;;  %s4741_s6 = sld [smem:[#allocation3 + $0xea]] }
 0x9d0   : > { %v3571_v60 = vadd.f32 %v3569_v4, %v3565_v28  ;;  %v3602_v28 = vstv %s4738_s24  ;;  %v3313_v4 = vmul.f32 %v3311_v22, %v7293_v52  ;;  %s4773_s24 = sld [smem:[#allocation3 + $0x108]] }
 0x9d1   : > { %3819 = vrot.lane.b32.xlu0 %v3814_v42, %s8138_s12  ;;  %v3759_v42 = vmul.f32 %v3758_v10, %v7274_v58 }
 0x9d2   : > { %v3585_v5 = vadd.f32 %v7573_v46, %v3571_v60  ;;  %v3291_v45 = vpop.permute.xlu1 %3290  ;;  %v3935_v46 = vmul.f32 %v7354_v19, %v8144_v12  ;;  %v3603_v60 = vmul.f32 %v7440_v13, %v3602_v28 }
 0x9d3   : > { %v3562_v9 = vpop.permute.xlu0 %3561  ;;  %v3295_v31 = vadd.f32 %v3291_v45, %v7348_v14  ;;  %3731 = vrot.lane.b32.xlu1 %v3726_v57, %s8137_s23  ;;  %v3604_v14 = vmul.f32 %v7448_v8, %v3602_v28  ;;  %v3813_v28 = vmul.f32 %v3812_v17, %v7309_v7  ;;  %v7671_v17 = vld [vmem:[#allocation2 + $0x38] sm:$0xff] }
 0x9d4   : > { %v3566_v37 = vadd.f32 %v3562_v9, %v3552_v63 }
 0x9d5   : > { %v3309_v62 = vadd.f32 %v3305_v50, %v3295_v31  ;;  %v3780_v31 = vmul.f32 %v3778_v2, %v7293_v52 }
 0x9d6   : > { %v3572_v61 = vadd.f32 %v3570_v15, %v3566_v37  ;;  %v8145_v15 = vstv %s6755_s30  ;;  %s4744_s30 = sld [smem:[#allocation3 + $0xed]] }
 0x9d7   : > { %v3315_v30 = vadd.f32 %v3313_v4, %v3309_v62  ;;  %v3636_v62 = vstv %s4741_s6  ;;  %v7663_v4 = vld [vmem:[#allocation2 + $0x30] sm:$0xff]  ;;  %s4782_s6 = sld [smem:[#allocation3 + $0x111]] }
 0x9d8   : > { %v3586_v48 = vadd.f32 %v3582_v38, %v3572_v61  ;;  %v3982_v38 = vmul.f32 %v7391_v18, %v8145_v15 }
 0x9d9   : > { %3940 = vrot.lane.b32.xlu0 %v3935_v46, %s8138_s12 }
 0x9da   : > { %v3600_v63 = vadd.f32 %v3596_v51, %v3586_v48  ;;  %v3323_v12 = vpop.permute.xlu1 %3322  ;;  %v3312_v48 = vmul.f32 %v3311_v22, %v7276_v3 }
 0x9db   : > { %v3594_v24 = vpop.permute.xlu0 %3593  ;;  %3763 = vrot.lane.b32.xlu1 %v3759_v42, %s8137_s23  ;;  %v3337_v42 = vpop.permute.xlu2 %3336 }
 0x9dc   : > { %v3599_v9 = vadd.f32 %v3594_v24, %v3585_v5  ;;  %v3606_v57 = vadd.f32 %v3604_v14, %v3600_v63  ;;  %v8146_v5 = vstv %s6886_s5  ;;  %s4747_s5 = sld [smem:[#allocation3 + $0xf0]] }
 0x9dd   : > { %v4003_v61 = vmul.f32 %v7404_v11, %v8146_v5 }
 0x9de   : > { %v3605_v45 = vadd.f32 %v3603_v60, %v3599_v9  ;;  %v8147_v60 = vstv %s6959_s27  ;;  %s7711_s27 = sld [smem:[#allocation3 + $0xf3]] }
 0x9e0   : > { %v3619_v37 = vadd.f32 %v3614_v35, %v3605_v45  ;;  %v3294_v35 = vadd.f32 %v3289_v44, %v7338_v26  ;;  %v4036_v26 = vmul.f32 %v7466_v41, %v8147_v60  ;;  %v3345_v44 = vstv %s4718_s22  ;;  %s4785_s22 = sld [smem:[#allocation3 + $0x114]] }
 0x9e1   : > { %3986 = vrot.lane.b32.xlu0 %v3982_v38, %s8137_s23  ;;  %v3346_v45 = vmul.f32 %v3345_v44, %v7309_v7  ;;  %v3347_v41 = vmul.f32 %v3345_v44, %v7346_v1 }
 0x9e2   : > { %v3633_v2 = vadd.f32 %v7617_v34, %v3619_v37  ;;  %v3638_v34 = vmul.f32 %v7671_v17, %v3636_v62 }
 0x9e3   : > { %v3616_v51 = vpop.permute.xlu0 %3615  ;;  %3785 = vrot.lane.b32.xlu1 %v3780_v31, %s8138_s12 }
 0x9e4   : > { %v3620_v50 = vadd.f32 %v3616_v51, %v3606_v57  ;;  %v3339_v51 = vpop.permute.xlu1 %3338 }
 0x9e6   : > { %v3634_v10 = vadd.f32 %v3630_v16, %v3620_v50  ;;  %v3637_v16 = vmul.f32 %v7663_v4, %v3636_v62  ;;  %v8148_v50 = vstv %s6964_s25  ;;  %v3359_v62 = vpop.permute.xlu2 %3358  ;;  %s4762_s25 = sld [smem:[#allocation3 + $0xfd]] }
 0x9e7   : > { %v4051_v5 = vmul.f32 %v7430_v27, %v8148_v50 }
 0x9e8   : > { %v3639_v14 = vadd.f32 %v3637_v16, %v3633_v2  ;;  %v3640_v22 = vadd.f32 %v3638_v34, %v3634_v10  ;;  %v8149_v10 = vstv %s6968_s19  ;;  %v8150_v2 = vstv %s7139_s29  ;;  %v7691_v34 = vld [vmem:[#allocation2 + $0x31] sm:$0xff]  ;;  %s4753_s19 = sld [smem:[#allocation3 + $0xf6]] }
 0x9e9   : > { %4008 = vrot.lane.b32.xlu0 %v4003_v61, %s8138_s12  ;;  %v4105_v16 = vmul.f32 %v7671_v17, %v8150_v2  ;;  %s4756_s29 = sld [smem:[#allocation3 + $0xf9]] }
 0x9eb   : > { %v3303_v46 = vpop.permute.xlu0 %3302  ;;  %3817 = vrot.lane.b32.xlu1 %v3813_v28, %s8138_s12 }
 0x9ec   : > { %v3308_v63 = vadd.f32 %v3303_v46, %v3294_v35  ;;  %v3371_v46 = vpop.permute.xlu1 %3370 }
 0x9ee   : > { %v3314_v24 = vadd.f32 %v3312_v48, %v3308_v63  ;;  %v3670_v63 = vstv %s4744_s30  ;;  %s4788_s30 = sld [smem:[#allocation3 + $0x117]] }
 0x9f0   : > { %v3328_v9 = vadd.f32 %v3323_v12, %v3314_v24  ;;  %v4084_v12 = vmul.f32 %v7440_v13, %v8149_v10 }
 0x9f1   : > { %4040 = vrot.lane.b32.xlu0 %v4036_v26, %s8138_s12 }
 0x9f2   : > { %v3342_v57 = vadd.f32 %v3337_v42, %v3328_v9  ;;  %v3671_v9 = vmul.f32 %v7691_v34, %v3670_v63 }
 0x9f3   : > { %v3325_v15 = vpop.permute.xlu0 %3324 }
 0x9f4   : > { %v3329_v38 = vadd.f32 %v3325_v15, %v3315_v30  ;;  %v3348_v37 = vadd.f32 %v3346_v45, %v3342_v57  ;;  %v3650_v30 = vpop.permute.xlu2 %3649  ;;  %v3662_v27 = vpop.permute.xlu1 %3661  ;;  %v8151_v57 = vstv %s7148_s28 }
 0x9f5   : > { %v4138_v45 = vmul.f32 %v7691_v34, %v8151_v57 }
 0x9f6   : > { %v3343_v31 = vadd.f32 %v3339_v51, %v3329_v38 }
 0x9f8   : > { %v3349_v61 = vadd.f32 %v3347_v41, %v3343_v31  ;;  %v7704_v41 = vld [vmem:[#allocation2 + $0x39] sm:$0xff] }
 0x9f9   : > { %4056 = vrot.lane.b32.xlu0 %v4051_v5, %s8137_s23  ;;  %v3672_v50 = vmul.f32 %v7704_v41, %v3670_v63  ;;  %v7716_v63 = vld [vmem:[#allocation2 + $0x32] sm:$0xff] }
 0x9fa   : > { %v3363_v42 = vadd.f32 %v3359_v62, %v3349_v61 }
 0x9fb   : > { %v3357_v35 = vpop.permute.xlu0 %3356 }
 0x9fc   : > { %v3362_v24 = vadd.f32 %v3357_v35, %v3348_v37  ;;  %v3682_v26 = vpop.permute.xlu2 %3681  ;;  %v3654_v37 = vadd.f32 %v3650_v30, %v3640_v22  ;;  %v3684_v61 = vpop.permute.xlu1 %3683 }
 0x9fe   : > { %v7697_v15 = vadd.f32 %v3371_v46, %v3362_v24 }
 0xa00   : > { %v3378_v31 = vsel %vm841_vm7, %v7697_v15, 0.0 }
 0xa01   : > { %4088 = vrot.lane.b32.xlu0 %v4084_v12, %s8137_s23  ;;  %v8152_v12 = vstv %s7145_s8  ;;  %s4768_s8 = sld [smem:[#allocation3 + $0x103]] }
 0xa02   : > { %v4153_v46 = vmul.f32 %v7704_v41, %v8152_v12 }
 0xa03   : > { %v3373_v28 = vpop.permute.xlu0 %3372 }
 0xa04   : > { %v7689_v13 = vadd.f32 %v3373_v28, %v3363_v42  ;;  %v3698_v10 = vpop.permute.xlu2 %3697  ;;  %v3704_v28 = vstv %s4747_s5  ;;  %s4791_s5 = sld [smem:[#allocation3 + $0x11a]] }
 0xa05   : > { %v3705_v24 = vmul.f32 %v7716_v63, %v3704_v28 }
 0xa09   : > { %4110 = vrot.lane.b32.xlu0 %v4105_v16, %s8138_s12  ;;  %v7713_v16 = vld [vmem:[#allocation2 + $0x3a] sm:$0xff] }
 0xa0b   : > { %v3648_v48 = vpop.permute.xlu0 %3647 }
 0xa0c   : > { %v3653_v60 = vadd.f32 %v3648_v48, %v3639_v14  ;;  %v3379_v14 = vsel %vm841_vm7, %v7689_v13, 0.0 }
 0xa0d   : > { %v3380_v62 = vadd.f32 %v3379_v14, %v3378_v31  ;;  %v3738_v14 = vstv %s7711_s27  ;;  %s4794_s27 = sld [smem:[#allocation3 + $0x11d]] }
 0xa0e   : > { %v3667_v44 = vadd.f32 %v3662_v27, %v3653_v60  ;;  %v3706_v27 = vmul.f32 %v7713_v16, %v3704_v28 }
 0xa10   : > { %v3673_v38 = vadd.f32 %v3671_v9, %v3667_v44  ;;  %v3716_v9 = vpop.permute.xlu1 %3715 }
 0xa11   : > { %4142 = vrot.lane.b32.xlu0 %v4138_v45, %s8138_s12  ;;  %v3730_v45 = vpop.permute.xlu2 %3729 }
 0xa12   : > { %v3687_v22 = vadd.f32 %v3682_v26, %v3673_v38  ;;  %v3739_v26 = vmul.f32 %v3738_v14, %v7274_v58 }
 0xa13   : > { %v3664_v51 = vpop.permute.xlu0 %3663 }
 0xa14   : > { %v3668_v5 = vadd.f32 %v3664_v51, %v3654_v37  ;;  %v8153_v51 = vstv %s7314_s18  ;;  %s4763_s18 = sld [smem:[#allocation3 + $0xfe]] }
 0xa15   : > { %3381 = vadd.xlane.f32.xlu1 %v3380_v62  ;;  %v3828_v31 = vmul.f32 %v8153_v51, %v7346_v1 }
 0xa16   : > { %v3674_v35 = vadd.f32 %v3672_v50, %v3668_v5 }
 0xa18   : > { %v3688_v2 = vadd.f32 %v3684_v61, %v3674_v35  ;;  %v3899_v35 = vstv %s4762_s25 }
 0xa19   : > { %4158 = vrot.lane.b32.xlu0 %v4153_v46, %s8137_s23 }
 0xa1a   : > { %v3702_v30 = vadd.f32 %v3698_v10, %v3688_v2  ;;  %v7725_v10 = vld [vmem:[#allocation2] sm:$0xff] }
 0xa1b   : > { %v3696_v48 = vpop.permute.xlu0 %3695  ;;  %v3900_v12 = vmul.f32 %v7725_v10, %v3899_v35 }
 0xa1c   : > { %v3701_v42 = vadd.f32 %v3696_v48, %v3687_v22  ;;  %v3708_v60 = vadd.f32 %v3706_v27, %v3702_v30  ;;  %v7729_v22 = vld [vmem:[#allocation2 + $0x8] sm:$0xff]  ;;  %v3913_v48 = vstv %s4763_s18 }
 0xa1d   : > { %v3901_v30 = vmul.f32 %v7729_v22, %v3899_v35 }
 0xa1e   : > { %v3707_v44 = vadd.f32 %v3705_v24, %v3701_v42  ;;  %v3914_v42 = vmul.f32 %v7725_v10, %v3913_v48 }
 0xa20   : > { %v3721_v57 = vadd.f32 %v3716_v9, %v3707_v44  ;;  %v3740_v9 = vmul.f32 %v3738_v14, %v7255_v47 }
 0xa22   : > { %v3735_v37 = vadd.f32 %v3730_v45, %v3721_v57  ;;  %v3752_v45 = vpop.permute.xlu2 %3751 }
 0xa23   : > { %v3718_v28 = vpop.permute.xlu0 %3717 }
 0xa24   : > { %v3741_v38 = vadd.f32 %v3739_v26, %v3735_v37  ;;  %v3722_v24 = vadd.f32 %v3718_v28, %v3708_v60  ;;  %v3806_v28 = vstv %s4756_s29  ;;  %s4722_s29 = sld [smem:[#allocation6 + $0x181]] }
 0xa2b   : > { %v3750_v27 = vpop.permute.xlu0 %3749 }
 0xa2d   : > { %v2921_v50 = vpop.xlane.xlu1 %2920 }
 0xa2e   : > { %v2922_v5 = vrot.slane %v2921_v50, 4  ;;  %3833 = vrot.lane.b32.xlu1 %v3828_v31, %s8137_s23  ;;  %v3772_v31 = vstv %s4753_s19  ;;  %s4721_s19 = sld [smem:[#allocation6 + $0x101]] }
 0xa2f   : > { %v3773_v35 = vmul.f32 %v3772_v31, %v7276_v3  ;;  %v8154_v3 = vstv %s6763_s26  ;;  %s4761_s26 = sld [smem:[#allocation3 + $0xfc]] }
 0xa30   : > { %v2923_v61 = vadd.f32 %v2922_v5, %v2921_v50  ;;  %v3755_v50 = vadd.f32 %v3750_v27, %v3741_v38  ;;  %v3915_v5 = vmul.f32 %v7729_v22, %v3913_v48  ;;  %v3807_v38 = vmul.f32 %v3806_v28, %v7309_v7 }
 0xa31   : > { %v3949_v48 = vmul.f32 %v7354_v19, %v8154_v3 }
 0xa32   : > { %v2924_v62 = vrot.slane %v2923_v61, 2 }
 0xa33   : > { %v3766_v26 = vpop.permute.xlu0 %3765 }
 0xa34   : > { %v2925_v46 = vadd.f32 %v2924_v62, %v2923_v61  ;;  %v3774_v61 = vmul.f32 %v3772_v31, %v7293_v52 }
 0xa36   : > { %3904 = vrot.lane.b32.xlu1 %v3900_v12, %s8138_s12  ;;  %v2926_v58 = vrot.slane %v2925_v46, 1 }
 0xa38   : > { %v2927_v2 = vadd.f32 %v2926_v58, %v2925_v46  ;;  %v3784_v46 = vpop.permute.xlu2 %3783 }
 0xa3a   : > { %4834 = vpush %v2927_v2 }
 0xa3b   : > { %v3798_v2 = vpop.permute.xlu0 %3797 }
 0xa3e   : > { %3906 = vrot.lane.b32.xlu1 %v3901_v30, %s8138_s12 }
 0xa45   : > { %v3732_v44 = vpop.permute.xlu1 %3731 }
 0xa46   : > { %v3736_v57 = vadd.f32 %v3732_v44, %v3722_v24  ;;  %3918 = vrot.lane.b32.xlu1 %v3914_v42, %s8137_s23  ;;  %v3800_v42 = vpop.permute.xlu2 %3799 }
 0xa48   : > { %v3742_v37 = vadd.f32 %v3740_v9, %v3736_v57  ;;  %v3967_v9 = vstv %s4768_s8  ;;  %v3808_v57 = vmul.f32 %v3806_v28, %v7346_v1 }
 0xa49   : > { %v3968_v7 = vmul.f32 %v7391_v18, %v3967_v9 }
 0xa4a   : > { %v3756_v51 = vadd.f32 %v3752_v45, %v3742_v37  ;;  %v3969_v37 = vmul.f32 %v7407_v21, %v3967_v9 }
 0xa4c   : > { %v3770_v60 = vadd.f32 %v3766_v26, %v3756_v51 }
 0xa4d   : > { %v3764_v62 = vpop.permute.xlu1 %3763 }
 0xa4e   : > { %v3769_v47 = vadd.f32 %v3764_v62, %v3755_v50  ;;  %3920 = vrot.lane.b32.xlu1 %v3915_v5, %s8137_s23  ;;  %v3776_v14 = vadd.f32 %v3774_v61, %v3770_v60  ;;  %v8156_v60 = vstv %s6975_s20 }
 0xa4f   : > { %v4071_v62 = vmul.f32 %v7448_v8, %v8156_v60  ;;  %v3893_v8 = vstv %s4761_s26  ;;  %s4759_s26 = sld [smem:[#allocation6 + $0x102]] }
 0xa50   : > { %v3775_v12 = vadd.f32 %v3773_v35, %v3769_v47  ;;  %v3895_v28 = vmul.f32 %v7729_v22, %v3893_v8  ;;  %v7806_v22 = vld [vmem:[#allocation2 + $0x50] sm:$0xff] }
 0xa52   : > { %v3789_v58 = vadd.f32 %v3784_v46, %v3775_v12  ;;  %v8158_v46 = vstv %s7154_s0  ;;  %s7819_s0 = sld [smem:[#allocation3 + $0x102]] }
 0xa54   : > { %v3803_v30 = vadd.f32 %v3798_v2, %v3789_v58 }
 0xa55   : > { %v3786_v27 = vpop.permute.xlu1 %3785 }
 0xa56   : > { %3938 = vrot.lane.b32.xlu1 %v6775_v25, %s8138_s12  ;;  %v7743_v52 = vadd.f32 %v3807_v38, %v3803_v30  ;;  %v3790_v24 = vadd.f32 %v3786_v27, %v3776_v14  ;;  %v7797_v38 = vld [vmem:[#allocation2 + $0x48] sm:$0xff]  ;;  %v8159_v30 = vstv %s7261_s17  ;;  %s4684_s17 = sld [smem:[#allocation6 + $0x180]] }
 0xa58   : > { %v3804_v44 = vadd.f32 %v3800_v42, %v3790_v24  ;;  %v8160_v42 = vstv %s7331_s2  ;;  %s7871_s2 = sld [smem:[#allocation3 + $0x116]] }
 0xa5a   : > { %v7751_v45 = vadd.f32 %v3808_v57, %v3804_v44  ;;  %v4221_v44 = vmul.f32 %v7806_v22, %v8160_v42 }
 0xa5d   : > { %v3818_v35 = vpop.permute.xlu1 %3817 }
 0xa5e   : > { %3954 = vrot.lane.b32.xlu1 %v3949_v48, %s8137_s23 }
 0xa66   : > { %3972 = vrot.lane.b32.xlu1 %v3968_v7, %s8138_s12 }
 0xa6b   : > { %s4835_s28 = spop %4834 }
 0xa6c   : > { %v2929_v25 = vstv %s4835_s28 }
 0xa6d   : > { %v2930_v26 = vmul.f32 %v2929_v25, %v6348_v29 }
 0xa6e   : > { %3974 = vrot.lane.b32.xlu1 %v3969_v37, %s8138_s12  ;;  %v3820_v37 = vpop.permute.xlu0 %3819 }
 0xa6f   : > { %v7758_v51 = vsub.f32 %v7603_v55, %v2930_v26  ;;  %v7761_v1 = vsub.f32 %v7595_v23, %v2930_v26  ;;  %v8155_v55 = vstv %s6890_s7  ;;  %s4764_s7 = sld [smem:[#allocation3 + $0xff]]  ;;  %v7813_v26 = vld [vmem:[#allocation2 + $0x49] sm:$0xff] }
 0xa70   : > { %v4017_v23 = vmul.f32 %v7404_v11, %v8155_v55  ;;  %v8157_v11 = vstv %s7152_s4  ;;  %v3961_v55 = vstv %s7819_s0  ;;  %s4683_s4 = sld [smem:[#allocation6 + $0x100]] }
 0xa71   : > { %v2933_v18 = vmul.f32 %v7758_v51, %v7758_v51  ;;  %v2934_v31 = vmul.f32 %v7761_v1, %v7761_v1  ;;  %v4119_v47 = vmul.f32 %v7671_v17, %v8157_v11  ;;  %v3963_v11 = vmul.f32 %v7407_v21, %v3961_v55 }
 0xa73   : > { %v2935_v50 = vsel %vm841_vm7, %v2933_v18, 0.0  ;;  %v2936_v5 = vsel %vm841_vm7, %v2934_v31, 0.0  ;;  %v8161_v18 = vstv %s7340_s14  ;;  %s188_s14 = sand.u32 1, %s5108_s13  }
 0xa74   : > { %v2937_v61 = vadd.f32 %v2936_v5, %v2935_v50  ;;  %v7823_v50 = vld [vmem:[#allocation2 + $0x52] sm:$0xff]  ;;  %v8162_v5 = vstv %s7334_s11  ;;  %s4488_s15 = sshll.u32 %s188_s14, 6 }
 0xa75   : > { %v3927_v27 = vstv %s4764_s7  ;;  %s7884_s21 = scalar_lea.vmem [#allocation8], %s4488_s15  ;;  %s4760_s7 = sld [smem:[#allocation6 + $0x182]] }
 0xa76   : > { %2938 = vadd.xlane.f32.xlu2 %v2937_v61  ;;  %4006 = vrot.lane.b32.xlu1 %v6909_v39, %s8138_s12  ;;  %v3928_v48 = vmul.f32 %v7394_v49, %v3927_v27  ;;  %v3929_v57 = vmul.f32 %v7354_v19, %v3927_v27  ;;  %v4254_v49 = vmul.f32 %v7813_v26, %v8161_v18  ;;  %v3941_v61 = vpop.permute.xlu0 %3940  ;;  %s8168_s15 = sld [smem:[#allocation35_spill]] }
 0xa77   : > { %v4275_v19 = vmul.f32 %v7823_v50, %v8162_v5 }
 0xa7e   : > { %4022 = vrot.lane.b32.xlu1 %v4017_v23, %s8137_s23 }
 0xa86   : > { %4054 = vrot.lane.b32.xlu1 %v6994_v32, %s8137_s23 }
 0xa88   : > { %v3382_v39 = vpop.xlane.xlu1 %3381 }
 0xa8e   : > { %3831 = vrot.lane.b32.xlu2 %v7362_v40, %s8137_s23  ;;  %4076 = vrot.lane.b32.xlu1 %v4071_v62, %s8138_s12  ;;  %v3894_v40 = vmul.f32 %v7725_v10, %v3893_v8  ;;  %v3383_v8 = vrot.slane %v3382_v39, 4 }
 0xa96   : > { %4108 = vrot.lane.b32.xlu1 %v7173_v43, %s8138_s12  ;;  %v4173_v43 = vmul.f32 %v7713_v16, %v8158_v46 }
 0xa9e   : > { %4124 = vrot.lane.b32.xlu1 %v4119_v47, %s8137_s23 }
 0xaa0   : > { %v3834_v32 = vpop.permute.xlu1 %3833 }
 0xaa6   : > { %4156 = vrot.lane.b32.xlu1 %v7179_v56, %s8137_s23  ;;  %v4206_v56 = vmul.f32 %v7797_v38, %v8159_v30  ;;  %v3823_v30 = vadd.f32 %v3818_v35, %v7743_v52 }
 0xaa8   : > { %v3905_v14 = vpop.permute.xlu1 %3904 }
 0xaa9   : > { %v3910_v12 = vadd.f32 %v3905_v14, %v3894_v40  ;;  %v3384_v40 = vadd.f32 %v3383_v8, %v3382_v39 }
 0xaab   : > { %v3385_v14 = vrot.slane %v3384_v40, 2 }
 0xaae   : > { %4178 = vrot.lane.b32.xlu1 %v4173_v43, %s8138_s12 }
 0xab0   : > { %v3907_v58 = vpop.permute.xlu1 %3906 }
 0xab1   : > { %v3911_v2 = vadd.f32 %v3907_v58, %v3895_v28  ;;  %v3386_v28 = vadd.f32 %v3385_v14, %v3384_v40  ;;  %v3824_v58 = vadd.f32 %v3820_v37, %v7751_v45  ;;  %v4353_v40 = vld [vmem:[%s5217_s9] sm:$0xff]  ;;  %v4354_v14 = vld [vmem:[%s5217_s9 + $0x8] sm:$0xff] }
 0xab6   : > { %4210 = vrot.lane.b32.xlu1 %v4206_v56, %s8138_s12  ;;  %v7837_v56 = vadd.f32 %v3834_v32, %v3824_v58 }
 0xab8   : > { %v3919_v10 = vpop.permute.xlu1 %3918  ;;  %v3840_v39 = vsel %vm841_vm7, %v7837_v56, 0.0 }
 0xab9   : > { %v3924_v3 = vadd.f32 %v3919_v10, %v3910_v12 }
 0xabb   : > { %v7804_v24 = vadd.f32 %v3928_v48, %v3924_v3  ;;  %v3387_v3 = vrot.slane %v3386_v28, 1 }
 0xabd   : > { %v3388_v45 = vadd.f32 %v3387_v3, %v3386_v28 }
 0xabe   : > { %4226 = vrot.lane.b32.xlu1 %v4221_v44, %s8137_s23 }
 0xac0   : > { %v3921_v9 = vpop.permute.xlu1 %3920 }
 0xac1   : > { %v3925_v7 = vadd.f32 %v3921_v9, %v3911_v2 }
 0xac3   : > { %v3931_v25 = vadd.f32 %v3929_v57, %v3925_v7 }
 0xac5   : > { %v3945_v23 = vadd.f32 %v3941_v61, %v3931_v25 }
 0xac6   : > { %4258 = vrot.lane.b32.xlu1 %v4254_v49, %s8137_s23 }
 0xac8   : > { %v7821_v31 = vpop.permute.xlu1 %3938 }
 0xace   : > { %4280 = vrot.lane.b32.xlu1 %v4275_v19, %s8138_s12 }
 0xad0   : > { %v3955_v60 = vpop.permute.xlu1 %3954 }
 0xad1   : > { %v3959_v62 = vadd.f32 %v3955_v60, %v3945_v23  ;;  %v2963_v23 = vstv %s4683_s4  ;;  %s4817_s4 = sshll.u32 %s5168_s16, 6 }
 0xad3   : > { %v7833_v47 = vadd.f32 %v3963_v11, %v3959_v62  ;;  %v2967_v62 = vstv %s4684_s17 }
 0xae9   : > { %v2939_v12 = vpop.xlane.xlu2 %2938 }
 0xaea   : > { %v2940_v46 = vrot.slane %v2939_v12, 4 }
 0xaec   : > { %v2941_v43 = vadd.f32 %v2940_v46, %v2939_v12  ;;  %v4185_v12 = vstv %s7871_s2 }
 0xaee   : > { %v2942_v2 = vrot.slane %v2941_v43, 2 }
 0xaf0   : > { %v2943_v10 = vadd.f32 %v2942_v2, %v2941_v43  ;;  %v4186_v2 = vmul.f32 %v7716_v63, %v4185_v12 }
 0xaf1   : > { %v3832_v27 = vpop.permute.xlu2 %3831 }
 0xaf2   : > { %v7839_v21 = vadd.f32 %v3832_v27, %v3823_v30  ;;  %v2944_v48 = vrot.slane %v2943_v10, 1  ;;  %v3973_v30 = vpop.permute.xlu1 %3972  ;;  %v4187_v27 = vmul.f32 %v7713_v16, %v4185_v12  ;;  %v4029_v12 = vstv %s4773_s24  ;;  %s4393_s24 = sshll.u32 %s7884_s21, 4  ;;  %s4394_s24 = int_to_ptr.vmem [resolvable:$true] %s4393_s24 }
 0xaf4   : > { %v3839_v42 = vsel %vm841_vm7, %v7839_v21, 0.0  ;;  %v2945_v44 = vadd.f32 %v2944_v48, %v2943_v10  ;;  %v8165_v48 = vld [vmem:[#allocation22_spill] sm:$0xff] }
 0xaf5   : > { %v3841_v9 = vadd.f32 %v3840_v39, %v3839_v42  ;;  %v8166_v39 = vld [vmem:[#allocation24_spill] sm:$0xff] }
 0xaf6   : > { %4836 = vpush %v2945_v44  ;;  %v4287_v44 = vstv %s4796_s3  ;;  %s4392_s3 = scalar_lea.hbm %s8168_s15, %s4817_s4 }
 0xaf7   : > { %4838 = vpush %v3388_v45  ;;  %3842 = vadd.xlane.f32.xlu2 %v3841_v9  ;;  %v7905_v9 = vld [vmem:[#allocation2 + $0x4a] sm:$0xff]  ;;  %s4395_s16 = sshll.u32 %s4392_s3, 4  ;;  %s4396_s16 = int_to_ptr.hbm [resolvable:$true] %s4395_s16 }
 0xaf8   : > { %v4288_v45 = vmul.f32 %v7905_v9, %v4287_v44 }
 0xafa   : > { %v3975_v3 = vpop.permute.xlu1 %3974 }
 0xb0f   : > { %3952 = vrot.lane.b32.xlu2 %v6794_v54, %s8137_s23 }
 0xb17   : > { %3988 = vrot.lane.b32.xlu2 %v6799_v59, %s8137_s23 }
 0xb1f   : > { %4020 = vrot.lane.b32.xlu2 %v6920_v36, %s8137_s23 }
 0xb27   : > { %s4837_s11 = spop %4836  ;;  %4042 = vrot.lane.b32.xlu2 %v7000_v20, %s8138_s12 }
 0xb28   : > { %v2947_v52 = vstv %s4837_s11  ;;  %s4839_s20 = spop %4838  ;;  %s4797_s11 = sld [smem:[#allocation6 + $0x103]] }
 0xb29   : > { %v2948_v35 = vmul.f32 %v2947_v52, %v6348_v29  ;;  %v3390_v32 = vstv %s4839_s20  ;;  %v7908_v52 = vld [vmem:[#allocation2 + $0x51] sm:$0xff]  ;;  %s4798_s20 = sld [smem:[#allocation6 + $0x183]] }
 0xb2a   : > { %v3391_v57 = vmul.f32 %v3390_v32, %v6348_v29  ;;  %v4007_v32 = vpop.permute.xlu1 %4006 }
 0xb2b   : > { %v2949_v7 = vadd.f32 1e-05, %v2948_v35 }
 0xb2c   : > { %v7856_v54 = vsub.f32 %v7697_v15, %v3391_v57  ;;  %v7859_v59 = vsub.f32 %v7689_v13, %v3391_v57 }
 0xb2d   : > { %4927 = vrsqrt.f32 %v2949_v7  ;;  %vm2956_vm1 = vweird.f32 %v2949_v7 }
 0xb2e   : > { %v3394_v36 = vmul.f32 %v7856_v54, %v7856_v54  ;;  %v3395_v20 = vmul.f32 %v7859_v59, %v7859_v59 }
 0xb2f   : > { %4074 = vrot.lane.b32.xlu2 %v7005_v53, %s8138_s12 }
 0xb30   : > { %v3396_v25 = vsel %vm841_vm7, %v3394_v36, 0.0  ;;  %v3397_v37 = vsel %vm841_vm7, %v3395_v20, 0.0  ;;  %v8167_v36 = vld [vmem:[#allocation20_spill] sm:$0xff]  ;;  %v3944_v20 = vadd.f32 %v7821_v31, %v7804_v24 }
 0xb31   : > { %v3398_v15 = vadd.f32 %v3397_v37, %v3396_v25 }
 0xb32   : > { %v4023_v25 = vpop.permute.xlu1 %4022 }
 0xb33   : > { %v4928_v18 = vpop.eup %4927  ;;  %3399 = vadd.xlane.f32.xlu0 %v3398_v15  ;;  %v5009_v15 = vld [vmem:[#allocation2 + $0x2] sm:$0xff] }
 0xb34   : > { %v2951_v13 = vmul.f32 %v4928_v18, %v2949_v7  ;;  %vm2957_vm0 = vweird.f32 %v4928_v18 }
 0xb35   : > { %vm2958_vm2 = vmor %vm2956_vm1, %vm2957_vm0 }
 0xb36   : > { %v2952_v49 = vmul.f32 %v4928_v18, %v2951_v13 }
 0xb37   : > { %4090 = vrot.lane.b32.xlu2 %v7010_v33, %s8137_s23 }
 0xb38   : > { %v2953_v5 = vmul.f32 0.5, %v2952_v49 }
 0xb3a   : > { %v2954_v19 = vsub.f32 1.5, %v2953_v5  ;;  %v4289_v5 = vmul.f32 %v7823_v50, %v4287_v44 }
 0xb3c   : > { %v2955_v53 = vmul.f32 %v4928_v18, %v2954_v19 }
 0xb3e   : > { %v2959_v61 = vsel %vm2958_vm2, %v4928_v18, %v2955_v53  ;;  %v3962_v18 = vmul.f32 %v5009_v15, %v3961_v55  ;;  %v3995_v53 = vstv %s4770_s10 }
 0xb3f   : > { %v2960_v60 = vmul.f32 %v2959_v61, %v7758_v51  ;;  %v2961_v33 = vmul.f32 %v2959_v61, %v7761_v1  ;;  %4122 = vrot.lane.b32.xlu2 %v7185_v0, %s8137_s23  ;;  %v8163_v0 = vld [vmem:[#allocation21_spill] sm:$0xff]  ;;  %v8164_v51 = vld [vmem:[#allocation19_spill] sm:$0xff]  ;;  %v4239_v1 = vstv %s4792_s1  ;;  %s8169_s1 = smov %s8168_s15 }
 0xb40   : > { %v4240_v10 = vmul.f32 %v7813_v26, %v4239_v1  ;;  %v4241_v35 = vmul.f32 %v7908_v52, %v4239_v1 }
 0xb41   : > { %v2964_v11 = vmul.f32 %v2963_v23, %v2960_v60  ;;  %v2965_v8 = vmul.f32 %v2963_v23, %v2961_v33  ;;  %v3979_v23 = vadd.f32 %v3975_v3, %v7833_v47  ;;  %v5010_v60 = vld [vmem:[#allocation2 + $0x18] sm:$0xff] }
 0xb42   : > { %v3996_v33 = vmul.f32 %v5010_v60, %v3995_v53  ;;  %v5013_v47 = vld [vmem:[#allocation2 + $0x19] sm:$0xff] }
 0xb43   : > { %v2968_v46 = vadd.f32 %v2967_v62, %v2964_v11  ;;  %v2969_v43 = vadd.f32 %v2967_v62, %v2965_v8  ;;  %v4055_v62 = vpop.permute.xlu1 %4054  ;;  %v5011_v11 = vld [vmem:[#allocation2 + $0x20] sm:$0xff]  ;;  %v4030_v1 = vmul.f32 %v5013_v47, %v4029_v12 }
 0xb44   : > { %v3997_v8 = vmul.f32 %v5011_v11, %v3995_v53 }
 0xb45   : > { %v4355_v28 = vadd.f32 %v4353_v40, %v2968_v46  ;;  %v4356_v58 = vadd.f32 %v4354_v14, %v2969_v43 }
 0xb47   : > { %4357 = vst.msk [vmem:[%s7884_s21] sm:$0xff] %vm841_vm7, %v4355_v28  ;;  %4190 = vrot.lane.b32.xlu0 %v4186_v2, %s8137_s23  ;;  %4144 = vrot.lane.b32.xlu2 %v7191_v6, %s8138_s12  ;;  %v3987_v6 = vpop.permute.xlu0 %3986 }
 0xb48   : > { %4358 = vst.msk [vmem:[%s7884_s21 + $0x8] sm:$0xff] %vm841_vm7, %v4356_v58  ;;  %v5012_v58 = vld [vmem:[#allocation2 + $0x21] sm:$0xff] }
 0xb49   : > { %v4031_v2 = vmul.f32 %v5012_v58, %v4029_v12 }
 0xb4f   : > { %4212 = vrot.lane.b32.xlu0 %v8163_v0, %s8138_s12  ;;  %4176 = vrot.lane.b32.xlu2 %v8164_v51, %s8138_s12  ;;  %v4009_v42 = vpop.permute.xlu0 %4008 }
 0xb57   : > { %4244 = vrot.lane.b32.xlu0 %v4240_v10, %s8138_s12  ;;  %4192 = vrot.lane.b32.xlu2 %v4187_v27, %s8137_s23  ;;  %v4041_v7 = vpop.permute.xlu0 %4040  ;;  %v4077_v27 = vpop.permute.xlu1 %4076 }
 0xb5f   : > { %4260 = vrot.lane.b32.xlu0 %v8165_v48, %s8137_s23  ;;  %4224 = vrot.lane.b32.xlu2 %v8166_v39, %s8137_s23  ;;  %v4057_v19 = vpop.permute.xlu0 %4056  ;;  %v5014_v39 = vld [vmem:[#allocation2 + $0x1a] sm:$0xff]  ;;  %v4109_v15 = vpop.permute.xlu1 %4108 }
 0xb67   : > { %4292 = vrot.lane.b32.xlu0 %v4288_v45, %s8137_s23  ;;  %4246 = vrot.lane.b32.xlu2 %v4241_v35, %s8138_s12  ;;  %v4089_v43 = vpop.permute.xlu0 %4088  ;;  %v4125_v60 = vpop.permute.xlu1 %4124 }
 0xb6a   : > { %v7913_v57 = vpop.xlane.xlu2 %3842 }
 0xb6f   : > { %4278 = vrot.lane.b32.xlu2 %v8167_v36, %s8138_s12  ;;  %s4776_s12 = sld [smem:[#allocation3 + $0x10b]]  ;;  %v4111_v35 = vpop.permute.xlu0 %4110 }
 0xb72   : > { %v3953_v37 = vpop.permute.xlu2 %3952 }
 0xb73   : > { %v3958_v13 = vadd.f32 %v3953_v37, %v3944_v20  ;;  %v5015_v37 = vld [vmem:[#allocation2 + $0x22] sm:$0xff] }
 0xb75   : > { %v3964_v49 = vadd.f32 %v3962_v18, %v3958_v13  ;;  %v4063_v3 = vstv %s4776_s12  ;;  %s4381_s12 = scalar_lea.sflag [#allocation4], %s188_s14 }
 0xb76   : > { %v4064_v44 = vmul.f32 %v5014_v39, %v4063_v3 }
 0xb77   : > { %v3978_v61 = vadd.f32 %v3973_v30, %v3964_v49  ;;  %4294 = vrot.lane.b32.xlu2 %v4289_v5, %s8137_s23  ;;  %s4779_s23 = sld [smem:[#allocation3 + $0x10e]]  ;;  %v4143_v53 = vpop.permute.xlu0 %4142 }
 0xb79   : > { %v3992_v24 = vadd.f32 %v3987_v6, %v3978_v61 }
 0xb7a   : > { %v3989_v31 = vpop.permute.xlu2 %3988 }
 0xb7b   : > { %v3993_v55 = vadd.f32 %v3989_v31, %v3979_v23  ;;  %v3998_v40 = vadd.f32 %v3996_v33, %v3992_v24 }
 0xb7d   : > { %v3999_v14 = vadd.f32 %v3997_v8, %v3993_v55  ;;  %v4012_v28 = vadd.f32 %v4007_v32, %v3998_v40  ;;  %v4097_v49 = vstv %s4779_s23  ;;  %v3844_v8 = vrot.slane %v7913_v57, 4  ;;  %s5060_s23 = sshra.s32 %s4396_s16, 4  ;;  %s5061_s23 = int_to_ptr.hbm [resolvable:$true] %s5060_s23 }
 0xb7e   : > { %v4099_v31 = vmul.f32 %v7671_v17, %v4097_v49  ;;  %v4131_v55 = vstv %s4782_s6  ;;  %s5062_s6 = scalar_lea.hbm %s5061_s23, 64  ;;  %p5067_p3 = scmp.lt.s32.totalorder %s5061_s23, %s8169_s1 }
 0xb7f   : > { %v4013_v46 = vadd.f32 %v4009_v42, %v3999_v14  ;;  %v4159_v11 = vpop.permute.xlu0 %4158  ;;  %v4133_v12 = vmul.f32 %v7704_v41, %v4131_v55  ;;  %v4132_v58 = vmul.f32 %v7691_v34, %v4131_v55  ;;  %p5063_p0 = scmp.ne.s32.totalorder %s5061_s23, %s5062_s6 }
 0xb81   : > { %v4027_v0 = vadd.f32 %v4023_v25, %v4013_v46  ;;  %v4065_v25 = vmul.f32 %v5015_v37, %v4063_v3  ;;  %p5064_p1 = pnand %p5063_p0, %p5185_p5 }
 0xb82   : > { %v4021_v51 = vpop.permute.xlu2 %4020 }
 0xb83   : > { %v4026_v30 = vadd.f32 %v4021_v51, %v4012_v28  ;;  %v4033_v10 = vadd.f32 %v4031_v2, %v4027_v0  ;;  %v4157_v28 = vpop.permute.xlu1 %4156  ;;  %p5065_p2 = pneg %p5064_p1 }
 0xb85   : > { %v4032_v6 = vadd.f32 %v4030_v1, %v4026_v30  ;;  %v4165_v1 = vstv %s4785_s22 }
 0xb87   : > { %v4046_v48 = vadd.f32 %v4041_v7, %v4032_v6  ;;  %v4098_v7 = vmul.f32 %v7663_v4, %v4097_v49  ;;  %v3845_v4 = vadd.f32 %v3844_v8, %v7913_v57  ;;  %v4166_v6 = vmul.f32 %v7716_v63, %v4165_v1 }
 0xb89   : > { %v4060_v45 = vadd.f32 %v4055_v62, %v4046_v48  ;;  %v3846_v51 = vrot.slane %v3845_v4, 2 }
 0xb8a   : > { %v4043_v36 = vpop.permute.xlu2 %4042 }
 0xb8b   : > { %v4047_v42 = vadd.f32 %v4043_v36, %v4033_v10  ;;  %v4066_v32 = vadd.f32 %v4064_v44, %v4060_v45  ;;  %v3847_v48 = vadd.f32 %v3846_v51, %v3845_v4  ;;  %v4179_v45 = vpop.permute.xlu1 %4178  ;;  %v4167_v36 = vmul.f32 %v7713_v16, %v4165_v1 }
 0xb8d   : > { %v4061_v20 = vadd.f32 %v4057_v19, %v4047_v42  ;;  %v3848_v42 = vrot.slane %v3847_v48, 1 }
 0xb8f   : > { %v4067_v18 = vadd.f32 %v4065_v25, %v4061_v20 }
 0xb91   : > { %v4081_v33 = vadd.f32 %v4077_v27, %v4067_v18 }
 0xb92   : > { %v4075_v13 = vpop.permute.xlu2 %4074 }
 0xb93   : > { %v4080_v5 = vadd.f32 %v4075_v13, %v4066_v32  ;;  %v4211_v63 = vpop.permute.xlu1 %4210  ;;  %v4199_v13 = vstv %s4788_s30  ;;  %s5066_s30 = scalar_lea.hbm %s8169_s1, 128 }
 0xb94   : > { %p5068_p4 = scmp.lt.s32.totalorder %s5066_s30, %s5062_s6 }
 0xb95   : > { %v4094_v61 = vadd.f32 %v4089_v43, %v4080_v5 }
 0xb96   : > { %p5069_p7 = por %p5068_p4, %p5067_p3 }
 0xb97   : > { %v4100_v23 = vadd.f32 %v4098_v7, %v4094_v61 }
 0xb98   : > { %p5070_p8 = pnand %p5069_p7, %p5065_p2 }
 0xb99   : > { %v4114_v14 = vadd.f32 %v4109_v15, %v4100_v23  ;;  %v3849_v15 = vadd.f32 %v3848_v42, %v3847_v48  ;;  %v4201_v23 = vmul.f32 %v7806_v22, %v4199_v13 }
 0xb9a   : > { %v4091_v24 = vpop.permute.xlu2 %4090 }
 0xb9b   : > { %v4095_v62 = vadd.f32 %v4091_v24, %v4081_v33  ;;  %v4233_v24 = vstv %s4791_s5 }
 0xb9d   : > { %v4101_v19 = vadd.f32 %v4099_v31, %v4095_v62  ;;  %v4227_v31 = vpop.permute.xlu1 %4226 }
 0xb9f   : > { %v4115_v40 = vadd.f32 %v4111_v35, %v4101_v19 }
 0xba1   : > { %v4129_v46 = vadd.f32 %v4125_v60, %v4115_v40  ;;  %v4234_v40 = vmul.f32 %v7813_v26, %v4233_v24 }
 0xba2   : > { %v4123_v43 = vpop.permute.xlu2 %4122 }
 0xba3   : > { %v4128_v2 = vadd.f32 %v4123_v43, %v4114_v14  ;;  %v4135_v17 = vadd.f32 %v4133_v12, %v4129_v46  ;;  %v4267_v43 = vstv %s4794_s27 }
 0xba4   : > { %v4269_v1 = vmul.f32 %v7823_v50, %v4267_v43 }
 0xba5   : > { %v4134_v0 = vadd.f32 %v4132_v58, %v4128_v2  ;;  %v4259_v58 = vpop.permute.xlu1 %4258 }
 0xba6   : > { %v3400_v47 = vpop.xlane.xlu0 %3399 }
 0xba7   : > { %v4148_v30 = vadd.f32 %v4143_v53, %v4134_v0  ;;  %v3401_v10 = vrot.slane %v3400_v47, 4  ;;  %v4200_v53 = vmul.f32 %v7797_v38, %v4199_v13  ;;  %v4235_v38 = vmul.f32 %v7908_v52, %v4233_v24  ;;  %v4799_v24 = vld [vmem:[%s5217_s9 + $0x10] sm:$0xff] }
 0xba9   : > { %v3402_v27 = vadd.f32 %v3401_v10, %v3400_v47  ;;  %v4162_v3 = vadd.f32 %v4157_v28, %v4148_v30 }
 0xbaa   : > { %v4145_v41 = vpop.permute.xlu2 %4144 }
 0xbab   : > { %v3403_v39 = vrot.slane %v3402_v27, 2  ;;  %v4149_v57 = vadd.f32 %v4145_v41, %v4135_v17  ;;  %v4168_v44 = vadd.f32 %v4166_v6, %v4162_v3  ;;  %v4268_v17 = vmul.f32 %v7905_v9, %v4267_v43 }
 0xbad   : > { %v4163_v35 = vadd.f32 %v4159_v11, %v4149_v57  ;;  %v3404_v34 = vadd.f32 %v3403_v39, %v3402_v27  ;;  %v4281_v27 = vpop.permute.xlu1 %4280 }
 0xbaf   : > { %v3405_v32 = vrot.slane %v3404_v34, 1  ;;  %v4169_v20 = vadd.f32 %v4167_v36, %v4163_v35 }
 0xbb1   : > { %v3406_v37 = vadd.f32 %v3405_v32, %v3404_v34  ;;  %v4183_v5 = vadd.f32 %v4179_v45, %v4169_v20 }
 0xbb2   : > { %v4177_v25 = vpop.permute.xlu2 %4176 }
 0xbb3   : > { %4840 = vpush %v3406_v37  ;;  %v4182_v18 = vadd.f32 %v4177_v25, %v4168_v44 }
 0xbb4   : > { %4842 = vpush %v3849_v15 }
 0xbb9   : > { %v4191_v49 = vpop.permute.xlu0 %4190 }
 0xbba   : > { %v4196_v61 = vadd.f32 %v4191_v49, %v4182_v18  ;;  %v4193_v7 = vpop.permute.xlu2 %4192 }
 0xbbb   : > { %v4197_v16 = vadd.f32 %v4193_v7, %v4183_v5 }
 0xbbc   : > { %v4202_v60 = vadd.f32 %v4200_v53, %v4196_v61  ;;  %v3424_v61 = vstv %s4721_s19 }
 0xbbd   : > { %v4203_v33 = vadd.f32 %v4201_v23, %v4197_v16  ;;  %v3428_v23 = vstv %s4722_s29 }
 0xbbe   : > { %v4216_v19 = vadd.f32 %v4211_v63, %v4202_v60 }
 0xbc1   : > { %v4213_v62 = vpop.permute.xlu0 %4212 }
 0xbc2   : > { %v4217_v11 = vadd.f32 %v4213_v62, %v4203_v33  ;;  %v4225_v8 = vpop.permute.xlu2 %4224 }
 0xbc3   : > { %v4230_v55 = vadd.f32 %v4225_v8, %v4216_v19 }
 0xbc4   : > { %v4231_v14 = vadd.f32 %v4227_v31, %v4217_v11  ;;  %v4800_v31 = vld [vmem:[%s5217_s9 + $0x18] sm:$0xff] }
 0xbc5   : > { %v4236_v12 = vadd.f32 %v4234_v40, %v4230_v55 }
 0xbc6   : > { %v4237_v46 = vadd.f32 %v4235_v38, %v4231_v14 }
 0xbc9   : > { %v4245_v4 = vpop.permute.xlu0 %4244 }
 0xbca   : > { %v4250_v22 = vadd.f32 %v4245_v4, %v4236_v12  ;;  %v4247_v28 = vpop.permute.xlu2 %4246 }
 0xbcb   : > { %v4251_v51 = vadd.f32 %v4247_v28, %v4237_v46 }
 0xbcc   : > { %v4264_v2 = vadd.f32 %v4259_v58, %v4250_v22 }
 0xbce   : > { %v4270_v0 = vadd.f32 %v4268_v17, %v4264_v2 }
 0xbd1   : > { %v4261_v47 = vpop.permute.xlu0 %4260 }
 0xbd2   : > { %v4265_v30 = vadd.f32 %v4261_v47, %v4251_v51  ;;  %v4279_v26 = vpop.permute.xlu2 %4278 }
 0xbd3   : > { %v4284_v52 = vadd.f32 %v4279_v26, %v4270_v0 }
 0xbd4   : > { %v4271_v10 = vadd.f32 %v4269_v1, %v4265_v30 }
 0xbd6   : > { %v4285_v3 = vadd.f32 %v4281_v27, %v4271_v10 }
 0xbd9   : > { %v4293_v6 = vpop.permute.xlu0 %4292 }
 0xbda   : > { %v7938_v41 = vadd.f32 %v4293_v6, %v4284_v52  ;;  %v4295_v48 = vpop.permute.xlu2 %4294 }
 0xbdb   : > { %v7940_v39 = vadd.f32 %v4295_v48, %v4285_v3 }
 0xbdc   : > { %v4300_v9 = vsel %vm841_vm7, %v7938_v41, 0.0 }
 0xbdd   : > { %v4301_v57 = vsel %vm841_vm7, %v7940_v39, 0.0 }
 0xbde   : > { %v4302_v44 = vadd.f32 %v4301_v57, %v4300_v9 }
 0xbe0   : > { %4303 = vadd.xlane.f32.xlu0 %v4302_v44 }
 0xbe4   : > { %s4841_s25 = spop %4840 }
 0xbe5   : > { %v3408_v50 = vstv %s4841_s25  ;;  %s4843_s18 = spop %4842 }
 0xbe6   : > { %v3409_v45 = vmul.f32 %v3408_v50, %v6348_v29  ;;  %v3851_v35 = vstv %s4843_s18 }
 0xbe7   : > { %v3852_v34 = vmul.f32 %v3851_v35, %v6348_v29 }
 0xbe8   : > { %v3410_v36 = vadd.f32 1e-05, %v3409_v45  ;;  %v3885_v45 = vstv %s4759_s26 }
 0xbe9   : > { %v7949_v42 = vsub.f32 %v7839_v21, %v3852_v34  ;;  %v7952_v32 = vsub.f32 %v7837_v56, %v3852_v34 }
 0xbea   : > { %4929 = vrsqrt.f32 %v3410_v36  ;;  %vm3417_vm4 = vweird.f32 %v3410_v36 }
 0xbeb   : > { %v3855_v20 = vmul.f32 %v7949_v42, %v7949_v42  ;;  %v3856_v37 = vmul.f32 %v7952_v32, %v7952_v32 }
 0xbed   : > { %v3857_v25 = vsel %vm841_vm7, %v3855_v20, 0.0  ;;  %v3858_v15 = vsel %vm841_vm7, %v3856_v37, 0.0 }
 0xbee   : > { %v3859_v63 = vadd.f32 %v3858_v15, %v3857_v25  ;;  %v4803_v25 = vld [vmem:[%s5217_s9 + $0x20] sm:$0xff]  ;;  %v4804_v15 = vld [vmem:[%s5217_s9 + $0x28] sm:$0xff] }
 0xbf0   : > { %v4930_v18 = vpop.eup %4929  ;;  %3860 = vadd.xlane.f32.xlu1 %v3859_v63 }
 0xbf1   : > { %v3412_v13 = vmul.f32 %v4930_v18, %v3410_v36  ;;  %vm3418_vm3 = vweird.f32 %v4930_v18  ;;  %v3889_v36 = vstv %s4760_s7 }
 0xbf2   : > { %vm3419_vm5 = vmor %vm3417_vm4, %vm3418_vm3 }
 0xbf3   : > { %v3413_v21 = vmul.f32 %v4930_v18, %v3412_v13 }
 0xbf5   : > { %v3414_v56 = vmul.f32 0.5, %v3413_v21 }
 0xbf7   : > { %v3415_v49 = vsub.f32 1.5, %v3414_v56 }
 0xbf9   : > { %v3416_v5 = vmul.f32 %v4930_v18, %v3415_v49 }
 0xbfb   : > { %v3420_v53 = vsel %vm3419_vm5, %v4930_v18, %v3416_v5 }
 0xbfc   : > { %v3421_v7 = vmul.f32 %v3420_v53, %v7856_v54  ;;  %v3422_v16 = vmul.f32 %v3420_v53, %v7859_v59 }
 0xbfe   : > { %v3425_v60 = vmul.f32 %v3424_v61, %v3421_v7  ;;  %v3426_v33 = vmul.f32 %v3424_v61, %v3422_v16 }
 0xc00   : > { %v3429_v62 = vadd.f32 %v3428_v23, %v3425_v60  ;;  %v3430_v19 = vadd.f32 %v3428_v23, %v3426_v33 }
 0xc02   : > { %v4361_v11 = vadd.f32 %v4799_v24, %v3429_v62  ;;  %v4362_v8 = vadd.f32 %v4800_v31, %v3430_v19 }
 0xc04   : > { %4801 = vst.msk [vmem:[%s7884_s21 + $0x10] sm:$0xff] %vm841_vm7, %v4361_v11 }
 0xc05   : > { %4802 = vst.msk [vmem:[%s7884_s21 + $0x18] sm:$0xff] %vm841_vm7, %v4362_v8  ;;  %v4346_v8 = vstv %s4797_s11 }
 0xc53   : > { %v4304_v55 = vpop.xlane.xlu0 %4303 }
 0xc54   : > { %v4305_v40 = vrot.slane %v4304_v55, 4 }
 0xc56   : > { %v4306_v14 = vadd.f32 %v4305_v40, %v4304_v55  ;;  %v4350_v40 = vstv %s4798_s20 }
 0xc58   : > { %v4307_v38 = vrot.slane %v4306_v14, 2 }
 0xc5a   : > { %v4308_v46 = vadd.f32 %v4307_v38, %v4306_v14 }
 0xc5c   : > { %v4309_v22 = vrot.slane %v4308_v46, 1 }
 0xc5e   : > { %v4310_v2 = vadd.f32 %v4309_v22, %v4308_v46 }
 0xc63   : > { %v3861_v54 = vpop.xlane.xlu1 %3860 }
 0xc64   : > { %v3862_v12 = vrot.slane %v3861_v54, 4 }
 0xc66   : > { %v3863_v59 = vadd.f32 %v3862_v12, %v3861_v54  ;;  %v4807_v54 = vld [vmem:[%s5217_s9 + $0x30] sm:$0xff]  ;;  %v4808_v12 = vld [vmem:[%s5217_s9 + $0x38] sm:$0xff] }
 0xc68   : > { %v3864_v4 = vrot.slane %v3863_v59, 2 }
 0xc6a   : > { %v3865_v43 = vadd.f32 %v3864_v4, %v3863_v59 }
 0xc6c   : > { %v3866_v28 = vrot.slane %v3865_v43, 1 }
 0xc6e   : > { %v3867_v58 = vadd.f32 %v3866_v28, %v3865_v43 }
 0xc70   : > { %4844 = vpush %v3867_v58 }
 0xc71   : > { %4846 = vpush %v4310_v2 }
 0xca1   : > { %s4845_s8 = spop %4844 }
 0xca2   : > { %v3869_v17 = vstv %s4845_s8  ;;  %s4847_s28 = spop %4846 }
 0xca3   : > { %v3870_v0 = vmul.f32 %v3869_v17, %v6348_v29  ;;  %v4312_v51 = vstv %s4847_s28 }
 0xca4   : > { %v4313_v47 = vmul.f32 %v4312_v51, %v6348_v29 }
 0xca5   : > { %v3871_v1 = vadd.f32 1e-05, %v3870_v0 }
 0xca6   : > { %v4314_v30 = vsub.f32 %v7938_v41, %v4313_v47  ;;  %v4315_v26 = vsub.f32 %v7940_v39, %v4313_v47 }
 0xca7   : > { %4931 = vrsqrt.f32 %v3871_v1  ;;  %vm3878_vm13 = vweird.f32 %v3871_v1 }
 0xca8   : > { %v4316_v10 = vmul.f32 %v4314_v30, %v4314_v30  ;;  %v4317_v27 = vmul.f32 %v4315_v26, %v4315_v26 }
 0xcaa   : > { %v4318_v52 = vsel %vm841_vm7, %v4316_v10, 0.0  ;;  %v4319_v6 = vsel %vm841_vm7, %v4317_v27, 0.0 }
 0xcab   : > { %v4320_v3 = vadd.f32 %v4319_v6, %v4318_v52 }
 0xcad   : > { %v4932_v48 = vpop.eup %4931  ;;  %4321 = vadd.xlane.f32.xlu2 %v4320_v3 }
 0xcae   : > { %v3873_v9 = vmul.f32 %v4932_v48, %v3871_v1  ;;  %vm3879_vm6 = vweird.f32 %v4932_v48 }
 0xcaf   : > { %vm3880_vm14 = vmor %vm3878_vm13, %vm3879_vm6 }
 0xcb0   : > { %v3874_v57 = vmul.f32 %v4932_v48, %v3873_v9 }
 0xcb2   : > { %v3875_v44 = vmul.f32 0.5, %v3874_v57 }
 0xcb4   : > { %v3876_v41 = vsub.f32 1.5, %v3875_v44 }
 0xcb6   : > { %v3877_v39 = vmul.f32 %v4932_v48, %v3876_v41 }
 0xcb8   : > { %v3881_v50 = vsel %vm3880_vm14, %v4932_v48, %v3877_v39 }
 0xcb9   : > { %v3882_v35 = vmul.f32 %v3881_v50, %v7949_v42  ;;  %v3883_v34 = vmul.f32 %v3881_v50, %v7952_v32 }
 0xcbb   : > { %v3886_v20 = vmul.f32 %v3885_v45, %v3882_v35  ;;  %v3887_v37 = vmul.f32 %v3885_v45, %v3883_v34 }
 0xcbd   : > { %v3890_v63 = vadd.f32 %v3889_v36, %v3886_v20  ;;  %v3891_v18 = vadd.f32 %v3889_v36, %v3887_v37 }
 0xcbf   : > { %v4368_v13 = vadd.f32 %v4803_v25, %v3890_v63  ;;  %v4369_v21 = vadd.f32 %v4804_v15, %v3891_v18 }
 0xcc1   : > { %4805 = vst.msk [vmem:[%s7884_s21 + $0x20] sm:$0xff] %vm841_vm7, %v4368_v13 }
 0xcc2   : > { %4806 = vst.msk [vmem:[%s7884_s21 + $0x28] sm:$0xff] %vm841_vm7, %v4369_v21 }
 0xd20   : > { %v4322_v56 = vpop.xlane.xlu2 %4321 }
 0xd21   : > { %v4323_v49 = vrot.slane %v4322_v56, 4 }
 0xd23   : > { %v4324_v5 = vadd.f32 %v4323_v49, %v4322_v56 }
 0xd25   : > { %v4325_v53 = vrot.slane %v4324_v5, 2 }
 0xd27   : > { %v4326_v42 = vadd.f32 %v4325_v53, %v4324_v5 }
 0xd29   : > { %v4327_v61 = vrot.slane %v4326_v42, 1 }
 0xd2b   : > { %v4328_v32 = vadd.f32 %v4327_v61, %v4326_v42 }
 0xd2d   : > { %4848 = vpush %v4328_v32 }
 0xd5e   : > { %s4849_s0 = spop %4848 }
 0xd5f   : > { %v4330_v7 = vstv %s4849_s0 }
 0xd60   : > { %v4331_v16 = vmul.f32 %v4330_v7, %v6348_v29 }
 0xd62   : > { %v4332_v23 = vadd.f32 1e-05, %v4331_v16 }
 0xd64   : > { %4933 = vrsqrt.f32 %v4332_v23  ;;  %vm4339_vm8 = vweird.f32 %v4332_v23 }
 0xd6a   : > { %v4934_v60 = vpop.eup %4933 }
 0xd6b   : > { %v4334_v33 = vmul.f32 %v4934_v60, %v4332_v23  ;;  %vm4340_vm15 = vweird.f32 %v4934_v60 }
 0xd6c   : > { %vm4341_vm9 = vmor %vm4339_vm8, %vm4340_vm15 }
 0xd6d   : > { %v4335_v24 = vmul.f32 %v4934_v60, %v4334_v33 }
 0xd6f   : > { %v4336_v31 = vmul.f32 0.5, %v4335_v24 }
 0xd71   : > { %v4337_v62 = vsub.f32 1.5, %v4336_v31 }
 0xd73   : > { %v4338_v19 = vmul.f32 %v4934_v60, %v4337_v62 }
 0xd75   : > { %v4342_v11 = vsel %vm4341_vm9, %v4934_v60, %v4338_v19 }
 0xd76   : > { %v4343_v29 = vmul.f32 %v4342_v11, %v4314_v30  ;;  %v4344_v55 = vmul.f32 %v4342_v11, %v4315_v26 }
 0xd78   : > { %v4347_v14 = vmul.f32 %v4346_v8, %v4343_v29  ;;  %v4348_v38 = vmul.f32 %v4346_v8, %v4344_v55 }
 0xd7a   : > { %v4351_v59 = vadd.f32 %v4350_v40, %v4347_v14  ;;  %v4352_v46 = vadd.f32 %v4350_v40, %v4348_v38 }
 0xd7c   : > { %v4375_v4 = vadd.f32 %v4807_v54, %v4351_v59  ;;  %v4376_v43 = vadd.f32 %v4808_v12, %v4352_v46 }
 0xd7e   : > { %4809 = vst.msk [vmem:[%s7884_s21 + $0x30] sm:$0xff] %vm841_vm7, %v4375_v4 }
 0xd7f   : > { %4810 = vst.msk [vmem:[%s7884_s21 + $0x38] sm:$0xff] %vm841_vm7, %v4376_v43 }
 0xd80   : > { %5073 = shalt.err (!%p5070_p8)
}
 0xd81   : > { %s5125_s14 = smov 128   ;;  %s5126_s21 = smov 8  }
 0xd82   : > { %4858 = dma.vmem_to_hbm [thread:$0]  (%p5185_p5), %s4394_s24, 1024, %s4396_s16, %s4381_s12, %s5125_s14, %s5125_s14, %s5126_s21  }
 0xd83 PF: > { %s8171_s25 = sld [smem:[#allocation14_spill]] }
 0xd84   : > { %s8172_s18 = sld [smem:[#allocation12_spill]] }
 0xd89   : > { %p4875_p9 = scmp.ge.s32.totalorder %s8171_s25, 2 }
 0xd8a   : > { %s4410_s29 = sand.u32 1, %s8172_s18  }
 0xd8b   : > { %p4868_p10 = pnand %p4875_p9, %p5189_p6  ;;  %s4411_s8 = scalar_lea.sflag [#allocation4], %s4410_s29 }
 0xd8d   : > { %p4869_p11 = pneg %p4868_p10 }
 0xd8f   : > { %5099 = dma.done.wait (%p4869_p11), %s4411_s8, 1024  }
 0xd90   : > { %5101 = vsyncadd (%p4869_p11), %s4411_s8, 4294966272  ;;  %s8174_s15 = sld [smem:[#allocation15_spill]]  ;;  %s8177_s12 = smov %s5108_s13 }
 0xd91   : > { %s8175_s28 = sld [smem:[#allocation13_spill]] }
 0xd92   : > { %s8176_s14 = sld [smem:[#allocation16_spill]] }
 0xd96   : > { %p15_p12 = scmp.ge.s32.totalorder %s8174_s15, 4  }
 0xd97   : > { %s8178_s13 = smov %s8175_s28 }
 0xd98   :  { %17 = sbr.rel (!%p15_p12) target bundleno = 10 (0xa), region = 85 }
 0xd9d   :  { %4417 = vsyncpa [#allocation4], 1 }
 0xd9e   :  { %4419 = vsyncpa [#allocation4 + $0x1], 1 }
 0xd9f   :  { %4420 = vsyncpa [#allocation5], 1 }
 0xda0   :  { %4422 = vsyncpa [#allocation5 + $0x1], 1 }
 0xda1   :  { %4423 = vsyncpa [#allocation7], 1 }

</bundles_post_ra>
